<compile_context>
chip_gen: v5e
topology: v5e:2x2
jax: 0.10.0
libtpu: 0.0.40
codegen_flags: <defaults>
</compile_context>

<pallas_src>
import functools
import math

import jax
import jax.numpy as jnp
from jax.experimental import pallas as pl
from jax.experimental.pallas import tpu as pltpu


_COMPUTE_DTYPE = jnp.bfloat16          # MXU input dtype; accumulation is f32.

_BLOCK_PARAM_ORDER = (
    'ln1_g', 'ln1_b', 'in_w', 'in_b', 'out_w', 'out_b',
    'ln2_g', 'ln2_b', 'pw1_w', 'pw1_b', 'dw_w', 'dw_b',
    'bn_g', 'bn_b', 'pw2_w', 'pw2_b',
    'ln3_g', 'ln3_b', 'ff1_w', 'ff1_b', 'ff2_w', 'ff2_b',
)
_MATMUL_KEYS = frozenset({'in_w', 'out_w', 'pw1_w', 'pw2_w', 'ff1_w', 'ff2_w'})


# ----------------------------- in-kernel helpers -----------------------------

def _layer_norm(x, gamma, beta, eps=1e-5):
    mu = jnp.mean(x, axis=-1, keepdims=True)
    var = jnp.mean(jnp.square(x - mu), axis=-1, keepdims=True)
    return (x - mu) * jax.lax.rsqrt(var + eps) * gamma + beta


def _silu(x):
    return x * jax.nn.sigmoid(x)


def _mm(x3, w_ref, b_ref):
    """(B,T,Din) @ (Din,Dout) + bias.  bf16 MXU inputs, f32 accumulation."""
    w = w_ref[...]                      # pre-cast to bf16 on the host
    b = b_ref[...]                      # f32
    B, T, Din = x3.shape
    y = jnp.dot(x3.reshape(B * T, Din).astype(w.dtype), w,
                preferred_element_type=jnp.float32)
    return y.reshape(B, T, w.shape[-1]) + b


# --------------------------------- kernel ------------------------------------

def _dae_kernel(
    # whole-model inputs (constant index maps -> loaded once, stay resident)
    x_in_ref, emb_w_ref, emb_b_ref, pos_ref,
    # per-layer weight slabs (leading layer axis selected by the grid index)
    ln1_g, ln1_b, attn_in_w, attn_in_b, attn_out_w, attn_out_b,
    ln2_g, ln2_b, pw1_w, pw1_b, dw_w, dw_b, bn_g, bn_b, pw2_w, pw2_b,
    ln3_g, ln3_b, ff1_w, ff1_b, ff2_w, ff2_b,
    fin_w_ref, fin_b_ref,
    # output: (B, output_dim, T) -- lane-dense on T
    o_ref,
    # VMEM scratch (persists across the layer grid axis)
    x_sc,          # (B, T, D) f32 residual stream
    conv_sc,       # (B, T + 2*pad_al, D) f32 zero-padded depthwise-conv buffer
    *, num_heads, conv_kernel_size,
):
    layer = pl.program_id(0)
    n_layers = pl.num_programs(0)

    B, T, D = x_sc.shape
    H = num_heads
    hd = D // H
    K = conv_kernel_size
    pad = K // 2
    pad_al = (conv_sc.shape[1] - T) // 2      # sublane-aligned halo (>= pad)

    # ---- grid step 0: embedding + positional encoding; zero conv halos ------
    @pl.when(layer == 0)
    def _embed():
        conv_sc[...] = jnp.zeros_like(conv_sc)        # halos stay zero afterwards
        x_in = x_in_ref[...]                          # (B, T, input_dim) f32
        Bm, Tm, Din = x_in.shape
        y = jnp.dot(x_in.reshape(Bm * Tm, Din).astype(emb_w_ref.dtype),
                    emb_w_ref[...], preferred_element_type=jnp.float32)
        x_sc[...] = y.reshape(Bm, Tm, -1) + emb_b_ref[...] + pos_ref[...]

    x = x_sc[...]                                     # (B, T, D) f32

    # ============================ ConformerBlock =============================
    # ---- 1) multi-head self-attention branch (nn.MultiheadAttention) --------
    xn = _layer_norm(x, ln1_g[...], ln1_b[...])
    qkv = _mm(xn, attn_in_w, attn_in_b)               # (B, T, 3D)
    q = qkv[:, :, 0 * D:1 * D] * (1.0 / math.sqrt(hd))   # PyTorch scales q
    k = qkv[:, :, 1 * D:2 * D]
    v = qkv[:, :, 2 * D:3 * D]
    heads = []
    # TODO(synk): for long T switch this to a flash-style online-softmax loop
    # over KV tiles instead of materializing (B, T, T) scores per head.
    for h in range(H):                                # static head loop
        sl = slice(h * hd, (h + 1) * hd)
        qh = q[:, :, sl].astype(_COMPUTE_DTYPE)
        kh = k[:, :, sl].astype(_COMPUTE_DTYPE)
        vh = v[:, :, sl].astype(_COMPUTE_DTYPE)
        s = jnp.einsum('btd,bsd->bts', qh, kh,
                       preferred_element_type=jnp.float32)     # (B, T, T) f32
        s = s - jnp.max(s, axis=-1, keepdims=True)
        p = jnp.exp(s)
        p = p * pl.reciprocal(jnp.sum(p, axis=-1, keepdims=True), approx=True)
        heads.append(jnp.einsum('bts,bsd->btd', p.astype(_COMPUTE_DTYPE), vh,
                                preferred_element_type=jnp.float32))
    attn = jnp.concatenate(heads, axis=-1)            # (B, T, D)
    x = x + _mm(attn, attn_out_w, attn_out_b)         # single full-D out_proj

    # ---- 2) convolution branch ----------------------------------------------
    xn = _layer_norm(x, ln2_g[...], ln2_b[...])
    y = _mm(xn, pw1_w, pw1_b)                         # Conv1d(D, 2D, 1): (B,T,2D)
    y = y[:, :, :D] * jax.nn.sigmoid(y[:, :, D:])     # GLU over channels
    # depthwise Conv1d(D, D, K, padding=K//2, groups=D): write the GLU output
    # into the persistent zero-padded buffer (aligned store at offset pad_al),
    # then accumulate the K taps from shifted static slices -- no concatenate,
    # no zero-padding relayout copy.
    conv_sc[:, pad_al:pad_al + T, :] = y
    wd = dw_w[...]                                    # (K, D), read once
    acc = jnp.zeros((B, T, D), jnp.float32)
    for kk in range(K):                               # static tap loop
        start = pad_al - pad + kk
        acc = acc + conv_sc[:, start:start + T, :] * wd[kk:kk + 1, :]
    y = acc + dw_b[...]
    # BatchNorm1d in training mode: batch statistics over the full (B*T) slab
    # (exact because the whole activation stays resident -- not tiled).
    # TODO(synk): eval()-mode running_mean/running_var are not modeled.
    yf = y.reshape(B * T, D)
    mu = jnp.mean(yf, axis=0, keepdims=True)
    var = jnp.mean(jnp.square(yf - mu), axis=0, keepdims=True)
    yf = (yf - mu) * jax.lax.rsqrt(var + 1e-5) * bn_g[...] + bn_b[...]
    y = _silu(yf).reshape(B, T, D)
    x = x + _mm(y, pw2_w, pw2_b)                      # Conv1d(D, D, 1)

    # ---- 3) feed-forward branch ----------------------------------------------
    xn = _layer_norm(x, ln3_g[...], ln3_b[...])
    y = _silu(_mm(xn, ff1_w, ff1_b))
    x = x + _mm(y, ff2_w, ff2_b)

    x_sc[...] = x                                     # carry residual to next layer

    # ---- last grid step: output Linear, emitted lane-dense as (B, O, T) -----
    @pl.when(layer == n_layers - 1)
    def _project():
        w = fin_w_ref[...]                            # (O, D)  PyTorch orientation
        bb = fin_b_ref[...]                           # (O, 1)
        for b in range(B):                            # static per-batch (O,D)@(D,T)
            xbT = x[b].T.astype(w.dtype)              # (D, T) 2-D transpose
            res = jnp.dot(w, xbT, preferred_element_type=jnp.float32) + bb
            o_ref[b, :, :] = res.astype(o_ref.dtype)


# --------------------------------- wrapper ------------------------------------

def denoising_conformer_dae(noisy_mel, packed, *, num_heads, conv_kernel_size):
    """noisy_mel: (batch, mel_dim, num_frames) -- PyTorch NCW convention."""
    B, M, T = noisy_mel.shape
    D = packed['emb_w'].shape[1]
    O = packed['fin_w'].shape[0]
    stacked = packed['stacked']
    L = stacked['ln1_g'].shape[0]
    assert packed['pos'].shape[1] == T, 'num_frames must equal seq_len (pos_encoding)'
    assert D % num_heads == 0

    pad = conv_kernel_size // 2
    pad_al = -(-pad // 8) * 8                         # sublane-aligned halo

    x_in = jnp.transpose(noisy_mel, (0, 2, 1))        # (B, T, M): tiny XLA transpose

    def const_spec(a):
        nd = a.ndim
        return pl.BlockSpec(a.shape, lambda l, _nd=nd: (0,) * _nd)

    def layer_spec(a):
        nd = a.ndim
        return pl.BlockSpec((None,) + a.shape[1:],
                            lambda l, _nd=nd: (l,) + (0,) * (_nd - 1))

    args = [x_in, packed['emb_w'], packed['emb_b'], packed['pos']]
    in_specs = [const_spec(a) for a in args]
    for key in _BLOCK_PARAM_ORDER:
        arr = stacked[key]
        args.append(arr)
        in_specs.append(layer_spec(arr))              # double-buffered per-layer slab
    for key in ('fin_w', 'fin_b'):
        args.append(packed[key])
        in_specs.append(const_spec(packed[key]))

    kernel = functools.partial(_dae_kernel, num_heads=num_heads,
                               conv_kernel_size=conv_kernel_size)

    return pl.pallas_call(
        kernel,
        out_shape=jax.ShapeDtypeStruct((B, O, T), jnp.float32),
        grid_spec=pltpu.PrefetchScalarGridSpec(
            num_scalar_prefetch=0,
            grid=(L,),
            in_specs=in_specs,
            out_specs=pl.BlockSpec((B, O, T), lambda l: (0, 0, 0)),
            scratch_shapes=[
                pltpu.VMEM((B, T, D), jnp.float32),                 # residual stream
                pltpu.VMEM((B, T + 2 * pad_al, D), jnp.float32),    # conv pad buffer
            ],
        ),
        compiler_params=pltpu.CompilerParams(
            # The layer axis carries the residual stream and exact BatchNorm
            # batch statistics in VMEM, so it is sequential ('arbitrary').
            # A batch-parallel axis (v7x 2-TC sharding) is intentionally not
            # added because it would break global BatchNorm batch statistics.
            dimension_semantics=("arbitrary",),
            # Budget against v7x's 64 MiB physical VMEM (v5e/v6e have 128 MiB);
            # actual usage at these sizes is far below this bound.
            vmem_limit_bytes=64 * 1024 * 1024,
        ),
    )(*args)


# ----------------------------- parameter creation -----------------------------

def init_params(key, *, input_dim, output_dim, seq_len, d_model, num_layers,
                conv_kernel_size):
    """Per-layer f32 params, laid out so kernels compute x @ W (PyTorch x @ W.T)."""
    def nrm(k, shape, scale=0.05):
        return jax.random.normal(k, shape, jnp.float32) * scale

    D, K = d_model, conv_kernel_size
    keys = jax.random.split(key, num_layers + 4)
    params = {
        'emb_w': nrm(keys[0], (input_dim, d_model)),     # Linear.weight.T
        'emb_b': nrm(keys[1], (1, d_model)),
        'pos': jax.random.uniform(keys[2], (1, seq_len, d_model), jnp.float32),
        'out_w': nrm(keys[3], (d_model, output_dim)),    # Linear.weight.T
        'out_b': jnp.zeros((1, output_dim), jnp.float32),
        'blocks': [],
    }
    for layer in range(num_layers):
        ks = jax.random.split(keys[4 + layer], 12)
        blk = {
            'ln1_g': jnp.ones((1, D)), 'ln1_b': jnp.zeros((1, D)),
            # MultiheadAttention: in_proj_weight.T / in_proj_bias
            'in_w': nrm(ks[0], (D, 3 * D)), 'in_b': nrm(ks[1], (1, 3 * D)),
            # out_proj.weight.T / bias
            'out_w': nrm(ks[2], (D, D)), 'out_b': nrm(ks[3], (1, D)),
            'ln2_g': jnp.ones((1, D)), 'ln2_b': jnp.zeros((1, D)),
            # Conv1d(D, 2D, 1).weight[:, :, 0].T / bias
            'pw1_w': nrm(ks[4], (D, 2 * D)), 'pw1_b': nrm(ks[5], (1, 2 * D)),
            # depthwise Conv1d(D, D, K, groups=D).weight[:, 0, :].T / bias
            'dw_w': nrm(ks[6], (K, D)), 'dw_b': nrm(ks[7], (1, D)),
            'bn_g': jnp.ones((1, D)), 'bn_b': jnp.zeros((1, D)),
            # Conv1d(D, D, 1).weight[:, :, 0].T / bias
            'pw2_w': nrm(ks[8], (D, D)), 'pw2_b': nrm(ks[9], (1, D)),
            'ln3_g': jnp.ones((1, D)), 'ln3_b': jnp.zeros((1, D)),
            'ff1_w': nrm(ks[10], (D, 4 * D)), 'ff1_b': jnp.zeros((1, 4 * D)),
            'ff2_w': nrm(ks[11], (4 * D, D)), 'ff2_b': jnp.zeros((1, D)),
        }
        params['blocks'].append(blk)
    return params


def pack_params(params, compute_dtype=_COMPUTE_DTYPE):
    """Stack per-layer weights on a leading layer axis (so one gridded
    pallas_call selects a layer slab per grid step) and pre-cast matmul weights
    to the MXU compute dtype (biases / norm params / depthwise taps stay f32)."""
    stacked = {}
    for key in _BLOCK_PARAM_ORDER:
        arr = jnp.stack([blk[key] for blk in params['blocks']], axis=0)
        if key in _MATMUL_KEYS:
            arr = arr.astype(compute_dtype)
        stacked[key] = arr
    return {
        'emb_w': params['emb_w'].astype(compute_dtype),      # (input_dim, D)
        'emb_b': params['emb_b'],                            # (1, D)
        'pos': params['pos'],                                # (1, seq_len, D)
        'fin_w': params['out_w'].T.astype(compute_dtype),    # (output_dim, D)
        'fin_b': params['out_b'].reshape(-1, 1),             # (output_dim, 1)
        'stacked': stacked,
    }


# ------------------------------------ main -------------------------------------

if __name__ == "__main__":
    # small, shape-consistent configuration of the PyTorch module
    INPUT_DIM = 16      # mel bins
    OUTPUT_DIM = 16
    SEQ_LEN = 64        # num_frames
    D_MODEL = 32
    NUM_HEADS = 4
    NUM_LAYERS = 2
    CONV_K = 7
    BATCH = 2

    root = jax.random.PRNGKey(0)
    k_param, k_in = jax.random.split(root)
    params = init_params(k_param, input_dim=INPUT_DIM, output_dim=OUTPUT_DIM,
                         seq_len=SEQ_LEN, d_model=D_MODEL,
                         num_layers=NUM_LAYERS, conv_kernel_size=CONV_K)
    packed = pack_params(params)
    noisy_mel = jax.random.normal(k_in, (BATCH, INPUT_DIM, SEQ_LEN), jnp.float32)

    fwd = jax.jit(functools.partial(denoising_conformer_dae,
                                    num_heads=NUM_HEADS,
                                    conv_kernel_size=CONV_K))
    clean_mel = jax.block_until_ready(fwd(noisy_mel, packed))

    assert clean_mel.shape == (BATCH, OUTPUT_DIM, SEQ_LEN), clean_mel.shape
    assert bool(jnp.all(jnp.isfinite(clean_mel)))
    print("KERNEL_OK")
</pallas_src>

<mosaic_0001>
module attributes {stable_mosaic.version = 11 : i64} {
  func.func @_dae_kernel(%arg0: i32, %arg1: memref<2x64x16xf32, #tpu.memory_space<vmem>>, %arg2: memref<16x32xbf16, #tpu.memory_space<vmem>>, %arg3: memref<1x32xf32, #tpu.memory_space<vmem>>, %arg4: memref<1x64x32xf32, #tpu.memory_space<vmem>>, %arg5: memref<1x1x32xf32, #tpu.memory_space<vmem>>, %arg6: memref<1x1x32xf32, #tpu.memory_space<vmem>>, %arg7: memref<1x32x96xbf16, #tpu.memory_space<vmem>>, %arg8: memref<1x1x96xf32, #tpu.memory_space<vmem>>, %arg9: memref<1x32x32xbf16, #tpu.memory_space<vmem>>, %arg10: memref<1x1x32xf32, #tpu.memory_space<vmem>>, %arg11: memref<1x1x32xf32, #tpu.memory_space<vmem>>, %arg12: memref<1x1x32xf32, #tpu.memory_space<vmem>>, %arg13: memref<1x32x64xbf16, #tpu.memory_space<vmem>>, %arg14: memref<1x1x64xf32, #tpu.memory_space<vmem>>, %arg15: memref<1x7x32xf32, #tpu.memory_space<vmem>>, %arg16: memref<1x1x32xf32, #tpu.memory_space<vmem>>, %arg17: memref<1x1x32xf32, #tpu.memory_space<vmem>>, %arg18: memref<1x1x32xf32, #tpu.memory_space<vmem>>, %arg19: memref<1x32x32xbf16, #tpu.memory_space<vmem>>, %arg20: memref<1x1x32xf32, #tpu.memory_space<vmem>>, %arg21: memref<1x1x32xf32, #tpu.memory_space<vmem>>, %arg22: memref<1x1x32xf32, #tpu.memory_space<vmem>>, %arg23: memref<1x32x128xbf16, #tpu.memory_space<vmem>>, %arg24: memref<1x1x128xf32, #tpu.memory_space<vmem>>, %arg25: memref<1x128x32xbf16, #tpu.memory_space<vmem>>, %arg26: memref<1x1x32xf32, #tpu.memory_space<vmem>>, %arg27: memref<16x32xbf16, #tpu.memory_space<vmem>>, %arg28: memref<16x1xf32, #tpu.memory_space<vmem>>, %arg29: memref<2x16x64xf32, #tpu.memory_space<vmem>>, %arg30: memref<2x64x32xf32, #tpu.memory_space<vmem>>, %arg31: memref<2x80x32xf32, #tpu.memory_space<vmem>>) attributes {dimension_semantics = [#tpu.dimension_semantics<arbitrary>], iteration_bounds = array<i64: 2>, scalar_prefetch = 0 : i64, scratch_operands = 2 : i64, tpu.core_type = #tpu.core_type<tc>, window_params = [{pipeline_mode = #tpu.pipeline_mode<synchronous>, transform_indices = @transform_0, window_bounds = array<i64: 2, 64, 16>}, {pipeline_mode = #tpu.pipeline_mode<synchronous>, transform_indices = @transform_1, window_bounds = array<i64: 16, 32>}, {pipeline_mode = #tpu.pipeline_mode<synchronous>, transform_indices = @transform_2, window_bounds = array<i64: 1, 32>}, {pipeline_mode = #tpu.pipeline_mode<synchronous>, transform_indices = @transform_3, window_bounds = array<i64: 1, 64, 32>}, {transform_indices = @transform_4, window_bounds = array<i64: 1, 1, 32>}, {transform_indices = @transform_5, window_bounds = array<i64: 1, 1, 32>}, {transform_indices = @transform_6, window_bounds = array<i64: 1, 32, 96>}, {transform_indices = @transform_7, window_bounds = array<i64: 1, 1, 96>}, {transform_indices = @transform_8, window_bounds = array<i64: 1, 32, 32>}, {transform_indices = @transform_9, window_bounds = array<i64: 1, 1, 32>}, {transform_indices = @transform_10, window_bounds = array<i64: 1, 1, 32>}, {transform_indices = @transform_11, window_bounds = array<i64: 1, 1, 32>}, {transform_indices = @transform_12, window_bounds = array<i64: 1, 32, 64>}, {transform_indices = @transform_13, window_bounds = array<i64: 1, 1, 64>}, {transform_indices = @transform_14, window_bounds = array<i64: 1, 7, 32>}, {transform_indices = @transform_15, window_bounds = array<i64: 1, 1, 32>}, {transform_indices = @transform_16, window_bounds = array<i64: 1, 1, 32>}, {transform_indices = @transform_17, window_bounds = array<i64: 1, 1, 32>}, {transform_indices = @transform_18, window_bounds = array<i64: 1, 32, 32>}, {transform_indices = @transform_19, window_bounds = array<i64: 1, 1, 32>}, {transform_indices = @transform_20, window_bounds = array<i64: 1, 1, 32>}, {transform_indices = @transform_21, window_bounds = array<i64: 1, 1, 32>}, {transform_indices = @transform_22, window_bounds = array<i64: 1, 32, 128>}, {transform_indices = @transform_23, window_bounds = array<i64: 1, 1, 128>}, {transform_indices = @transform_24, window_bounds = array<i64: 1, 128, 32>}, {transform_indices = @transform_25, window_bounds = array<i64: 1, 1, 32>}, {pipeline_mode = #tpu.pipeline_mode<synchronous>, transform_indices = @transform_26, window_bounds = array<i64: 16, 32>}, {pipeline_mode = #tpu.pipeline_mode<synchronous>, transform_indices = @transform_27, window_bounds = array<i64: 16, 1>}, {pipeline_mode = #tpu.pipeline_mode<synchronous>, transform_indices = @transform_28, window_bounds = array<i64: 2, 16, 64>}]} {
    %c0_i32 = arith.constant 0 : i32
    %0 = arith.cmpi eq, %arg0, %c0_i32 : i32
    %1 = arith.extui %0 : i1 to i32
    %c0_i32_0 = arith.constant 0 : i32
    %2 = arith.cmpi ne, %1, %c0_i32_0 : i32
    scf.if %2 {
      %cst_136 = arith.constant 0.000000e+00 : f32
      %342 = vector.broadcast %cst_136 : f32 to vector<2x80x32xf32>
      %c0_137 = arith.constant 0 : index
      %c0_138 = arith.constant 0 : index
      %c0_139 = arith.constant 0 : index
      %343 = vector.load %arg31[%c0_137, %c0_138, %c0_139] : memref<2x80x32xf32, #tpu.memory_space<vmem>>, vector<2x80x32xf32>
      tpu.vector_store %arg31[%c0_137, %c0_138, %c0_139], %342 {strides = array<i32>} : memref<2x80x32xf32, #tpu.memory_space<vmem>>, vector<2x80x32xf32>,
      %c0_140 = arith.constant 0 : index
      %c0_141 = arith.constant 0 : index
      %c0_142 = arith.constant 0 : index
      %344 = vector.load %arg1[%c0_140, %c0_141, %c0_142] : memref<2x64x16xf32, #tpu.memory_space<vmem>>, vector<2x64x16xf32>
      %345 = vector.shape_cast %344 : vector<2x64x16xf32> to vector<128x16xf32>
      %346 = arith.truncf %345 : vector<128x16xf32> to vector<128x16xbf16>
      %c0_143 = arith.constant 0 : index
      %c0_144 = arith.constant 0 : index
      %347 = vector.load %arg2[%c0_143, %c0_144] : memref<16x32xbf16, #tpu.memory_space<vmem>>, vector<16x32xbf16>
      %cst_145 = arith.constant dense<0.000000e+00> : vector<128x32xf32>
      %348 = tpu.matmul %346, %347, %cst_145 {dimension_numbers = #tpu.dot_dimension_numbers<[1], [0], [0], [1], [0, 0, 1, 1], [], []>} : vector<128x16xbf16>, vector<16x32xbf16>, vector<128x32xf32> -> vector<128x32xf32>
      %349 = vector.shape_cast %348 : vector<128x32xf32> to vector<2x64x32xf32>
      %c0_146 = arith.constant 0 : index
      %c0_147 = arith.constant 0 : index
      %350 = vector.load %arg3[%c0_146, %c0_147] : memref<1x32xf32, #tpu.memory_space<vmem>>, vector<1x32xf32>
      %351 = vector.shape_cast %350 : vector<1x32xf32> to vector<1x1x32xf32>
      %352 = vector.broadcast %351 : vector<1x1x32xf32> to vector<2x64x32xf32>
      %353 = arith.addf %349, %352 : vector<2x64x32xf32>
      %c0_148 = arith.constant 0 : index
      %c0_149 = arith.constant 0 : index
      %c0_150 = arith.constant 0 : index
      %354 = vector.load %arg4[%c0_148, %c0_149, %c0_150] : memref<1x64x32xf32, #tpu.memory_space<vmem>>, vector<1x64x32xf32>
      %355 = vector.broadcast %354 : vector<1x64x32xf32> to vector<2x64x32xf32>
      %356 = arith.addf %353, %355 : vector<2x64x32xf32>
      %c0_151 = arith.constant 0 : index
      %c0_152 = arith.constant 0 : index
      %c0_153 = arith.constant 0 : index
      %357 = vector.load %arg30[%c0_151, %c0_152, %c0_153] : memref<2x64x32xf32, #tpu.memory_space<vmem>>, vector<2x64x32xf32>
      tpu.vector_store %arg30[%c0_151, %c0_152, %c0_153], %356 {strides = array<i32>} : memref<2x64x32xf32, #tpu.memory_space<vmem>>, vector<2x64x32xf32>,
    } else {
    }
    %c0 = arith.constant 0 : index
    %c0_1 = arith.constant 0 : index
    %c0_2 = arith.constant 0 : index
    %3 = vector.load %arg30[%c0, %c0_1, %c0_2] : memref<2x64x32xf32, #tpu.memory_space<vmem>>, vector<2x64x32xf32>
    %c0_3 = arith.constant 0 : index
    %c0_4 = arith.constant 0 : index
    %c0_5 = arith.constant 0 : index
    %4 = vector.load %arg5[%c0_3, %c0_4, %c0_5] : memref<1x1x32xf32, #tpu.memory_space<vmem>>, vector<1x1x32xf32>
    %5 = vector.shape_cast %4 : vector<1x1x32xf32> to vector<1x32xf32>
    %c0_6 = arith.constant 0 : index
    %c0_7 = arith.constant 0 : index
    %c0_8 = arith.constant 0 : index
    %6 = vector.load %arg6[%c0_6, %c0_7, %c0_8] : memref<1x1x32xf32, #tpu.memory_space<vmem>>, vector<1x1x32xf32>
    %7 = vector.shape_cast %6 : vector<1x1x32xf32> to vector<1x32xf32>
    %cst = arith.constant dense<0.000000e+00> : vector<2x64xf32>
    %8 = vector.multi_reduction <add>, %3, %cst [2] : vector<2x64x32xf32> to vector<2x64xf32>
    %9 = vector.shape_cast %8 : vector<2x64xf32> to vector<2x64x1xf32>
    %cst_9 = arith.constant 3.200000e+01 : f32
    %10 = vector.broadcast %cst_9 : f32 to vector<2x64x1xf32>
    %11 = arith.divf %9, %10 : vector<2x64x1xf32>
    %12 = vector.broadcast %11 : vector<2x64x1xf32> to vector<2x64x32xf32>
    %13 = arith.subf %3, %12 : vector<2x64x32xf32>
    %14 = arith.mulf %13, %13 : vector<2x64x32xf32>
    %cst_10 = arith.constant dense<0.000000e+00> : vector<2x64xf32>
    %15 = vector.multi_reduction <add>, %14, %cst_10 [2] : vector<2x64x32xf32> to vector<2x64xf32>
    %16 = vector.shape_cast %15 : vector<2x64xf32> to vector<2x64x1xf32>
    %cst_11 = arith.constant 3.200000e+01 : f32
    %17 = vector.broadcast %cst_11 : f32 to vector<2x64x1xf32>
    %18 = arith.divf %16, %17 : vector<2x64x1xf32>
    %19 = vector.broadcast %11 : vector<2x64x1xf32> to vector<2x64x32xf32>
    %20 = arith.subf %3, %19 : vector<2x64x32xf32>
    %cst_12 = arith.constant 9.99999974E-6 : f32
    %21 = vector.broadcast %cst_12 : f32 to vector<2x64x1xf32>
    %22 = arith.addf %18, %21 : vector<2x64x1xf32>
    %23 = math.rsqrt %22 : vector<2x64x1xf32>
    %24 = vector.broadcast %23 : vector<2x64x1xf32> to vector<2x64x32xf32>
    %25 = arith.mulf %20, %24 : vector<2x64x32xf32>
    %26 = vector.shape_cast %5 : vector<1x32xf32> to vector<1x1x32xf32>
    %27 = vector.broadcast %26 : vector<1x1x32xf32> to vector<2x64x32xf32>
    %28 = arith.mulf %25, %27 : vector<2x64x32xf32>
    %29 = vector.shape_cast %7 : vector<1x32xf32> to vector<1x1x32xf32>
    %30 = vector.broadcast %29 : vector<1x1x32xf32> to vector<2x64x32xf32>
    %31 = arith.addf %28, %30 : vector<2x64x32xf32>
    %c0_13 = arith.constant 0 : index
    %c0_14 = arith.constant 0 : index
    %c0_15 = arith.constant 0 : index
    %32 = vector.load %arg7[%c0_13, %c0_14, %c0_15] : memref<1x32x96xbf16, #tpu.memory_space<vmem>>, vector<1x32x96xbf16>
    %33 = vector.shape_cast %32 : vector<1x32x96xbf16> to vector<32x96xbf16>
    %c0_16 = arith.constant 0 : index
    %c0_17 = arith.constant 0 : index
    %c0_18 = arith.constant 0 : index
    %34 = vector.load %arg8[%c0_16, %c0_17, %c0_18] : memref<1x1x96xf32, #tpu.memory_space<vmem>>, vector<1x1x96xf32>
    %35 = vector.shape_cast %34 : vector<1x1x96xf32> to vector<1x96xf32>
    %36 = vector.shape_cast %31 : vector<2x64x32xf32> to vector<128x32xf32>
    %37 = arith.truncf %36 : vector<128x32xf32> to vector<128x32xbf16>
    %cst_19 = arith.constant dense<0.000000e+00> : vector<128x96xf32>
    %38 = tpu.matmul %37, %33, %cst_19 {dimension_numbers = #tpu.dot_dimension_numbers<[1], [0], [0], [1], [0, 0, 1, 1], [], []>} : vector<128x32xbf16>, vector<32x96xbf16>, vector<128x96xf32> -> vector<128x96xf32>
    %39 = vector.shape_cast %38 : vector<128x96xf32> to vector<2x64x96xf32>
    %40 = vector.shape_cast %35 : vector<1x96xf32> to vector<1x1x96xf32>
    %41 = vector.broadcast %40 : vector<1x1x96xf32> to vector<2x64x96xf32>
    %42 = arith.addf %39, %41 : vector<2x64x96xf32>
    %43 = vector.extract_strided_slice %42 {offsets = [0, 0, 0], sizes = [2, 64, 32], strides = [1, 1, 1]} : vector<2x64x96xf32> to vector<2x64x32xf32>
    %cst_20 = arith.constant 0.353553385 : f32
    %44 = vector.broadcast %cst_20 : f32 to vector<2x64x32xf32>
    %45 = arith.mulf %43, %44 : vector<2x64x32xf32>
    %46 = vector.extract_strided_slice %42 {offsets = [0, 0, 32], sizes = [2, 64, 32], strides = [1, 1, 1]} : vector<2x64x96xf32> to vector<2x64x32xf32>
    %47 = vector.extract_strided_slice %42 {offsets = [0, 0, 64], sizes = [2, 64, 32], strides = [1, 1, 1]} : vector<2x64x96xf32> to vector<2x64x32xf32>
    %48 = vector.extract_strided_slice %45 {offsets = [0, 0, 0], sizes = [2, 64, 8], strides = [1, 1, 1]} : vector<2x64x32xf32> to vector<2x64x8xf32>
    %49 = arith.truncf %48 : vector<2x64x8xf32> to vector<2x64x8xbf16>
    %50 = vector.extract_strided_slice %46 {offsets = [0, 0, 0], sizes = [2, 64, 8], strides = [1, 1, 1]} : vector<2x64x32xf32> to vector<2x64x8xf32>
    %51 = arith.truncf %50 : vector<2x64x8xf32> to vector<2x64x8xbf16>
    %52 = vector.extract_strided_slice %47 {offsets = [0, 0, 0], sizes = [2, 64, 8], strides = [1, 1, 1]} : vector<2x64x32xf32> to vector<2x64x8xf32>
    %53 = arith.truncf %52 : vector<2x64x8xf32> to vector<2x64x8xbf16>
    "tpu.trace_start"() <{level = 10 : i32, message = "btd,bsd->bts"}> : () -> ()
    %cst_21 = arith.constant dense<0.000000e+00> : vector<2x64x64xf32>
    %54 = tpu.matmul %49, %51, %cst_21 {dimension_numbers = #tpu.dot_dimension_numbers<[2], [2], [1], [1], [0, 0, 0, 1, 1, 1], [0], [0]>} : vector<2x64x8xbf16>, vector<2x64x8xbf16>, vector<2x64x64xf32> -> vector<2x64x64xf32>
    "tpu.trace_stop"() : () -> ()
    %cst_22 = arith.constant dense<0xFF800000> : vector<2x64xf32>
    %55 = vector.multi_reduction <maximumf>, %54, %cst_22 [2] : vector<2x64x64xf32> to vector<2x64xf32>
    %56 = vector.shape_cast %55 : vector<2x64xf32> to vector<2x64x1xf32>
    %57 = vector.broadcast %56 : vector<2x64x1xf32> to vector<2x64x64xf32>
    %58 = arith.subf %54, %57 : vector<2x64x64xf32>
    %59 = math.exp %58 : vector<2x64x64xf32>
    %cst_23 = arith.constant dense<0.000000e+00> : vector<2x64xf32>
    %60 = vector.multi_reduction <add>, %59, %cst_23 [2] : vector<2x64x64xf32> to vector<2x64xf32>
    %61 = vector.shape_cast %60 : vector<2x64xf32> to vector<2x64x1xf32>
    %62 = tpu.reciprocal %61 {approx = true} : vector<2x64x1xf32> -> vector<2x64x1xf32>
    %63 = vector.broadcast %62 : vector<2x64x1xf32> to vector<2x64x64xf32>
    %64 = arith.mulf %59, %63 : vector<2x64x64xf32>
    %65 = arith.truncf %64 : vector<2x64x64xf32> to vector<2x64x64xbf16>
    "tpu.trace_start"() <{level = 10 : i32, message = "bts,bsd->btd"}> : () -> ()
    %cst_24 = arith.constant dense<0.000000e+00> : vector<2x64x8xf32>
    %66 = tpu.matmul %65, %53, %cst_24 {dimension_numbers = #tpu.dot_dimension_numbers<[2], [1], [1], [2], [0, 0, 0, 1, 1, 2], [0], [0]>} : vector<2x64x64xbf16>, vector<2x64x8xbf16>, vector<2x64x8xf32> -> vector<2x64x8xf32>
    "tpu.trace_stop"() : () -> ()
    %67 = vector.extract_strided_slice %45 {offsets = [0, 0, 8], sizes = [2, 64, 8], strides = [1, 1, 1]} : vector<2x64x32xf32> to vector<2x64x8xf32>
    %68 = arith.truncf %67 : vector<2x64x8xf32> to vector<2x64x8xbf16>
    %69 = vector.extract_strided_slice %46 {offsets = [0, 0, 8], sizes = [2, 64, 8], strides = [1, 1, 1]} : vector<2x64x32xf32> to vector<2x64x8xf32>
    %70 = arith.truncf %69 : vector<2x64x8xf32> to vector<2x64x8xbf16>
    %71 = vector.extract_strided_slice %47 {offsets = [0, 0, 8], sizes = [2, 64, 8], strides = [1, 1, 1]} : vector<2x64x32xf32> to vector<2x64x8xf32>
    %72 = arith.truncf %71 : vector<2x64x8xf32> to vector<2x64x8xbf16>
    "tpu.trace_start"() <{level = 10 : i32, message = "btd,bsd->bts"}> : () -> ()
    %cst_25 = arith.constant dense<0.000000e+00> : vector<2x64x64xf32>
    %73 = tpu.matmul %68, %70, %cst_25 {dimension_numbers = #tpu.dot_dimension_numbers<[2], [2], [1], [1], [0, 0, 0, 1, 1, 1], [0], [0]>} : vector<2x64x8xbf16>, vector<2x64x8xbf16>, vector<2x64x64xf32> -> vector<2x64x64xf32>
    "tpu.trace_stop"() : () -> ()
    %cst_26 = arith.constant dense<0xFF800000> : vector<2x64xf32>
    %74 = vector.multi_reduction <maximumf>, %73, %cst_26 [2] : vector<2x64x64xf32> to vector<2x64xf32>
    %75 = vector.shape_cast %74 : vector<2x64xf32> to vector<2x64x1xf32>
    %76 = vector.broadcast %75 : vector<2x64x1xf32> to vector<2x64x64xf32>
    %77 = arith.subf %73, %76 : vector<2x64x64xf32>
    %78 = math.exp %77 : vector<2x64x64xf32>
    %cst_27 = arith.constant dense<0.000000e+00> : vector<2x64xf32>
    %79 = vector.multi_reduction <add>, %78, %cst_27 [2] : vector<2x64x64xf32> to vector<2x64xf32>
    %80 = vector.shape_cast %79 : vector<2x64xf32> to vector<2x64x1xf32>
    %81 = tpu.reciprocal %80 {approx = true} : vector<2x64x1xf32> -> vector<2x64x1xf32>
    %82 = vector.broadcast %81 : vector<2x64x1xf32> to vector<2x64x64xf32>
    %83 = arith.mulf %78, %82 : vector<2x64x64xf32>
    %84 = arith.truncf %83 : vector<2x64x64xf32> to vector<2x64x64xbf16>
    "tpu.trace_start"() <{level = 10 : i32, message = "bts,bsd->btd"}> : () -> ()
    %cst_28 = arith.constant dense<0.000000e+00> : vector<2x64x8xf32>
    %85 = tpu.matmul %84, %72, %cst_28 {dimension_numbers = #tpu.dot_dimension_numbers<[2], [1], [1], [2], [0, 0, 0, 1, 1, 2], [0], [0]>} : vector<2x64x64xbf16>, vector<2x64x8xbf16>, vector<2x64x8xf32> -> vector<2x64x8xf32>
    "tpu.trace_stop"() : () -> ()
    %86 = vector.extract_strided_slice %45 {offsets = [0, 0, 16], sizes = [2, 64, 8], strides = [1, 1, 1]} : vector<2x64x32xf32> to vector<2x64x8xf32>
    %87 = arith.truncf %86 : vector<2x64x8xf32> to vector<2x64x8xbf16>
    %88 = vector.extract_strided_slice %46 {offsets = [0, 0, 16], sizes = [2, 64, 8], strides = [1, 1, 1]} : vector<2x64x32xf32> to vector<2x64x8xf32>
    %89 = arith.truncf %88 : vector<2x64x8xf32> to vector<2x64x8xbf16>
    %90 = vector.extract_strided_slice %47 {offsets = [0, 0, 16], sizes = [2, 64, 8], strides = [1, 1, 1]} : vector<2x64x32xf32> to vector<2x64x8xf32>
    %91 = arith.truncf %90 : vector<2x64x8xf32> to vector<2x64x8xbf16>
    "tpu.trace_start"() <{level = 10 : i32, message = "btd,bsd->bts"}> : () -> ()
    %cst_29 = arith.constant dense<0.000000e+00> : vector<2x64x64xf32>
    %92 = tpu.matmul %87, %89, %cst_29 {dimension_numbers = #tpu.dot_dimension_numbers<[2], [2], [1], [1], [0, 0, 0, 1, 1, 1], [0], [0]>} : vector<2x64x8xbf16>, vector<2x64x8xbf16>, vector<2x64x64xf32> -> vector<2x64x64xf32>
    "tpu.trace_stop"() : () -> ()
    %cst_30 = arith.constant dense<0xFF800000> : vector<2x64xf32>
    %93 = vector.multi_reduction <maximumf>, %92, %cst_30 [2] : vector<2x64x64xf32> to vector<2x64xf32>
    %94 = vector.shape_cast %93 : vector<2x64xf32> to vector<2x64x1xf32>
    %95 = vector.broadcast %94 : vector<2x64x1xf32> to vector<2x64x64xf32>
    %96 = arith.subf %92, %95 : vector<2x64x64xf32>
    %97 = math.exp %96 : vector<2x64x64xf32>
    %cst_31 = arith.constant dense<0.000000e+00> : vector<2x64xf32>
    %98 = vector.multi_reduction <add>, %97, %cst_31 [2] : vector<2x64x64xf32> to vector<2x64xf32>
    %99 = vector.shape_cast %98 : vector<2x64xf32> to vector<2x64x1xf32>
    %100 = tpu.reciprocal %99 {approx = true} : vector<2x64x1xf32> -> vector<2x64x1xf32>
    %101 = vector.broadcast %100 : vector<2x64x1xf32> to vector<2x64x64xf32>
    %102 = arith.mulf %97, %101 : vector<2x64x64xf32>
    %103 = arith.truncf %102 : vector<2x64x64xf32> to vector<2x64x64xbf16>
    "tpu.trace_start"() <{level = 10 : i32, message = "bts,bsd->btd"}> : () -> ()
    %cst_32 = arith.constant dense<0.000000e+00> : vector<2x64x8xf32>
    %104 = tpu.matmul %103, %91, %cst_32 {dimension_numbers = #tpu.dot_dimension_numbers<[2], [1], [1], [2], [0, 0, 0, 1, 1, 2], [0], [0]>} : vector<2x64x64xbf16>, vector<2x64x8xbf16>, vector<2x64x8xf32> -> vector<2x64x8xf32>
    "tpu.trace_stop"() : () -> ()
    %105 = vector.extract_strided_slice %45 {offsets = [0, 0, 24], sizes = [2, 64, 8], strides = [1, 1, 1]} : vector<2x64x32xf32> to vector<2x64x8xf32>
    %106 = arith.truncf %105 : vector<2x64x8xf32> to vector<2x64x8xbf16>
    %107 = vector.extract_strided_slice %46 {offsets = [0, 0, 24], sizes = [2, 64, 8], strides = [1, 1, 1]} : vector<2x64x32xf32> to vector<2x64x8xf32>
    %108 = arith.truncf %107 : vector<2x64x8xf32> to vector<2x64x8xbf16>
    %109 = vector.extract_strided_slice %47 {offsets = [0, 0, 24], sizes = [2, 64, 8], strides = [1, 1, 1]} : vector<2x64x32xf32> to vector<2x64x8xf32>
    %110 = arith.truncf %109 : vector<2x64x8xf32> to vector<2x64x8xbf16>
    "tpu.trace_start"() <{level = 10 : i32, message = "btd,bsd->bts"}> : () -> ()
    %cst_33 = arith.constant dense<0.000000e+00> : vector<2x64x64xf32>
    %111 = tpu.matmul %106, %108, %cst_33 {dimension_numbers = #tpu.dot_dimension_numbers<[2], [2], [1], [1], [0, 0, 0, 1, 1, 1], [0], [0]>} : vector<2x64x8xbf16>, vector<2x64x8xbf16>, vector<2x64x64xf32> -> vector<2x64x64xf32>
    "tpu.trace_stop"() : () -> ()
    %cst_34 = arith.constant dense<0xFF800000> : vector<2x64xf32>
    %112 = vector.multi_reduction <maximumf>, %111, %cst_34 [2] : vector<2x64x64xf32> to vector<2x64xf32>
    %113 = vector.shape_cast %112 : vector<2x64xf32> to vector<2x64x1xf32>
    %114 = vector.broadcast %113 : vector<2x64x1xf32> to vector<2x64x64xf32>
    %115 = arith.subf %111, %114 : vector<2x64x64xf32>
    %116 = math.exp %115 : vector<2x64x64xf32>
    %cst_35 = arith.constant dense<0.000000e+00> : vector<2x64xf32>
    %117 = vector.multi_reduction <add>, %116, %cst_35 [2] : vector<2x64x64xf32> to vector<2x64xf32>
    %118 = vector.shape_cast %117 : vector<2x64xf32> to vector<2x64x1xf32>
    %119 = tpu.reciprocal %118 {approx = true} : vector<2x64x1xf32> -> vector<2x64x1xf32>
    %120 = vector.broadcast %119 : vector<2x64x1xf32> to vector<2x64x64xf32>
    %121 = arith.mulf %116, %120 : vector<2x64x64xf32>
    %122 = arith.truncf %121 : vector<2x64x64xf32> to vector<2x64x64xbf16>
    "tpu.trace_start"() <{level = 10 : i32, message = "bts,bsd->btd"}> : () -> ()
    %cst_36 = arith.constant dense<0.000000e+00> : vector<2x64x8xf32>
    %123 = tpu.matmul %122, %110, %cst_36 {dimension_numbers = #tpu.dot_dimension_numbers<[2], [1], [1], [2], [0, 0, 0, 1, 1, 2], [0], [0]>} : vector<2x64x64xbf16>, vector<2x64x8xbf16>, vector<2x64x8xf32> -> vector<2x64x8xf32>
    "tpu.trace_stop"() : () -> ()
    %124 = tpu.concatenate %66, %85, %104, %123 in 2 : vector<2x64x8xf32>, vector<2x64x8xf32>, vector<2x64x8xf32>, vector<2x64x8xf32> -> vector<2x64x32xf32>
    %c0_37 = arith.constant 0 : index
    %c0_38 = arith.constant 0 : index
    %c0_39 = arith.constant 0 : index
    %125 = vector.load %arg9[%c0_37, %c0_38, %c0_39] : memref<1x32x32xbf16, #tpu.memory_space<vmem>>, vector<1x32x32xbf16>
    %126 = vector.shape_cast %125 : vector<1x32x32xbf16> to vector<32x32xbf16>
    %c0_40 = arith.constant 0 : index
    %c0_41 = arith.constant 0 : index
    %c0_42 = arith.constant 0 : index
    %127 = vector.load %arg10[%c0_40, %c0_41, %c0_42] : memref<1x1x32xf32, #tpu.memory_space<vmem>>, vector<1x1x32xf32>
    %128 = vector.shape_cast %127 : vector<1x1x32xf32> to vector<1x32xf32>
    %129 = vector.shape_cast %124 : vector<2x64x32xf32> to vector<128x32xf32>
    %130 = arith.truncf %129 : vector<128x32xf32> to vector<128x32xbf16>
    %cst_43 = arith.constant dense<0.000000e+00> : vector<128x32xf32>
    %131 = tpu.matmul %130, %126, %cst_43 {dimension_numbers = #tpu.dot_dimension_numbers<[1], [0], [0], [1], [0, 0, 1, 1], [], []>} : vector<128x32xbf16>, vector<32x32xbf16>, vector<128x32xf32> -> vector<128x32xf32>
    %132 = vector.shape_cast %131 : vector<128x32xf32> to vector<2x64x32xf32>
    %133 = vector.shape_cast %128 : vector<1x32xf32> to vector<1x1x32xf32>
    %134 = vector.broadcast %133 : vector<1x1x32xf32> to vector<2x64x32xf32>
    %135 = arith.addf %132, %134 : vector<2x64x32xf32>
    %136 = arith.addf %3, %135 : vector<2x64x32xf32>
    %c0_44 = arith.constant 0 : index
    %c0_45 = arith.constant 0 : index
    %c0_46 = arith.constant 0 : index
    %137 = vector.load %arg11[%c0_44, %c0_45, %c0_46] : memref<1x1x32xf32, #tpu.memory_space<vmem>>, vector<1x1x32xf32>
    %138 = vector.shape_cast %137 : vector<1x1x32xf32> to vector<1x32xf32>
    %c0_47 = arith.constant 0 : index
    %c0_48 = arith.constant 0 : index
    %c0_49 = arith.constant 0 : index
    %139 = vector.load %arg12[%c0_47, %c0_48, %c0_49] : memref<1x1x32xf32, #tpu.memory_space<vmem>>, vector<1x1x32xf32>
    %140 = vector.shape_cast %139 : vector<1x1x32xf32> to vector<1x32xf32>
    %cst_50 = arith.constant dense<0.000000e+00> : vector<2x64xf32>
    %141 = vector.multi_reduction <add>, %136, %cst_50 [2] : vector<2x64x32xf32> to vector<2x64xf32>
    %142 = vector.shape_cast %141 : vector<2x64xf32> to vector<2x64x1xf32>
    %cst_51 = arith.constant 3.200000e+01 : f32
    %143 = vector.broadcast %cst_51 : f32 to vector<2x64x1xf32>
    %144 = arith.divf %142, %143 : vector<2x64x1xf32>
    %145 = vector.broadcast %144 : vector<2x64x1xf32> to vector<2x64x32xf32>
    %146 = arith.subf %136, %145 : vector<2x64x32xf32>
    %147 = arith.mulf %146, %146 : vector<2x64x32xf32>
    %cst_52 = arith.constant dense<0.000000e+00> : vector<2x64xf32>
    %148 = vector.multi_reduction <add>, %147, %cst_52 [2] : vector<2x64x32xf32> to vector<2x64xf32>
    %149 = vector.shape_cast %148 : vector<2x64xf32> to vector<2x64x1xf32>
    %cst_53 = arith.constant 3.200000e+01 : f32
    %150 = vector.broadcast %cst_53 : f32 to vector<2x64x1xf32>
    %151 = arith.divf %149, %150 : vector<2x64x1xf32>
    %152 = vector.broadcast %144 : vector<2x64x1xf32> to vector<2x64x32xf32>
    %153 = arith.subf %136, %152 : vector<2x64x32xf32>
    %cst_54 = arith.constant 9.99999974E-6 : f32
    %154 = vector.broadcast %cst_54 : f32 to vector<2x64x1xf32>
    %155 = arith.addf %151, %154 : vector<2x64x1xf32>
    %156 = math.rsqrt %155 : vector<2x64x1xf32>
    %157 = vector.broadcast %156 : vector<2x64x1xf32> to vector<2x64x32xf32>
    %158 = arith.mulf %153, %157 : vector<2x64x32xf32>
    %159 = vector.shape_cast %138 : vector<1x32xf32> to vector<1x1x32xf32>
    %160 = vector.broadcast %159 : vector<1x1x32xf32> to vector<2x64x32xf32>
    %161 = arith.mulf %158, %160 : vector<2x64x32xf32>
    %162 = vector.shape_cast %140 : vector<1x32xf32> to vector<1x1x32xf32>
    %163 = vector.broadcast %162 : vector<1x1x32xf32> to vector<2x64x32xf32>
    %164 = arith.addf %161, %163 : vector<2x64x32xf32>
    %c0_55 = arith.constant 0 : index
    %c0_56 = arith.constant 0 : index
    %c0_57 = arith.constant 0 : index
    %165 = vector.load %arg13[%c0_55, %c0_56, %c0_57] : memref<1x32x64xbf16, #tpu.memory_space<vmem>>, vector<1x32x64xbf16>
    %166 = vector.shape_cast %165 : vector<1x32x64xbf16> to vector<32x64xbf16>
    %c0_58 = arith.constant 0 : index
    %c0_59 = arith.constant 0 : index
    %c0_60 = arith.constant 0 : index
    %167 = vector.load %arg14[%c0_58, %c0_59, %c0_60] : memref<1x1x64xf32, #tpu.memory_space<vmem>>, vector<1x1x64xf32>
    %168 = vector.shape_cast %167 : vector<1x1x64xf32> to vector<1x64xf32>
    %169 = vector.shape_cast %164 : vector<2x64x32xf32> to vector<128x32xf32>
    %170 = arith.truncf %169 : vector<128x32xf32> to vector<128x32xbf16>
    %cst_61 = arith.constant dense<0.000000e+00> : vector<128x64xf32>
    %171 = tpu.matmul %170, %166, %cst_61 {dimension_numbers = #tpu.dot_dimension_numbers<[1], [0], [0], [1], [0, 0, 1, 1], [], []>} : vector<128x32xbf16>, vector<32x64xbf16>, vector<128x64xf32> -> vector<128x64xf32>
    %172 = vector.shape_cast %171 : vector<128x64xf32> to vector<2x64x64xf32>
    %173 = vector.shape_cast %168 : vector<1x64xf32> to vector<1x1x64xf32>
    %174 = vector.broadcast %173 : vector<1x1x64xf32> to vector<2x64x64xf32>
    %175 = arith.addf %172, %174 : vector<2x64x64xf32>
    %176 = vector.extract_strided_slice %175 {offsets = [0, 0, 0], sizes = [2, 64, 32], strides = [1, 1, 1]} : vector<2x64x64xf32> to vector<2x64x32xf32>
    %177 = vector.extract_strided_slice %175 {offsets = [0, 0, 32], sizes = [2, 64, 32], strides = [1, 1, 1]} : vector<2x64x64xf32> to vector<2x64x32xf32>
    %178 = arith.negf %177 : vector<2x64x32xf32>
    %179 = math.exp %178 : vector<2x64x32xf32>
    %cst_62 = arith.constant 1.000000e+00 : f32
    %180 = vector.broadcast %cst_62 : f32 to vector<2x64x32xf32>
    %181 = arith.addf %180, %179 : vector<2x64x32xf32>
    %182 = arith.divf %180, %181 : vector<2x64x32xf32>
    %183 = arith.mulf %176, %182 : vector<2x64x32xf32>
    %c0_63 = arith.constant 0 : index
    %c8 = arith.constant 8 : index
    %c0_64 = arith.constant 0 : index
    %184 = vector.load %arg31[%c0_63, %c8, %c0_64] : memref<2x80x32xf32, #tpu.memory_space<vmem>>, vector<2x64x32xf32>
    tpu.vector_store %arg31[%c0_63, %c8, %c0_64], %183 {strides = array<i32>} : memref<2x80x32xf32, #tpu.memory_space<vmem>>, vector<2x64x32xf32>,
    %c0_65 = arith.constant 0 : index
    %c0_66 = arith.constant 0 : index
    %c0_67 = arith.constant 0 : index
    %185 = vector.load %arg15[%c0_65, %c0_66, %c0_67] : memref<1x7x32xf32, #tpu.memory_space<vmem>>, vector<1x7x32xf32>
    %186 = vector.shape_cast %185 : vector<1x7x32xf32> to vector<7x32xf32>
    %cst_68 = arith.constant 0.000000e+00 : f32
    %187 = vector.broadcast %cst_68 : f32 to vector<2x64x32xf32>
    %c0_69 = arith.constant 0 : index
    %c5 = arith.constant 5 : index
    %c0_70 = arith.constant 0 : index
    %188 = vector.load %arg31[%c0_69, %c5, %c0_70] : memref<2x80x32xf32, #tpu.memory_space<vmem>>, vector<2x64x32xf32>
    %189 = vector.extract_strided_slice %186 {offsets = [0, 0], sizes = [1, 32], strides = [1, 1]} : vector<7x32xf32> to vector<1x32xf32>
    %190 = vector.shape_cast %189 : vector<1x32xf32> to vector<1x1x32xf32>
    %191 = vector.broadcast %190 : vector<1x1x32xf32> to vector<2x64x32xf32>
    %192 = arith.mulf %188, %191 : vector<2x64x32xf32>
    %193 = arith.addf %187, %192 : vector<2x64x32xf32>
    %c0_71 = arith.constant 0 : index
    %c6 = arith.constant 6 : index
    %c0_72 = arith.constant 0 : index
    %194 = vector.load %arg31[%c0_71, %c6, %c0_72] : memref<2x80x32xf32, #tpu.memory_space<vmem>>, vector<2x64x32xf32>
    %195 = vector.extract_strided_slice %186 {offsets = [1, 0], sizes = [1, 32], strides = [1, 1]} : vector<7x32xf32> to vector<1x32xf32>
    %196 = vector.shape_cast %195 : vector<1x32xf32> to vector<1x1x32xf32>
    %197 = vector.broadcast %196 : vector<1x1x32xf32> to vector<2x64x32xf32>
    %198 = arith.mulf %194, %197 : vector<2x64x32xf32>
    %199 = arith.addf %193, %198 : vector<2x64x32xf32>
    %c0_73 = arith.constant 0 : index
    %c7 = arith.constant 7 : index
    %c0_74 = arith.constant 0 : index
    %200 = vector.load %arg31[%c0_73, %c7, %c0_74] : memref<2x80x32xf32, #tpu.memory_space<vmem>>, vector<2x64x32xf32>
    %201 = vector.extract_strided_slice %186 {offsets = [2, 0], sizes = [1, 32], strides = [1, 1]} : vector<7x32xf32> to vector<1x32xf32>
    %202 = vector.shape_cast %201 : vector<1x32xf32> to vector<1x1x32xf32>
    %203 = vector.broadcast %202 : vector<1x1x32xf32> to vector<2x64x32xf32>
    %204 = arith.mulf %200, %203 : vector<2x64x32xf32>
    %205 = arith.addf %199, %204 : vector<2x64x32xf32>
    %c0_75 = arith.constant 0 : index
    %c8_76 = arith.constant 8 : index
    %c0_77 = arith.constant 0 : index
    %206 = vector.load %arg31[%c0_75, %c8_76, %c0_77] : memref<2x80x32xf32, #tpu.memory_space<vmem>>, vector<2x64x32xf32>
    %207 = vector.extract_strided_slice %186 {offsets = [3, 0], sizes = [1, 32], strides = [1, 1]} : vector<7x32xf32> to vector<1x32xf32>
    %208 = vector.shape_cast %207 : vector<1x32xf32> to vector<1x1x32xf32>
    %209 = vector.broadcast %208 : vector<1x1x32xf32> to vector<2x64x32xf32>
    %210 = arith.mulf %206, %209 : vector<2x64x32xf32>
    %211 = arith.addf %205, %210 : vector<2x64x32xf32>
    %c0_78 = arith.constant 0 : index
    %c9 = arith.constant 9 : index
    %c0_79 = arith.constant 0 : index
    %212 = vector.load %arg31[%c0_78, %c9, %c0_79] : memref<2x80x32xf32, #tpu.memory_space<vmem>>, vector<2x64x32xf32>
    %213 = vector.extract_strided_slice %186 {offsets = [4, 0], sizes = [1, 32], strides = [1, 1]} : vector<7x32xf32> to vector<1x32xf32>
    %214 = vector.shape_cast %213 : vector<1x32xf32> to vector<1x1x32xf32>
    %215 = vector.broadcast %214 : vector<1x1x32xf32> to vector<2x64x32xf32>
    %216 = arith.mulf %212, %215 : vector<2x64x32xf32>
    %217 = arith.addf %211, %216 : vector<2x64x32xf32>
    %c0_80 = arith.constant 0 : index
    %c10 = arith.constant 10 : index
    %c0_81 = arith.constant 0 : index
    %218 = vector.load %arg31[%c0_80, %c10, %c0_81] : memref<2x80x32xf32, #tpu.memory_space<vmem>>, vector<2x64x32xf32>
    %219 = vector.extract_strided_slice %186 {offsets = [5, 0], sizes = [1, 32], strides = [1, 1]} : vector<7x32xf32> to vector<1x32xf32>
    %220 = vector.shape_cast %219 : vector<1x32xf32> to vector<1x1x32xf32>
    %221 = vector.broadcast %220 : vector<1x1x32xf32> to vector<2x64x32xf32>
    %222 = arith.mulf %218, %221 : vector<2x64x32xf32>
    %223 = arith.addf %217, %222 : vector<2x64x32xf32>
    %c0_82 = arith.constant 0 : index
    %c11 = arith.constant 11 : index
    %c0_83 = arith.constant 0 : index
    %224 = vector.load %arg31[%c0_82, %c11, %c0_83] : memref<2x80x32xf32, #tpu.memory_space<vmem>>, vector<2x64x32xf32>
    %225 = vector.extract_strided_slice %186 {offsets = [6, 0], sizes = [1, 32], strides = [1, 1]} : vector<7x32xf32> to vector<1x32xf32>
    %226 = vector.shape_cast %225 : vector<1x32xf32> to vector<1x1x32xf32>
    %227 = vector.broadcast %226 : vector<1x1x32xf32> to vector<2x64x32xf32>
    %228 = arith.mulf %224, %227 : vector<2x64x32xf32>
    %229 = arith.addf %223, %228 : vector<2x64x32xf32>
    %c0_84 = arith.constant 0 : index
    %c0_85 = arith.constant 0 : index
    %c0_86 = arith.constant 0 : index
    %230 = vector.load %arg16[%c0_84, %c0_85, %c0_86] : memref<1x1x32xf32, #tpu.memory_space<vmem>>, vector<1x1x32xf32>
    %231 = vector.shape_cast %230 : vector<1x1x32xf32> to vector<1x32xf32>
    %232 = vector.shape_cast %231 : vector<1x32xf32> to vector<1x1x32xf32>
    %233 = vector.broadcast %232 : vector<1x1x32xf32> to vector<2x64x32xf32>
    %234 = arith.addf %229, %233 : vector<2x64x32xf32>
    %235 = vector.shape_cast %234 : vector<2x64x32xf32> to vector<128x32xf32>
    %cst_87 = arith.constant dense<0.000000e+00> : vector<32xf32>
    %236 = vector.multi_reduction <add>, %235, %cst_87 [0] : vector<128x32xf32> to vector<32xf32>
    %237 = vector.shape_cast %236 : vector<32xf32> to vector<1x32xf32>
    %cst_88 = arith.constant 1.280000e+02 : f32
    %238 = vector.broadcast %cst_88 : f32 to vector<1x32xf32>
    %239 = arith.divf %237, %238 : vector<1x32xf32>
    %240 = vector.broadcast %239 : vector<1x32xf32> to vector<128x32xf32>
    %241 = arith.subf %235, %240 : vector<128x32xf32>
    %242 = arith.mulf %241, %241 : vector<128x32xf32>
    %cst_89 = arith.constant dense<0.000000e+00> : vector<32xf32>
    %243 = vector.multi_reduction <add>, %242, %cst_89 [0] : vector<128x32xf32> to vector<32xf32>
    %244 = vector.shape_cast %243 : vector<32xf32> to vector<1x32xf32>
    %cst_90 = arith.constant 1.280000e+02 : f32
    %245 = vector.broadcast %cst_90 : f32 to vector<1x32xf32>
    %246 = arith.divf %244, %245 : vector<1x32xf32>
    %247 = vector.broadcast %239 : vector<1x32xf32> to vector<128x32xf32>
    %248 = arith.subf %235, %247 : vector<128x32xf32>
    %cst_91 = arith.constant 9.99999974E-6 : f32
    %249 = vector.broadcast %cst_91 : f32 to vector<1x32xf32>
    %250 = arith.addf %246, %249 : vector<1x32xf32>
    %251 = math.rsqrt %250 : vector<1x32xf32>
    %252 = vector.broadcast %251 : vector<1x32xf32> to vector<128x32xf32>
    %253 = arith.mulf %248, %252 : vector<128x32xf32>
    %c0_92 = arith.constant 0 : index
    %c0_93 = arith.constant 0 : index
    %c0_94 = arith.constant 0 : index
    %254 = vector.load %arg17[%c0_92, %c0_93, %c0_94] : memref<1x1x32xf32, #tpu.memory_space<vmem>>, vector<1x1x32xf32>
    %255 = vector.shape_cast %254 : vector<1x1x32xf32> to vector<1x32xf32>
    %256 = vector.broadcast %255 : vector<1x32xf32> to vector<128x32xf32>
    %257 = arith.mulf %253, %256 : vector<128x32xf32>
    %c0_95 = arith.constant 0 : index
    %c0_96 = arith.constant 0 : index
    %c0_97 = arith.constant 0 : index
    %258 = vector.load %arg18[%c0_95, %c0_96, %c0_97] : memref<1x1x32xf32, #tpu.memory_space<vmem>>, vector<1x1x32xf32>
    %259 = vector.shape_cast %258 : vector<1x1x32xf32> to vector<1x32xf32>
    %260 = vector.broadcast %259 : vector<1x32xf32> to vector<128x32xf32>
    %261 = arith.addf %257, %260 : vector<128x32xf32>
    %262 = arith.negf %261 : vector<128x32xf32>
    %263 = math.exp %262 : vector<128x32xf32>
    %cst_98 = arith.constant 1.000000e+00 : f32
    %264 = vector.broadcast %cst_98 : f32 to vector<128x32xf32>
    %265 = arith.addf %264, %263 : vector<128x32xf32>
    %266 = arith.divf %264, %265 : vector<128x32xf32>
    %267 = arith.mulf %261, %266 : vector<128x32xf32>
    %268 = vector.shape_cast %267 : vector<128x32xf32> to vector<2x64x32xf32>
    %c0_99 = arith.constant 0 : index
    %c0_100 = arith.constant 0 : index
    %c0_101 = arith.constant 0 : index
    %269 = vector.load %arg19[%c0_99, %c0_100, %c0_101] : memref<1x32x32xbf16, #tpu.memory_space<vmem>>, vector<1x32x32xbf16>
    %270 = vector.shape_cast %269 : vector<1x32x32xbf16> to vector<32x32xbf16>
    %c0_102 = arith.constant 0 : index
    %c0_103 = arith.constant 0 : index
    %c0_104 = arith.constant 0 : index
    %271 = vector.load %arg20[%c0_102, %c0_103, %c0_104] : memref<1x1x32xf32, #tpu.memory_space<vmem>>, vector<1x1x32xf32>
    %272 = vector.shape_cast %271 : vector<1x1x32xf32> to vector<1x32xf32>
    %273 = vector.shape_cast %268 : vector<2x64x32xf32> to vector<128x32xf32>
    %274 = arith.truncf %273 : vector<128x32xf32> to vector<128x32xbf16>
    %cst_105 = arith.constant dense<0.000000e+00> : vector<128x32xf32>
    %275 = tpu.matmul %274, %270, %cst_105 {dimension_numbers = #tpu.dot_dimension_numbers<[1], [0], [0], [1], [0, 0, 1, 1], [], []>} : vector<128x32xbf16>, vector<32x32xbf16>, vector<128x32xf32> -> vector<128x32xf32>
    %276 = vector.shape_cast %275 : vector<128x32xf32> to vector<2x64x32xf32>
    %277 = vector.shape_cast %272 : vector<1x32xf32> to vector<1x1x32xf32>
    %278 = vector.broadcast %277 : vector<1x1x32xf32> to vector<2x64x32xf32>
    %279 = arith.addf %276, %278 : vector<2x64x32xf32>
    %280 = arith.addf %136, %279 : vector<2x64x32xf32>
    %c0_106 = arith.constant 0 : index
    %c0_107 = arith.constant 0 : index
    %c0_108 = arith.constant 0 : index
    %281 = vector.load %arg21[%c0_106, %c0_107, %c0_108] : memref<1x1x32xf32, #tpu.memory_space<vmem>>, vector<1x1x32xf32>
    %282 = vector.shape_cast %281 : vector<1x1x32xf32> to vector<1x32xf32>
    %c0_109 = arith.constant 0 : index
    %c0_110 = arith.constant 0 : index
    %c0_111 = arith.constant 0 : index
    %283 = vector.load %arg22[%c0_109, %c0_110, %c0_111] : memref<1x1x32xf32, #tpu.memory_space<vmem>>, vector<1x1x32xf32>
    %284 = vector.shape_cast %283 : vector<1x1x32xf32> to vector<1x32xf32>
    %cst_112 = arith.constant dense<0.000000e+00> : vector<2x64xf32>
    %285 = vector.multi_reduction <add>, %280, %cst_112 [2] : vector<2x64x32xf32> to vector<2x64xf32>
    %286 = vector.shape_cast %285 : vector<2x64xf32> to vector<2x64x1xf32>
    %cst_113 = arith.constant 3.200000e+01 : f32
    %287 = vector.broadcast %cst_113 : f32 to vector<2x64x1xf32>
    %288 = arith.divf %286, %287 : vector<2x64x1xf32>
    %289 = vector.broadcast %288 : vector<2x64x1xf32> to vector<2x64x32xf32>
    %290 = arith.subf %280, %289 : vector<2x64x32xf32>
    %291 = arith.mulf %290, %290 : vector<2x64x32xf32>
    %cst_114 = arith.constant dense<0.000000e+00> : vector<2x64xf32>
    %292 = vector.multi_reduction <add>, %291, %cst_114 [2] : vector<2x64x32xf32> to vector<2x64xf32>
    %293 = vector.shape_cast %292 : vector<2x64xf32> to vector<2x64x1xf32>
    %cst_115 = arith.constant 3.200000e+01 : f32
    %294 = vector.broadcast %cst_115 : f32 to vector<2x64x1xf32>
    %295 = arith.divf %293, %294 : vector<2x64x1xf32>
    %296 = vector.broadcast %288 : vector<2x64x1xf32> to vector<2x64x32xf32>
    %297 = arith.subf %280, %296 : vector<2x64x32xf32>
    %cst_116 = arith.constant 9.99999974E-6 : f32
    %298 = vector.broadcast %cst_116 : f32 to vector<2x64x1xf32>
    %299 = arith.addf %295, %298 : vector<2x64x1xf32>
    %300 = math.rsqrt %299 : vector<2x64x1xf32>
    %301 = vector.broadcast %300 : vector<2x64x1xf32> to vector<2x64x32xf32>
    %302 = arith.mulf %297, %301 : vector<2x64x32xf32>
    %303 = vector.shape_cast %282 : vector<1x32xf32> to vector<1x1x32xf32>
    %304 = vector.broadcast %303 : vector<1x1x32xf32> to vector<2x64x32xf32>
    %305 = arith.mulf %302, %304 : vector<2x64x32xf32>
    %306 = vector.shape_cast %284 : vector<1x32xf32> to vector<1x1x32xf32>
    %307 = vector.broadcast %306 : vector<1x1x32xf32> to vector<2x64x32xf32>
    %308 = arith.addf %305, %307 : vector<2x64x32xf32>
    %c0_117 = arith.constant 0 : index
    %c0_118 = arith.constant 0 : index
    %c0_119 = arith.constant 0 : index
    %309 = vector.load %arg23[%c0_117, %c0_118, %c0_119] : memref<1x32x128xbf16, #tpu.memory_space<vmem>>, vector<1x32x128xbf16>
    %310 = vector.shape_cast %309 : vector<1x32x128xbf16> to vector<32x128xbf16>
    %c0_120 = arith.constant 0 : index
    %c0_121 = arith.constant 0 : index
    %c0_122 = arith.constant 0 : index
    %311 = vector.load %arg24[%c0_120, %c0_121, %c0_122] : memref<1x1x128xf32, #tpu.memory_space<vmem>>, vector<1x1x128xf32>
    %312 = vector.shape_cast %311 : vector<1x1x128xf32> to vector<1x128xf32>
    %313 = vector.shape_cast %308 : vector<2x64x32xf32> to vector<128x32xf32>
    %314 = arith.truncf %313 : vector<128x32xf32> to vector<128x32xbf16>
    %cst_123 = arith.constant dense<0.000000e+00> : vector<128x128xf32>
    %315 = tpu.matmul %314, %310, %cst_123 {dimension_numbers = #tpu.dot_dimension_numbers<[1], [0], [0], [1], [0, 0, 1, 1], [], []>} : vector<128x32xbf16>, vector<32x128xbf16>, vector<128x128xf32> -> vector<128x128xf32>
    %316 = vector.shape_cast %315 : vector<128x128xf32> to vector<2x64x128xf32>
    %317 = vector.shape_cast %312 : vector<1x128xf32> to vector<1x1x128xf32>
    %318 = vector.broadcast %317 : vector<1x1x128xf32> to vector<2x64x128xf32>
    %319 = arith.addf %316, %318 : vector<2x64x128xf32>
    %320 = arith.negf %319 : vector<2x64x128xf32>
    %321 = math.exp %320 : vector<2x64x128xf32>
    %cst_124 = arith.constant 1.000000e+00 : f32
    %322 = vector.broadcast %cst_124 : f32 to vector<2x64x128xf32>
    %323 = arith.addf %322, %321 : vector<2x64x128xf32>
    %324 = arith.divf %322, %323 : vector<2x64x128xf32>
    %325 = arith.mulf %319, %324 : vector<2x64x128xf32>
    %c0_125 = arith.constant 0 : index
    %c0_126 = arith.constant 0 : index
    %c0_127 = arith.constant 0 : index
    %326 = vector.load %arg25[%c0_125, %c0_126, %c0_127] : memref<1x128x32xbf16, #tpu.memory_space<vmem>>, vector<1x128x32xbf16>
    %327 = vector.shape_cast %326 : vector<1x128x32xbf16> to vector<128x32xbf16>
    %c0_128 = arith.constant 0 : index
    %c0_129 = arith.constant 0 : index
    %c0_130 = arith.constant 0 : index
    %328 = vector.load %arg26[%c0_128, %c0_129, %c0_130] : memref<1x1x32xf32, #tpu.memory_space<vmem>>, vector<1x1x32xf32>
    %329 = vector.shape_cast %328 : vector<1x1x32xf32> to vector<1x32xf32>
    %330 = vector.shape_cast %325 : vector<2x64x128xf32> to vector<128x128xf32>
    %331 = arith.truncf %330 : vector<128x128xf32> to vector<128x128xbf16>
    %cst_131 = arith.constant dense<0.000000e+00> : vector<128x32xf32>
    %332 = tpu.matmul %331, %327, %cst_131 {dimension_numbers = #tpu.dot_dimension_numbers<[1], [0], [0], [1], [0, 0, 1, 1], [], []>} : vector<128x128xbf16>, vector<128x32xbf16>, vector<128x32xf32> -> vector<128x32xf32>
    %333 = vector.shape_cast %332 : vector<128x32xf32> to vector<2x64x32xf32>
    %334 = vector.shape_cast %329 : vector<1x32xf32> to vector<1x1x32xf32>
    %335 = vector.broadcast %334 : vector<1x1x32xf32> to vector<2x64x32xf32>
    %336 = arith.addf %333, %335 : vector<2x64x32xf32>
    %337 = arith.addf %280, %336 : vector<2x64x32xf32>
    %c0_132 = arith.constant 0 : index
    %c0_133 = arith.constant 0 : index
    %c0_134 = arith.constant 0 : index
    %338 = vector.load %arg30[%c0_132, %c0_133, %c0_134] : memref<2x64x32xf32, #tpu.memory_space<vmem>>, vector<2x64x32xf32>
    tpu.vector_store %arg30[%c0_132, %c0_133, %c0_134], %337 {strides = array<i32>} : memref<2x64x32xf32, #tpu.memory_space<vmem>>, vector<2x64x32xf32>,
    %c1_i32 = arith.constant 1 : i32
    %339 = arith.cmpi eq, %arg0, %c1_i32 : i32
    %340 = arith.extui %339 : i1 to i32
    %c0_i32_135 = arith.constant 0 : i32
    %341 = arith.cmpi ne, %340, %c0_i32_135 : i32
    scf.if %341 {
      %c0_136 = arith.constant 0 : index
      %c0_137 = arith.constant 0 : index
      %342 = vector.load %arg27[%c0_136, %c0_137] : memref<16x32xbf16, #tpu.memory_space<vmem>>, vector<16x32xbf16>
      %c0_138 = arith.constant 0 : index
      %c0_139 = arith.constant 0 : index
      %343 = vector.load %arg28[%c0_138, %c0_139] : memref<16x1xf32, #tpu.memory_space<vmem>>, vector<16x1xf32>
      %344 = vector.extract_strided_slice %337 {offsets = [0, 0, 0], sizes = [1, 64, 32], strides = [1, 1, 1]} : vector<2x64x32xf32> to vector<1x64x32xf32>
      %345 = vector.shape_cast %344 : vector<1x64x32xf32> to vector<64x32xf32>
      %346 = tpu.transpose %345, [1, 0] : vector<64x32xf32> -> vector<32x64xf32>
      %347 = arith.truncf %346 : vector<32x64xf32> to vector<32x64xbf16>
      %cst_140 = arith.constant dense<0.000000e+00> : vector<16x64xf32>
      %348 = tpu.matmul %342, %347, %cst_140 {dimension_numbers = #tpu.dot_dimension_numbers<[1], [0], [0], [1], [0, 0, 1, 1], [], []>} : vector<16x32xbf16>, vector<32x64xbf16>, vector<16x64xf32> -> vector<16x64xf32>
      %349 = vector.broadcast %343 : vector<16x1xf32> to vector<16x64xf32>
      %350 = arith.addf %348, %349 : vector<16x64xf32>
      %c0_141 = arith.constant 0 : index
      %c0_142 = arith.constant 0 : index
      %c0_143 = arith.constant 0 : index
      %351 = vector.load %arg29[%c0_141, %c0_142, %c0_143] : memref<2x16x64xf32, #tpu.memory_space<vmem>>, vector<1x16x64xf32>
      %352 = vector.shape_cast %351 : vector<1x16x64xf32> to vector<16x64xf32>
      %353 = vector.shape_cast %350 : vector<16x64xf32> to vector<1x16x64xf32>
      tpu.vector_store %arg29[%c0_141, %c0_142, %c0_143], %353 {strides = array<i32>} : memref<2x16x64xf32, #tpu.memory_space<vmem>>, vector<1x16x64xf32>,
      %354 = vector.extract_strided_slice %337 {offsets = [1, 0, 0], sizes = [1, 64, 32], strides = [1, 1, 1]} : vector<2x64x32xf32> to vector<1x64x32xf32>
      %355 = vector.shape_cast %354 : vector<1x64x32xf32> to vector<64x32xf32>
      %356 = tpu.transpose %355, [1, 0] : vector<64x32xf32> -> vector<32x64xf32>
      %357 = arith.truncf %356 : vector<32x64xf32> to vector<32x64xbf16>
      %cst_144 = arith.constant dense<0.000000e+00> : vector<16x64xf32>
      %358 = tpu.matmul %342, %357, %cst_144 {dimension_numbers = #tpu.dot_dimension_numbers<[1], [0], [0], [1], [0, 0, 1, 1], [], []>} : vector<16x32xbf16>, vector<32x64xbf16>, vector<16x64xf32> -> vector<16x64xf32>
      %359 = vector.broadcast %343 : vector<16x1xf32> to vector<16x64xf32>
      %360 = arith.addf %358, %359 : vector<16x64xf32>
      %c1 = arith.constant 1 : index
      %c0_145 = arith.constant 0 : index
      %c0_146 = arith.constant 0 : index
      %361 = vector.load %arg29[%c1, %c0_145, %c0_146] : memref<2x16x64xf32, #tpu.memory_space<vmem>>, vector<1x16x64xf32>
      %362 = vector.shape_cast %361 : vector<1x16x64xf32> to vector<16x64xf32>
      %363 = vector.shape_cast %360 : vector<16x64xf32> to vector<1x16x64xf32>
      tpu.vector_store %arg29[%c1, %c0_145, %c0_146], %363 {strides = array<i32>} : memref<2x16x64xf32, #tpu.memory_space<vmem>>, vector<1x16x64xf32>,
    } else {
    }
    return
  }
  func.func @transform_0(%arg0: i32) -> (i32, i32, i32) {
    %c0_i32 = arith.constant 0 : i32
    %c0_i32_0 = arith.constant 0 : i32
    %c0_i32_1 = arith.constant 0 : i32
    %c0_i32_2 = arith.constant 0 : i32
    return %c0_i32, %c0_i32_0, %c0_i32_1 : i32, i32, i32
  }
  func.func @transform_1(%arg0: i32) -> (i32, i32) {
    %c0_i32 = arith.constant 0 : i32
    %c0_i32_0 = arith.constant 0 : i32
    %c0_i32_1 = arith.constant 0 : i32
    return %c0_i32, %c0_i32_0 : i32, i32
  }
  func.func @transform_2(%arg0: i32) -> (i32, i32) {
    %c0_i32 = arith.constant 0 : i32
    %c0_i32_0 = arith.constant 0 : i32
    %c0_i32_1 = arith.constant 0 : i32
    return %c0_i32, %c0_i32_0 : i32, i32
  }
  func.func @transform_3(%arg0: i32) -> (i32, i32, i32) {
    %c0_i32 = arith.constant 0 : i32
    %c0_i32_0 = arith.constant 0 : i32
    %c0_i32_1 = arith.constant 0 : i32
    %c0_i32_2 = arith.constant 0 : i32
    return %c0_i32, %c0_i32_0, %c0_i32_1 : i32, i32, i32
  }
  func.func @transform_4(%arg0: i32) -> (i32, i32, i32) {
    %c0_i32 = arith.constant 0 : i32
    %c0_i32_0 = arith.constant 0 : i32
    %c0_i32_1 = arith.constant 0 : i32
    return %arg0, %c0_i32, %c0_i32_0 : i32, i32, i32
  }
  func.func @transform_5(%arg0: i32) -> (i32, i32, i32) {
    %c0_i32 = arith.constant 0 : i32
    %c0_i32_0 = arith.constant 0 : i32
    %c0_i32_1 = arith.constant 0 : i32
    return %arg0, %c0_i32, %c0_i32_0 : i32, i32, i32
  }
  func.func @transform_6(%arg0: i32) -> (i32, i32, i32) {
    %c0_i32 = arith.constant 0 : i32
    %c0_i32_0 = arith.constant 0 : i32
    %c0_i32_1 = arith.constant 0 : i32
    return %arg0, %c0_i32, %c0_i32_0 : i32, i32, i32
  }
  func.func @transform_7(%arg0: i32) -> (i32, i32, i32) {
    %c0_i32 = arith.constant 0 : i32
    %c0_i32_0 = arith.constant 0 : i32
    %c0_i32_1 = arith.constant 0 : i32
    return %arg0, %c0_i32, %c0_i32_0 : i32, i32, i32
  }
  func.func @transform_8(%arg0: i32) -> (i32, i32, i32) {
    %c0_i32 = arith.constant 0 : i32
    %c0_i32_0 = arith.constant 0 : i32
    %c0_i32_1 = arith.constant 0 : i32
    return %arg0, %c0_i32, %c0_i32_0 : i32, i32, i32
  }
  func.func @transform_9(%arg0: i32) -> (i32, i32, i32) {
    %c0_i32 = arith.constant 0 : i32
    %c0_i32_0 = arith.constant 0 : i32
    %c0_i32_1 = arith.constant 0 : i32
    return %arg0, %c0_i32, %c0_i32_0 : i32, i32, i32
  }
  func.func @transform_10(%arg0: i32) -> (i32, i32, i32) {
    %c0_i32 = arith.constant 0 : i32
    %c0_i32_0 = arith.constant 0 : i32
    %c0_i32_1 = arith.constant 0 : i32
    return %arg0, %c0_i32, %c0_i32_0 : i32, i32, i32
  }
  func.func @transform_11(%arg0: i32) -> (i32, i32, i32) {
    %c0_i32 = arith.constant 0 : i32
    %c0_i32_0 = arith.constant 0 : i32
    %c0_i32_1 = arith.constant 0 : i32
    return %arg0, %c0_i32, %c0_i32_0 : i32, i32, i32
  }
  func.func @transform_12(%arg0: i32) -> (i32, i32, i32) {
    %c0_i32 = arith.constant 0 : i32
    %c0_i32_0 = arith.constant 0 : i32
    %c0_i32_1 = arith.constant 0 : i32
    return %arg0, %c0_i32, %c0_i32_0 : i32, i32, i32
  }
  func.func @transform_13(%arg0: i32) -> (i32, i32, i32) {
    %c0_i32 = arith.constant 0 : i32
    %c0_i32_0 = arith.constant 0 : i32
    %c0_i32_1 = arith.constant 0 : i32
    return %arg0, %c0_i32, %c0_i32_0 : i32, i32, i32
  }
  func.func @transform_14(%arg0: i32) -> (i32, i32, i32) {
    %c0_i32 = arith.constant 0 : i32
    %c0_i32_0 = arith.constant 0 : i32
    %c0_i32_1 = arith.constant 0 : i32
    return %arg0, %c0_i32, %c0_i32_0 : i32, i32, i32
  }
  func.func @transform_15(%arg0: i32) -> (i32, i32, i32) {
    %c0_i32 = arith.constant 0 : i32
    %c0_i32_0 = arith.constant 0 : i32
    %c0_i32_1 = arith.constant 0 : i32
    return %arg0, %c0_i32, %c0_i32_0 : i32, i32, i32
  }
  func.func @transform_16(%arg0: i32) -> (i32, i32, i32) {
    %c0_i32 = arith.constant 0 : i32
    %c0_i32_0 = arith.constant 0 : i32
    %c0_i32_1 = arith.constant 0 : i32
    return %arg0, %c0_i32, %c0_i32_0 : i32, i32, i32
  }
  func.func @transform_17(%arg0: i32) -> (i32, i32, i32) {
    %c0_i32 = arith.constant 0 : i32
    %c0_i32_0 = arith.constant 0 : i32
    %c0_i32_1 = arith.constant 0 : i32
    return %arg0, %c0_i32, %c0_i32_0 : i32, i32, i32
  }
  func.func @transform_18(%arg0: i32) -> (i32, i32, i32) {
    %c0_i32 = arith.constant 0 : i32
    %c0_i32_0 = arith.constant 0 : i32
    %c0_i32_1 = arith.constant 0 : i32
    return %arg0, %c0_i32, %c0_i32_0 : i32, i32, i32
  }
  func.func @transform_19(%arg0: i32) -> (i32, i32, i32) {
    %c0_i32 = arith.constant 0 : i32
    %c0_i32_0 = arith.constant 0 : i32
    %c0_i32_1 = arith.constant 0 : i32
    return %arg0, %c0_i32, %c0_i32_0 : i32, i32, i32
  }
  func.func @transform_20(%arg0: i32) -> (i32, i32, i32) {
    %c0_i32 = arith.constant 0 : i32
    %c0_i32_0 = arith.constant 0 : i32
    %c0_i32_1 = arith.constant 0 : i32
    return %arg0, %c0_i32, %c0_i32_0 : i32, i32, i32
  }
  func.func @transform_21(%arg0: i32) -> (i32, i32, i32) {
    %c0_i32 = arith.constant 0 : i32
    %c0_i32_0 = arith.constant 0 : i32
    %c0_i32_1 = arith.constant 0 : i32
    return %arg0, %c0_i32, %c0_i32_0 : i32, i32, i32
  }
  func.func @transform_22(%arg0: i32) -> (i32, i32, i32) {
    %c0_i32 = arith.constant 0 : i32
    %c0_i32_0 = arith.constant 0 : i32
    %c0_i32_1 = arith.constant 0 : i32
    return %arg0, %c0_i32, %c0_i32_0 : i32, i32, i32
  }
  func.func @transform_23(%arg0: i32) -> (i32, i32, i32) {
    %c0_i32 = arith.constant 0 : i32
    %c0_i32_0 = arith.constant 0 : i32
    %c0_i32_1 = arith.constant 0 : i32
    return %arg0, %c0_i32, %c0_i32_0 : i32, i32, i32
  }
  func.func @transform_24(%arg0: i32) -> (i32, i32, i32) {
    %c0_i32 = arith.constant 0 : i32
    %c0_i32_0 = arith.constant 0 : i32
    %c0_i32_1 = arith.constant 0 : i32
    return %arg0, %c0_i32, %c0_i32_0 : i32, i32, i32
  }
  func.func @transform_25(%arg0: i32) -> (i32, i32, i32) {
    %c0_i32 = arith.constant 0 : i32
    %c0_i32_0 = arith.constant 0 : i32
    %c0_i32_1 = arith.constant 0 : i32
    return %arg0, %c0_i32, %c0_i32_0 : i32, i32, i32
  }
  func.func @transform_26(%arg0: i32) -> (i32, i32) {
    %c0_i32 = arith.constant 0 : i32
    %c0_i32_0 = arith.constant 0 : i32
    %c0_i32_1 = arith.constant 0 : i32
    return %c0_i32, %c0_i32_0 : i32, i32
  }
  func.func @transform_27(%arg0: i32) -> (i32, i32) {
    %c0_i32 = arith.constant 0 : i32
    %c0_i32_0 = arith.constant 0 : i32
    %c0_i32_1 = arith.constant 0 : i32
    return %c0_i32, %c0_i32_0 : i32, i32
  }
  func.func @transform_28(%arg0: i32) -> (i32, i32, i32) {
    %c0_i32 = arith.constant 0 : i32
    %c0_i32_0 = arith.constant 0 : i32
    %c0_i32_1 = arith.constant 0 : i32
    %c0_i32_2 = arith.constant 0 : i32
    return %c0_i32, %c0_i32_0, %c0_i32_1 : i32, i32, i32
  }
}

</mosaic_0001>

<bundles_post_ra>
// kernel: denoising_conformer_dae.1
= control target key start
LH: loop header
LB: loop body
LE: loop exit
PB: predicated region body
PF: predicated region fallthrough
CT: control target
= control target key end

     0   :  { %s12681_s0 = inlined_call_operand.vmem [shape: f32[2,64,16], index: 0, kind: input, shape index: {}]   ;;  %s12682_s1 = inlined_call_operand.vmem [shape: bf16[16,32], index: 1, kind: input, shape index: {}]   ;;  %s12683_s2 = inlined_call_operand.vmem [shape: f32[1,32], index: 2, kind: input, shape index: {}]   ;;  %s12684_s3 = inlined_call_operand.vmem [shape: f32[1,64,32], index: 3, kind: input, shape index: {}]   ;;  %s12685_s4 = inlined_call_operand.vmem [shape: f32[2,1,32], index: 4, kind: input, shape index: {}]   ;;  %s12686_s5 = inlined_call_operand.vmem [shape: f32[2,1,32], index: 5, kind: input, shape index: {}]   ;;  %s12687_s6 = inlined_call_operand.vmem [shape: bf16[2,32,96], index: 6, kind: input, shape index: {}]   ;;  %s12688_s7 = inlined_call_operand.vmem [shape: f32[2,1,96], index: 7, kind: input, shape index: {}]   ;;  %s12689_s8 = inlined_call_operand.vmem [shape: bf16[2,32,32], index: 8, kind: input, shape index: {}]   ;;  %s12690_s9 = inlined_call_operand.vmem [shape: f32[2,1,32], index: 9, kind: input, shape index: {}]   ;;  %s12691_s10 = inlined_call_operand.vmem [shape: f32[2,1,32], index: 10, kind: input, shape index: {}]   ;;  %s12692_s11 = inlined_call_operand.vmem [shape: f32[2,1,32], index: 11, kind: input, shape index: {}]   ;;  %s12693_s12 = inlined_call_operand.vmem [shape: bf16[2,32,64], index: 12, kind: input, shape index: {}]   ;;  %s12694_s13 = inlined_call_operand.vmem [shape: f32[2,1,64], index: 13, kind: input, shape index: {}]   ;;  %s12695_s14 = inlined_call_operand.vmem [shape: f32[2,7,32], index: 14, kind: input, shape index: {}]   ;;  %s12696_s15 = inlined_call_operand.vmem [shape: f32[2,1,32], index: 15, kind: input, shape index: {}]   ;;  %s12697_s16 = inlined_call_operand.vmem [shape: f32[2,1,32], index: 16, kind: input, shape index: {}]   ;;  %s12698_s17 = inlined_call_operand.vmem [shape: f32[2,1,32], index: 17, kind: input, shape index: {}]   ;;  %s12699_s18 = inlined_call_operand.vmem [shape: bf16[2,32,32], index: 18, kind: input, shape index: {}]   ;;  %s12700_s19 = inlined_call_operand.vmem [shape: f32[2,1,32], index: 19, kind: input, shape index: {}]   ;;  %s12701_s20 = inlined_call_operand.vmem [shape: f32[2,1,32], index: 20, kind: input, shape index: {}]   ;;  %s12702_s21 = inlined_call_operand.vmem [shape: f32[2,1,32], index: 21, kind: input, shape index: {}]   ;;  %s12703_s22 = inlined_call_operand.vmem [shape: bf16[2,32,128], index: 22, kind: input, shape index: {}]   ;;  %s12704_s23 = inlined_call_operand.vmem [shape: f32[2,1,128], index: 23, kind: input, shape index: {}]   ;;  %s12705_s24 = inlined_call_operand.vmem [shape: bf16[2,128,32], index: 24, kind: input, shape index: {}]   ;;  %s12706_s25 = inlined_call_operand.vmem [shape: f32[2,1,32], index: 25, kind: input, shape index: {}]   ;;  %s12707_s26 = inlined_call_operand.vmem [shape: bf16[16,32], index: 26, kind: input, shape index: {}]   ;;  %s12708_s27 = inlined_call_operand.vmem [shape: f32[16,1], index: 27, kind: input, shape index: {}]   ;;  %s12709_s28 = inlined_call_operand.hbm [shape: f32[2,16,64], index: 28, kind: output, shape index: {}]  }
   0x1   :  { %12752 = sst [smem:[#allocation42_spill]] %s12681_s0 }
   0x2   :  { %12753 = sst [smem:[#allocation43_spill]] %s12682_s1 }
   0x3   :  { %12754 = sst [smem:[#allocation44_spill]] %s12683_s2 }
   0x4   :  { %12755 = sst [smem:[#allocation45_spill]] %s12684_s3 }
   0x5   :  { %12756 = sst [smem:[#allocation46_spill]] %s12685_s4 }
   0x6   :  { %12757 = sst [smem:[#allocation47_spill]] %s12686_s5 }
   0x7   :  { %12758 = sst [smem:[#allocation48_spill]] %s12687_s6 }
   0x8   :  { %12759 = sst [smem:[#allocation49_spill]] %s12688_s7 }
   0x9   :  { %12760 = sst [smem:[#allocation50_spill]] %s12689_s8 }
   0xa   :  { %12761 = sst [smem:[#allocation51_spill]] %s12690_s9 }
   0xb   :  { %12762 = sst [smem:[#allocation52_spill]] %s12691_s10 }
   0xc   :  { %12763 = sst [smem:[#allocation53_spill]] %s12692_s11 }
   0xd   :  { %12764 = sst [smem:[#allocation54_spill]] %s12693_s12 }
   0xe   :  { %12765 = sst [smem:[#allocation55_spill]] %s12695_s14 }
   0xf   :  { %12766 = sst [smem:[#allocation56_spill]] %s12699_s18 }
  0x10   :  { %12767 = sst [smem:[#allocation57_spill]] %s12701_s20 }
  0x11   :  { %12768 = sst [smem:[#allocation58_spill]] %s12705_s24 }
  0x12   :  { %12769 = sst [smem:[#allocation59_spill]] %s12706_s25 }
  0x13   :  { %12770 = sst [smem:[#allocation60_spill]] %s12707_s26 }
  0x14   :  { %12771 = sst [smem:[#allocation61_spill]] %s12708_s27 }
  0x15   :  { %12772 = sst [smem:[#allocation62_spill]] %s12709_s28 }
  0x16   :  { %33 = vsyncpa [#allocation5], 0  ;;  %s8845_s8 = smov 0  }
  0x17 LB: > { %12773 = sst [smem:[#allocation7_spill]] %s8678_s8  ;;  %s8851_s5 = sadd.s32 4294967295, %s8678_s8   ;;  %s8678_s8 = sphi %s8845_s8, %s39_s8  }
  0x18   : > { %12774 = sst [smem:[#allocation8_spill]] %s8851_s5  ;;  %p7574_p0 = scmp.ge.s32.totalorder %s8678_s8, 1 }
  0x19   : > { %p937_p1 = scmp.lt.s32.totalorder %s8678_s8, 3 }
  0x1b   : > { %p938_p2 = pnand %p7574_p0, %p937_p1 }
  0x1d   : > { %941 = sbr.rel (%p938_p2) target bundleno = 4380 (0x111c), region = 132 }
  0x22   : > { %p1080_p3 = scmp.lt.s32.totalorder %s8851_s5, 1  ;;  %s12778_s28 = sld [smem:[#allocation48_spill]] }
  0x23   : > { %s12780_s6 = sld [smem:[#allocation50_spill]] }
  0x24   : > { %s8857_s9 = scalar_select %p1080_p3, %s8851_s5, 1 }
  0x25   : > { %s12785_s27 = sld [smem:[#allocation54_spill]] }
  0x26   : > { %s7836_s7 = sshll.u32 %s8857_s9, 4  ;;  %s7581_s11 = sshll.u32 %s8857_s9, 3 }
  0x27   : > { %s12786_s14 = sld [smem:[#allocation55_spill]] }
  0x28   : > { %s8875_s26 = scalar_lea.vmem %s12778_s28, %s7836_s7  ;;  %s12787_s18 = sld [smem:[#allocation56_spill]] }
  0x29   : > { %12779 = sst [smem:[#allocation9_spill]] %s8875_s26  ;;  %s8880_s10 = scalar_lea.vmem %s12780_s6, %s7836_s7 }
  0x2a   : > { %12781 = sst [smem:[#allocation10_spill]] %s8880_s10 }
  0x2b   : > { %s8897_s5 = scalar_lea.vmem %s12785_s27, %s7836_s7  ;;  %s8941_s27 = scalar_lea.vmem %s12703_s22, %s7836_s7 }
  0x2c   : > { %s12789_s29 = sld [smem:[#allocation59_spill]] }
  0x2d   : > { %s8907_s24 = scalar_lea.vmem %s12786_s14, %s7581_s11  ;;  %s7841_s14 = sshll.u32 %s8857_s9, 6 }
  0x2e   : > { %s8924_s0 = scalar_lea.vmem %s12787_s18, %s7836_s7  ;;  %s12790_s1 = sld [smem:[#allocation58_spill]] }
  0x2f   : > { %s12791_s30 = sld [smem:[#allocation8_spill]] }
  0x32   : > { %s1158_s18 = scalar_lea.vmem %s12789_s29, %s8857_s9 }
  0x34   : > { %s8955_s20 = scalar_lea.vmem %s12790_s1, %s7841_s14 }
  0x35   : > { %p7588_p4 = scmp.ne.s32.totalorder %s12791_s30, 0 }
  0x36   : > { %s12792_s8 = sld [smem:[#allocation43_spill]] (!%p7588_p4) }
  0x37   : > { %1163 = sbr.rel (%p7588_p4) target bundleno = 228 (0xe4), region = 136  ;;  %s12793_s6 = sld [smem:[#allocation42_spill]] (!%p7588_p4) }
  0x38   : > { %s12794_s29 = sld [smem:[#allocation44_spill]] (!%p7588_p4) }
  0x39   : > { %s12795_s2 = sld [smem:[#allocation45_spill]] (!%p7588_p4) }
  0x3c   : > { %v7842_v0 = vld [vmem:[%s12792_s8] sm:$0xff]  ;;  %vm1164_vm0 = vcmask 261120   ;;  %v8680_v7 = vmov 0.0   ;;  %vm1217_vm1 = vcmask 130048  }
  0x3d   : > { %v1185_v1 = vld [vmem:[%s12793_s6] sm:$0xff]  ;;  %v1186_v2 = vld [vmem:[%s12793_s6 + $0x8] sm:$0xff]  ;;  %1165 = vst.msk [vmem:[#allocation3] sm:$0xff] %vm1164_vm0, %v8680_v7  ;;  %1249 = vmatpush.bf16.msra.mxu0 %v7842_v0  ;;  %7862 = vmatpush.bf16.msra.mxu1 %v7842_v0  ;;  %v1187_v14 = vld [vmem:[%s12793_s6 + $0x10] sm:$0xff] }
  0x3e   : > { %v1201_v3 = vpack.c.bf16 %v1186_v2, %v1185_v1  ;;  %v1189_v4 = vld [vmem:[%s12793_s6 + $0x20] sm:$0xff]  ;;  %v1190_v5 = vld [vmem:[%s12793_s6 + $0x28] sm:$0xff]  ;;  %1166 = vst.msk [vmem:[#allocation3 + $0x8] sm:$0xff] %vm1164_vm0, %v8680_v7  ;;  %7863 = vmatpush.bf16.msra.mxu2 %v7842_v0  ;;  %7864 = vmatpush.bf16.msra.mxu3 %v7842_v0  ;;  %v1188_v15 = vld [vmem:[%s12793_s6 + $0x18] sm:$0xff] }
  0x3f   : > { %v1193_v6 = vld [vmem:[%s12793_s6 + $0x40] sm:$0xff]  ;;  %v1203_v8 = vpack.c.bf16 %v1190_v5, %v1189_v4  ;;  %v1194_v9 = vld [vmem:[%s12793_s6 + $0x48] sm:$0xff]  ;;  %1167 = vst.msk [vmem:[#allocation3 + $0x10] sm:$0xff] %vm1164_vm0, %v8680_v7  ;;  %v1191_v16 = vld [vmem:[%s12793_s6 + $0x30] sm:$0xff]  ;;  %v1202_v22 = vpack.c.bf16 %v1188_v15, %v1187_v14 }
  0x40   : > { %v1197_v10 = vld [vmem:[%s12793_s6 + $0x60] sm:$0xff]  ;;  %v1198_v11 = vld [vmem:[%s12793_s6 + $0x68] sm:$0xff]  ;;  %v1205_v12 = vpack.c.bf16 %v1194_v9, %v1193_v6  ;;  %1168 = vst.msk [vmem:[#allocation3 + $0x18] sm:$0xff] %vm1164_vm0, %v8680_v7  ;;  %7593 = vmatmul.msk.bf16.vlgmr.msra.gmra.mxu0 %vm1217_vm1, %v1201_v3  ;;  %v1192_v17 = vld [vmem:[%s12793_s6 + $0x38] sm:$0xff] }
  0x41   : > { %v1207_v13 = vpack.c.bf16 %v1198_v11, %v1197_v10  ;;  %7595 = vmatmul.msk.bf16.vlgmr.msra.gmra.mxu1 %vm1217_vm1, %v1203_v8  ;;  %1169 = vst.msk [vmem:[#allocation3 + $0x20] sm:$0xff] %vm1164_vm0, %v8680_v7  ;;  %v1195_v18 = vld [vmem:[%s12793_s6 + $0x50] sm:$0xff]  ;;  %v1196_v19 = vld [vmem:[%s12793_s6 + $0x58] sm:$0xff]  ;;  %v1204_v23 = vpack.c.bf16 %v1192_v17, %v1191_v16  ;;  %v9040_v26 = vld [vmem:[%s12794_s29] ss:$0 sm:$0xff] }
  0x42   : > { %7597 = vmatmul.msk.bf16.vlgmr.msra.gmra.mxu2 %vm1217_vm1, %v1205_v12  ;;  %1170 = vst.msk [vmem:[#allocation3 + $0x28] sm:$0xff] %vm1164_vm0, %v8680_v7  ;;  %v1199_v20 = vld [vmem:[%s12793_s6 + $0x70] sm:$0xff]  ;;  %v1200_v21 = vld [vmem:[%s12793_s6 + $0x78] sm:$0xff]  ;;  %v1206_v24 = vpack.c.bf16 %v1196_v19, %v1195_v18  ;;  %v1311_v28 = vld [vmem:[%s12795_s2] sm:$0xff] }
  0x43   : > { %7599 = vmatmul.msk.bf16.vlgmr.msra.gmra.mxu3 %vm1217_vm1, %v1207_v13  ;;  %1171 = vst.msk [vmem:[#allocation3 + $0x30] sm:$0xff] %vm1164_vm0, %v8680_v7  ;;  %v1208_v25 = vpack.c.bf16 %v1200_v21, %v1199_v20  ;;  %v1315_v30 = vld [vmem:[%s12795_s2 + $0x20] sm:$0xff]  ;;  %v1312_v40 = vld [vmem:[%s12795_s2 + $0x8] sm:$0xff]  ;;  %v1313_v54 = vld [vmem:[%s12795_s2 + $0x10] sm:$0xff] }
  0x44   : > { %1172 = vst.msk [vmem:[#allocation3 + $0x38] sm:$0xff] %vm1164_vm0, %v8680_v7  ;;  %v1316_v42 = vld [vmem:[%s12795_s2 + $0x28] sm:$0xff]  ;;  %v1317_v56 = vld [vmem:[%s12795_s2 + $0x30] sm:$0xff]  ;;  %v1314_v4 = vld [vmem:[%s12795_s2 + $0x18] sm:$0xff] }
  0x45   : > { %1173 = vst.msk [vmem:[#allocation3 + $0x40] sm:$0xff] %vm1164_vm0, %v8680_v7  ;;  %v1318_v6 = vld [vmem:[%s12795_s2 + $0x38] sm:$0xff] }
  0x46   : > { %1174 = vst.msk [vmem:[#allocation3 + $0x48] sm:$0xff] %vm1164_vm0, %v8680_v7 }
  0x47   : > { %1175 = vst.msk [vmem:[#allocation3 + $0x50] sm:$0xff] %vm1164_vm0, %v8680_v7 }
  0x48   : > { %1176 = vst.msk [vmem:[#allocation3 + $0x58] sm:$0xff] %vm1164_vm0, %v8680_v7 }
  0x49   : > { %1177 = vst.msk [vmem:[#allocation3 + $0x60] sm:$0xff] %vm1164_vm0, %v8680_v7 }
  0x4a   : > { %1178 = vst.msk [vmem:[#allocation3 + $0x68] sm:$0xff] %vm1164_vm0, %v8680_v7 }
  0x4b   : > { %1179 = vst.msk [vmem:[#allocation3 + $0x70] sm:$0xff] %vm1164_vm0, %v8680_v7 }
  0x4c   : > { %1180 = vst.msk [vmem:[#allocation3 + $0x78] sm:$0xff] %vm1164_vm0, %v8680_v7 }
  0x4d   : > { %1181 = vst.msk [vmem:[#allocation3 + $0x80] sm:$0xff] %vm1164_vm0, %v8680_v7 }
  0x4e   : > { %1182 = vst.msk [vmem:[#allocation3 + $0x88] sm:$0xff] %vm1164_vm0, %v8680_v7 }
  0x4f   : > { %1183 = vst.msk [vmem:[#allocation3 + $0x90] sm:$0xff] %vm1164_vm0, %v8680_v7 }
  0x50   : > { %1184 = vst.msk [vmem:[#allocation3 + $0x98] sm:$0xff] %vm1164_vm0, %v8680_v7  ;;  %7594 = vmatmul.msk.bf16.gmra.mxu0 %vm1217_vm1, %v1202_v22 }
  0x51   : > { %7596 = vmatmul.msk.bf16.gmra.mxu1 %vm1217_vm1, %v1204_v23 }
  0x52   : > { %7598 = vmatmul.msk.bf16.gmra.mxu2 %vm1217_vm1, %v1206_v24 }
  0x53   : > { %7600 = vmatmul.msk.bf16.gmra.mxu3 %vm1217_vm1, %v1208_v25 }
  0xbd   : > { %v1251_v27 = vpop.f32.mrf.mxu0 }
  0xbe   : > { %v1261_v29 = vpop.f32.mrf.mxu1  ;;  %v1295_v31 = vadd.f32 %v9040_v26, %v1251_v27 }
  0xbf   : > { %v1299_v32 = vadd.f32 %v9040_v26, %v1261_v29 }
  0xc0   : > { %v1319_v33 = vadd.f32 %v1311_v28, %v1295_v31 }
  0xc1   : > { %v1323_v34 = vadd.f32 %v1315_v30, %v1299_v32 }
  0xc2   : > { %1335 = vst.msk [vmem:[#allocation2] sm:$0xff] %vm1164_vm0, %v1319_v33 }
  0xc3   : > { %1339 = vst.msk [vmem:[#allocation2 + $0x20] sm:$0xff] %vm1164_vm0, %v1323_v34 }
  0xc5   : > { %v1271_v35 = vpop.f32.mrf.mxu2  ;;  %v1253_v39 = vpop.f32.mrf.mxu0 }
  0xc6   : > { %v1281_v36 = vpop.f32.mrf.mxu3  ;;  %v1303_v37 = vadd.f32 %v9040_v26, %v1271_v35  ;;  %v1263_v41 = vpop.f32.mrf.mxu1  ;;  %v1296_v43 = vadd.f32 %v9040_v26, %v1253_v39 }
  0xc7   : > { %v1307_v38 = vadd.f32 %v9040_v26, %v1281_v36  ;;  %v1300_v44 = vadd.f32 %v9040_v26, %v1263_v41 }
  0xc8   : > { %v1327_v45 = vadd.f32 %v1311_v28, %v1303_v37  ;;  %v1320_v47 = vadd.f32 %v1312_v40, %v1296_v43 }
  0xc9   : > { %v1331_v46 = vadd.f32 %v1315_v30, %v1307_v38  ;;  %v1324_v48 = vadd.f32 %v1316_v42, %v1300_v44 }
  0xca   : > { %1343 = vst.msk [vmem:[#allocation2 + $0x40] sm:$0xff] %vm1164_vm0, %v1327_v45 }
  0xcb   : > { %1347 = vst.msk [vmem:[#allocation2 + $0x60] sm:$0xff] %vm1164_vm0, %v1331_v46 }
  0xcc   : > { %1336 = vst.msk [vmem:[#allocation2 + $0x8] sm:$0xff] %vm1164_vm0, %v1320_v47 }
  0xcd   : > { %1340 = vst.msk [vmem:[#allocation2 + $0x28] sm:$0xff] %vm1164_vm0, %v1324_v48  ;;  %v1273_v49 = vpop.f32.mrf.mxu2  ;;  %v1256_v53 = vpop.f32.mrf.mxu0 }
  0xce   : > { %v1283_v50 = vpop.f32.mrf.mxu3  ;;  %v1304_v51 = vadd.f32 %v9040_v26, %v1273_v49  ;;  %v1266_v55 = vpop.f32.mrf.mxu1  ;;  %v1297_v57 = vadd.f32 %v9040_v26, %v1256_v53 }
  0xcf   : > { %v1308_v52 = vadd.f32 %v9040_v26, %v1283_v50  ;;  %v1301_v58 = vadd.f32 %v9040_v26, %v1266_v55 }
  0xd0   : > { %v1328_v59 = vadd.f32 %v1312_v40, %v1304_v51  ;;  %v1321_v61 = vadd.f32 %v1313_v54, %v1297_v57 }
  0xd1   : > { %v1332_v60 = vadd.f32 %v1316_v42, %v1308_v52  ;;  %v1325_v62 = vadd.f32 %v1317_v56, %v1301_v58 }
  0xd2   : > { %1344 = vst.msk [vmem:[#allocation2 + $0x48] sm:$0xff] %vm1164_vm0, %v1328_v59 }
  0xd3   : > { %1348 = vst.msk [vmem:[#allocation2 + $0x68] sm:$0xff] %vm1164_vm0, %v1332_v60 }
  0xd4   : > { %1337 = vst.msk [vmem:[#allocation2 + $0x10] sm:$0xff] %vm1164_vm0, %v1321_v61 }
  0xd5   : > { %1341 = vst.msk [vmem:[#allocation2 + $0x30] sm:$0xff] %vm1164_vm0, %v1325_v62  ;;  %v1276_v63 = vpop.f32.mrf.mxu2  ;;  %v1258_v3 = vpop.f32.mrf.mxu0 }
  0xd6   : > { %v1286_v0 = vpop.f32.mrf.mxu3  ;;  %v1305_v1 = vadd.f32 %v9040_v26, %v1276_v63  ;;  %v1268_v5 = vpop.f32.mrf.mxu1  ;;  %v1298_v7 = vadd.f32 %v9040_v26, %v1258_v3 }
  0xd7   : > { %v1309_v2 = vadd.f32 %v9040_v26, %v1286_v0  ;;  %v1302_v8 = vadd.f32 %v9040_v26, %v1268_v5 }
  0xd8   : > { %v1329_v9 = vadd.f32 %v1313_v54, %v1305_v1  ;;  %v1322_v11 = vadd.f32 %v1314_v4, %v1298_v7 }
  0xd9   : > { %v1333_v10 = vadd.f32 %v1317_v56, %v1309_v2  ;;  %v1326_v12 = vadd.f32 %v1318_v6, %v1302_v8 }
  0xda   : > { %1345 = vst.msk [vmem:[#allocation2 + $0x50] sm:$0xff] %vm1164_vm0, %v1329_v9 }
  0xdb   : > { %1349 = vst.msk [vmem:[#allocation2 + $0x70] sm:$0xff] %vm1164_vm0, %v1333_v10 }
  0xdc   : > { %1338 = vst.msk [vmem:[#allocation2 + $0x18] sm:$0xff] %vm1164_vm0, %v1322_v11 }
  0xdd   : > { %1342 = vst.msk [vmem:[#allocation2 + $0x38] sm:$0xff] %vm1164_vm0, %v1326_v12  ;;  %v1278_v13 = vpop.f32.mrf.mxu2 }
  0xde   : > { %v1288_v14 = vpop.f32.mrf.mxu3  ;;  %v1306_v15 = vadd.f32 %v9040_v26, %v1278_v13 }
  0xdf   : > { %v1310_v16 = vadd.f32 %v9040_v26, %v1288_v14 }
  0xe0   : > { %v1330_v17 = vadd.f32 %v1314_v4, %v1306_v15 }
  0xe1   : > { %v1334_v18 = vadd.f32 %v1318_v6, %v1310_v16 }
  0xe2   : > { %1346 = vst.msk [vmem:[#allocation2 + $0x58] sm:$0xff] %vm1164_vm0, %v1330_v17 }
  0xe3   : > { %1350 = vst.msk [vmem:[#allocation2 + $0x78] sm:$0xff] %vm1164_vm0, %v1334_v18 }
  0xe4 PF: > { %v1353_v19 = vld [vmem:[#allocation2 + $0x10] sm:$0xff]  ;;  %vm1369_vm2 = vcmask 261120   ;;  %v1351_v20 = vld [vmem:[#allocation2] sm:$0xff]  ;;  %v1354_v21 = vld [vmem:[#allocation2 + $0x18] sm:$0xff]  ;;  %v8681_v35 = vmov 32.0   ;;  %s12797_s11 = sld [smem:[#allocation9_spill]] }
  0xe5   : > { %v1376_v22 = vsel %vm1369_vm2, %v1353_v19, 0.0  ;;  %v1370_v23 = vsel %vm1369_vm2, %v1351_v20, 0.0  ;;  %v1352_v24 = vld [vmem:[#allocation2 + $0x8] sm:$0xff]  ;;  %v1355_v25 = vld [vmem:[#allocation2 + $0x20] sm:$0xff]  ;;  %v1379_v26 = vsel %vm1369_vm2, %v1354_v21, 0.0  ;;  %v1357_v31 = vld [vmem:[#allocation2 + $0x30] sm:$0xff]  ;;  %8036 = vrcp.f32 %v8681_v35 }
  0xe6   : > { %1377 = vadd.xlane.f32.xlu1 %v1376_v22  ;;  %1371 = vadd.xlane.f32.xlu0 %v1370_v23  ;;  %v1382_v27 = vsel %vm1369_vm2, %v1355_v25, 0.0  ;;  %v1373_v28 = vsel %vm1369_vm2, %v1352_v24, 0.0  ;;  %v1356_v29 = vld [vmem:[#allocation2 + $0x28] sm:$0xff]  ;;  %v1388_v32 = vsel %vm1369_vm2, %v1357_v31, 0.0  ;;  %v9121_v55 = vld [vmem:[#allocation2 + $0x38] sm:$0xff]  ;;  %v9142_v4 = vld [vmem:[#allocation2 + $0x40] sm:$0xff] }
  0xe7   : > { %1383 = vadd.xlane.f32.xlu2 %v1382_v27  ;;  %v1385_v30 = vsel %vm1369_vm2, %v1356_v29, 0.0  ;;  %v1391_v61 = vsel %vm1369_vm2, %v9121_v55, 0.0  ;;  %v1394_v8 = vsel %vm1369_vm2, %v9142_v4, 0.0  ;;  %v9155_v13 = vld [vmem:[#allocation2 + $0x60] sm:$0xff]  ;;  %v9157_v14 = vld [vmem:[#allocation2 + $0x48] sm:$0xff]  ;;  %v9178_v27 = vld [vmem:[#allocation2 + $0x70] sm:$0xff] }
  0xe8   : > { %v1406_v17 = vsel %vm1369_vm2, %v9155_v13, 0.0  ;;  %v1397_v18 = vsel %vm1369_vm2, %v9157_v14, 0.0  ;;  %v9173_v23 = vld [vmem:[#allocation2 + $0x68] sm:$0xff]  ;;  %s12802_s3 = sld [smem:[#allocation46_spill]]  ;;  %s8682_s1 = smov 80  }
  0xe9   : > { %v9105_v33 = vld [vmem:[#allocation2 + $0x58] sm:$0xff]  ;;  %s12804_s7 = sld [smem:[#allocation47_spill]]  ;;  %s8684_s4 = smov 72  }
  0xea   : > { %v1403_v34 = vsel %vm1369_vm2, %v9105_v33, 0.0  ;;  %s12812_s29 = sld [smem:[#allocation49_spill]]  ;;  %s8685_s28 = smov 64  }
  0xeb   : > { %v8037_v36 = vpop.eup %8036  ;;  %s8688_s30 = smov 56   ;;  %s8689_s25 = smov 104  }
  0xec   : > { %v1419_v37 = vmul.f32 32.0, %v8037_v36  ;;  %vm1423_vm3 = vweird.f32 %v8037_v36  ;;  %s8692_s26 = smov 40   ;;  %s8693_s10 = smov 8  }
  0xee   : > { %1380 = vadd.xlane.f32.xlu1 %v1379_v26  ;;  %1374 = vadd.xlane.f32.xlu0 %v1373_v28  ;;  %v1420_v38 = vsub.f32 1.0, %v1419_v37  ;;  %v1412_v28 = vsel %vm1369_vm2, %v9178_v27, 0.0  ;;  %v7843_v37 = vld [vmem:[%s12797_s11] sm:$0xff]  ;;  %s12803_s12 = scalar_lea.vmem %s12802_s3, %s8857_s9  ;;  %s8686_s3 = smov 88  }
  0xef   : > { %1386 = vadd.xlane.f32.xlu2 %v1385_v30  ;;  %s12805_s8 = scalar_lea.vmem %s12804_s7, %s8857_s9  ;;  %s8690_s7 = smov 48  }
  0xf0   : > { %v1421_v39 = vmul.f32 %v8037_v36, %v1420_v38  ;;  %s12813_s14 = scalar_lea.vmem %s12812_s29, %s8857_s9  ;;  %s8694_s29 = smov 16  }
  0xf2   : > { %v1422_v40 = vadd.f32 %v8037_v36, %v1421_v39 }
  0xf4   : > { %v9109_v41 = vsel %vm1423_vm3, %v8037_v36, %v1422_v40 }
  0xf5   : > { %12796 = vst [vmem:[#allocation11_spill] sm:$0xff] %v9109_v41 }
  0xf7   : > { %1389 = vadd.xlane.f32.xlu2 %v1388_v32 }
  0xff   : > { %1404 = vadd.xlane.f32.xlu2 %v1403_v34  ;;  %v7844_v34 = vld [vmem:[%s12797_s11 + $0x8] sm:$0xff]  ;;  %s8683_s11 = smov 96  }
 0x100   : > { %1822 = vmatpush.bf16.msra.mxu0 %v7844_v34 }
 0x104   : > { %1823 = vmatpush.bf16.msra.mxu0 %v7843_v37 }
 0x159   : > { %v1378_v42 = vpop.xlane.xlu1 %1377  ;;  %v1372_v43 = vpop.xlane.xlu0 %1371 }
 0x15a   : > { %v1425_v44 = vmul.f32 %v9109_v41, %v1372_v43  ;;  %v1384_v45 = vpop.xlane.xlu2 %1383  ;;  %v1427_v54 = vmul.f32 %v9109_v41, %v1378_v42 }
 0x15b   : > { %v1429_v53 = vmul.f32 %v9109_v41, %v1384_v45 }
 0x15c   : > { %v9112_v46 = vsub.f32 %v1351_v20, %v1425_v44  ;;  %v9135_v63 = vsub.f32 %v1353_v19, %v1427_v54  ;;  %v9168_v20 = vld [vmem:[#allocation2 + $0x50] sm:$0xff] }
 0x15d   : > { %v9127_v59 = vsub.f32 %v1355_v25, %v1429_v53  ;;  %v1400_v22 = vsel %vm1369_vm2, %v9168_v20, 0.0 }
 0x15e   : > { %v1457_v47 = vmul.f32 %v9112_v46, %v9112_v46  ;;  %v1459_v5 = vmul.f32 %v9135_v63, %v9135_v63 }
 0x15f   : > { %v1461_v3 = vmul.f32 %v9127_v59, %v9127_v59 }
 0x160   : > { %v1473_v48 = vsel %vm1369_vm2, %v1457_v47, 0.0  ;;  %v1479_v9 = vsel %vm1369_vm2, %v1459_v5, 0.0 }
 0x161   : > { %v1381_v49 = vpop.xlane.xlu1 %1380  ;;  %1474 = vadd.xlane.f32.xlu0 %v1473_v48  ;;  %v1375_v50 = vpop.xlane.xlu0 %1374  ;;  %v1485_v7 = vsel %vm1369_vm2, %v1461_v3, 0.0 }
 0x162   : > { %v1428_v51 = vmul.f32 %v9109_v41, %v1381_v49  ;;  %v1426_v52 = vmul.f32 %v9109_v41, %v1375_v50  ;;  %v1387_v58 = vpop.xlane.xlu2 %1386 }
 0x163   : > { %v1430_v2 = vmul.f32 %v9109_v41, %v1387_v58 }
 0x164   : > { %v9123_v56 = vsub.f32 %v1354_v21, %v1428_v51  ;;  %v9125_v57 = vsub.f32 %v1352_v24, %v1426_v52  ;;  %v1409_v24 = vsel %vm1369_vm2, %v9173_v23, 0.0 }
 0x165   : > { %v9146_v6 = vsub.f32 %v1356_v29, %v1430_v2 }
 0x166   : > { %v1460_v60 = vmul.f32 %v9123_v56, %v9123_v56  ;;  %v1458_v62 = vmul.f32 %v9125_v57, %v9125_v57 }
 0x167   : > { %v1462_v12 = vmul.f32 %v9146_v6, %v9146_v6 }
 0x168   : > { %v1482_v0 = vsel %vm1369_vm2, %v1460_v60, 0.0  ;;  %v1476_v1 = vsel %vm1369_vm2, %v1458_v62, 0.0 }
 0x169   : > { %1483 = vadd.xlane.f32.xlu2 %v1482_v0  ;;  %1392 = vadd.xlane.f32.xlu0 %v1391_v61  ;;  %v1488_v16 = vsel %vm1369_vm2, %v1462_v12, 0.0 }
 0x16a   : > { %1477 = vadd.xlane.f32.xlu1 %v1476_v1  ;;  %v1390_v10 = vpop.xlane.xlu2 %1389 }
 0x16b   : > { %v1431_v11 = vmul.f32 %v9109_v41, %v1390_v10 }
 0x16d   : > { %v9159_v15 = vsub.f32 %v1357_v31, %v1431_v11 }
 0x16f   : > { %v1463_v19 = vmul.f32 %v9159_v15, %v9159_v15 }
 0x171   : > { %1486 = vadd.xlane.f32.xlu2 %v1485_v7  ;;  %1395 = vadd.xlane.f32.xlu0 %v1394_v8  ;;  %v1491_v21 = vsel %vm1369_vm2, %v1463_v19, 0.0 }
 0x172   : > { %1480 = vadd.xlane.f32.xlu1 %v1479_v9  ;;  %v1405_v25 = vpop.xlane.xlu2 %1404 }
 0x173   : > { %v1436_v26 = vmul.f32 %v9109_v41, %v1405_v25 }
 0x175   : > { %v9183_v29 = vsub.f32 %v9105_v33, %v1436_v26 }
 0x177   : > { %v1468_v30 = vmul.f32 %v9183_v29, %v9183_v29 }
 0x179   : > { %1489 = vadd.xlane.f32.xlu0 %v1488_v16  ;;  %1407 = vadd.xlane.f32.xlu2 %v1406_v17  ;;  %v1506_v31 = vsel %vm1369_vm2, %v1468_v30, 0.0 }
 0x17a   : > { %1398 = vadd.xlane.f32.xlu1 %v1397_v18 }
 0x181   : > { %1492 = vadd.xlane.f32.xlu0 %v1491_v21 }
 0x182   : > { %1401 = vadd.xlane.f32.xlu1 %v1400_v22 }
 0x189   : > { %1410 = vadd.xlane.f32.xlu0 %v1409_v24 }
 0x191   : > { %1413 = vadd.xlane.f32.xlu0 %v1412_v28 }
 0x199   : > { %1507 = vadd.xlane.f32.xlu0 %v1506_v31 }
 0x1d4   : > { %v1475_v32 = vpop.xlane.xlu0 %1474 }
 0x1d5   : > { %v1521_v35 = vmul.f32 %v1475_v32, %v9109_v41 }
 0x1d7   : > { %v1537_v36 = vadd.f32 1e-05, %v1521_v35 }
 0x1d9   : > { %8038 = vrsqrt.f32 %v1537_v36  ;;  %vm1559_vm5 = vweird.f32 %v1537_v36 }
 0x1dc   : > { %v1484_v38 = vpop.xlane.xlu2 %1483  ;;  %v1393_v39 = vpop.xlane.xlu0 %1392 }
 0x1dd   : > { %v1524_v33 = vmul.f32 %v1484_v38, %v9109_v41  ;;  %v1478_v40 = vpop.xlane.xlu1 %1477  ;;  %v1432_v42 = vmul.f32 %v9109_v41, %v1393_v39 }
 0x1de   : > { %v1522_v43 = vmul.f32 %v1478_v40, %v9109_v41 }
 0x1df   : > { %v8039_v44 = vpop.eup %8038  ;;  %v9194_v45 = vadd.f32 1e-05, %v1524_v33  ;;  %v9197_v47 = vsub.f32 %v9121_v55, %v1432_v42  ;;  %v9252_v33 = vld [vmem:[%s12803_s12] ss:$0 sm:$0xff]  ;;  %s8687_s12 = smov 112  }
 0x1e0   : > { %v1554_v48 = vmul.f32 %v8039_v44, %v1537_v36  ;;  %v1538_v49 = vadd.f32 1e-05, %v1522_v43  ;;  %vm1560_vm4 = vweird.f32 %v8039_v44  ;;  %v9242_v36 = vld [vmem:[#allocation2 + $0x78] sm:$0xff] }
 0x1e1   : > { %8040 = vrsqrt.f32 %v9194_v45  ;;  %v1464_v50 = vmul.f32 %v9197_v47, %v9197_v47  ;;  %vm9220_vm7 = vmor %vm1559_vm5, %vm1560_vm4  ;;  %vm1589_vm12 = vweird.f32 %v9194_v45 }
 0x1e2   : > { %v1555_v51 = vmul.f32 %v8039_v44, %v1554_v48  ;;  %8042 = vrsqrt.f32 %v1538_v49  ;;  %vm1569_vm6 = vweird.f32 %v1538_v49 }
 0x1e3   : > { %v1494_v52 = vsel %vm1369_vm2, %v1464_v50, 0.0 }
 0x1e4   : > { %v1556_v53 = vmul.f32 0.5, %v1555_v51  ;;  %v1487_v54 = vpop.xlane.xlu2 %1486  ;;  %1495 = vadd.xlane.f32.xlu1 %v1494_v52  ;;  %v1396_v58 = vpop.xlane.xlu0 %1395 }
 0x1e5   : > { %v1481_v60 = vpop.xlane.xlu1 %1480  ;;  %v1433_v61 = vmul.f32 %v9109_v41, %v1396_v58  ;;  %v1525_v3 = vmul.f32 %v1487_v54, %v9109_v41 }
 0x1e6   : > { %v1557_v55 = vsub.f32 1.5, %v1556_v53  ;;  %v1523_v62 = vmul.f32 %v1481_v60, %v9109_v41 }
 0x1e7   : > { %v9205_v0 = vpop.eup %8040  ;;  %v9208_v1 = vsub.f32 %v9142_v4, %v1433_v61  ;;  %v9218_v4 = vadd.f32 1e-05, %v1525_v3 }
 0x1e8   : > { %v8043_v2 = vpop.eup %8042  ;;  %v9211_v5 = vadd.f32 1e-05, %v1523_v62  ;;  %v1558_v8 = vmul.f32 %v8039_v44, %v1557_v55  ;;  %v1584_v9 = vmul.f32 %v9205_v0, %v9194_v45  ;;  %vm1590_vm13 = vweird.f32 %v9205_v0 }
 0x1e9   : > { %v1564_v7 = vmul.f32 %v8043_v2, %v1538_v49  ;;  %v1465_v11 = vmul.f32 %v9208_v1, %v9208_v1  ;;  %vm1570_vm8 = vweird.f32 %v8043_v2  ;;  %vm9301_vm15 = vmor %vm1589_vm12, %vm1590_vm13  ;;  %vm1599_vm3 = vweird.f32 %v9218_v4 }
 0x1ea   : > { %8044 = vrsqrt.f32 %v9211_v5  ;;  %v1562_v24 = vsel %vm9220_vm7, %v8039_v44, %v1558_v8  ;;  %v1585_v25 = vmul.f32 %v9205_v0, %v1584_v9  ;;  %vm9234_vm9 = vmor %vm1569_vm6, %vm1570_vm8  ;;  %vm1579_vm10 = vweird.f32 %v9211_v5 }
 0x1eb   : > { %v1565_v10 = vmul.f32 %v8043_v2, %v1564_v7  ;;  %v1497_v21 = vsel %vm1369_vm2, %v1465_v11, 0.0  ;;  %8046 = vrsqrt.f32 %v9218_v4  ;;  %v1713_v39 = vmul.f32 %v1562_v24, %v9112_v46 }
 0x1ec   : > { %v1490_v12 = vpop.xlane.xlu0 %1489  ;;  %v1408_v16 = vpop.xlane.xlu2 %1407  ;;  %1498 = vadd.xlane.f32.xlu1 %v1497_v21  ;;  %v1586_v40 = vmul.f32 0.5, %v1585_v25  ;;  %v1415_v46 = vsel %vm1369_vm2, %v9242_v36, 0.0 }
 0x1ed   : > { %v1566_v18 = vmul.f32 0.5, %v1565_v10  ;;  %v1399_v19 = vpop.xlane.xlu1 %1398  ;;  %v1526_v22 = vmul.f32 %v1490_v12, %v9109_v41  ;;  %v1437_v31 = vmul.f32 %v9109_v41, %v1408_v16  ;;  %v1732_v53 = vmul.f32 %v9252_v33, %v1713_v39 }
 0x1ee   : > { %v1434_v26 = vmul.f32 %v9109_v41, %v1399_v19  ;;  %v1587_v58 = vsub.f32 1.5, %v1586_v40 }
 0x1ef   : > { %v1567_v28 = vsub.f32 1.5, %v1566_v18  ;;  %v9230_v30 = vadd.f32 1e-05, %v1526_v22  ;;  %v9259_v44 = vsub.f32 %v9155_v13, %v1437_v31  ;;  %v9274_v13 = vld [vmem:[%s12805_s8] ss:$0 sm:$0xff]  ;;  %s8691_s8 = smov 120  }
 0x1f0   : > { %v8045_v32 = vpop.eup %8044  ;;  %v9240_v35 = vsub.f32 %v9157_v14, %v1434_v26  ;;  %v1751_v9 = vadd.f32 %v9274_v13, %v1732_v53  ;;  %v1588_v45 = vmul.f32 %v9205_v0, %v1587_v58 }
 0x1f1   : > { %v1568_v37 = vmul.f32 %v8043_v2, %v1567_v28  ;;  %v1574_v38 = vmul.f32 %v8045_v32, %v9211_v5  ;;  %8048 = vrsqrt.f32 %v9230_v30  ;;  %v9276_v54 = vpop.eup %8046  ;;  %vm1580_vm11 = vweird.f32 %v8045_v32 }
 0x1f2   : > { %v1466_v14 = vmul.f32 %v9240_v35, %v9240_v35  ;;  %v1469_v62 = vmul.f32 %v9259_v44, %v9259_v44  ;;  %vm9290_vm14 = vmor %vm1579_vm10, %vm1580_vm11  ;;  %v1594_v11 = vmul.f32 %v9276_v54, %v9218_v4  ;;  %v1592_v24 = vsel %vm9301_vm15, %v9205_v0, %v1588_v45 }
 0x1f3   : > { %v1572_v42 = vsel %vm9234_vm9, %v8043_v2, %v1568_v37  ;;  %v1575_v43 = vmul.f32 %v8045_v32, %v1574_v38  ;;  %v1716_v34 = vmul.f32 %v1592_v24, %v9123_v56  ;;  %vm1609_vm0 = vweird.f32 %v9230_v30 }
 0x1f4   : > { %v1500_v48 = vsel %vm1369_vm2, %v1466_v14, 0.0  ;;  %v9264_v49 = vpop.xlane.xlu0 %1492  ;;  %v1714_v50 = vmul.f32 %v1572_v42, %v9125_v57  ;;  %1416 = vadd.xlane.f32.xlu1 %v1415_v46  ;;  %v1509_v16 = vsel %vm1369_vm2, %v1469_v62, 0.0  ;;  %v1595_v25 = vmul.f32 %v9276_v54, %v1594_v11 }
 0x1f5   : > { %v1576_v51 = vmul.f32 0.5, %v1575_v43  ;;  %1501 = vadd.xlane.f32.xlu2 %v1500_v48  ;;  %v1402_v52 = vpop.xlane.xlu1 %1401  ;;  %vm1600_vm4 = vweird.f32 %v9276_v54 }
 0x1f6   : > { %v1435_v60 = vmul.f32 %v9109_v41, %v1402_v52  ;;  %v1733_v57 = vmul.f32 %v9252_v33, %v1714_v50  ;;  %v1596_v37 = vmul.f32 0.5, %v1595_v25  ;;  %vm1601_vm6 = vmor %vm1599_vm3, %vm1600_vm4 }
 0x1f7   : > { %v8049_v61 = vpop.eup %8048  ;;  %v1577_v55 = vsub.f32 1.5, %v1576_v51 }
 0x1f8   : > { %v1604_v2 = vmul.f32 %v8049_v61, %v9230_v30  ;;  %v9286_v3 = vsub.f32 %v9168_v20, %v1435_v60  ;;  %v1752_v10 = vadd.f32 %v9274_v13, %v1733_v57  ;;  %v1597_v42 = vsub.f32 1.5, %v1596_v37 }
 0x1f9   : > { %v1578_v7 = vmul.f32 %v8045_v32, %v1577_v55  ;;  %vm1610_vm1 = vweird.f32 %v8049_v61 }
 0x1fa   : > { %v1467_v20 = vmul.f32 %v9286_v3, %v9286_v3  ;;  %v1772_v5 = vpack.c.bf16 %v1752_v10, %v1751_v9  ;;  %v1605_v18 = vmul.f32 %v8049_v61, %v1604_v2  ;;  %vm1611_vm5 = vmor %vm1609_vm0, %vm1610_vm1  ;;  %v1598_v50 = vmul.f32 %v9276_v54, %v1597_v42 }
 0x1fb   : > { %v1582_v17 = vsel %vm9290_vm14, %v8045_v32, %v1578_v7 }
 0x1fc   : > { %v1503_v19 = vsel %vm1369_vm2, %v1467_v20, 0.0  ;;  %v1411_v21 = vpop.xlane.xlu0 %1410  ;;  %7609 = vmatmul.msk.bf16.vlgmr.msra.gmra.mxu0 %vm1369_vm2, %v1772_v5  ;;  %1510 = vadd.xlane.f32.xlu1 %v1509_v16  ;;  %v1715_v28 = vmul.f32 %v1582_v17, %v9135_v63  ;;  %v1606_v31 = vmul.f32 0.5, %v1605_v18  ;;  %v1602_v4 = vsel %vm1601_vm6, %v9276_v54, %v1598_v50 }
 0x1fd   : > { %1504 = vadd.xlane.f32.xlu2 %v1503_v19  ;;  %v1438_v22 = vmul.f32 %v9109_v41, %v1411_v21  ;;  %v1717_v53 = vmul.f32 %v1602_v4, %v9127_v59 }
 0x1fe   : > { %v1734_v39 = vmul.f32 %v9252_v33, %v1715_v28  ;;  %v1607_v0 = vsub.f32 1.5, %v1606_v31 }
 0x1ff   : > { %v9316_v26 = vsub.f32 %v9173_v23, %v1438_v22  ;;  %v1735_v23 = vmul.f32 %v9252_v33, %v1716_v34  ;;  %v1736_v60 = vmul.f32 %v9252_v33, %v1717_v53 }
 0x200   : > { %v1753_v56 = vadd.f32 %v9274_v13, %v1734_v39  ;;  %v1608_v43 = vmul.f32 %v8049_v61, %v1607_v0 }
 0x201   : > { %v1470_v32 = vmul.f32 %v9316_v26, %v9316_v26  ;;  %v1754_v46 = vadd.f32 %v9274_v13, %v1735_v23  ;;  %v1755_v55 = vadd.f32 %v9274_v13, %v1736_v60 }
 0x202   : > { %v1612_v51 = vsel %vm1611_vm5, %v8049_v61, %v1608_v43  ;;  %v1527_v61 = vmul.f32 %v9264_v49, %v9109_v41 }
 0x203   : > { %v1512_v38 = vsel %vm1369_vm2, %v1470_v32, 0.0  ;;  %v1773_v30 = vpack.c.bf16 %v1754_v46, %v1753_v56  ;;  %v1718_v52 = vmul.f32 %v1612_v51, %v9146_v6 }
 0x204   : > { %v1414_v40 = vpop.xlane.xlu0 %1413  ;;  %v1543_v2 = vadd.f32 1e-05, %v1527_v61 }
 0x205   : > { %1513 = vadd.xlane.f32.xlu2 %v1512_v38  ;;  %v1439_v14 = vmul.f32 %v9109_v41, %v1414_v40  ;;  %v1737_v58 = vmul.f32 %v9252_v33, %v1718_v52 }
 0x206   : > { %8050 = vrsqrt.f32 %v1543_v2  ;;  %vm1619_vm7 = vweird.f32 %v1543_v2 }
 0x207   : > { %v9328_v63 = vsub.f32 %v9178_v27, %v1439_v14  ;;  %v1756_v57 = vadd.f32 %v9274_v13, %v1737_v58 }
 0x209   : > { %v1471_v48 = vmul.f32 %v9328_v63, %v9328_v63  ;;  %v1774_v62 = vpack.c.bf16 %v1756_v57, %v1755_v55 }
 0x20b   : > { %v1515_v27 = vsel %vm1369_vm2, %v1471_v48, 0.0 }
 0x20c   : > { %1516 = vadd.xlane.f32.xlu0 %v1515_v27  ;;  %7610 = vmatmul.msk.bf16.gmra.mxu0 %vm1369_vm2, %v1773_v30  ;;  %v8051_v54 = vpop.eup %8050  ;;  %v1508_v11 = vpop.xlane.xlu0 %1507 }
 0x20d   : > { %v1614_v6 = vmul.f32 %v8051_v54, %v1543_v2  ;;  %vm1620_vm8 = vweird.f32 %v8051_v54  ;;  %v1532_v17 = vmul.f32 %v1508_v11, %v9109_v41 }
 0x20e   : > { %vm1621_vm9 = vmor %vm1619_vm7, %vm1620_vm8 }
 0x20f   : > { %v1615_v7 = vmul.f32 %v8051_v54, %v1614_v6  ;;  %v9352_v24 = vadd.f32 1e-05, %v1532_v17 }
 0x211   : > { %v1616_v10 = vmul.f32 0.5, %v1615_v7  ;;  %vm1669_vm6 = vweird.f32 %v9352_v24 }
 0x213   : > { %v1617_v45 = vsub.f32 1.5, %v1616_v10 }
 0x215   : > { %v1618_v49 = vmul.f32 %v8051_v54, %v1617_v45 }
 0x217   : > { %v1622_v21 = vsel %vm1621_vm9, %v8051_v54, %v1618_v49 }
 0x218   : > { %v1719_v37 = vmul.f32 %v1622_v21, %v9159_v15 }
 0x21a   : > { %v1738_v15 = vmul.f32 %v9252_v33, %v1719_v37 }
 0x21c   : > { %7611 = vmatmul.msk.bf16.gmra.mxu0 %vm1369_vm2, %v1774_v62  ;;  %v1757_v4 = vadd.f32 %v9274_v13, %v1738_v15 }
 0x257   : > { %v1496_v59 = vpop.xlane.xlu1 %1495 }
 0x258   : > { %v1528_v8 = vmul.f32 %v1496_v59, %v9109_v41 }
 0x25a   : > { %v1544_v9 = vadd.f32 1e-05, %v1528_v8 }
 0x25c   : > { %8052 = vrsqrt.f32 %v1544_v9  ;;  %vm1629_vm11 = vweird.f32 %v1544_v9 }
 0x25f   : > { %v1499_v20 = vpop.xlane.xlu1 %1498 }
 0x260   : > { %v1529_v5 = vmul.f32 %v1499_v20, %v9109_v41 }
 0x262   : > { %v8053_v12 = vpop.eup %8052  ;;  %v1545_v18 = vadd.f32 1e-05, %v1529_v5  ;;  %v9393_v5 = vld [vmem:[%s12813_s14] ss:$0 sm:$0xff]  ;;  %s8695_s14 = smov 24  }
 0x263   : > { %v1624_v16 = vmul.f32 %v8053_v12, %v1544_v9  ;;  %vm1630_vm10 = vweird.f32 %v8053_v12 }
 0x264   : > { %8054 = vrsqrt.f32 %v1545_v18  ;;  %vm1631_vm12 = vmor %vm1629_vm11, %vm1630_vm10  ;;  %vm1639_vm14 = vweird.f32 %v1545_v18 }
 0x265   : > { %v1625_v19 = vmul.f32 %v8053_v12, %v1624_v16  ;;  %8056 = vrsqrt.f32 %v9352_v24 }
 0x267   : > { %v1626_v22 = vmul.f32 0.5, %v1625_v19  ;;  %v1417_v32 = vpop.xlane.xlu1 %1416 }
 0x268   : > { %v1502_v25 = vpop.xlane.xlu2 %1501  ;;  %v1440_v34 = vmul.f32 %v9109_v41, %v1417_v32 }
 0x269   : > { %v1627_v28 = vsub.f32 1.5, %v1626_v22  ;;  %v1530_v31 = vmul.f32 %v1502_v25, %v9109_v41 }
 0x26a   : > { %v8055_v0 = vpop.eup %8054  ;;  %v9359_v40 = vsub.f32 %v9242_v36, %v1440_v34 }
 0x26b   : > { %v1628_v38 = vmul.f32 %v8053_v12, %v1627_v28  ;;  %v1546_v39 = vadd.f32 1e-05, %v1530_v31  ;;  %v1634_v23 = vmul.f32 %v8055_v0, %v1545_v18  ;;  %v9368_v51 = vpop.eup %8056  ;;  %vm1640_vm13 = vweird.f32 %v8055_v0 }
 0x26c   : > { %v1472_v42 = vmul.f32 %v9359_v40, %v9359_v40  ;;  %v1664_v62 = vmul.f32 %v9368_v51, %v9352_v24  ;;  %vm9376_vm15 = vmor %vm1639_vm14, %vm1640_vm13  ;;  %vm1670_vm7 = vweird.f32 %v9368_v51 }
 0x26d   : > { %v1632_v14 = vsel %vm1631_vm12, %v8053_v12, %v1628_v38  ;;  %8058 = vrsqrt.f32 %v1546_v39  ;;  %v1635_v43 = vmul.f32 %v8055_v0, %v1634_v23  ;;  %vm1649_vm0 = vweird.f32 %v1546_v39  ;;  %vm9422_vm9 = vmor %vm1669_vm6, %vm1670_vm7 }
 0x26e   : > { %v1720_v56 = vmul.f32 %v1632_v14, %v9197_v47  ;;  %v1518_v48 = vsel %vm1369_vm2, %v1472_v42, 0.0  ;;  %v1665_v8 = vmul.f32 %v9368_v51, %v1664_v62  ;;  %vm1980_vm7 = vcmask 64512  }
 0x26f   : > { %v1636_v30 = vmul.f32 0.5, %v1635_v43  ;;  %1519 = vadd.xlane.f32.xlu1 %v1518_v48  ;;  %v1511_v27 = vpop.xlane.xlu1 %1510 }
 0x270   : > { %v1505_v46 = vpop.xlane.xlu2 %1504  ;;  %v1739_v50 = vmul.f32 %v9252_v33, %v1720_v56  ;;  %v1533_v57 = vmul.f32 %v1511_v27, %v9109_v41  ;;  %v1666_v18 = vmul.f32 0.5, %v1665_v8 }
 0x271   : > { %v1531_v36 = vmul.f32 %v1505_v46, %v9109_v41  ;;  %v1637_v53 = vsub.f32 1.5, %v1636_v30 }
 0x272   : > { %v1758_v52 = vadd.f32 %v9274_v13, %v1739_v50  ;;  %v9380_v7 = vadd.f32 1e-05, %v1533_v57  ;;  %v1667_v32 = vsub.f32 1.5, %v1666_v18 }
 0x273   : > { %v8059_v47 = vpop.eup %8058  ;;  %v1547_v58 = vadd.f32 1e-05, %v1531_v36  ;;  %v1638_v61 = vmul.f32 %v8055_v0, %v1637_v53 }
 0x274   : > { %v1644_v60 = vmul.f32 %v8059_v47, %v1546_v39  ;;  %v1775_v55 = vpack.c.bf16 %v1758_v52, %v1757_v4  ;;  %vm1650_vm1 = vweird.f32 %v8059_v47  ;;  %v1668_v43 = vmul.f32 %v9368_v51, %v1667_v32 }
 0x275   : > { %8060 = vrsqrt.f32 %v1547_v58  ;;  %v1642_v9 = vsel %vm9376_vm15, %v8055_v0, %v1638_v61  ;;  %vm1651_vm3 = vmor %vm1649_vm0, %vm1650_vm1  ;;  %vm1659_vm4 = vweird.f32 %v1547_v58  ;;  %vm1679_vm12 = vweird.f32 %v9380_v7 }
 0x276   : > { %v1645_v2 = vmul.f32 %v8059_v47, %v1644_v60  ;;  %7612 = vmatmul.msk.bf16.gmra.mxu0 %vm1369_vm2, %v1775_v55  ;;  %8062 = vrsqrt.f32 %v9380_v7  ;;  %v1721_v17 = vmul.f32 %v1642_v9, %v9208_v1  ;;  %v1672_v24 = vsel %vm9422_vm9, %v9368_v51, %v1668_v43 }
 0x277   : > { %v1724_v51 = vmul.f32 %v1672_v24, %v9183_v29  ;;  %vm4110_vm9 = vcmask 130048  }
 0x278   : > { %v1646_v6 = vmul.f32 0.5, %v1645_v2  ;;  %v1514_v59 = vpop.xlane.xlu2 %1513  ;;  %v1740_v31 = vmul.f32 %v9252_v33, %v1721_v17 }
 0x279   : > { %v1534_v10 = vmul.f32 %v1514_v59, %v9109_v41  ;;  %v1825_v11 = vpop.f32.mrf.mxu0 }
 0x27a   : > { %v1647_v45 = vsub.f32 1.5, %v1646_v6  ;;  %v1868_v22 = vadd.f32 %v9393_v5, %v1825_v11  ;;  %v1759_v15 = vadd.f32 %v9274_v13, %v1740_v31 }
 0x27b   : > { %v8061_v20 = vpop.eup %8060  ;;  %v9386_v12 = vadd.f32 1e-05, %v1534_v10  ;;  %v1743_v10 = vmul.f32 %v9252_v33, %v1724_v51 }
 0x27c   : > { %v1648_v49 = vmul.f32 %v8059_v47, %v1647_v45  ;;  %v1654_v16 = vmul.f32 %v8061_v20, %v1547_v58  ;;  %vm1660_vm5 = vweird.f32 %v8061_v20  ;;  %v9402_v37 = vpop.eup %8062  ;;  %v1916_v0 = vpack.c.bf16 %v1868_v22, %v1868_v22 }
 0x27d   : > { %8064 = vrsqrt.f32 %v9386_v12  ;;  %vm9410_vm8 = vmor %vm1659_vm4, %vm1660_vm5  ;;  %v1674_v46 = vmul.f32 %v9402_v37, %v9380_v7  ;;  %v1884_v53 = vmul.f32 0.35355338, %v1868_v22  ;;  %vm1689_vm10 = vweird.f32 %v9386_v12 }
 0x27e   : > { %v1652_v19 = vsel %vm1651_vm3, %v8059_v47, %v1648_v49  ;;  %v1655_v21 = vmul.f32 %v8061_v20, %v1654_v16  ;;  %v1960_v52 = vunpack.c.l.b16 %v1916_v0  ;;  %vm1680_vm13 = vweird.f32 %v9402_v37 }
 0x27f   : > { %v1722_v25 = vmul.f32 %v1652_v19, %v9240_v35  ;;  %v1675_v58 = vmul.f32 %v9402_v37, %v1674_v46  ;;  %v1900_v2 = vpack.c.bf16 %v1884_v53, %v1884_v53  ;;  %vm1681_vm15 = vmor %vm1679_vm12, %vm1680_vm13 }
 0x280   : > { %v1656_v28 = vmul.f32 0.5, %v1655_v21 }
 0x281   : > { %v1741_v34 = vmul.f32 %v9252_v33, %v1722_v25  ;;  %v1827_v38 = vpop.f32.mrf.mxu0  ;;  %v1676_v54 = vmul.f32 0.5, %v1675_v58  ;;  %v1940_v9 = vunpack.c.l.b16 %v1900_v2 }
 0x282   : > { %v1657_v1 = vsub.f32 1.5, %v1656_v28  ;;  %v1869_v35 = vadd.f32 %v9393_v5, %v1827_v38 }
 0x283   : > { %v9405_v39 = vpop.eup %8064  ;;  %v1760_v14 = vadd.f32 %v9274_v13, %v1741_v34  ;;  %v1677_v45 = vsub.f32 1.5, %v1676_v54 }
 0x284   : > { %v1658_v23 = vmul.f32 %v8061_v20, %v1657_v1  ;;  %v1684_v56 = vmul.f32 %v9405_v39, %v9386_v12  ;;  %v1917_v48 = vpack.c.bf16 %v1869_v35, %v1869_v35  ;;  %v1885_v30 = vmul.f32 0.35355338, %v1869_v35 }
 0x285   : > { %v1776_v36 = vpack.c.bf16 %v1760_v14, %v1759_v15  ;;  %vm1690_vm11 = vweird.f32 %v9405_v39  ;;  %v1762_v12 = vadd.f32 %v9274_v13, %v1743_v10  ;;  %v1678_v18 = vmul.f32 %v9402_v37, %v1677_v45 }
 0x286   : > { %v1662_v27 = vsel %vm9410_vm8, %v8061_v20, %v1658_v23  ;;  %v1685_v4 = vmul.f32 %v9405_v39, %v1684_v56  ;;  %v1961_v47 = vunpack.c.l.b16 %v1917_v48  ;;  %v1901_v57 = vpack.c.bf16 %v1885_v30, %v1885_v30  ;;  %vm1691_vm14 = vmor %vm1689_vm10, %vm1690_vm11 }
 0x287   : > { %7613 = vmatmul.msk.bf16.gmra.mxu0 %vm1369_vm2, %v1776_v36  ;;  %v1723_v62 = vmul.f32 %v1662_v27, %v9286_v3  ;;  %v1682_v31 = vsel %vm1681_vm15, %v9402_v37, %v1678_v18  ;;  %vm2135_vm8 = vcmask 523264   ;;  %vm4127_vm10 = vcmask 195584  }
 0x288   : > { %v9434_v60 = vpack.c.b16 %v1961_v47, %v1960_v52  ;;  %v1686_v61 = vmul.f32 0.5, %v1685_v4  ;;  %v1941_v6 = vunpack.c.l.b16 %v1901_v57  ;;  %v1725_v7 = vmul.f32 %v1682_v31, %v9259_v44  ;;  %v1517_v52 = vpop.xlane.xlu0 %1516 }
 0x289   : > { %v1830_v55 = vpop.f32.mrf.mxu0  ;;  %v1742_v3 = vmul.f32 %v9252_v33, %v1723_v62  ;;  %v1535_v53 = vmul.f32 %v1517_v52, %v9109_v41 }
 0x28a   : > { %12818 = vst [vmem:[#allocation12_spill] sm:$0xff] %v9434_v60  ;;  %2958 = vrot.lane.b32.xlu1 %v9434_v60, %s8682_s1  ;;  %1972 = vrot.lane.b32.xlu2 %v9434_v60, %s8683_s11  ;;  %v1687_v59 = vsub.f32 1.5, %v1686_v61  ;;  %v1870_v8 = vadd.f32 %v9393_v5, %v1830_v55  ;;  %v9450_v11 = vpack.c.b16 %v1941_v6, %v1940_v9 }
 0x28b   : > { %3434 = vrot.lane.b32.xlu0 %v9434_v60, %s8684_s4  ;;  %v1761_v20 = vadd.f32 %v9274_v13, %v1742_v3  ;;  %v1744_v38 = vmul.f32 %v9252_v33, %v1725_v7  ;;  %v1551_v57 = vadd.f32 1e-05, %v1535_v53 }
 0x28c   : > { %v1688_v49 = vmul.f32 %v9405_v39, %v1687_v59  ;;  %v1918_v16 = vpack.c.bf16 %v1870_v8, %v1870_v8  ;;  %v1886_v43 = vmul.f32 0.35355338, %v1870_v8 }
 0x28d   : > { %v1777_v21 = vpack.c.bf16 %v1762_v12, %v1761_v20  ;;  %v1763_v0 = vadd.f32 %v9274_v13, %v1744_v38  ;;  %8066 = vrsqrt.f32 %v1551_v57  ;;  %vm1699_vm0 = vweird.f32 %v1551_v57 }
 0x28e   : > { %v1692_v22 = vsel %vm1691_vm14, %v9405_v39, %v1688_v49  ;;  %v1962_v25 = vunpack.c.l.b16 %v1918_v16  ;;  %v1902_v30 = vpack.c.bf16 %v1886_v43, %v1886_v43 }
 0x28f   : > { %v1726_v1 = vmul.f32 %v1692_v22, %v9316_v26 }
 0x290   : > { %v1942_v27 = vunpack.c.l.b16 %v1902_v30 }
 0x291   : > { %v1832_v29 = vpop.f32.mrf.mxu0  ;;  %v1745_v37 = vmul.f32 %v9252_v33, %v1726_v1 }
 0x292   : > { %v1871_v17 = vadd.f32 %v9393_v5, %v1832_v29  ;;  %2348 = vrot.lane.b32.xlu1 %v9434_v60, %s8685_s28  ;;  %2482 = vrot.lane.b32.xlu2 %v9434_v60, %s8686_s3 }
 0x293   : > { %2950 = vrot.lane.b32.xlu0 %v9450_v11, %s8687_s12  ;;  %v1764_v26 = vadd.f32 %v9274_v13, %v1745_v37  ;;  %v8067_v51 = vpop.eup %8066 }
 0x294   : > { %v1919_v19 = vpack.c.bf16 %v1871_v17, %v1871_v17  ;;  %v1887_v56 = vmul.f32 0.35355338, %v1871_v17  ;;  %v1694_v54 = vmul.f32 %v8067_v51, %v1551_v57  ;;  %vm1700_vm1 = vweird.f32 %v8067_v51 }
 0x295   : > { %v1778_v35 = vpack.c.bf16 %v1764_v26, %v1763_v0  ;;  %vm1701_vm3 = vmor %vm1699_vm0, %vm1700_vm1 }
 0x296   : > { %v1963_v28 = vunpack.c.l.b16 %v1919_v19  ;;  %v1903_v48 = vpack.c.bf16 %v1887_v56, %v1887_v56  ;;  %v1695_v6 = vmul.f32 %v8067_v51, %v1694_v54 }
 0x297   : > { %7614 = vmatmul.msk.bf16.gmra.mxu0 %vm1369_vm2, %v1777_v21 }
 0x298   : > { %v9469_v32 = vpack.c.b16 %v1963_v28, %v1962_v25  ;;  %v1943_v36 = vunpack.c.l.b16 %v1903_v48  ;;  %v1696_v9 = vmul.f32 0.5, %v1695_v6 }
 0x299   : > { %v1835_v34 = vpop.f32.mrf.mxu0 }
 0x29a   : > { %2824 = vrot.lane.b32.xlu1 %v9434_v60, %s8688_s30  ;;  %3426 = vrot.lane.b32.xlu2 %v9450_v11, %s8689_s25  ;;  %v1872_v14 = vadd.f32 %v9393_v5, %v1835_v34  ;;  %v9506_v4 = vpack.c.b16 %v1943_v36, %v1942_v27  ;;  %v1697_v10 = vsub.f32 1.5, %v1696_v9 }
 0x29b   : > { %2484 = vrot.lane.b32.xlu0 %v9469_v32, %s8686_s3 }
 0x29c   : > { %v1920_v42 = vpack.c.bf16 %v1872_v14, %v1872_v14  ;;  %v1888_v24 = vmul.f32 0.35355338, %v1872_v14  ;;  %v1698_v29 = vmul.f32 %v8067_v51, %v1697_v10 }
 0x29e   : > { %v1964_v46 = vunpack.c.l.b16 %v1920_v42  ;;  %v1904_v55 = vpack.c.bf16 %v1888_v24, %v1888_v24  ;;  %v1702_v17 = vsel %vm1701_vm3, %v8067_v51, %v1698_v29 }
 0x29f   : > { %v1727_v19 = vmul.f32 %v1702_v17, %v9328_v63 }
 0x2a0   : > { %v1944_v61 = vunpack.c.l.b16 %v1904_v55 }
 0x2a1   : > { %v1837_v39 = vpop.f32.mrf.mxu0  ;;  %v1746_v34 = vmul.f32 %v9252_v33, %v1727_v19 }
 0x2a2   : > { %3300 = vrot.lane.b32.xlu1 %v9434_v60, %s8690_s7  ;;  %2350 = vrot.lane.b32.xlu2 %v9469_v32, %s8685_s28  ;;  %v1873_v44 = vadd.f32 %v9393_v5, %v1837_v39 }
 0x2a3   : > { %2960 = vrot.lane.b32.xlu0 %v9469_v32, %s8682_s1  ;;  %v1765_v26 = vadd.f32 %v9274_v13, %v1746_v34 }
 0x2a4   : > { %v1921_v23 = vpack.c.bf16 %v1873_v44, %v1873_v44  ;;  %v1889_v47 = vmul.f32 0.35355338, %v1873_v44 }
 0x2a6   : > { %v1965_v15 = vunpack.c.l.b16 %v1921_v23  ;;  %v1905_v58 = vpack.c.bf16 %v1889_v47, %v1889_v47 }
 0x2a7   : > { %7615 = vmatmul.msk.bf16.gmra.mxu0 %vm1369_vm2, %v1778_v35 }
 0x2a8   : > { %v9498_v50 = vpack.c.b16 %v1965_v15, %v1964_v46  ;;  %v1945_v62 = vunpack.c.l.b16 %v1905_v58 }
 0x2aa   : > { %2474 = vrot.lane.b32.xlu1 %v9450_v11, %s8691_s8  ;;  %2826 = vrot.lane.b32.xlu2 %v9469_v32, %s8688_s30  ;;  %v9527_v2 = vpack.c.b16 %v1945_v62, %v1944_v61 }
 0x2ab   : > { %3436 = vrot.lane.b32.xlu0 %v9469_v32, %s8684_s4 }
 0x2b2   : > { %1974 = vrot.lane.b32.xlu1 %v9469_v32, %s8683_s11  ;;  %2486 = vrot.lane.b32.xlu2 %v9498_v50, %s8686_s3 }
 0x2b3   : > { %3302 = vrot.lane.b32.xlu0 %v9469_v32, %s8690_s7 }
 0x2ba   : > { %2952 = vrot.lane.b32.xlu1 %v9506_v4, %s8687_s12  ;;  %2352 = vrot.lane.b32.xlu2 %v9498_v50, %s8685_s28 }
 0x2bb   : > { %2476 = vrot.lane.b32.xlu0 %v9506_v4, %s8691_s8 }
 0x2c2   : > { %3428 = vrot.lane.b32.xlu1 %v9506_v4, %s8689_s25 }
 0x2c3   : > { %1976 = vrot.lane.b32.xlu0 %v9498_v50, %s8683_s11 }
 0x2ca   : > { %2828 = vrot.lane.b32.xlu1 %v9498_v50, %s8688_s30 }
 0x2cb   : > { %2962 = vrot.lane.b32.xlu0 %v9498_v50, %s8682_s1 }
 0x2d2   : > { %3304 = vrot.lane.b32.xlu1 %v9498_v50, %s8690_s7 }
 0x2d3   : > { %3438 = vrot.lane.b32.xlu0 %v9498_v50, %s8684_s4 }
 0x2db   : > { %2478 = vrot.lane.b32.xlu0 %v9527_v2, %s8691_s8 }
 0x2e2   : > { %v1520_v3 = vpop.xlane.xlu1 %1519 }
 0x2e3   : > { %2954 = vrot.lane.b32.xlu0 %v9527_v2, %s8687_s12  ;;  %v1536_v59 = vmul.f32 %v1520_v3, %v9109_v41 }
 0x2e4   : > { %v9579_v51 = vpop.permute.xlu2 %1972 }
 0x2e5   : > { %v1552_v8 = vadd.f32 1e-05, %v1536_v59 }
 0x2e7   : > { %8068 = vrsqrt.f32 %v1552_v8  ;;  %vm1709_vm5 = vweird.f32 %v1552_v8 }
 0x2eb   : > { %3430 = vrot.lane.b32.xlu0 %v9527_v2, %s8689_s25 }
 0x2ec   : > { %v9597_v17 = vpop.permute.xlu2 %2482 }
 0x2ed   : > { %v8069_v45 = vpop.eup %8068 }
 0x2ee   : > { %v1704_v20 = vmul.f32 %v8069_v45, %v1552_v8  ;;  %vm1710_vm4 = vweird.f32 %v8069_v45 }
 0x2ef   : > { %vm1711_vm6 = vmor %vm1709_vm5, %vm1710_vm4 }
 0x2f0   : > { %v1705_v49 = vmul.f32 %v8069_v45, %v1704_v20 }
 0x2f2   : > { %v1706_v12 = vmul.f32 0.5, %v1705_v49 }
 0x2f3   : > { %v1840_v16 = vpop.f32.mrf.mxu0 }
 0x2f4   : > { %v1707_v18 = vsub.f32 1.5, %v1706_v12  ;;  %v1874_v22 = vadd.f32 %v9393_v5, %v1840_v16 }
 0x2f6   : > { %v1708_v21 = vmul.f32 %v8069_v45, %v1707_v18  ;;  %v1922_v1 = vpack.c.bf16 %v1874_v22, %v1874_v22  ;;  %v1890_v14 = vmul.f32 0.35355338, %v1874_v22 }
 0x2f8   : > { %v1712_v25 = vsel %vm1711_vm6, %v8069_v45, %v1708_v21  ;;  %v1966_v44 = vunpack.c.l.b16 %v1922_v1 }
 0x2f9   : > { %v1728_v31 = vmul.f32 %v1712_v25, %v9359_v40 }
 0x2fb   : > { %v1842_v28 = vpop.f32.mrf.mxu0  ;;  %v1747_v37 = vmul.f32 %v9252_v33, %v1728_v31  ;;  %v1906_v33 = vpack.c.bf16 %v1890_v14, %v1890_v14  ;;  %v9617_v31 = vpop.permute.xlu2 %3426 }
 0x2fc   : > { %v1875_v7 = vadd.f32 %v9393_v5, %v1842_v28  ;;  %v9569_v47 = vpop.permute.xlu1 %2958 }
 0x2fd   : > { %v9542_v39 = vpop.permute.xlu0 %3434  ;;  %v1766_v0 = vadd.f32 %v9274_v13, %v1747_v37  ;;  %v1946_v43 = vunpack.c.l.b16 %v1906_v33 }
 0x2fe   : > { %v1923_v38 = vpack.c.bf16 %v1875_v7, %v1875_v7  ;;  %v1891_v63 = vmul.f32 0.35355338, %v1875_v7 }
 0x2ff   : > { %v1779_v23 = vpack.c.bf16 %v1766_v0, %v1765_v26 }
 0x300   : > { %v1967_v35 = vunpack.c.l.b16 %v1923_v38  ;;  %v1907_v42 = vpack.c.bf16 %v1891_v63, %v1891_v63 }
 0x301   : > { %7616 = vmatmul.msk.bf16.gmra.mxu0 %vm1369_vm2, %v1779_v23 }
 0x302   : > { %v9546_v40 = vpack.c.b16 %v1967_v35, %v1966_v44  ;;  %v1947_v15 = vunpack.c.l.b16 %v1907_v42 }
 0x303   : > { %v9630_v35 = vpop.permute.xlu2 %2350 }
 0x304   : > { %2488 = vrot.lane.b32.xlu1 %v9546_v40, %s8686_s3  ;;  %1978 = vrot.lane.b32.xlu2 %v9546_v40, %s8683_s11  ;;  %v1845_v56 = vpop.f32.mrf.mxu0  ;;  %v9557_v46 = vpack.c.b16 %v1947_v15, %v1946_v43  ;;  %v9589_v8 = vpop.permute.xlu1 %2348 }
 0x305   : > { %2354 = vrot.lane.b32.xlu0 %v9546_v40, %s8685_s28  ;;  %v9555_v13 = vpop.permute.xlu0 %2950  ;;  %v1876_v27 = vadd.f32 %v9393_v5, %v1845_v56 }
 0x307   : > { %v1924_v53 = vpack.c.bf16 %v1876_v27, %v1876_v27  ;;  %v1892_v62 = vmul.f32 0.35355338, %v1876_v27 }
 0x309   : > { %v2062_v61 = vunpack.c.l.b16 %v1924_v53  ;;  %v1908_v3 = vpack.c.bf16 %v1892_v62, %v1892_v62 }
 0x30b   : > { %v2042_v29 = vunpack.c.l.b16 %v1908_v3  ;;  %v9643_v27 = vpop.permute.xlu2 %2826 }
 0x30c   : > { %2830 = vrot.lane.b32.xlu1 %v9546_v40, %s8688_s30  ;;  %2964 = vrot.lane.b32.xlu2 %v9546_v40, %s8682_s1  ;;  %v1847_v48 = vpop.f32.mrf.mxu0  ;;  %v9605_v19 = vpop.permute.xlu1 %2824 }
 0x30d   : > { %2956 = vrot.lane.b32.xlu0 %v9557_v46, %s8687_s12  ;;  %v1877_v30 = vadd.f32 %v9393_v5, %v1847_v48  ;;  %v9566_v36 = vpop.permute.xlu0 %2484 }
 0x30f   : > { %v1925_v52 = vpack.c.bf16 %v1877_v30, %v1877_v30  ;;  %v1893_v58 = vmul.f32 0.35355338, %v1877_v30 }
 0x311   : > { %v2063_v57 = vunpack.c.l.b16 %v1925_v52  ;;  %v1909_v54 = vpack.c.bf16 %v1893_v58, %v1893_v58 }
 0x313   : > { %v9581_v6 = vpack.c.b16 %v2063_v57, %v2062_v61  ;;  %v2043_v9 = vunpack.c.l.b16 %v1909_v54  ;;  %v2487_v61 = vpop.permute.xlu2 %2486 }
 0x314   : > { %2480 = vrot.lane.b32.xlu1 %v9557_v46, %s8691_s8  ;;  %3440 = vrot.lane.b32.xlu2 %v9546_v40, %s8684_s4  ;;  %v1850_v24 = vpop.f32.mrf.mxu0  ;;  %v9619_v7 = vpop.permute.xlu1 %3300 }
 0x315   : > { %3432 = vrot.lane.b32.xlu0 %v9557_v46, %s8689_s25  ;;  %v9577_v55 = vpop.permute.xlu0 %2960  ;;  %12819 = vst [vmem:[#allocation13_spill] sm:$0xff] %v9581_v6  ;;  %v1878_v20 = vadd.f32 %v9393_v5, %v1850_v24  ;;  %v9595_v49 = vpack.c.b16 %v2043_v9, %v2042_v29 }
 0x317   : > { %v1926_v12 = vpack.c.bf16 %v1878_v20, %v1878_v20  ;;  %v1894_v1 = vmul.f32 0.35355338, %v1878_v20 }
 0x319   : > { %v2064_v21 = vunpack.c.l.b16 %v1926_v12  ;;  %v1910_v26 = vpack.c.bf16 %v1894_v1, %v1894_v1 }
 0x31b   : > { %v2044_v14 = vunpack.c.l.b16 %v1910_v26  ;;  %v2353_v20 = vpop.permute.xlu2 %2352 }
 0x31c   : > { %2074 = vrot.lane.b32.xlu1 %v9581_v6, %s8683_s11  ;;  %3306 = vrot.lane.b32.xlu2 %v9546_v40, %s8690_s7  ;;  %v1852_v59 = vpop.f32.mrf.mxu0  ;;  %v9635_v56 = vpop.permute.xlu1 %2474 }
 0x31d   : > { %3027 = vrot.lane.b32.xlu0 %v9581_v6, %s8682_s1  ;;  %v1879_v10 = vadd.f32 %v9393_v5, %v1852_v59  ;;  %v9592_v45 = vpop.permute.xlu0 %3436 }
 0x31f   : > { %v1927_v16 = vpack.c.bf16 %v1879_v10, %v1879_v10  ;;  %v1895_v34 = vmul.f32 0.35355338, %v1879_v10 }
 0x321   : > { %v2065_v18 = vunpack.c.l.b16 %v1927_v16  ;;  %v1911_v37 = vpack.c.bf16 %v1895_v34, %v1895_v34 }
 0x323   : > { %v9609_v28 = vpack.c.b16 %v2065_v18, %v2064_v21  ;;  %v2045_v0 = vunpack.c.l.b16 %v1911_v37 }
 0x324   : > { %3495 = vrot.lane.b32.xlu1 %v9595_v49, %s8689_s25  ;;  %2551 = vrot.lane.b32.xlu2 %v9581_v6, %s8686_s3  ;;  %v1855_v22 = vpop.f32.mrf.mxu0  ;;  %v1975_v53 = vpop.permute.xlu1 %1974 }
 0x325   : > { %3503 = vrot.lane.b32.xlu0 %v9581_v6, %s8684_s4  ;;  %v9607_v25 = vpop.permute.xlu0 %3302  ;;  %v1880_v23 = vadd.f32 %v9393_v5, %v1855_v22  ;;  %v9633_v42 = vpack.c.b16 %v2045_v0, %v2044_v14  ;;  %v1997_v26 = vsel %vm1980_vm7, %v1975_v53, 0 }
 0x327   : > { %v1928_v15 = vpack.c.bf16 %v1880_v23, %v1880_v23  ;;  %v1896_v57 = vmul.f32 0.35355338, %v1880_v23  ;;  %v1994_v23 = vsel %vm1980_vm7, %v9579_v51, 0 }
 0x329   : > { %v2066_v30 = vunpack.c.l.b16 %v1928_v15  ;;  %v1912_v54 = vpack.c.bf16 %v1896_v57, %v1896_v57 }
 0x32b   : > { %v2046_v9 = vunpack.c.l.b16 %v1912_v54 }
 0x32c   : > { %2421 = vrot.lane.b32.xlu2 %v9581_v6, %s8685_s28  ;;  %2553 = vrot.lane.b32.xlu1 %v9609_v28, %s8686_s3  ;;  %v1857_v38 = vpop.f32.mrf.mxu0  ;;  %v9661_v59 = vpop.permute.xlu1 %2952 }
 0x32d   : > { %2897 = vrot.lane.b32.xlu0 %v9581_v6, %s8688_s30  ;;  %v9621_v63 = vpop.permute.xlu0 %2476  ;;  %v1881_v44 = vadd.f32 %v9393_v5, %v1857_v38 }
 0x32f   : > { %v1929_v33 = vpack.c.bf16 %v1881_v44, %v1881_v44  ;;  %v1897_v24 = vmul.f32 0.35355338, %v1881_v44 }
 0x331   : > { %v2067_v48 = vunpack.c.l.b16 %v1929_v33  ;;  %v1913_v62 = vpack.c.bf16 %v1897_v24, %v1897_v24  ;;  %v2506_v24 = vsel %vm1980_vm7, %v9566_v36, 0 }
 0x333   : > { %v9645_v52 = vpack.c.b16 %v2067_v48, %v2066_v30  ;;  %v2047_v3 = vunpack.c.l.b16 %v1913_v62  ;;  %v2509_v48 = vsel %vm1980_vm7, %v2487_v61, 0 }
 0x334   : > { %2543 = vrot.lane.b32.xlu2 %v9595_v49, %s8691_s8  ;;  %2899 = vrot.lane.b32.xlu1 %v9609_v28, %s8688_s30  ;;  %v9673_v16 = vpop.permute.xlu1 %3428 }
 0x335   : > { %3019 = vrot.lane.b32.xlu0 %v9595_v49, %s8687_s12  ;;  %v1977_v43 = vpop.permute.xlu0 %1976  ;;  %12820 = vst [vmem:[#allocation14_spill] sm:$0xff] %v9645_v52  ;;  %v9665_v29 = vpack.c.b16 %v2047_v3, %v2046_v9 }
 0x336   : > { %v2000_v1 = vsel %vm1980_vm7, %v1977_v43, 0 }
 0x33c   : > { %2423 = vrot.lane.b32.xlu2 %v9609_v28, %s8685_s28  ;;  %3021 = vrot.lane.b32.xlu1 %v9633_v42, %s8687_s12  ;;  %v2829_v22 = vpop.permute.xlu1 %2828 }
 0x33d   : > { %2076 = vrot.lane.b32.xlu0 %v9609_v28, %s8683_s11  ;;  %v9653_v58 = vpop.permute.xlu0 %2962 }
 0x344   : > { %2545 = vrot.lane.b32.xlu2 %v9633_v42, %s8691_s8  ;;  %2555 = vrot.lane.b32.xlu1 %v9645_v52, %s8686_s3  ;;  %v3305_v37 = vpop.permute.xlu1 %3304 }
 0x345   : > { %3029 = vrot.lane.b32.xlu0 %v9609_v28, %s8682_s1  ;;  %v9663_v10 = vpop.permute.xlu0 %3438 }
 0x34c   : > { %3497 = vrot.lane.b32.xlu2 %v9633_v42, %s8689_s25  ;;  %3031 = vrot.lane.b32.xlu1 %v9645_v52, %s8682_s1 }
 0x34d   : > { %3505 = vrot.lane.b32.xlu0 %v9609_v28, %s8684_s4  ;;  %v9675_v12 = vpop.permute.xlu0 %2478 }
 0x354   : > { %2425 = vrot.lane.b32.xlu1 %v9645_v52, %s8685_s28  ;;  %2078 = vrot.lane.b32.xlu2 %v9645_v52, %s8683_s11 }
 0x355   : > { %2547 = vrot.lane.b32.xlu0 %v9665_v29, %s8691_s8  ;;  %v9686_v34 = vpop.permute.xlu0 %2954 }
 0x35c   : > { %2901 = vrot.lane.b32.xlu1 %v9645_v52, %s8688_s30  ;;  %3507 = vrot.lane.b32.xlu2 %v9645_v52, %s8684_s4 }
 0x35d   : > { %v9691_v38 = vpop.permute.xlu0 %3430 }
 0x35e   : > { %v1979_v18 = vpop.permute.xlu2 %1978 }
 0x35f   : > { %v2003_v21 = vsel %vm1980_vm7, %v1979_v18, 0 }
 0x360   : > { %2009 = vmatpush.bf16.xpose.msra.mxu2 %v2003_v21 }
 0x364   : > { %3377 = vrot.lane.b32.xlu2 %v9645_v52, %s8690_s7  ;;  %3023 = vrot.lane.b32.xlu1 %v9665_v29, %s8687_s12 }
 0x366   : > { %v2965_v44 = vpop.permute.xlu2 %2964 }
 0x367   : > { %v2988_v36 = vsel %vm1980_vm7, %v2965_v44, 0 }
 0x368   : > { %2010 = vmatpush.bf16.xpose.msra.mxu2 %v2000_v1 }
 0x36c   : > { %3499 = vrot.lane.b32.xlu1 %v9665_v29, %s8689_s25 }
 0x36e   : > { %v3441_v30 = vpop.permute.xlu2 %3440 }
 0x370   : > { %2011 = vmatpush.bf16.xpose.msra.mxu2 %v1997_v26 }
 0x376   : > { %v2489_v0 = vpop.permute.xlu1 %2488 }
 0x377   : > { %v2355_v14 = vpop.permute.xlu0 %2354  ;;  %v2512_v33 = vsel %vm1980_vm7, %v2489_v0, 0 }
 0x378   : > { %2376 = vmatpush.bf16.msra.mxu3 %v2355_v14  ;;  %2012 = vmatpush.bf16.xpose.msra.mxu2 %v1994_v23 }
 0x379   : > { %2518 = vmatpush.bf16.xpose.msra.mxu1 %v2512_v33 }
 0x37c   : > { %2377 = vmatpush.bf16.msra.mxu3 %v2353_v20 }
 0x37e   : > { %v2831_v15 = vpop.permute.xlu1 %2830  ;;  %v1860_v43 = vpop.f32.mrf.mxu0 }
 0x37f   : > { %7617 = vmatmul.msk.bf16.vlgmr.msra.gmra.mxu2 %vm1980_vm7, %v9450_v11  ;;  %2852 = vmatpush.bf16.msrb.mxu0 %v2831_v15  ;;  %v1882_v51 = vadd.f32 %v9393_v5, %v1860_v43 }
 0x380   : > { %2378 = vmatpush.bf16.msra.mxu3 %v9630_v35  ;;  %v3307_v35 = vpop.permute.xlu2 %3306 }
 0x381   : > { %2519 = vmatpush.bf16.xpose.msra.mxu1 %v2509_v48  ;;  %v1930_v11 = vpack.c.bf16 %v1882_v51, %v1882_v51 }
 0x383   : > { %2853 = vmatpush.bf16.msrb.mxu0 %v2829_v22  ;;  %v2068_v61 = vunpack.c.l.b16 %v1930_v11  ;;  %v2957_v22 = vpop.permute.xlu0 %2956 }
 0x384   : > { %2379 = vmatpush.bf16.msra.mxu3 %v9589_v8 }
 0x386   : > { %v1862_v53 = vpop.f32.mrf.mxu0  ;;  %v2481_v54 = vpop.permute.xlu1 %2480 }
 0x387   : > { %2854 = vmatpush.bf16.msrb.mxu0 %v9643_v27  ;;  %v1883_v57 = vadd.f32 %v9393_v5, %v1862_v53  ;;  %v2503_v5 = vsel %vm1980_vm7, %v9597_v17, 0  ;;  %v2985_v17 = vsel %vm1980_vm7, %v9653_v58, 0  ;;  %v3464_v58 = vsel %vm1980_vm7, %v3441_v30, 0 }
 0x389   : > { %2520 = vmatpush.bf16.xpose.msra.mxu1 %v2506_v24  ;;  %v1931_v62 = vpack.c.bf16 %v1883_v57, %v1883_v57 }
 0x38b   : > { %2855 = vmatpush.bf16.msrb.mxu0 %v9605_v19  ;;  %v2069_v8 = vunpack.c.l.b16 %v1931_v62  ;;  %v1899_v19 = vmul.f32 0.35355338, %v1883_v57 }
 0x38d   : > { %v9708_v3 = vpack.c.b16 %v2069_v8, %v2068_v61  ;;  %v1915_v27 = vpack.c.bf16 %v1899_v19, %v1899_v19 }
 0x38e   : > { %v9722_v9 = vpop.permute.xlu1 %2074 }
 0x38f   : > { %3328 = vmatpush.bf16.msra.mxu0 %v3307_v35  ;;  %12821 = vst [vmem:[#allocation15_spill] sm:$0xff] %v9708_v3  ;;  %7618 = vmatmul.msk.bf16.gmra.mxu2 %vm1980_vm7, %v9506_v4  ;;  %v1898_v4 = vmul.f32 0.35355338, %v1882_v51 }
 0x390   : > { %3509 = vrot.lane.b32.xlu1 %v9708_v3, %s8684_s4  ;;  %2557 = vrot.lane.b32.xlu2 %v9708_v3, %s8686_s3  ;;  %s12879_s3 = sld [smem:[#allocation51_spill]] }
 0x391   : > { %2080 = vrot.lane.b32.xlu0 %v9708_v3, %s8683_s11  ;;  %2521 = vmatpush.bf16.xpose.msra.mxu1 %v2503_v5  ;;  %v1914_v20 = vpack.c.bf16 %v1898_v4, %v1898_v4 }
 0x393   : > { %3329 = vmatpush.bf16.msra.mxu0 %v3305_v37  ;;  %v2048_v18 = vunpack.c.l.b16 %v1914_v20  ;;  %v9758_v37 = vpop.permute.xlu0 %3432 }
 0x396   : > { %v9739_v21 = vpop.permute.xlu1 %3495 }
 0x397   : > { %3330 = vmatpush.bf16.msra.mxu0 %v9607_v25  ;;  %v2049_v25 = vunpack.c.l.b16 %v1915_v27 }
 0x398   : > { %2427 = vrot.lane.b32.xlu1 %v9708_v3, %s8685_s28  ;;  %3033 = vrot.lane.b32.xlu2 %v9708_v3, %s8682_s1  ;;  %s12878_s1 = sld [smem:[#allocation10_spill]]  ;;  %s12892_s28 = scalar_lea.vmem %s12694_s13, %s8857_s9 }
 0x399   : > { %2994 = vmatpush.bf16.xpose.msrb.mxu1 %v2988_v36  ;;  %2903 = vrot.lane.b32.xlu0 %v9708_v3, %s8688_s30 }
 0x39a   : > { %7633 = vmatmul.msk.bf16.vlgmr.msra.gmra.mxu1 %vm1980_vm7, %v9635_v56  ;;  %v2982_v56 = vsel %vm1980_vm7, %v9577_v55, 0  ;;  %v3461_v55 = vsel %vm1980_vm7, %v9663_v10, 0  ;;  %v3455_v10 = vsel %vm1980_vm7, %v9542_v39, 0 }
 0x39b   : > { %3331 = vmatpush.bf16.msra.mxu0 %v9619_v7  ;;  %v9735_v7 = vpack.c.b16 %v2049_v25, %v2048_v18 }
 0x39e   : > { %v9756_v1 = vpop.permute.xlu1 %2553 }
 0x39f   : > { %7619 = vmatmul.msk.bf16.gmra.mxu2 %vm1980_vm7, %v9527_v2  ;;  %v2979_v2 = vsel %vm1980_vm7, %v9569_v47, 0  ;;  %v3458_v47 = vsel %vm1980_vm7, %v9592_v45, 0 }
 0x3a0   : > { %2549 = vrot.lane.b32.xlu1 %v9735_v7, %s8691_s8 }
 0x3a1   : > { %2995 = vmatpush.bf16.xpose.msrb.mxu1 %v2985_v17  ;;  %3379 = vrot.lane.b32.xlu0 %v9708_v3, %s8690_s7 }
 0x3a6   : > { %v9764_v26 = vpop.permute.xlu1 %2899 }
 0x3a8   : > { %3025 = vrot.lane.b32.xlu1 %v9735_v7, %s8687_s12  ;;  %s12880_s12 = scalar_lea.vmem %s12879_s3, %s8857_s9  ;;  %s12895_s3 = scalar_lea.vmem %s12696_s15, %s8857_s9 }
 0x3a9   : > { %2996 = vmatpush.bf16.xpose.msrb.mxu1 %v2982_v56  ;;  %3501 = vrot.lane.b32.xlu0 %v9735_v7, %s8689_s25  ;;  %s12887_s25 = sld [smem:[#allocation52_spill]] }
 0x3aa   : > { %7634 = vmatmul.msk.bf16.gmra.mxu1 %vm1980_vm7, %v9621_v63  ;;  %v9766_v63 = vpop.permute.xlu0 %3027 }
 0x3ae   : > { %v9772_v0 = vpop.permute.xlu1 %3021 }
 0x3af   : > { %7620 = vmatmul.msk.bf16.gmra.mxu2 %vm1980_vm7, %v9557_v46  ;;  %v9776_v46 = vpop.permute.xlu2 %2551 }
 0x3b1   : > { %2997 = vmatpush.bf16.xpose.msrb.mxu1 %v2979_v2  ;;  %v2095_v2 = vsel %vm1980_vm7, %v9722_v9, 0 }
 0x3b2   : > { %v9774_v44 = vpop.permute.xlu0 %3503 }
 0x3b6   : > { %v2556_v14 = vpop.permute.xlu1 %2555 }
 0x3b7   : > { %v2578_v9 = vsel %vm1980_vm7, %v2556_v14, 0 }
 0x3b9   : > { %3470 = vmatpush.bf16.xpose.msra.mxu1 %v3464_v58 }
 0x3ba   : > { %7635 = vmatmul.msk.bf16.gmra.mxu1 %vm1980_vm7, %v9675_v12  ;;  %v9780_v23 = vpop.permute.xlu0 %2897  ;;  %v2422_v12 = vpop.permute.xlu2 %2421 }
 0x3be   : > { %v9783_v33 = vpop.permute.xlu1 %3031 }
 0x3c1   : > { %3471 = vmatpush.bf16.xpose.msra.mxu1 %v3461_v55 }
 0x3c2   : > { %v9785_v45 = vpop.permute.xlu0 %3019  ;;  %v9787_v15 = vpop.permute.xlu2 %2543 }
 0x3c6   : > { %v2426_v43 = vpop.permute.xlu1 %2425 }
 0x3c9   : > { %3472 = vmatpush.bf16.xpose.msra.mxu1 %v3458_v47 }
 0x3ca   : > { %7636 = vmatmul.msk.bf16.gmra.mxu1 %vm1980_vm7, %v2481_v54  ;;  %v2077_v48 = vpop.permute.xlu0 %2076  ;;  %v2424_v30 = vpop.permute.xlu2 %2423 }
 0x3cb   : > { %v2098_v17 = vsel %vm1980_vm7, %v2077_v48, 0 }
 0x3ce   : > { %v9791_v39 = vpop.permute.xlu1 %2901 }
 0x3d1   : > { %3473 = vmatpush.bf16.xpose.msra.mxu1 %v3455_v10 }
 0x3d2   : > { %v9793_v51 = vpop.permute.xlu0 %3029  ;;  %v9797_v53 = vpop.permute.xlu2 %2545 }
 0x3d6   : > { %v9799_v24 = vpop.permute.xlu1 %3023 }
 0x3da   : > { %7649 = vmatmul.msk.bf16.vlgmr.msrb.gmra.mxu1 %vm1980_vm7, %v9555_v13  ;;  %v9801_v11 = vpop.permute.xlu0 %3505  ;;  %v9803_v57 = vpop.permute.xlu2 %3497 }
 0x3de   : > { %v9807_v13 = vpop.permute.xlu1 %3499 }
 0x3e2   : > { %v9809_v35 = vpop.permute.xlu0 %2547  ;;  %v2079_v62 = vpop.permute.xlu2 %2078 }
 0x3e3   : > { %v2101_v4 = vsel %vm1980_vm7, %v2079_v62, 0 }
 0x3ea   : > { %7650 = vmatmul.msk.bf16.gmra.mxu1 %vm1980_vm7, %v9661_v59  ;;  %v9816_v5 = vpop.permute.xlu2 %3507 }
 0x3f2   : > { %v9826_v20 = vpop.permute.xlu2 %3377 }
 0x3f3   : > { %12822 = vst [vmem:[#allocation16_spill] sm:$0xff] %v9826_v20 }
 0x3fa   : > { %7651 = vmatmul.msk.bf16.gmra.mxu1 %vm1980_vm7, %v9686_v34  ;;  %v2558_v56 = vpop.permute.xlu2 %2557 }
 0x3fb   : > { %v2581_v58 = vsel %vm1980_vm7, %v2558_v56, 0 }
 0x402   : > { %v9811_v61 = vpop.f32.mrf.mxu2  ;;  %v9813_v54 = vpop.permute.xlu1 %3509 }
 0x403   : > { %v2081_v59 = vpop.permute.xlu0 %2080  ;;  %v2136_v47 = vsel %vm2135_vm8, %v9811_v61, -inf }
 0x404   : > { %v2104_v8 = vsel %vm1980_vm7, %v2081_v59, 0 }
 0x405   : > { %2110 = vmatpush.bf16.xpose.msrb.mxu2 %v2104_v8 }
 0x40a   : > { %7652 = vmatmul.msk.bf16.gmra.mxu1 %vm1980_vm7, %v2957_v22  ;;  %v9819_v36 = vpop.f32.mrf.mxu2  ;;  %v2428_v34 = vpop.permute.xlu1 %2427 }
 0x40b   : > { %v2139_v19 = vsel %vm2135_vm8, %v9819_v36, -inf  ;;  %2449 = vmatpush.bf16.msrb.mxu3 %v2428_v34  ;;  %v3034_v34 = vpop.permute.xlu2 %3033 }
 0x40c   : > { %2140 = vmax.xlane.f32.xlu1 %v2139_v19 }
 0x40d   : > { %2111 = vmatpush.bf16.xpose.msrb.mxu2 %v2101_v4 }
 0x40f   : > { %2450 = vmatpush.bf16.msrb.mxu3 %v2426_v43 }
 0x412   : > { %v9824_v27 = vpop.f32.mrf.mxu2 }
 0x413   : > { %2451 = vmatpush.bf16.msrb.mxu3 %v2424_v30  ;;  %v2142_v62 = vsel %vm2135_vm8, %v9824_v27, -inf }
 0x415   : > { %2112 = vmatpush.bf16.xpose.msrb.mxu2 %v2098_v17 }
 0x417   : > { %v9829_v25 = vpop.f32.mrf.mxu1  ;;  %2452 = vmatpush.bf16.msrb.mxu3 %v2422_v12 }
 0x418   : > { %v2612_v18 = vsel %vm2135_vm8, %v9829_v25, -inf }
 0x419   : > { %2613 = vmax.xlane.f32.xlu2 %v2612_v18  ;;  %v3054_v18 = vsel %vm1980_vm7, %v9783_v33, 0  ;;  %v3051_v33 = vsel %vm1980_vm7, %v9793_v51, 0 }
 0x41a   : > { %7665 = vmatmul.msk.bf16.vlgmr.msra.gmra.mxu1 %vm1980_vm7, %v9617_v31  ;;  %v9835_v22 = vpop.f32.mrf.mxu2 }
 0x41b   : > { %v2145_v59 = vsel %vm2135_vm8, %v9835_v22, -inf }
 0x41d   : > { %2113 = vmatpush.bf16.xpose.msrb.mxu2 %v2095_v2 }
 0x41f   : > { %v9840_v55 = vpop.f32.mrf.mxu1 }
 0x420   : > { %v2615_v43 = vsel %vm2135_vm8, %v9840_v55, -inf }
 0x421   : > { %2137 = vmax.xlane.f32.xlu2 %v2136_v47 }
 0x422   : > { %v9844_v10 = vpop.f32.mrf.mxu2 }
 0x423   : > { %v2148_v31 = vsel %vm2135_vm8, %v9844_v10, -inf }
 0x424   : > { %2149 = vmax.xlane.f32.xlu0 %v2148_v31  ;;  %7621 = vmatmul.msk.bf16.vlgmr.msrb.gmra.mxu2 %vm1980_vm7, %v9595_v49  ;;  %v2575_v49 = vsel %vm1980_vm7, %v9756_v1, 0  ;;  %v3057_v1 = vsel %vm1980_vm7, %v3034_v34, 0  ;;  %v3524_v34 = vsel %vm1980_vm7, %v9774_v44, 0 }
 0x425   : > { %2587 = vmatpush.bf16.xpose.msra.mxu2 %v2581_v58 }
 0x427   : > { %v9851_v12 = vpop.f32.mrf.mxu1 }
 0x428   : > { %v2618_v48 = vsel %vm2135_vm8, %v9851_v12, -inf }
 0x429   : > { %2616 = vmax.xlane.f32.xlu2 %v2615_v43  ;;  %2619 = vmax.xlane.f32.xlu1 %v2618_v48 }
 0x42a   : > { %7666 = vmatmul.msk.bf16.gmra.mxu1 %vm1980_vm7, %v9673_v16  ;;  %v9859_v30 = vpop.f32.mrf.mxu2  ;;  %v2572_v16 = vsel %vm1980_vm7, %v9776_v46, 0 }
 0x42b   : > { %v2151_v56 = vsel %vm2135_vm8, %v9859_v30, -inf }
 0x42d   : > { %2588 = vmatpush.bf16.xpose.msra.mxu2 %v2578_v9  ;;  %v3048_v9 = vsel %vm1980_vm7, %v9766_v63, 0  ;;  %v3533_v63 = vsel %vm1980_vm7, %v9813_v54, 0  ;;  %v3527_v54 = vsel %vm1980_vm7, %v9801_v11, 0  ;;  %v2550_v11 = vpop.permute.xlu1 %2549 }
 0x42f   : > { %v9863_v14 = vpop.f32.mrf.mxu1 }
 0x430   : > { %v2621_v4 = vsel %vm2135_vm8, %v9863_v14, -inf }
 0x431   : > { %2143 = vmax.xlane.f32.xlu2 %v2142_v62  ;;  %2146 = vmax.xlane.f32.xlu1 %v2145_v59  ;;  %v3530_v62 = vsel %vm1980_vm7, %v9816_v5, 0 }
 0x432   : > { %v9869_v8 = vpop.f32.mrf.mxu2 }
 0x433   : > { %v2154_v51 = vsel %vm2135_vm8, %v9869_v8, -inf }
 0x434   : > { %7622 = vmatmul.msk.bf16.gmra.mxu2 %vm1980_vm7, %v9633_v42 }
 0x435   : > { %2589 = vmatpush.bf16.xpose.msra.mxu2 %v2575_v49 }
 0x437   : > { %v9876_v19 = vpop.f32.mrf.mxu1 }
 0x438   : > { %v2624_v17 = vsel %vm2135_vm8, %v9876_v19, -inf }
 0x439   : > { %2622 = vmax.xlane.f32.xlu2 %v2621_v4  ;;  %2625 = vmax.xlane.f32.xlu1 %v2624_v17 }
 0x43a   : > { %7667 = vmatmul.msk.bf16.gmra.mxu1 %vm1980_vm7, %v9691_v38  ;;  %v9884_v42 = vpop.f32.mrf.mxu2 }
 0x43b   : > { %v2157_v2 = vsel %vm2135_vm8, %v9884_v42, -inf }
 0x43d   : > { %2590 = vmatpush.bf16.xpose.msra.mxu2 %v2572_v16 }
 0x43f   : > { %v9886_v46 = vpop.f32.mrf.mxu1 }
 0x440   : > { %v2627_v58 = vsel %vm2135_vm8, %v9886_v46, -inf }
 0x441   : > { %2152 = vmax.xlane.f32.xlu2 %v2151_v56  ;;  %2158 = vmax.xlane.f32.xlu1 %v2157_v2 }
 0x442   : > { %2628 = vmax.xlane.f32.xlu0 %v2627_v58 }
 0x444   : > { %7623 = vmatmul.msk.bf16.gmra.mxu2 %vm1980_vm7, %v9665_v29 }
 0x445   : > { %3063 = vmatpush.bf16.xpose.msrb.mxu2 %v3057_v1 }
 0x447   : > { %v9898_v38 = vpop.f32.mrf.mxu1 }
 0x448   : > { %v2630_v47 = vsel %vm2135_vm8, %v9898_v38, -inf }
 0x44a   : > { %2631 = vmax.xlane.f32.xlu0 %v2630_v47  ;;  %7668 = vmatmul.msk.bf16.gmra.mxu1 %vm1980_vm7, %v9758_v37 }
 0x44d   : > { %3064 = vmatpush.bf16.xpose.msrb.mxu2 %v3054_v18 }
 0x44f   : > { %v9906_v31 = vpop.f32.mrf.mxu1 }
 0x450   : > { %v2633_v29 = vsel %vm2135_vm8, %v9906_v31, -inf }
 0x451   : > { %2634 = vmax.xlane.f32.xlu2 %v2633_v29 }
 0x452   : > { %2155 = vmax.xlane.f32.xlu0 %v2154_v51 }
 0x454   : > { %7624 = vmatmul.msk.bf16.gmra.mxu2 %vm1980_vm7, %v9735_v7 }
 0x455   : > { %3065 = vmatpush.bf16.xpose.msrb.mxu2 %v3051_v33 }
 0x457   : > { %v9916_v43 = vpop.f32.mrf.mxu1 }
 0x458   : > { %v3088_v37 = vsel %vm2135_vm8, %v9916_v43, -inf }
 0x459   : > { %3089 = vmax.xlane.f32.xlu1 %v3088_v37 }
 0x45d   : > { %3066 = vmatpush.bf16.xpose.msrb.mxu2 %v3048_v9 }
 0x45f   : > { %v9920_v48 = vpop.f32.mrf.mxu1 }
 0x460   : > { %v3091_v2 = vsel %vm2135_vm8, %v9920_v48, -inf }
 0x464   : > { %7637 = vmatmul.msk.bf16.vlgmr.msra.gmra.mxu2 %vm1980_vm7, %v9787_v15 }
 0x465   : > { %3539 = vmatpush.bf16.xpose.msra.mxu2 %v3533_v63 }
 0x467   : > { %v9926_v49 = vpop.f32.mrf.mxu1 }
 0x468   : > { %v3094_v7 = vsel %vm2135_vm8, %v9926_v49, -inf }
 0x469   : > { %3095 = vmax.xlane.f32.xlu1 %v3094_v7 }
 0x46d   : > { %3540 = vmatpush.bf16.xpose.msra.mxu2 %v3530_v62 }
 0x46f   : > { %v9932_v59 = vpop.f32.mrf.mxu1 }
 0x470   : > { %v3097_v29 = vsel %vm2135_vm8, %v9932_v59, -inf }
 0x474   : > { %7638 = vmatmul.msk.bf16.gmra.mxu2 %vm1980_vm7, %v9797_v53 }
 0x475   : > { %3541 = vmatpush.bf16.xpose.msra.mxu2 %v3527_v54 }
 0x477   : > { %v9938_v15 = vpop.f32.mrf.mxu1 }
 0x478   : > { %v3100_v62 = vsel %vm2135_vm8, %v9938_v15, -inf }
 0x47d   : > { %3542 = vmatpush.bf16.xpose.msra.mxu2 %v3524_v34 }
 0x47f   : > { %v9942_v16 = vpop.f32.mrf.mxu1 }
 0x480   : > { %v3103_v7 = vsel %vm2135_vm8, %v9942_v16, -inf }
 0x484   : > { %7639 = vmatmul.msk.bf16.gmra.mxu2 %vm1980_vm7, %v9809_v35 }
 0x487   : > { %v9946_v5 = vpop.f32.mrf.mxu1 }
 0x488   : > { %v3106_v53 = vsel %vm2135_vm8, %v9946_v5, -inf }
 0x489   : > { %3107 = vmax.xlane.f32.xlu1 %v3106_v53 }
 0x48c   : > { %v2614_v56 = vpop.xlane.xlu2 %2613 }
 0x48f   : > { %v9950_v1 = vpop.f32.mrf.mxu1 }
 0x490   : > { %12823 = vst [vmem:[#allocation17_spill] sm:$0xff] %v9950_v1 }
 0x494   : > { %7640 = vmatmul.msk.bf16.gmra.mxu2 %vm1980_vm7, %v2550_v11  ;;  %v2138_v47 = vpop.xlane.xlu2 %2137 }
 0x497   : > { %v9953_v4 = vpop.f32.mrf.mxu1 }
 0x498   : > { %v3564_v44 = vsel %vm2135_vm8, %v9953_v4, -inf }
 0x499   : > { %3565 = vmax.xlane.f32.xlu1 %v3564_v44  ;;  %v3026_v44 = vpop.permute.xlu1 %3025 }
 0x49c   : > { %v2617_v37 = vpop.xlane.xlu2 %2616 }
 0x49f   : > { %v9990_v54 = vpop.f32.mrf.mxu1 }
 0x4a0   : > { %12824 = vst [vmem:[#allocation18_spill] sm:$0xff] %v9990_v54 }
 0x4a4   : > { %7653 = vmatmul.msk.bf16.vlgmr.msrb.gmra.mxu2 %vm1980_vm7, %v9785_v45  ;;  %v2144_v11 = vpop.xlane.xlu2 %2143 }
 0x4a7   : > { %v9959_v35 = vpop.f32.mrf.mxu2 }
 0x4a8   : > { %v2160_v17 = vsel %vm2135_vm8, %v9959_v35, -inf }
 0x4a9   : > { %2161 = vmax.xlane.f32.xlu0 %v2160_v17  ;;  %v9998_v17 = vpop.f32.mrf.mxu1 }
 0x4af   : > { %v9963_v18 = vpop.f32.mrf.mxu2 }
 0x4b0   : > { %v2163_v58 = vsel %vm2135_vm8, %v9963_v18, -inf }
 0x4b1   : > { %3092 = vmax.xlane.f32.xlu0 %v3091_v2  ;;  %2164 = vmax.xlane.f32.xlu2 %v2163_v58 }
 0x4b4   : > { %7654 = vmatmul.msk.bf16.gmra.mxu2 %vm1980_vm7, %v9772_v0  ;;  %v2661_v0 = vsub.f32 %v9840_v55, %v2617_v37  ;;  %v10009_v37 = vpop.xlane.xlu2 %2622 }
 0x4b6   : > { %v2678_v34 = vmul.f32 1.442695, %v2661_v0  ;;  %v10011_v0 = vpop.f32.mrf.mxu1 }
 0x4b7   : > { %v9971_v45 = vpop.f32.mrf.mxu2 }
 0x4b8   : > { %v2166_v33 = vsel %vm2135_vm8, %v9971_v45, -inf  ;;  %8070 = vpow2.f32 %v2678_v34  ;;  %v10016_v34 = vpop.permute.xlu0 %2903 }
 0x4b9   : > { %2167 = vmax.xlane.f32.xlu2 %v2166_v33 }
 0x4bc   : > { %v10025_v52 = vpop.xlane.xlu2 %2152 }
 0x4be   : > { %v10001_v2 = vpop.eup %8070 }
 0x4bf   : > { %v9975_v9 = vpop.f32.mrf.mxu2  ;;  %v2711_v33 = vsel %vm2135_vm8, %v10001_v2, 0.0 }
 0x4c0   : > { %v2169_v51 = vsel %vm2135_vm8, %v9975_v9, -inf }
 0x4c1   : > { %3098 = vmax.xlane.f32.xlu2 %v3097_v29  ;;  %2170 = vmax.xlane.f32.xlu0 %v2169_v51  ;;  %v2141_v51 = vpop.xlane.xlu1 %2140 }
 0x4c4   : > { %7655 = vmatmul.msk.bf16.gmra.mxu2 %vm1980_vm7, %v9799_v24  ;;  %v3109_v24 = vsel %vm2135_vm8, %v9950_v1, -inf }
 0x4c7   : > { %v9984_v63 = vpop.f32.mrf.mxu2 }
 0x4c8   : > { %v2172_v55 = vsel %vm2135_vm8, %v9984_v63, -inf }
 0x4c9   : > { %3104 = vmax.xlane.f32.xlu2 %v3103_v7  ;;  %3101 = vmax.xlane.f32.xlu0 %v3100_v62  ;;  %v2186_v7 = vsub.f32 %v9824_v27, %v2144_v11  ;;  %v10029_v27 = vpop.f32.mrf.mxu1  ;;  %v3570_v11 = vsel %vm2135_vm8, %v9998_v17, -inf }
 0x4ca   : > { %12826 = vst [vmem:[#allocation20_spill] sm:$0xff] %v10029_v27 }
 0x4cf   : > { %v9992_v53 = vpop.f32.mrf.mxu2 }
 0x4d0   : > { %v2175_v29 = vsel %vm2135_vm8, %v9992_v53, -inf }
 0x4d1   : > { %3110 = vmax.xlane.f32.xlu2 %v3109_v24  ;;  %2173 = vmax.xlane.f32.xlu0 %v2172_v55  ;;  %v2660_v24 = vsub.f32 %v9829_v25, %v2614_v56  ;;  %v3567_v55 = vsel %vm2135_vm8, %v9990_v54, -inf  ;;  %v2184_v56 = vsub.f32 %v9811_v61, %v2138_v47 }
 0x4d3   : > { %v2676_v41 = vmul.f32 1.442695, %v2660_v24 }
 0x4d4   : > { %7656 = vmatmul.msk.bf16.gmra.mxu2 %vm1980_vm7, %v3026_v44 }
 0x4d7   : > { %v10003_v58 = vpop.f32.mrf.mxu2 }
 0x4d8   : > { %v2178_v44 = vsel %vm2135_vm8, %v10003_v58, -inf }
 0x4d9   : > { %2712 = vadd.xlane.f32.xlu2 %v2711_v33  ;;  %2176 = vmax.xlane.f32.xlu0 %v2175_v29  ;;  %v10023_v33 = vpop.xlane.xlu1 %2619  ;;  %v2204_v29 = vmul.f32 1.442695, %v2186_v7 }
 0x4db   : > { %8072 = vpow2.f32 %v2204_v29  ;;  %v2635_v29 = vpop.xlane.xlu2 %2634 }
 0x4dc   : > { %8074 = vpow2.f32 %v2676_v41  ;;  %v2667_v3 = vsub.f32 %v9906_v31, %v2635_v29 }
 0x4df   : > { %v10014_v62 = vpop.f32.mrf.mxu2 }
 0x4e0   : > { %12825 = vst [vmem:[#allocation19_spill] sm:$0xff] %v10014_v62  ;;  %v2181_v24 = vsel %vm2135_vm8, %v10014_v62, -inf }
 0x4e1   : > { %3568 = vmax.xlane.f32.xlu2 %v3567_v55  ;;  %2179 = vmax.xlane.f32.xlu0 %v2178_v44  ;;  %v2147_v55 = vpop.xlane.xlu1 %2146  ;;  %v2200_v44 = vmul.f32 1.442695, %v2184_v56  ;;  %v10042_v41 = vpop.eup %8072 }
 0x4e2   : > { %v10044_v61 = vpop.eup %8074  ;;  %v2187_v47 = vsub.f32 %v9835_v22, %v2147_v55 }
 0x4e3   : > { %8076 = vpow2.f32 %v2200_v44  ;;  %v2708_v56 = vsel %vm2135_vm8, %v10044_v61, 0.0 }
 0x4e4   : > { %7669 = vmatmul.msk.bf16.vlgmr.msra.gmra.mxu2 %vm1980_vm7, %v9739_v21  ;;  %v10040_v21 = vpop.permute.xlu0 %3379  ;;  %v2206_v20 = vmul.f32 1.442695, %v2187_v47 }
 0x4e5   : > { %12827 = vst [vmem:[#allocation21_spill] sm:$0xff] %v10040_v21  ;;  %v2690_v21 = vmul.f32 1.442695, %v2667_v3 }
 0x4e6   : > { %8078 = vpow2.f32 %v2206_v20 }
 0x4e7   : > { %v10031_v25 = vpop.f32.mrf.mxu2  ;;  %8080 = vpow2.f32 %v2690_v21 }
 0x4e8   : > { %v2636_v7 = vsel %vm2135_vm8, %v10031_v25, -inf }
 0x4e9   : > { %3571 = vmax.xlane.f32.xlu2 %v3570_v11  ;;  %2637 = vmax.xlane.f32.xlu1 %v2636_v7  ;;  %v2185_v11 = vsub.f32 %v9819_v36, %v2141_v51  ;;  %v2238_v7 = vsel %vm2135_vm8, %v10042_v41, 0.0  ;;  %v10059_v31 = vpop.eup %8076 }
 0x4ea   : > { %2182 = vmax.xlane.f32.xlu0 %v2181_v24  ;;  %v10053_v24 = vpop.f32.mrf.mxu1  ;;  %v2232_v3 = vsel %vm2135_vm8, %v10059_v31, 0.0 }
 0x4eb   : > { %v2202_v55 = vmul.f32 1.442695, %v2185_v11  ;;  %v3579_v51 = vsel %vm2135_vm8, %v10053_v24, -inf }
 0x4ec   : > { %v3502_v22 = vpop.permute.xlu0 %3501  ;;  %v10071_v29 = vpop.eup %8078 }
 0x4ed   : > { %8082 = vpow2.f32 %v2202_v55  ;;  %v10073_v21 = vpop.eup %8080 }
 0x4ee   : > { %12831 = vst [vmem:[#allocation25_spill] sm:$0xff] %v10073_v21  ;;  %v2729_v55 = vsel %vm2135_vm8, %v10073_v21, 0.0 }
 0x4ef   : > { %v10048_v60 = vpop.f32.mrf.mxu2 }
 0x4f0   : > { %12828 = vst [vmem:[#allocation22_spill] sm:$0xff] %v10048_v60 }
 0x4f1   : > { %2239 = vadd.xlane.f32.xlu1 %v2238_v7 }
 0x4f2   : > { %2709 = vadd.xlane.f32.xlu0 %v2708_v56  ;;  %v2662_v56 = vsub.f32 %v9851_v12, %v10023_v33 }
 0x4f3   : > { %v10075_v47 = vpop.eup %8082 }
 0x4f4   : > { %7670 = vmatmul.msk.bf16.gmra.mxu2 %vm1980_vm7, %v9803_v57  ;;  %v10069_v57 = vpop.f32.mrf.mxu1  ;;  %v2150_v20 = vpop.xlane.xlu0 %2149 }
 0x4f5   : > { %12830 = vst [vmem:[#allocation24_spill] sm:$0xff] %v10069_v57  ;;  %v2188_v11 = vsub.f32 %v9844_v10, %v2150_v20 }
 0x4f7   : > { %v10061_v36 = vpop.f32.mrf.mxu2 }
 0x4f8   : > { %12829 = vst [vmem:[#allocation23_spill] sm:$0xff] %v10061_v36  ;;  %v2642_v44 = vsel %vm2135_vm8, %v10061_v36, -inf  ;;  %v2680_v36 = vmul.f32 1.442695, %v2662_v56 }
 0x4f9   : > { %3580 = vmax.xlane.f32.xlu1 %v3579_v51  ;;  %2643 = vmax.xlane.f32.xlu2 %v2642_v44  ;;  %v2241_v51 = vsel %vm2135_vm8, %v10071_v29, 0.0  ;;  %v2235_v44 = vsel %vm2135_vm8, %v10075_v47, 0.0 }
 0x4fa   : > { %2233 = vadd.xlane.f32.xlu0 %v2232_v3  ;;  %v2208_v3 = vmul.f32 1.442695, %v2188_v11  ;;  %v3576_v11 = vsel %vm2135_vm8, %v10029_v27, -inf }
 0x4fc   : > { %v2629_v10 = vpop.xlane.xlu0 %2628  ;;  %v10090_v20 = vpop.f32.mrf.mxu1  ;;  %8084 = vpow2.f32 %v2208_v3 }
 0x4fd   : > { %12833 = vst [vmem:[#allocation27_spill] sm:$0xff] %v10090_v20  ;;  %v2665_v12 = vsub.f32 %v9886_v46, %v2629_v10  ;;  %8086 = vpow2.f32 %v2680_v36 }
 0x4ff   : > { %v10078_v7 = vpop.f32.mrf.mxu2  ;;  %v2686_v56 = vmul.f32 1.442695, %v2665_v12 }
 0x500   : > { %12832 = vst [vmem:[#allocation26_spill] sm:$0xff] %v10078_v7 }
 0x501   : > { %2730 = vadd.xlane.f32.xlu1 %v2729_v55  ;;  %2242 = vadd.xlane.f32.xlu2 %v2241_v51  ;;  %v2663_v55 = vsub.f32 %v9863_v14, %v10009_v37  ;;  %v3585_v51 = vsel %vm2135_vm8, %v10090_v20, -inf  ;;  %v2189_v14 = vsub.f32 %v9859_v30, %v10025_v52  ;;  %8088 = vpow2.f32 %v2686_v56 }
 0x502   : > { %2236 = vadd.xlane.f32.xlu0 %v2235_v44  ;;  %v10103_v44 = vpop.eup %8084 }
 0x503   : > { %v2682_v46 = vmul.f32 1.442695, %v2663_v55  ;;  %v10105_v36 = vpop.eup %8086  ;;  %v2244_v10 = vsel %vm2135_vm8, %v10103_v44, 0.0  ;;  %v2210_v12 = vmul.f32 1.442695, %v2189_v14  ;;  %v2626_v14 = vpop.xlane.xlu1 %2625 }
 0x504   : > { %7671 = vmatmul.msk.bf16.gmra.mxu2 %vm1980_vm7, %v9807_v13  ;;  %v2639_v13 = vsel %vm2135_vm8, %v10048_v60, -inf  ;;  %v2632_v3 = vpop.xlane.xlu0 %2631 }
 0x505   : > { %8090 = vpow2.f32 %v2682_v46 }
 0x506   : > { %8092 = vpow2.f32 %v2210_v12  ;;  %v3573_v12 = vsel %vm2135_vm8, %v10011_v0, -inf }
 0x507   : > { %v10093_v33 = vpop.f32.mrf.mxu2  ;;  %v10116_v55 = vpop.eup %8088 }
 0x508   : > { %12834 = vst [vmem:[#allocation28_spill] sm:$0xff] %v10093_v33  ;;  %v2723_v30 = vsel %vm2135_vm8, %v10116_v55, 0.0 }
 0x509   : > { %3586 = vmax.xlane.f32.xlu1 %v3585_v51  ;;  %3577 = vmax.xlane.f32.xlu2 %v3576_v11  ;;  %v2714_v51 = vsel %vm2135_vm8, %v10105_v36, 0.0 }
 0x50a   : > { %2640 = vmax.xlane.f32.xlu0 %v2639_v13 }
 0x50b   : > { %v10118_v11 = vpop.eup %8090  ;;  %v2159_v62 = vpop.xlane.xlu1 %2158 }
 0x50c   : > { %v2717_v13 = vsel %vm2135_vm8, %v10118_v11, 0.0  ;;  %v2156_v56 = vpop.xlane.xlu0 %2155  ;;  %v10126_v46 = vpop.eup %8092 }
 0x50f   : > { %v10109_v37 = vpop.f32.mrf.mxu2 }
 0x510   : > { %12835 = vst [vmem:[#allocation29_spill] sm:$0xff] %v10109_v37 }
 0x511   : > { %2245 = vadd.xlane.f32.xlu2 %v2244_v10  ;;  %v2664_v10 = vsub.f32 %v9876_v19, %v2626_v14  ;;  %v2651_v19 = vsel %vm2135_vm8, %v10109_v37, -inf  ;;  %v2645_v14 = vsel %vm2135_vm8, %v10078_v7, -inf }
 0x512   : > { %2715 = vadd.xlane.f32.xlu0 %v2714_v51  ;;  %v2247_v51 = vsel %vm2135_vm8, %v10126_v46, 0.0 }
 0x514   : > { %7672 = vmatmul.msk.bf16.gmra.mxu2 %vm1980_vm7, %v3502_v22 }
 0x517   : > { %v10120_v52 = vpop.f32.mrf.mxu2 }
 0x518   : > { %12836 = vst [vmem:[#allocation30_spill] sm:$0xff] %v10120_v52 }
 0x519   : > { %2724 = vadd.xlane.f32.xlu2 %v2723_v30  ;;  %v2684_v30 = vmul.f32 1.442695, %v2664_v10 }
 0x51a   : > { %2718 = vadd.xlane.f32.xlu0 %v2717_v13  ;;  %v2190_v13 = vsub.f32 %v9869_v8, %v2156_v56  ;;  %v2666_v56 = vsub.f32 %v9898_v38, %v2632_v3 }
 0x51b   : > { %8094 = vpow2.f32 %v2684_v30 }
 0x51c   : > { %v10135_v20 = vpop.xlane.xlu0 %2161  ;;  %v2688_v37 = vmul.f32 1.442695, %v2666_v56 }
 0x51f   : > { %v10128_v22 = vpop.f32.mrf.mxu2 }
 0x520   : > { %12837 = vst [vmem:[#allocation31_spill] sm:$0xff] %v10128_v22 }
 0x521   : > { %2248 = vadd.xlane.f32.xlu2 %v2247_v51  ;;  %v2212_v51 = vmul.f32 1.442695, %v2190_v13  ;;  %v10148_v10 = vpop.eup %8094 }
 0x522   : > { %3574 = vmax.xlane.f32.xlu0 %v3573_v12  ;;  %v2720_v13 = vsel %vm2135_vm8, %v10148_v10, 0.0 }
 0x523   : > { %8096 = vpow2.f32 %v2212_v51 }
 0x524   : > { %v2165_v27 = vpop.xlane.xlu2 %2164  ;;  %v10144_v1 = vpop.xlane.xlu0 %3092  ;;  %8098 = vpow2.f32 %v2688_v37 }
 0x527   : > { %v10138_v60 = vpop.f32.mrf.mxu2 }
 0x528   : > { %12838 = vst [vmem:[#allocation32_spill] sm:$0xff] %v10138_v60 }
 0x529   : > { %2652 = vmax.xlane.f32.xlu2 %v2651_v19  ;;  %v3582_v19 = vsel %vm2135_vm8, %v10069_v57, -inf  ;;  %v10161_v54 = vpop.eup %8096  ;;  %v2191_v57 = vsub.f32 %v9884_v42, %v2159_v62  ;;  %v2654_v62 = vsel %vm2135_vm8, %v10120_v52, -inf }
 0x52a   : > { %2646 = vmax.xlane.f32.xlu0 %v2645_v14  ;;  %v3090_v14 = vpop.xlane.xlu1 %3089 }
 0x52b   : > { %v3136_v3 = vsub.f32 %v9916_v43, %v3090_v14  ;;  %v10174_v43 = vpop.eup %8098 }
 0x52c   : > { %v10146_v12 = vpop.xlane.xlu2 %2167  ;;  %v2726_v37 = vsel %vm2135_vm8, %v10174_v43, 0.0 }
 0x52d   : > { %v3152_v56 = vmul.f32 1.442695, %v3136_v3  ;;  %v2193_v3 = vsub.f32 %v9963_v18, %v2165_v27  ;;  %v3112_v27 = vsel %vm2135_vm8, %v10138_v60, -inf }
 0x52f   : > { %v10150_v8 = vpop.f32.mrf.mxu2 }
 0x530   : > { %12839 = vst [vmem:[#allocation33_spill] sm:$0xff] %v10150_v8  ;;  %v3115_v30 = vsel %vm2135_vm8, %v10150_v8, -inf }
 0x531   : > { %3116 = vmax.xlane.f32.xlu1 %v3115_v30  ;;  %3583 = vmax.xlane.f32.xlu2 %v3582_v19  ;;  %v2250_v30 = vsel %vm2135_vm8, %v10161_v54, 0.0  ;;  %v2648_v19 = vsel %vm2135_vm8, %v10093_v33, -inf }
 0x532   : > { %2721 = vadd.xlane.f32.xlu0 %v2720_v13  ;;  %v2214_v13 = vmul.f32 1.442695, %v2191_v57 }
 0x534   : > { %v10159_v7 = vpop.xlane.xlu2 %3098  ;;  %v2171_v51 = vpop.xlane.xlu0 %2170 }
 0x535   : > { %v2195_v38 = vsub.f32 %v9975_v9, %v2171_v51 }
 0x537   : > { %v2222_v8 = vmul.f32 1.442695, %v2195_v38 }
 0x539   : > { %2251 = vadd.xlane.f32.xlu2 %v2250_v30  ;;  %8100 = vpow2.f32 %v2222_v8  ;;  %v2192_v30 = vsub.f32 %v9959_v35, %v10135_v20  ;;  %v3137_v35 = vsub.f32 %v9920_v48, %v10144_v1  ;;  %v2657_v20 = vsel %vm2135_vm8, %v10128_v22, -inf  ;;  %v10216_v1 = vpop.f32.mrf.mxu2 }
 0x53a   : > { %2649 = vmax.xlane.f32.xlu0 %v2648_v19  ;;  %8102 = vpow2.f32 %v3152_v56  ;;  %v2194_v48 = vsub.f32 %v9971_v45, %v10146_v12  ;;  %12842 = vst [vmem:[#allocation36_spill] sm:$0xff] %v10216_v1 }
 0x53b   : > { %8104 = vpow2.f32 %v2214_v13  ;;  %v2218_v13 = vmul.f32 1.442695, %v2193_v3 }
 0x53c   : > { %v10170_v21 = vpop.xlane.xlu2 %3104  ;;  %v10172_v9 = vpop.xlane.xlu0 %3101 }
 0x53d   : > { %8106 = vpow2.f32 %v2218_v13 }
 0x53f   : > { %v10176_v42 = vpop.eup %8100 }
 0x540   : > { %12840 = vst [vmem:[#allocation34_spill] sm:$0xff] %v10176_v42  ;;  %v2265_v57 = vsel %vm2135_vm8, %v10176_v42, 0.0  ;;  %v10186_v14 = vpop.eup %8102 }
 0x541   : > { %2655 = vmax.xlane.f32.xlu2 %v2654_v62  ;;  %2266 = vadd.xlane.f32.xlu1 %v2265_v57  ;;  %12841 = vst [vmem:[#allocation35_spill] sm:$0xff] %v10186_v14  ;;  %v10188_v51 = vpop.eup %8104  ;;  %v3184_v19 = vsel %vm2135_vm8, %v10186_v14, 0.0  ;;  %v3096_v62 = vpop.xlane.xlu1 %3095 }
 0x542   : > { %2727 = vadd.xlane.f32.xlu0 %v2726_v37  ;;  %v2253_v56 = vsel %vm2135_vm8, %v10188_v51, 0.0  ;;  %v2216_v37 = vmul.f32 1.442695, %v2192_v30  ;;  %v3138_v52 = vsub.f32 %v9926_v49, %v3096_v62  ;;  %v3154_v30 = vmul.f32 1.442695, %v3137_v35 }
 0x544   : > { %v10184_v8 = vpop.xlane.xlu0 %2173  ;;  %v10190_v38 = vpop.xlane.xlu2 %3110  ;;  %8108 = vpow2.f32 %v2216_v37  ;;  %v3156_v3 = vmul.f32 1.442695, %v3138_v52  ;;  %v2220_v37 = vmul.f32 1.442695, %v2194_v48 }
 0x546   : > { %8110 = vpow2.f32 %v3156_v3  ;;  %v10236_v3 = vpop.f32.mrf.mxu2 }
 0x547   : > { %8112 = vpow2.f32 %v3154_v30 }
 0x548   : > { %8114 = vpow2.f32 %v2220_v37 }
 0x549   : > { %3185 = vadd.xlane.f32.xlu2 %v3184_v19  ;;  %v10238_v30 = vpop.xlane.xlu1 %3107 }
 0x54a   : > { %2254 = vadd.xlane.f32.xlu0 %v2253_v56  ;;  %v10210_v56 = vpop.eup %8106 }
 0x54b   : > { %v10212_v49 = vpop.eup %8108  ;;  %v2259_v13 = vsel %vm2135_vm8, %v10210_v56, 0.0 }
 0x54c   : > { %v10199_v57 = vpop.xlane.xlu0 %2176  ;;  %v2713_v18 = vpop.xlane.xlu2 %2712  ;;  %v2256_v52 = vsel %vm2135_vm8, %v10212_v49, 0.0 }
 0x54d   : > { %v10226_v35 = vpop.eup %8110  ;;  %8116 = vrcp.f32 %v2713_v18  ;;  %v3139_v18 = vsub.f32 %v9932_v59, %v10159_v7  ;;  %v3118_v59 = vsel %vm2135_vm8, %v10216_v1, -inf }
 0x54e   : > { %12843 = vst [vmem:[#allocation37_spill] sm:$0xff] %v10226_v35  ;;  %v10230_v12 = vpop.eup %8112 }
 0x54f   : > { %12844 = vst [vmem:[#allocation38_spill] sm:$0xff] %v10230_v12  ;;  %v10242_v48 = vpop.eup %8114 }
 0x550   : > { %12845 = vst [vmem:[#allocation39_spill] sm:$0xff] %v10242_v48  ;;  %v2262_v37 = vsel %vm2135_vm8, %v10242_v48, 0.0 }
 0x551   : > { %3113 = vmax.xlane.f32.xlu2 %v3112_v27  ;;  %v3190_v27 = vsel %vm2135_vm8, %v10226_v35, 0.0  ;;  %v3566_v60 = vpop.xlane.xlu1 %3565  ;;  %v10249_v35 = vpop.f32.mrf.mxu2 }
 0x552   : > { %2658 = vmax.xlane.f32.xlu0 %v2657_v20  ;;  %v3187_v20 = vsel %vm2135_vm8, %v10230_v12, 0.0 }
 0x554   : > { %v10208_v19 = vpop.xlane.xlu0 %2179  ;;  %v10222_v62 = vpop.xlane.xlu2 %3568 }
 0x559   : > { %2260 = vadd.xlane.f32.xlu2 %v2259_v13 }
 0x55a   : > { %2257 = vadd.xlane.f32.xlu0 %v2256_v52  ;;  %3782 = vrot.lane.b32.xlu1 %v9546_v40, %s8692_s26  ;;  %v8117_v52 = vpop.eup %8116 }
 0x55c   : > { %v10240_v40 = vpop.xlane.xlu2 %3571 }
 0x55d   : > { %v10228_v45 = vpop.xlane.xlu0 %2182 }
 0x561   : > { %3191 = vadd.xlane.f32.xlu2 %v3190_v27  ;;  %v2773_v27 = vmul.f32 %v8117_v52, %v10001_v2 }
 0x562   : > { %3188 = vadd.xlane.f32.xlu0 %v3187_v20  ;;  %v3158_v20 = vmul.f32 1.442695, %v3139_v18  ;;  %v2638_v18 = vpop.xlane.xlu1 %2637 }
 0x563   : > { %v2789_v42 = vpack.c.bf16 %v2773_v27, %v2773_v27 }
 0x565   : > { %v2710_v13 = vpop.xlane.xlu0 %2709  ;;  %v2813_v7 = vunpack.c.l.b16 %v2789_v42 }
 0x566   : > { %8118 = vrcp.f32 %v2710_v13 }
 0x567   : > { %8120 = vpow2.f32 %v3158_v20 }
 0x569   : > { %2263 = vadd.xlane.f32.xlu2 %v2262_v37 }
 0x56c   : > { %v8119_v22 = vpop.eup %8118  ;;  %v10251_v33 = vpop.xlane.xlu2 %2643 }
 0x56d   : > { %12846 = vst [vmem:[#allocation40_spill] sm:$0xff] %v10251_v33  ;;  %v2772_v12 = vmul.f32 %v8119_v22, %v10044_v61  ;;  %v2234_v13 = vpop.xlane.xlu0 %2233  ;;  %v10256_v48 = vpop.eup %8120 }
 0x56e   : > { %8122 = vrcp.f32 %v2234_v13  ;;  %12847 = vst [vmem:[#allocation41_spill] sm:$0xff] %v10256_v48  ;;  %v10259_v33 = vpop.f32.mrf.mxu2  ;;  %v3193_v22 = vsel %vm2135_vm8, %v10256_v48, 0.0  ;;  %v2240_v13 = vpop.xlane.xlu1 %2239 }
 0x56f   : > { %v2788_v14 = vpack.c.bf16 %v2772_v12, %v2772_v12 }
 0x571   : > { %3119 = vmax.xlane.f32.xlu2 %v3118_v59  ;;  %v2812_v2 = vunpack.c.l.b16 %v2788_v14 }
 0x573   : > { %v2820_v52 = vpack.c.b16 %v2813_v7, %v2812_v2 }
 0x574   : > { %v2243_v37 = vpop.xlane.xlu2 %2242  ;;  %v8123_v61 = vpop.eup %8122 }
 0x575   : > { %7641 = vmatmul.msk.bf16.vlgmr.msrb.gmra.mxu0 %vm2135_vm8, %v2820_v52  ;;  %v2237_v27 = vpop.xlane.xlu0 %2236  ;;  %v2296_v42 = vmul.f32 %v8123_v61, %v10059_v31  ;;  %v3612_v31 = vsub.f32 %v9953_v4, %v3566_v60  ;;  %v2668_v4 = vsub.f32 %v10031_v25, %v2638_v18 }
 0x576   : > { %3373 = vrot.lane.b32.xlu0 %v9581_v6, %s8690_s7  ;;  %8124 = vrcp.f32 %v2237_v27  ;;  %v10273_v7 = vpop.f32.mrf.mxu2  ;;  %v3121_v6 = vsel %vm2135_vm8, %v10236_v3, -inf }
 0x577   : > { %v2312_v2 = vpack.c.bf16 %v2296_v42, %v2296_v42  ;;  %8126 = vrcp.f32 %v2243_v37  ;;  %v3628_v37 = vmul.f32 1.442695, %v3612_v31 }
 0x578   : > { %8128 = vrcp.f32 %v2240_v13 }
 0x579   : > { %3194 = vadd.xlane.f32.xlu2 %v3193_v22  ;;  %v2336_v27 = vunpack.c.l.b16 %v2312_v2 }
 0x57c   : > { %v10266_v14 = vpop.xlane.xlu2 %3577  ;;  %v8125_v12 = vpop.eup %8124 }
 0x57d   : > { %v10268_v20 = vpop.xlane.xlu0 %2640  ;;  %v2297_v59 = vmul.f32 %v8125_v12, %v10075_v47  ;;  %v8127_v1 = vpop.eup %8126 }
 0x57e   : > { %3778 = vrot.lane.b32.xlu0 %v9469_v32, %s8692_s26  ;;  %v8129_v47 = vpop.eup %8128  ;;  %v2299_v42 = vmul.f32 %v8127_v1, %v10071_v29  ;;  %v10281_v12 = vpop.f32.mrf.mxu2  ;;  %v2692_v29 = vmul.f32 1.442695, %v2668_v4 }
 0x57f   : > { %v2313_v52 = vpack.c.bf16 %v2297_v59, %v2297_v59  ;;  %v2298_v60 = vmul.f32 %v8129_v47, %v10042_v41 }
 0x580   : > { %v2315_v13 = vpack.c.bf16 %v2299_v42, %v2299_v42 }
 0x581   : > { %v2337_v22 = vunpack.c.l.b16 %v2313_v52  ;;  %v2314_v2 = vpack.c.bf16 %v2298_v60, %v2298_v60 }
 0x582   : > { %v2339_v41 = vunpack.c.l.b16 %v2315_v13 }
 0x583   : > { %v2344_v48 = vpack.c.b16 %v2337_v22, %v2336_v27  ;;  %v2338_v25 = vunpack.c.l.b16 %v2314_v2  ;;  %v2197_v2 = vsub.f32 %v9992_v53, %v10199_v57 }
 0x584   : > { %v2246_v61 = vpop.xlane.xlu2 %2245  ;;  %3122 = vmax.xlane.f32.xlu1 %v3121_v6 }
 0x585   : > { %v2716_v32 = vpop.xlane.xlu0 %2715  ;;  %7625 = vmatmul.msk.bf16.vlgmr.msra.gmra.mxu3 %vm2135_vm8, %v2344_v48  ;;  %v3130_v48 = vsel %vm2135_vm8, %v10273_v7, -inf }
 0x586   : > { %2925 = vmatpush.bf16.msra.mxu3 %v10016_v34  ;;  %8130 = vrcp.f32 %v2716_v32  ;;  %v10295_v52 = vpop.f32.mrf.mxu2 }
 0x587   : > { %8132 = vpow2.f32 %v3628_v37 }
 0x58a   : > { %2926 = vmatpush.bf16.msra.mxu3 %v9791_v39 }
 0x58c   : > { %v2725_v6 = vpop.xlane.xlu2 %2724  ;;  %3131 = vmax.xlane.f32.xlu1 %v3130_v48  ;;  %v8131_v34 = vpop.eup %8130 }
 0x58d   : > { %v2719_v59 = vpop.xlane.xlu0 %2718  ;;  %v10289_v1 = vpop.eup %8132  ;;  %v2774_v39 = vmul.f32 %v8131_v34, %v10105_v36  ;;  %v3141_v36 = vsub.f32 %v9942_v16, %v10170_v21 }
 0x58e   : > { %8134 = vrcp.f32 %v2719_v59  ;;  %2927 = vmatpush.bf16.msra.mxu3 %v9764_v26  ;;  %v3660_v22 = vsel %vm2135_vm8, %v10289_v1, 0.0  ;;  %v2345_v26 = vpack.c.b16 %v2339_v41, %v2338_v25  ;;  %v2226_v25 = vmul.f32 1.442695, %v2197_v2 }
 0x58f   : > { %8136 = vrcp.f32 %v2246_v61  ;;  %v2790_v47 = vpack.c.bf16 %v2774_v39, %v2774_v39  ;;  %v3162_v48 = vmul.f32 1.442695, %v3141_v36 }
 0x590   : > { %8138 = vpow2.f32 %v2692_v29  ;;  %v10320_v29 = vpop.f32.mrf.mxu2 }
 0x591   : > { %3375 = vrot.lane.b32.xlu2 %v9609_v28, %s8690_s7  ;;  %v2814_v60 = vunpack.c.l.b16 %v2790_v47  ;;  %s12888_s7 = scalar_lea.vmem %s12887_s25, %s8857_s9 }
 0x592   : > { %2928 = vmatpush.bf16.msra.mxu3 %v9780_v23 }
 0x594   : > { %v8135_v18 = vpop.eup %8134  ;;  %v2249_v27 = vpop.xlane.xlu2 %2248  ;;  %3661 = vadd.xlane.f32.xlu1 %v3660_v22  ;;  %v3588_v22 = vsel %vm2135_vm8, %v10295_v52, -inf }
 0x595   : > { %v8137_v31 = vpop.eup %8136  ;;  %8140 = vrcp.f32 %v2249_v27  ;;  %v3575_v61 = vpop.xlane.xlu0 %3574  ;;  %v2775_v32 = vmul.f32 %v8135_v18, %v10118_v11  ;;  %7626 = vmatmul.msk.bf16.gmra.mxu3 %vm2135_vm8, %v2345_v26  ;;  %v3614_v11 = vsub.f32 %v9998_v17, %v10240_v40 }
 0x596   : > { %v2300_v37 = vmul.f32 %v8137_v31, %v10103_v44  ;;  %v10304_v42 = vpop.eup %8138  ;;  %8142 = vpow2.f32 %v3162_v48  ;;  %v3581_v18 = vpop.xlane.xlu1 %3580  ;;  %v3615_v27 = vsub.f32 %v10011_v0, %v3575_v61  ;;  %v3142_v48 = vsub.f32 %v9946_v5, %v10238_v30 }
 0x597   : > { %v2791_v23 = vpack.c.bf16 %v2775_v32, %v2775_v32  ;;  %v2732_v16 = vsel %vm2135_vm8, %v10304_v42, 0.0  ;;  %v3632_v40 = vmul.f32 1.442695, %v3614_v11  ;;  %8144 = vrcp.f32 %v2725_v6 }
 0x598   : > { %v2316_v44 = vpack.c.bf16 %v2300_v37, %v2300_v37  ;;  %v3634_v6 = vmul.f32 1.442695, %v3615_v27  ;;  %v10332_v47 = vpop.f32.mrf.mxu2  ;;  %v3164_v2 = vmul.f32 1.442695, %v3142_v48 }
 0x599   : > { %3780 = vrot.lane.b32.xlu2 %v9498_v50, %s8692_s26  ;;  %v2815_v4 = vunpack.c.l.b16 %v2791_v23  ;;  %8146 = vpow2.f32 %v3632_v40 }
 0x59a   : > { %v2340_v41 = vunpack.c.l.b16 %v2316_v44  ;;  %8148 = vpow2.f32 %v2226_v25 }
 0x59b   : > { %v8141_v13 = vpop.eup %8140  ;;  %v2821_v59 = vpack.c.b16 %v2815_v4, %v2814_v60 }
 0x59c   : > { %v10310_v34 = vpop.xlane.xlu2 %2652  ;;  %v2301_v21 = vmul.f32 %v8141_v13, %v10126_v46  ;;  %2733 = vadd.xlane.f32.xlu1 %v2732_v16  ;;  %v10323_v53 = vpop.eup %8142 }
 0x59d   : > { %7642 = vmatmul.msk.bf16.gmra.mxu0 %vm2135_vm8, %v2821_v59  ;;  %v10318_v50 = vpop.xlane.xlu0 %2646  ;;  %v8145_v31 = vpop.eup %8144  ;;  %v3199_v32 = vsel %vm2135_vm8, %v10323_v53, 0.0 }
 0x59e   : > { %v2317_v17 = vpack.c.bf16 %v2301_v21, %v2301_v21  ;;  %v2777_v61 = vmul.f32 %v8145_v31, %v10116_v55  ;;  %v2731_v23 = vpop.xlane.xlu1 %2730  ;;  %v3140_v55 = vsub.f32 %v9938_v15, %v10172_v9  ;;  %v2198_v9 = vsub.f32 %v10003_v58, %v10208_v19  ;;  %v12848_v58 = vld [vmem:[#allocation25_spill] sm:$0xff] }
 0x59f   : > { %v10334_v0 = vpop.eup %8146 }
 0x5a0   : > { %v2341_v39 = vunpack.c.l.b16 %v2317_v17  ;;  %v10337_v36 = vpop.eup %8148  ;;  %v3666_v4 = vsel %vm2135_vm8, %v10334_v0, 0.0  ;;  %v2793_v59 = vpack.c.bf16 %v2777_v61, %v2777_v61  ;;  %v3160_v30 = vmul.f32 1.442695, %v3140_v55  ;;  %v10352_v40 = vpop.f32.mrf.mxu2 }
 0x5a1   : > { %v2271_v16 = vsel %vm2135_vm8, %v10337_v36, 0.0 }
 0x5a2   : > { %v2346_v46 = vpack.c.b16 %v2341_v39, %v2340_v41  ;;  %v2817_v5 = vunpack.c.l.b16 %v2793_v59 }
 0x5a4   : > { %v10325_v57 = vpop.xlane.xlu2 %3583  ;;  %3589 = vmax.xlane.f32.xlu1 %v3588_v22 }
 0x5a5   : > { %v2722_v26 = vpop.xlane.xlu0 %2721  ;;  %7627 = vmatmul.msk.bf16.gmra.mxu3 %vm2135_vm8, %v2346_v46 }
 0x5a6   : > { %8150 = vrcp.f32 %v2722_v26  ;;  %v10361_v25 = vpop.xlane.xlu1 %3586  ;;  %v2228_v26 = vmul.f32 1.442695, %v2198_v9 }
 0x5a7   : > { %8152 = vpow2.f32 %v3634_v6 }
 0x5a8   : > { %3200 = vadd.xlane.f32.xlu0 %v3199_v32  ;;  %8154 = vrcp.f32 %v2731_v23  ;;  %v10373_v61 = vpop.f32.mrf.mxu2 }
 0x5a9   : > { %8156 = vpow2.f32 %v3164_v2 }
 0x5aa   : > { %8158 = vpow2.f32 %v3160_v30 }
 0x5ac   : > { %v8151_v37 = vpop.eup %8150  ;;  %v2252_v60 = vpop.xlane.xlu2 %2251  ;;  %3667 = vadd.xlane.f32.xlu1 %v3666_v4 }
 0x5ad   : > { %v10343_v13 = vpop.xlane.xlu0 %2649  ;;  %v2776_v11 = vmul.f32 %v8151_v37, %v10148_v10  ;;  %v10350_v44 = vpop.eup %8152  ;;  %v3617_v10 = vsub.f32 %v10053_v24, %v3581_v18  ;;  %v3127_v24 = vsel %vm2135_vm8, %v10259_v33, -inf  ;;  %v2196_v18 = vsub.f32 %v9984_v63, %v10184_v8 }
 0x5ae   : > { %v3669_v15 = vsel %vm2135_vm8, %v10350_v44, 0.0  ;;  %v8155_v27 = vpop.eup %8154  ;;  %v3594_v37 = vsel %vm2135_vm8, %v10332_v47, -inf  ;;  %v3117_v63 = vpop.xlane.xlu1 %3116 }
 0x5af   : > { %v2792_v21 = vpack.c.bf16 %v2776_v11, %v2776_v11  ;;  %v3638_v22 = vmul.f32 1.442695, %v3617_v10  ;;  %v2779_v19 = vmul.f32 %v8155_v27, %v12848_v58  ;;  %v10369_v31 = vpop.eup %8156  ;;  %v2224_v32 = vmul.f32 1.442695, %v2196_v18  ;;  %v12849_v10 = vld [vmem:[#allocation18_spill] sm:$0xff] }
 0x5b0   : > { %2272 = vadd.xlane.f32.xlu0 %v2271_v16  ;;  %v10371_v6 = vpop.eup %8158  ;;  %v3202_v59 = vsel %vm2135_vm8, %v10369_v31, 0.0  ;;  %v10401_v58 = vpop.f32.mrf.mxu2 }
 0x5b1   : > { %v2816_v17 = vunpack.c.l.b16 %v2792_v21  ;;  %v2795_v11 = vpack.c.bf16 %v2779_v19, %v2779_v19  ;;  %v3196_v21 = vsel %vm2135_vm8, %v10371_v6, 0.0 }
 0x5b3   : > { %v2822_v41 = vpack.c.b16 %v2817_v5, %v2816_v17  ;;  %v2819_v5 = vunpack.c.l.b16 %v2795_v11 }
 0x5b4   : > { %v10355_v39 = vpop.xlane.xlu2 %2655  ;;  %3670 = vadd.xlane.f32.xlu1 %v3669_v15 }
 0x5b5   : > { %7643 = vmatmul.msk.bf16.gmra.mxu0 %vm2135_vm8, %v2822_v41  ;;  %v2728_v46 = vpop.xlane.xlu0 %2727  ;;  %v3613_v41 = vsub.f32 %v12849_v10, %v10222_v62  ;;  %v12853_v10 = vld [vmem:[#allocation19_spill] sm:$0xff] }
 0x5b6   : > { %8160 = vrcp.f32 %v2728_v46  ;;  %v2267_v27 = vpop.xlane.xlu1 %2266 }
 0x5b7   : > { %8162 = vrcp.f32 %v2252_v60 }
 0x5b8   : > { %3128 = vmax.xlane.f32.xlu0 %v3127_v24  ;;  %8164 = vpow2.f32 %v3638_v22 }
 0x5b9   : > { %8166 = vpow2.f32 %v2228_v26  ;;  %v12850_v26 = vld [vmem:[#allocation17_spill] sm:$0xff] }
 0x5ba   : > { %v3143_v62 = vsub.f32 %v12850_v26, %v10190_v38 }
 0x5bc   : > { %v3186_v23 = vpop.xlane.xlu2 %3185  ;;  %v8161_v4 = vpop.eup %8160  ;;  %3595 = vmax.xlane.f32.xlu1 %v3594_v37  ;;  %v3630_v37 = vmul.f32 1.442695, %v3613_v41  ;;  %v2199_v41 = vsub.f32 %v12853_v10, %v10228_v45 }
 0x5bd   : > { %v2255_v8 = vpop.xlane.xlu0 %2254  ;;  %v8163_v60 = vpop.eup %8162  ;;  %v2778_v48 = vmul.f32 %v8161_v4, %v10174_v43 }
 0x5be   : > { %8168 = vrcp.f32 %v2255_v8  ;;  %v10380_v16 = vpop.eup %8164  ;;  %v2302_v2 = vmul.f32 %v8163_v60, %v10161_v54  ;;  %v3166_v60 = vmul.f32 1.442695, %v3143_v62  ;;  %v2230_v62 = vmul.f32 1.442695, %v2199_v41 }
 0x5bf   : > { %8170 = vpow2.f32 %v2224_v32  ;;  %v2794_v55 = vpack.c.bf16 %v2778_v48, %v2778_v48  ;;  %v10385_v30 = vpop.eup %8166  ;;  %v3675_v9 = vsel %vm2135_vm8, %v10380_v16, 0.0  ;;  %v12851_v48 = vld [vmem:[#allocation33_spill] sm:$0xff] }
 0x5c0   : > { %3203 = vadd.xlane.f32.xlu0 %v3202_v59  ;;  %v2318_v24 = vpack.c.bf16 %v2302_v2, %v2302_v2  ;;  %v2274_v19 = vsel %vm2135_vm8, %v10385_v30, 0.0  ;;  %v3145_v11 = vsub.f32 %v12851_v48, %v3117_v63  ;;  %8172 = vpow2.f32 %v3630_v37 }
 0x5c1   : > { %v2818_v17 = vunpack.c.l.b16 %v2794_v55  ;;  %v3603_v55 = vsel %vm2135_vm8, %v10401_v58, -inf  ;;  %v3133_v63 = vsel %vm2135_vm8, %v10281_v12, -inf }
 0x5c2   : > { %3197 = vadd.xlane.f32.xlu2 %v3196_v21  ;;  %v12852_v21 = vld [vmem:[#allocation26_spill] sm:$0xff] }
 0x5c3   : > { %v2823_v46 = vpack.c.b16 %v2819_v5, %v2818_v17  ;;  %v2671_v2 = vsub.f32 %v12852_v21, %v10318_v50  ;;  %v12856_v21 = vld [vmem:[#allocation35_spill] sm:$0xff] }
 0x5c4   : > { %v8169_v43 = vpop.eup %8168  ;;  %v10389_v15 = vpop.xlane.xlu2 %3113  ;;  %3676 = vadd.xlane.f32.xlu1 %v3675_v9 }
 0x5c5   : > { %v10393_v22 = vpop.xlane.xlu0 %2658  ;;  %v2303_v54 = vmul.f32 %v8169_v43, %v10188_v51  ;;  %v10396_v18 = vpop.eup %8170  ;;  %7644 = vmatmul.msk.bf16.gmra.mxu0 %vm2135_vm8, %v2823_v46  ;;  %v2342_v51 = vunpack.c.l.b16 %v2318_v24  ;;  %v3170_v43 = vmul.f32 1.442695, %v3145_v11  ;;  %v2698_v50 = vmul.f32 1.442695, %v2671_v2 }
 0x5c6   : > { %v2268_v4 = vsel %vm2135_vm8, %v10396_v18, 0.0  ;;  %v10417_v9 = vpop.f32.mrf.mxu2  ;;  %v3124_v46 = vsel %vm2135_vm8, %v10249_v35, -inf }
 0x5c7   : > { %v2319_v32 = vpack.c.bf16 %v2303_v54, %v2303_v54  ;;  %v10421_v54 = vpop.eup %8172  ;;  %v3606_v45 = vsel %vm2135_vm8, %v10417_v9, -inf }
 0x5c8   : > { %2275 = vadd.xlane.f32.xlu0 %v2274_v19 }
 0x5c9   : > { %v2343_v8 = vunpack.c.l.b16 %v2319_v32 }
 0x5ca   : > { %2269 = vadd.xlane.f32.xlu2 %v2268_v4 }
 0x5cb   : > { %v2347_v59 = vpack.c.b16 %v2343_v8, %v2342_v51  ;;  %v12854_v8 = vld [vmem:[#allocation29_spill] sm:$0xff] }
 0x5cc   : > { %v2261_v38 = vpop.xlane.xlu2 %2260  ;;  %v3783_v17 = vpop.permute.xlu1 %3782  ;;  %3604 = vmax.xlane.f32.xlu1 %v3603_v55 }
 0x5cd   : > { %8174 = vrcp.f32 %v2261_v38  ;;  %7628 = vmatmul.msk.bf16.gmra.mxu3 %vm2135_vm8, %v2347_v59  ;;  %v2258_v5 = vpop.xlane.xlu0 %2257  ;;  %3804 = vmatpush.bf16.msrb.mxu0 %v3783_v17  ;;  %v12855_v59 = vld [vmem:[#allocation22_spill] sm:$0xff] }
 0x5ce   : > { %8176 = vrcp.f32 %v2258_v5  ;;  %v2669_v38 = vsub.f32 %v12855_v59, %v10268_v20 }
 0x5cf   : > { %8178 = vpow2.f32 %v3166_v60  ;;  %v2673_v60 = vsub.f32 %v12854_v8, %v10310_v34  ;;  %v12860_v8 = vld [vmem:[#allocation34_spill] sm:$0xff] }
 0x5d0   : > { %8180 = vrcp.f32 %v3186_v23  ;;  %3134 = vmax.xlane.f32.xlu0 %v3133_v63  ;;  %v2694_v10 = vmul.f32 1.442695, %v2669_v38  ;;  %v12861_v38 = vld [vmem:[#allocation16_spill] sm:$0xff] }
 0x5d1   : > { %8182 = vpow2.f32 %v3170_v43  ;;  %v2702_v5 = vmul.f32 1.442695, %v2673_v60 }
 0x5d2   : > { %3125 = vmax.xlane.f32.xlu2 %v3124_v46  ;;  %8184 = vpow2.f32 %v2698_v50 }
 0x5d3   : > { %v8175_v24 = vpop.eup %8174 }
 0x5d4   : > { %v8177_v26 = vpop.eup %8176  ;;  %v2305_v19 = vmul.f32 %v8175_v24, %v10210_v56  ;;  %v3192_v32 = vpop.xlane.xlu2 %3191  ;;  %3607 = vmax.xlane.f32.xlu1 %v3606_v45  ;;  %v3663_v56 = vsel %vm2135_vm8, %v10421_v54, 0.0  ;;  %v12857_v24 = vld [vmem:[#allocation38_spill] sm:$0xff] }
 0x5d5   : > { %v10426_v23 = vpop.eup %8178  ;;  %v2304_v37 = vmul.f32 %v8177_v26, %v10212_v49  ;;  %v3189_v4 = vpop.xlane.xlu0 %3188 }
 0x5d6   : > { %v8181_v51 = vpop.eup %8180  ;;  %v2321_v48 = vpack.c.bf16 %v2305_v19, %v2305_v19  ;;  %8186 = vrcp.f32 %v3189_v4  ;;  %v3205_v34 = vsel %vm2135_vm8, %v10426_v23, 0.0  ;;  %v12858_v19 = vld [vmem:[#allocation20_spill] sm:$0xff] }
 0x5d7   : > { %8188 = vrcp.f32 %v2267_v27  ;;  %v2320_v11 = vpack.c.bf16 %v2304_v37, %v2304_v37  ;;  %v10435_v49 = vpop.eup %8182  ;;  %v3248_v2 = vmul.f32 %v8181_v51, %v12856_v21  ;;  %v3616_v45 = vsub.f32 %v12858_v19, %v10266_v14  ;;  %v12859_v37 = vld [vmem:[#allocation21_spill] sm:$0xff] }
 0x5d8   : > { %8190 = vpow2.f32 %v2230_v62  ;;  %3664 = vadd.xlane.f32.xlu0 %v3663_v56  ;;  %v2410_v55 = vunpack.c.l.b16 %v2321_v48  ;;  %v10440_v27 = vpop.eup %8184  ;;  %v3211_v20 = vsel %vm2135_vm8, %v10435_v49, 0.0 }
 0x5d9   : > { %v2409_v17 = vunpack.c.l.b16 %v2320_v11  ;;  %v3264_v46 = vpack.c.bf16 %v3248_v2, %v3248_v2  ;;  %v2741_v51 = vsel %vm2135_vm8, %v10440_v27, 0.0  ;;  %v3636_v59 = vmul.f32 1.442695, %v3616_v45 }
 0x5da   : > { %3206 = vadd.xlane.f32.xlu2 %v3205_v34  ;;  %v12862_v34 = vld [vmem:[#allocation39_spill] sm:$0xff] }
 0x5db   : > { %v2417_v43 = vpack.c.b16 %v2410_v55, %v2409_v17  ;;  %v3288_v48 = vunpack.c.l.b16 %v3264_v46  ;;  %v12864_v46 = vld [vmem:[#allocation40_spill] sm:$0xff] }
 0x5dc   : > { %v8187_v63 = vpop.eup %8186  ;;  %v2264_v41 = vpop.xlane.xlu2 %2263  ;;  %3212 = vadd.xlane.f32.xlu1 %v3211_v20 }
 0x5dd   : > { %v8189_v50 = vpop.eup %8188  ;;  %v3249_v26 = vmul.f32 %v8187_v63, %v12857_v24  ;;  %8192 = vrcp.f32 %v2264_v41  ;;  %7629 = vmatmul.msk.bf16.vlgmr.msrb.gmra.mxu3 %vm2135_vm8, %v2417_v43  ;;  %v12863_v43 = vld [vmem:[#allocation36_spill] sm:$0xff]  ;;  %v12865_v24 = vld [vmem:[#allocation23_spill] sm:$0xff] }
 0x5de   : > { %v10446_v62 = vpop.eup %8190  ;;  %8194 = vpow2.f32 %v2702_v5  ;;  %3401 = vmatpush.bf16.msrb.mxu3 %v12859_v37  ;;  %v2307_v60 = vmul.f32 %v8189_v50, %v12860_v8 }
 0x5df   : > { %v3265_v4 = vpack.c.bf16 %v3249_v26, %v3249_v26  ;;  %8196 = vpow2.f32 %v2694_v10  ;;  %v2277_v56 = vsel %vm2135_vm8, %v10446_v62, 0.0  ;;  %v2670_v26 = vsub.f32 %v12865_v24, %v12864_v46  ;;  %v12870_v46 = vld [vmem:[#allocation31_spill] sm:$0xff] }
 0x5e0   : > { %2742 = vadd.xlane.f32.xlu0 %v2741_v51  ;;  %v2323_v5 = vpack.c.bf16 %v2307_v60, %v2307_v60  ;;  %8198 = vpow2.f32 %v3636_v59  ;;  %v2675_v24 = vsub.f32 %v12870_v46, %v10393_v22  ;;  %v12873_v46 = vld [vmem:[#allocation30_spill] sm:$0xff] }
 0x5e1   : > { %v3289_v11 = vunpack.c.l.b16 %v3265_v4  ;;  %8200 = vrcp.f32 %v3192_v32  ;;  %v2696_v8 = vmul.f32 1.442695, %v2670_v26 }
 0x5e2   : > { %3402 = vmatpush.bf16.msrb.mxu3 %v12861_v38  ;;  %2278 = vadd.xlane.f32.xlu2 %v2277_v56  ;;  %v2412_v45 = vunpack.c.l.b16 %v2323_v5  ;;  %v12867_v38 = vld [vmem:[#allocation28_spill] sm:$0xff] }
 0x5e3   : > { %v8193_v14 = vpop.eup %8192  ;;  %v3296_v55 = vpack.c.b16 %v3289_v11, %v3288_v48  ;;  %v12866_v48 = vld [vmem:[#allocation24_spill] sm:$0xff] }
 0x5e4   : > { %v10457_v21 = vpop.eup %8194  ;;  %v3120_v2 = vpop.xlane.xlu2 %3119  ;;  %v2306_v17 = vmul.f32 %v8193_v14, %v12862_v34  ;;  %v3618_v11 = vsub.f32 %v12866_v48, %v10325_v57  ;;  %v2672_v14 = vsub.f32 %v12867_v38, %v10343_v13 }
 0x5e5   : > { %v3146_v63 = vsub.f32 %v12863_v43, %v3120_v2  ;;  %7657 = vmatmul.msk.bf16.vlgmr.msra.gmra.mxu0 %vm2135_vm8, %v3296_v55  ;;  %v10462_v10 = vpop.eup %8196  ;;  %v2747_v50 = vsel %vm2135_vm8, %v10457_v21, 0.0  ;;  %v12868_v55 = vld [vmem:[#allocation37_spill] sm:$0xff] }
 0x5e6   : > { %v2322_v41 = vpack.c.bf16 %v2306_v17, %v2306_v17  ;;  %v2735_v37 = vsel %vm2135_vm8, %v10462_v10, 0.0  ;;  %v10470_v51 = vpop.eup %8198  ;;  %v3591_v17 = vsel %vm2135_vm8, %v10320_v29, -inf  ;;  %v3640_v57 = vmul.f32 1.442695, %v3618_v11 }
 0x5e7   : > { %v3172_v20 = vmul.f32 1.442695, %v3146_v63  ;;  %v8201_v60 = vpop.eup %8200  ;;  %v3672_v59 = vsel %vm2135_vm8, %v10470_v51, 0.0  ;;  %v2700_v43 = vmul.f32 1.442695, %v2672_v14 }
 0x5e8   : > { %2748 = vadd.xlane.f32.xlu0 %v2747_v50  ;;  %v2411_v19 = vunpack.c.l.b16 %v2322_v41  ;;  %v3250_v2 = vmul.f32 %v8201_v60, %v12868_v55  ;;  %v12869_v41 = vld [vmem:[#allocation41_spill] sm:$0xff]  ;;  %v3374_v26 = vpop.permute.xlu0 %3373 }
 0x5e9   : > { %8202 = vpow2.f32 %v3172_v20 }
 0x5ea   : > { %2736 = vadd.xlane.f32.xlu2 %v2735_v37  ;;  %v2418_v4 = vpack.c.b16 %v2412_v45, %v2411_v19  ;;  %v3266_v63 = vpack.c.bf16 %v3250_v2, %v3250_v2  ;;  %v3600_v45 = vsel %vm2135_vm8, %v10373_v61, -inf }
 0x5ec   : > { %v3195_v32 = vpop.xlane.xlu2 %3194  ;;  %v3290_v37 = vunpack.c.l.b16 %v3266_v63 }
 0x5ed   : > { %8204 = vrcp.f32 %v3195_v32  ;;  %7630 = vmatmul.msk.bf16.gmra.mxu3 %vm2135_vm8, %v2418_v4  ;;  %v2706_v32 = vmul.f32 1.442695, %v2675_v24  ;;  %v2674_v24 = vsub.f32 %v12873_v46, %v10355_v39 }
 0x5ee   : > { %8206 = vpow2.f32 %v2696_v8 }
 0x5ef   : > { %v10475_v56 = vpop.eup %8202  ;;  %8208 = vpow2.f32 %v3640_v57  ;;  %v12871_v57 = vld [vmem:[#allocation12_spill] sm:$0xff] }
 0x5f0   : > { %3673 = vadd.xlane.f32.xlu0 %v3672_v59  ;;  %v3214_v34 = vsel %vm2135_vm8, %v10475_v56, 0.0  ;;  %8210 = vpow2.f32 %v2700_v43  ;;  %v3779_v38 = vpop.permute.xlu0 %3778 }
 0x5f1   : > { %3215 = vadd.xlane.f32.xlu1 %v3214_v34  ;;  %8212 = vpow2.f32 %v2706_v32  ;;  %v10508_v34 = vpop.f32.mrf.mxu2 }
 0x5f2   : > { %3592 = vmax.xlane.f32.xlu2 %v3591_v17  ;;  %v3609_v17 = vsel %vm2135_vm8, %v10508_v34, -inf }
 0x5f3   : > { %v8205_v5 = vpop.eup %8204 }
 0x5f4   : > { %v3251_v20 = vmul.f32 %v8205_v5, %v12869_v41  ;;  %v3376_v50 = vpop.permute.xlu2 %3375  ;;  %v10487_v13 = vpop.eup %8206  ;;  %v12872_v41 = vld [vmem:[#allocation15_spill] sm:$0xff] }
 0x5f5   : > { %3403 = vmatpush.bf16.msrb.mxu3 %v3376_v50  ;;  %v2738_v8 = vsel %vm2135_vm8, %v10487_v13, 0.0  ;;  %v10495_v48 = vpop.eup %8208 }
 0x5f6   : > { %v3267_v19 = vpack.c.bf16 %v3251_v20, %v3251_v20  ;;  %v10498_v22 = vpop.eup %8210  ;;  %v3678_v59 = vsel %vm2135_vm8, %v10495_v48, 0.0 }
 0x5f7   : > { %v2744_v14 = vsel %vm2135_vm8, %v10498_v22, 0.0  ;;  %v10504_v55 = vpop.eup %8212  ;;  %v3123_v63 = vpop.xlane.xlu1 %3122 }
 0x5f8   : > { %3601 = vmax.xlane.f32.xlu0 %v3600_v45  ;;  %v3291_v4 = vunpack.c.l.b16 %v3267_v19  ;;  %v2753_v2 = vsel %vm2135_vm8, %v10504_v55, 0.0  ;;  %v2704_v19 = vmul.f32 1.442695, %v2674_v24 }
 0x5f9   : > { %3404 = vmatpush.bf16.msrb.mxu3 %v3374_v26 }
 0x5fa   : > { %2739 = vadd.xlane.f32.xlu2 %v2738_v8  ;;  %v3297_v60 = vpack.c.b16 %v3291_v4, %v3290_v37 }
 0x5fc   : > { %v3781_v11 = vpop.permute.xlu2 %3780  ;;  %7658 = vmatmul.msk.bf16.gmra.mxu0 %vm2135_vm8, %v3297_v60 }
 0x5fd   : > { %3805 = vmatpush.bf16.msrb.mxu0 %v3781_v11  ;;  %v3147_v11 = vsub.f32 %v10236_v3, %v3123_v63 }
 0x5ff   : > { %v3132_v50 = vpop.xlane.xlu1 %3131 }
 0x600   : > { %3679 = vadd.xlane.f32.xlu0 %v3678_v59 }
 0x601   : > { %3806 = vmatpush.bf16.msrb.mxu0 %v3779_v38 }
 0x602   : > { %2745 = vadd.xlane.f32.xlu2 %v2744_v14 }
 0x607   : > { %v10518_v4 = vpop.xlane.xlu1 %3661 }
 0x608   : > { %2754 = vadd.xlane.f32.xlu0 %v2753_v2 }
 0x60f   : > { %v10528_v24 = vpop.xlane.xlu1 %2733 }
 0x610   : > { %3610 = vmax.xlane.f32.xlu0 %v3609_v17 }
 0x61a   : > { %3776 = vrot.lane.b32.xlu2 %v12871_v57, %s8692_s26  ;;  %v3174_v57 = vmul.f32 1.442695, %v3147_v11 }
 0x61b   : > { %v3201_v5 = vpop.xlane.xlu0 %3200 }
 0x61c   : > { %8214 = vrcp.f32 %v3201_v5  ;;  %v12874_v5 = vld [vmem:[#allocation32_spill] sm:$0xff] }
 0x622   : > { %v8215_v37 = vpop.eup %8214 }
 0x623   : > { %v2273_v43 = vpop.xlane.xlu0 %2272  ;;  %v3253_v8 = vmul.f32 %v8215_v37, %v10323_v53 }
 0x624   : > { %3855 = vrot.lane.b32.xlu0 %v12872_v41, %s8692_s26 }
 0x625   : > { %v3269_v59 = vpack.c.bf16 %v3253_v8, %v3253_v8 }
 0x627   : > { %v3293_v46 = vunpack.c.l.b16 %v3269_v59 }
 0x62b   : > { %v3129_v20 = vpop.xlane.xlu0 %3128 }
 0x62c   : > { %v3149_v11 = vsub.f32 %v10259_v33, %v3129_v20  ;;  %v3590_v20 = vpop.xlane.xlu1 %3589 }
 0x633   : > { %v3204_v26 = vpop.xlane.xlu0 %3203 }
 0x635   : > { %v3198_v45 = vpop.xlane.xlu2 %3197 }
 0x636   : > { %8216 = vrcp.f32 %v3198_v45  ;;  %v3150_v45 = vsub.f32 %v10273_v7, %v3132_v50 }
 0x637   : > { %8218 = vrcp.f32 %v2273_v43  ;;  %v3144_v43 = vsub.f32 %v12874_v5, %v10389_v15  ;;  %v3178_v5 = vmul.f32 1.442695, %v3149_v11 }
 0x638   : > { %8220 = vpow2.f32 %v2704_v19 }
 0x639   : > { %v3168_v37 = vmul.f32 1.442695, %v3144_v43 }
 0x63b   : > { %v2276_v32 = vpop.xlane.xlu0 %2275 }
 0x63c   : > { %v8217_v60 = vpop.eup %8216 }
 0x63d   : > { %v3252_v38 = vmul.f32 %v8217_v60, %v10371_v6  ;;  %v2270_v14 = vpop.xlane.xlu2 %2269  ;;  %v8219_v39 = vpop.eup %8218 }
 0x63e   : > { %8222 = vrcp.f32 %v2270_v14  ;;  %v10523_v2 = vpop.eup %8220  ;;  %v2309_v53 = vmul.f32 %v8219_v39, %v10337_v36  ;;  %v12875_v39 = vld [vmem:[#allocation27_spill] sm:$0xff] }
 0x63f   : > { %v3268_v17 = vpack.c.bf16 %v3252_v38, %v3252_v38  ;;  %v2750_v3 = vsel %vm2135_vm8, %v10523_v2, 0.0  ;;  %8224 = vpow2.f32 %v3174_v57  ;;  %v3180_v38 = vmul.f32 1.442695, %v3150_v45 }
 0x640   : > { %v2325_v60 = vpack.c.bf16 %v2309_v53, %v2309_v53  ;;  %8226 = vrcp.f32 %v3204_v26  ;;  %v3620_v53 = vsub.f32 %v10295_v52, %v3590_v20 }
 0x641   : > { %v3292_v41 = vunpack.c.l.b16 %v3268_v17  ;;  %v3619_v17 = vsub.f32 %v12875_v39, %v10361_v25  ;;  %8228 = vpow2.f32 %v3168_v37 }
 0x642   : > { %v2414_v50 = vunpack.c.l.b16 %v2325_v60 }
 0x643   : > { %v3135_v6 = vpop.xlane.xlu0 %3134  ;;  %2751 = vadd.xlane.f32.xlu2 %v2750_v3  ;;  %v3298_v63 = vpack.c.b16 %v3293_v46, %v3292_v41  ;;  %v3642_v26 = vmul.f32 1.442695, %v3619_v17 }
 0x644   : > { %v8223_v19 = vpop.eup %8222 }
 0x645   : > { %v3126_v8 = vpop.xlane.xlu2 %3125  ;;  %7659 = vmatmul.msk.bf16.gmra.mxu0 %vm2135_vm8, %v3298_v63  ;;  %v2308_v15 = vmul.f32 %v8223_v19, %v10396_v18  ;;  %v10539_v57 = vpop.eup %8224  ;;  %v3597_v18 = vsel %vm2135_vm8, %v10352_v40, -inf  ;;  %v3151_v63 = vsub.f32 %v10281_v12, %v3135_v6 }
 0x646   : > { %v3148_v36 = vsub.f32 %v10249_v35, %v3126_v8  ;;  %v3217_v25 = vsel %vm2135_vm8, %v10539_v57, 0.0  ;;  %v8227_v41 = vpop.eup %8226 }
 0x647   : > { %v2324_v59 = vpack.c.bf16 %v2308_v15, %v2308_v15  ;;  %v10548_v46 = vpop.eup %8228  ;;  %v3254_v19 = vmul.f32 %v8227_v41, %v10369_v31  ;;  %v3644_v15 = vmul.f32 1.442695, %v3620_v53 }
 0x648   : > { %v3176_v14 = vmul.f32 1.442695, %v3148_v36  ;;  %v3208_v8 = vsel %vm2135_vm8, %v10548_v46, 0.0 }
 0x649   : > { %v2413_v7 = vunpack.c.l.b16 %v2324_v59  ;;  %v3270_v12 = vpack.c.bf16 %v3254_v19, %v3254_v19 }
 0x64a   : > { %8230 = vpow2.f32 %v3176_v14 }
 0x64b   : > { %v10543_v35 = vpop.xlane.xlu0 %3664  ;;  %3598 = vmax.xlane.f32.xlu2 %v3597_v18  ;;  %v2419_v33 = vpack.c.b16 %v2414_v50, %v2413_v7  ;;  %8232 = vpow2.f32 %v3180_v38  ;;  %v3294_v17 = vunpack.c.l.b16 %v3270_v12 }
 0x64d   : > { %v3207_v43 = vpop.xlane.xlu2 %3206  ;;  %7631 = vmatmul.msk.bf16.gmra.mxu3 %vm2135_vm8, %v2419_v33 }
 0x64e   : > { %8234 = vrcp.f32 %v3207_v43  ;;  %3218 = vadd.xlane.f32.xlu0 %v3217_v25 }
 0x64f   : > { %8236 = vpow2.f32 %v3178_v5 }
 0x650   : > { %v10551_v3 = vpop.eup %8230  ;;  %8238 = vrcp.f32 %v2276_v32  ;;  %v3182_v32 = vmul.f32 1.442695, %v3151_v63 }
 0x651   : > { %8240 = vpow2.f32 %v3642_v26  ;;  %v3220_v45 = vsel %vm2135_vm8, %v10551_v3, 0.0  ;;  %v10557_v37 = vpop.eup %8232 }
 0x652   : > { %3221 = vadd.xlane.f32.xlu1 %v3220_v45  ;;  %v3226_v11 = vsel %vm2135_vm8, %v10557_v37, 0.0  ;;  %v10586_v45 = vpop.f32.mrf.mxu3 }
 0x653   : > { %v10561_v52 = vpop.xlane.xlu0 %2742  ;;  %3209 = vadd.xlane.f32.xlu2 %v3208_v8 }
 0x654   : > { %v8235_v60 = vpop.eup %8234 }
 0x655   : > { %v10563_v36 = vpop.eup %8236  ;;  %v3255_v31 = vmul.f32 %v8235_v60, %v10426_v23  ;;  %v2279_v6 = vpop.xlane.xlu2 %2278 }
 0x656   : > { %v8239_v59 = vpop.eup %8238  ;;  %8242 = vrcp.f32 %v2279_v6  ;;  %3227 = vadd.xlane.f32.xlu0 %v3226_v11  ;;  %v3223_v39 = vsel %vm2135_vm8, %v10563_v36, 0.0 }
 0x657   : > { %v10568_v38 = vpop.eup %8240  ;;  %8244 = vpow2.f32 %v3644_v15  ;;  %v3271_v14 = vpack.c.bf16 %v3255_v31, %v3255_v31  ;;  %v2310_v50 = vmul.f32 %v8239_v59, %v10385_v30  ;;  %v12876_v59 = vld [vmem:[#allocation13_spill] sm:$0xff] }
 0x658   : > { %8246 = vpow2.f32 %v3182_v32  ;;  %v3681_v23 = vsel %vm2135_vm8, %v10568_v38, 0.0 }
 0x659   : > { %v3295_v7 = vunpack.c.l.b16 %v3271_v14  ;;  %v2326_v25 = vpack.c.bf16 %v2310_v50, %v2310_v50  ;;  %v3668_v14 = vpop.xlane.xlu1 %3667 }
 0x65a   : > { %3224 = vadd.xlane.f32.xlu1 %v3223_v39 }
 0x65b   : > { %3682 = vadd.xlane.f32.xlu2 %v3681_v23  ;;  %v3299_v18 = vpack.c.b16 %v3295_v7, %v3294_v17  ;;  %v10575_v33 = vpop.xlane.xlu0 %2748  ;;  %v2415_v63 = vunpack.c.l.b16 %v2326_v25  ;;  %v10599_v17 = vpop.f32.mrf.mxu0 }
 0x65c   : > { %v8243_v5 = vpop.eup %8242  ;;  %v10602_v7 = vpop.f32.mrf.mxu3 }
 0x65d   : > { %v10577_v20 = vpop.eup %8244  ;;  %v2737_v26 = vpop.xlane.xlu2 %2736  ;;  %7660 = vmatmul.msk.bf16.gmra.mxu0 %vm2135_vm8, %v3299_v18  ;;  %v2311_v43 = vmul.f32 %v8243_v5, %v10446_v62 }
 0x65e   : > { %v10581_v41 = vpop.eup %8246  ;;  %8248 = vrcp.f32 %v2737_v26  ;;  %v3684_v8 = vsel %vm2135_vm8, %v10577_v20, 0.0 }
 0x65f   : > { %v2327_v30 = vpack.c.bf16 %v2311_v43, %v2311_v43  ;;  %8250 = vrcp.f32 %v10528_v24  ;;  %v3229_v53 = vsel %vm2135_vm8, %v10581_v41, 0.0 }
 0x660   : > { %8252 = vrcp.f32 %v10543_v35 }
 0x661   : > { %v2416_v19 = vunpack.c.l.b16 %v2327_v30 }
 0x662   : > { %3230 = vadd.xlane.f32.xlu1 %v3229_v53  ;;  %v3671_v53 = vpop.xlane.xlu1 %3670 }
 0x663   : > { %3685 = vadd.xlane.f32.xlu2 %v3684_v8  ;;  %v2420_v62 = vpack.c.b16 %v2416_v19, %v2415_v63  ;;  %v10591_v12 = vpop.xlane.xlu0 %3673 }
 0x664   : > { %v8249_v15 = vpop.eup %8248  ;;  %v10616_v8 = vpop.f32.mrf.mxu3 }
 0x665   : > { %v3593_v60 = vpop.xlane.xlu2 %3592  ;;  %7632 = vmatmul.msk.bf16.gmra.mxu3 %vm2135_vm8, %v2420_v62  ;;  %v8251_v32 = vpop.eup %8250  ;;  %v2781_v31 = vmul.f32 %v8249_v15, %v10462_v10 }
 0x666   : > { %v3621_v24 = vsub.f32 %v10320_v29, %v3593_v60  ;;  %v2780_v11 = vmul.f32 %v8251_v32, %v10304_v42  ;;  %v8253_v10 = vpop.eup %8252 }
 0x667   : > { %v2797_v39 = vpack.c.bf16 %v2781_v31, %v2781_v31 }
 0x668   : > { %v3646_v6 = vmul.f32 1.442695, %v3621_v24  ;;  %v2796_v29 = vpack.c.bf16 %v2780_v11, %v2780_v11 }
 0x669   : > { %v2886_v23 = vunpack.c.l.b16 %v2797_v39 }
 0x66a   : > { %8254 = vpow2.f32 %v3646_v6  ;;  %3849 = vrot.lane.b32.xlu0 %v12876_v59, %s8692_s26  ;;  %v2885_v18 = vunpack.c.l.b16 %v2796_v29 }
 0x66b   : > { %8256 = vrcp.f32 %v10518_v4  ;;  %v10607_v35 = vpop.xlane.xlu0 %3601  ;;  %v3725_v4 = vmul.f32 %v8253_v10, %v10421_v54 }
 0x66c   : > { %v2893_v43 = vpack.c.b16 %v2886_v23, %v2885_v18  ;;  %v10626_v10 = vpop.f32.mrf.mxu3 }
 0x66d   : > { %v2740_v50 = vpop.xlane.xlu2 %2739  ;;  %v3741_v62 = vpack.c.bf16 %v3725_v4, %v3725_v4 }
 0x66e   : > { %8258 = vrcp.f32 %v2740_v50 }
 0x66f   : > { %8260 = vrcp.f32 %v10561_v52  ;;  %v10614_v52 = vpop.f32.mrf.mxu0  ;;  %v3765_v24 = vunpack.c.l.b16 %v3741_v62 }
 0x670   : > { %v10604_v42 = vpop.eup %8254  ;;  %8262 = vrcp.f32 %v3671_v53 }
 0x671   : > { %v3687_v5 = vsel %vm2135_vm8, %v10604_v42, 0.0  ;;  %v8257_v26 = vpop.eup %8256  ;;  %8264 = vrcp.f32 %v3668_v14 }
 0x672   : > { %3688 = vadd.xlane.f32.xlu1 %v3687_v5  ;;  %v3724_v30 = vmul.f32 %v8257_v26, %v10289_v1  ;;  %v12877_v1 = vld [vmem:[#allocation14_spill] sm:$0xff] }
 0x673   : > { %v10620_v54 = vpop.xlane.xlu0 %3679 }
 0x674   : > { %v8259_v25 = vpop.eup %8258  ;;  %v3740_v60 = vpack.c.bf16 %v3724_v30, %v3724_v30 }
 0x675   : > { %v2746_v63 = vpop.xlane.xlu2 %2745  ;;  %7645 = vmatmul.msk.bf16.vlgmr.msra.gmra.mxu3 %vm2135_vm8, %v2893_v43  ;;  %v8261_v19 = vpop.eup %8260  ;;  %v2782_v15 = vmul.f32 %v8259_v25, %v10487_v13 }
 0x676   : > { %v2783_v32 = vmul.f32 %v8261_v19, %v10440_v27  ;;  %v3764_v6 = vunpack.c.l.b16 %v3740_v60  ;;  %8266 = vrcp.f32 %v2746_v63  ;;  %v3596_v13 = vpop.xlane.xlu1 %3595  ;;  %v8263_v27 = vpop.eup %8262 }
 0x677   : > { %v2798_v31 = vpack.c.bf16 %v2782_v15, %v2782_v15  ;;  %v10624_v39 = vpop.f32.mrf.mxu0  ;;  %8268 = vrcp.f32 %v10575_v33  ;;  %v8265_v18 = vpop.eup %8264  ;;  %v3727_v14 = vmul.f32 %v8263_v27, %v10350_v44 }
 0x678   : > { %v2799_v59 = vpack.c.bf16 %v2783_v32, %v2783_v32  ;;  %v3772_v29 = vpack.c.b16 %v3765_v24, %v3764_v6  ;;  %v3726_v43 = vmul.f32 %v8265_v18, %v10334_v0  ;;  %v10639_v15 = vpop.f32.mrf.mxu3  ;;  %8270 = vrcp.f32 %v10591_v12 }
 0x679   : > { %v2887_v50 = vunpack.c.l.b16 %v2798_v31  ;;  %v3743_v30 = vpack.c.bf16 %v3727_v14, %v3727_v14  ;;  %v3622_v12 = vsub.f32 %v10332_v47, %v3596_v13 }
 0x67a   : > { %v2888_v23 = vunpack.c.l.b16 %v2799_v59  ;;  %v3742_v33 = vpack.c.bf16 %v3726_v43, %v3726_v43 }
 0x67b   : > { %3853 = vrot.lane.b32.xlu2 %v12877_v1, %s8692_s26  ;;  %v10631_v4 = vpop.xlane.xlu0 %2754  ;;  %v3767_v44 = vunpack.c.l.b16 %v3743_v30  ;;  %v3648_v27 = vmul.f32 1.442695, %v3622_v12 }
 0x67c   : > { %v2894_v5 = vpack.c.b16 %v2888_v23, %v2887_v50  ;;  %v8267_v26 = vpop.eup %8266  ;;  %v3766_v60 = vunpack.c.l.b16 %v3742_v33 }
 0x67d   : > { %v3777_v11 = vpop.permute.xlu2 %3776  ;;  %v8269_v25 = vpop.eup %8268  ;;  %v2784_v53 = vmul.f32 %v8267_v26, %v10498_v22 }
 0x67e   : > { %3807 = vmatpush.bf16.msrb.mxu0 %v3777_v11  ;;  %v3677_v19 = vpop.xlane.xlu1 %3676  ;;  %v2785_v62 = vmul.f32 %v8269_v25, %v10457_v21  ;;  %v3773_v22 = vpack.c.b16 %v3767_v44, %v3766_v60  ;;  %v8271_v31 = vpop.eup %8270 }
 0x67f   : > { %v10636_v63 = vpop.f32.mrf.mxu0  ;;  %v2800_v0 = vpack.c.bf16 %v2784_v53, %v2784_v53  ;;  %8272 = vrcp.f32 %v3677_v19  ;;  %v3728_v59 = vmul.f32 %v8271_v31, %v10470_v51  ;;  %v3624_v53 = vsub.f32 %v10373_v61, %v10607_v35 }
 0x680   : > { %v2801_v32 = vpack.c.bf16 %v2785_v62, %v2785_v62  ;;  %8274 = vpow2.f32 %v3648_v27 }
 0x681   : > { %7673 = vmatmul.msk.bf16.vlgmr.msrb.gmra.mxu0 %vm2135_vm8, %v3772_v29  ;;  %v2889_v1 = vunpack.c.l.b16 %v2800_v0  ;;  %v3744_v14 = vpack.c.bf16 %v3728_v59, %v3728_v59  ;;  %v3652_v62 = vmul.f32 1.442695, %v3624_v53 }
 0x682   : > { %v2890_v21 = vunpack.c.l.b16 %v2801_v32 }
 0x683   : > { %v3611_v24 = vpop.xlane.xlu0 %3610  ;;  %v3768_v13 = vunpack.c.l.b16 %v3744_v14 }
 0x684   : > { %v2895_v29 = vpack.c.b16 %v2890_v21, %v2889_v1  ;;  %v3627_v0 = vsub.f32 %v10508_v34, %v3611_v24 }
 0x685   : > { %7646 = vmatmul.msk.bf16.gmra.mxu3 %vm2135_vm8, %v2894_v5  ;;  %v8273_v11 = vpop.eup %8272 }
 0x686   : > { %v3729_v50 = vmul.f32 %v8273_v11, %v10380_v16  ;;  %v3605_v18 = vpop.xlane.xlu1 %3604  ;;  %v10658_v16 = vpop.eup %8274  ;;  %v3658_v61 = vmul.f32 1.442695, %v3627_v0 }
 0x687   : > { %v10644_v6 = vpop.f32.mrf.mxu0  ;;  %v3625_v47 = vsub.f32 %v10401_v58, %v3605_v18  ;;  %v3690_v33 = vsel %vm2135_vm8, %v10658_v16, 0.0 }
 0x688   : > { %v3745_v5 = vpack.c.bf16 %v3729_v50, %v3729_v50 }
 0x689   : > { %v3654_v25 = vmul.f32 1.442695, %v3625_v47 }
 0x68a   : > { %v3769_v43 = vunpack.c.l.b16 %v3745_v5 }
 0x68b   : > { %3851 = vrot.lane.b32.xlu1 %v9609_v28, %s8692_s26  ;;  %v10649_v28 = vpop.f32.mrf.mxu3  ;;  %8276 = vpow2.f32 %v3654_v25 }
 0x68c   : > { %v3774_v30 = vpack.c.b16 %v3769_v43, %v3768_v13  ;;  %8278 = vpow2.f32 %v3652_v62 }
 0x68d   : > { %8280 = vrcp.f32 %v10631_v4 }
 0x68e   : > { %8282 = vpow2.f32 %v3658_v61  ;;  %v3608_v1 = vpop.xlane.xlu1 %3607 }
 0x68f   : > { %v10653_v26 = vpop.f32.mrf.mxu0  ;;  %v3626_v5 = vsub.f32 %v10417_v9, %v3608_v1 }
 0x691   : > { %7674 = vmatmul.msk.bf16.gmra.mxu0 %vm2135_vm8, %v3773_v22  ;;  %v10669_v44 = vpop.eup %8276  ;;  %v3656_v53 = vmul.f32 1.442695, %v3626_v5 }
 0x692   : > { %v3699_v60 = vsel %vm2135_vm8, %v10669_v44, 0.0  ;;  %v10678_v22 = vpop.eup %8278 }
 0x693   : > { %v10656_v51 = vpop.f32.mrf.mxu3  ;;  %v3696_v31 = vsel %vm2135_vm8, %v10678_v22, 0.0  ;;  %v8281_v21 = vpop.eup %8280 }
 0x694   : > { %v10685_v11 = vpop.eup %8282  ;;  %v2787_v59 = vmul.f32 %v8281_v21, %v10504_v55  ;;  %v7901_v55 = vpack.i.bf16 %v10614_v52, %v10599_v17  ;;  %v7916_v17 = vpack.i.bf16 %v10636_v63, %v10624_v39 }
 0x695   : > { %7647 = vmatmul.msk.bf16.gmra.mxu3 %vm2135_vm8, %v2895_v29  ;;  %v3705_v4 = vsel %vm2135_vm8, %v10685_v11, 0.0 }
 0x696   : > { %v3856_v23 = vpop.permute.xlu0 %3855  ;;  %v3213_v50 = vpop.xlane.xlu1 %3212  ;;  %v2803_v18 = vpack.c.bf16 %v2787_v59, %v2787_v59 }
 0x697   : > { %3877 = vmatpush.bf16.msra.mxu3 %v3856_v23  ;;  %v10665_v19 = vpop.f32.mrf.mxu0 }
 0x69b   : > { %v10667_v58 = vpop.f32.mrf.mxu3 }
 0x69f   : > { %v10674_v32 = vpop.f32.mrf.mxu0 }
 0x6a1   : > { %7675 = vmatmul.msk.bf16.gmra.mxu0 %vm2135_vm8, %v3774_v30  ;;  %v2892_v30 = vunpack.c.l.b16 %v2803_v18 }
 0x6a3   : > { %v10676_v35 = vpop.f32.mrf.mxu3 }
 0x6a4   : > { %3691 = vadd.xlane.f32.xlu2 %v3690_v33 }
 0x6a7   : > { %v10683_v34 = vpop.f32.mrf.mxu0 }
 0x6ab   : > { %v10687_v12 = vpop.f32.mrf.mxu3 }
 0x6ac   : > { %3700 = vadd.xlane.f32.xlu2 %v3699_v60  ;;  %v3216_v60 = vpop.xlane.xlu1 %3215 }
 0x6af   : > { %v10695_v47 = vpop.f32.mrf.mxu0 }
 0x6b3   : > { %v10699_v33 = vpop.f32.mrf.mxu3 }
 0x6b5   : > { %3697 = vadd.xlane.f32.xlu1 %v3696_v31 }
 0x6b6   : > { %v2752_v24 = vpop.xlane.xlu2 %2751 }
 0x6b7   : > { %8284 = vrcp.f32 %v2752_v24  ;;  %v10703_v62 = vpop.f32.mrf.mxu0 }
 0x6b8   : > { %8286 = vrcp.f32 %v3213_v50 }
 0x6bb   : > { %v10716_v59 = vpop.f32.mrf.mxu3 }
 0x6bd   : > { %v8285_v29 = vpop.eup %8284  ;;  %3706 = vadd.xlane.f32.xlu1 %v3705_v4  ;;  %v7931_v4 = vpack.i.bf16 %v10653_v26, %v10644_v6 }
 0x6be   : > { %v3599_v27 = vpop.xlane.xlu2 %3598  ;;  %v2786_v23 = vmul.f32 %v8285_v29, %v10523_v2  ;;  %v8287_v9 = vpop.eup %8286 }
 0x6bf   : > { %v3623_v14 = vsub.f32 %v10352_v40, %v3599_v27  ;;  %v3257_v52 = vmul.f32 %v8287_v9, %v10435_v49  ;;  %v3340_v27 = vpop.f32.mrf.mxu0 }
 0x6c0   : > { %v2802_v13 = vpack.c.bf16 %v2786_v23, %v2786_v23 }
 0x6c1   : > { %v3650_v43 = vmul.f32 1.442695, %v3623_v14  ;;  %v3219_v1 = vpop.xlane.xlu0 %3218  ;;  %v3273_v21 = vpack.c.bf16 %v3257_v52, %v3257_v52 }
 0x6c2   : > { %v2891_v25 = vunpack.c.l.b16 %v2802_v13 }
 0x6c3   : > { %8288 = vpow2.f32 %v3650_v43  ;;  %v3362_v29 = vunpack.c.l.b16 %v3273_v21 }
 0x6c4   : > { %7902 = vrot.lane.b32.xlu2 %v7901_v55, %s8693_s10  ;;  %v2896_v40 = vpack.c.b16 %v2892_v30, %v2891_v25 }
 0x6c5   : > { %v3222_v23 = vpop.xlane.xlu1 %3221 }
 0x6c6   : > { %v3210_v2 = vpop.xlane.xlu2 %3209  ;;  %7648 = vmatmul.msk.bf16.gmra.mxu3 %vm2135_vm8, %v2896_v40 }
 0x6c7   : > { %8290 = vrcp.f32 %v3210_v2  ;;  %v3343_v9 = vpop.f32.mrf.mxu0 }
 0x6c8   : > { %8292 = vpow2.f32 %v3656_v53  ;;  %v7946_v53 = vpack.i.bf16 %v10674_v32, %v10665_v19 }
 0x6c9   : > { %v10705_v0 = vpop.eup %8288  ;;  %8294 = vrcp.f32 %v10620_v54 }
 0x6ca   : > { %v3693_v61 = vsel %vm2135_vm8, %v10705_v0, 0.0  ;;  %8296 = vrcp.f32 %v3219_v1 }
 0x6cb   : > { %3694 = vadd.xlane.f32.xlu0 %v3693_v61 }
 0x6cc   : > { %7917 = vrot.lane.b32.xlu2 %v7916_v17, %s8693_s10 }
 0x6cd   : > { %v8291_v31 = vpop.eup %8290 }
 0x6ce   : > { %v10714_v24 = vpop.eup %8292  ;;  %v3256_v54 = vmul.f32 %v8291_v31, %v10548_v46  ;;  %v3683_v39 = vpop.xlane.xlu2 %3682 }
 0x6cf   : > { %v8295_v63 = vpop.eup %8294  ;;  %8298 = vrcp.f32 %v3683_v39  ;;  %v3702_v14 = vsel %vm2135_vm8, %v10714_v24, 0.0 }
 0x6d0   : > { %v3272_v49 = vpack.c.bf16 %v3256_v54, %v3256_v54  ;;  %8300 = vrcp.f32 %v3216_v60  ;;  %v3730_v50 = vmul.f32 %v8295_v63, %v10495_v48  ;;  %v8297_v5 = vpop.eup %8296  ;;  %v10726_v6 = vpop.f32.mrf.mxu3  ;;  %v7906_v54 = vpack.i.bf16 %v10695_v47, %v10683_v34 }
 0x6d1   : > { %v3259_v25 = vmul.f32 %v8297_v5, %v10539_v57  ;;  %v3228_v5 = vpop.xlane.xlu0 %3227 }
 0x6d2   : > { %v3361_v18 = vunpack.c.l.b16 %v3272_v49  ;;  %v3746_v43 = vpack.c.bf16 %v3730_v50, %v3730_v50 }
 0x6d3   : > { %3703 = vadd.xlane.f32.xlu0 %v3702_v14  ;;  %v3275_v52 = vpack.c.bf16 %v3259_v25, %v3259_v25 }
 0x6d4   : > { %v3369_v46 = vpack.c.b16 %v3362_v29, %v3361_v18  ;;  %7932 = vrot.lane.b32.xlu2 %v7931_v4, %s8693_s10  ;;  %v3770_v2 = vunpack.c.l.b16 %v3746_v43  ;;  %v7921_v18 = vpack.i.bf16 %v3340_v27, %v10703_v62 }
 0x6d5   : > { %v8299_v13 = vpop.eup %8298  ;;  %v3364_v57 = vunpack.c.l.b16 %v3275_v52 }
 0x6d6   : > { %v3731_v55 = vmul.f32 %v8299_v13, %v10568_v38  ;;  %v10728_v26 = vpop.xlane.xlu2 %3685  ;;  %7661 = vmatmul.msk.bf16.vlgmr.msrb.gmra.mxu3 %vm2135_vm8, %v3369_v46  ;;  %v8301_v48 = vpop.eup %8300 }
 0x6d7   : > { %v3258_v40 = vmul.f32 %v8301_v48, %v10475_v56  ;;  %v3225_v38 = vpop.xlane.xlu1 %3224  ;;  %v3345_v56 = vpop.f32.mrf.mxu0 }
 0x6d8   : > { %v3747_v30 = vpack.c.bf16 %v3731_v55, %v3731_v55  ;;  %8302 = vrcp.f32 %v3225_v38  ;;  %v10737_v31 = vpop.f32.mrf.mxu3  ;;  %v7936_v43 = vpack.i.bf16 %v3345_v56, %v3343_v9 }
 0x6d9   : > { %v3274_v61 = vpack.c.bf16 %v3258_v40, %v3258_v40  ;;  %8304 = vrcp.f32 %v3222_v23 }
 0x6da   : > { %v3771_v17 = vunpack.c.l.b16 %v3747_v30 }
 0x6db   : > { %v3363_v19 = vunpack.c.l.b16 %v3274_v61 }
 0x6dc   : > { %7947 = vrot.lane.b32.xlu2 %v7946_v53, %s8693_s10  ;;  %v3775_v60 = vpack.c.b16 %v3771_v17, %v3770_v2  ;;  %v3850_v38 = vpop.permute.xlu0 %3849 }
 0x6dd   : > { %v3370_v32 = vpack.c.b16 %v3364_v57, %v3363_v19 }
 0x6de   : > { %v3854_v1 = vpop.permute.xlu2 %3853  ;;  %7676 = vmatmul.msk.bf16.gmra.mxu0 %vm2135_vm8, %v3775_v60  ;;  %v8303_v21 = vpop.eup %8302 }
 0x6df   : > { %3878 = vmatpush.bf16.msra.mxu3 %v3854_v1  ;;  %v8305_v39 = vpop.eup %8304  ;;  %v3261_v63 = vmul.f32 %v8303_v21, %v10563_v36  ;;  %v3231_v50 = vpop.xlane.xlu1 %3230 }
 0x6e0   : > { %v3260_v4 = vmul.f32 %v8305_v39, %v10551_v3  ;;  %v3348_v23 = vpop.f32.mrf.mxu0  ;;  %8306 = vrcp.f32 %v3231_v50 }
 0x6e1   : > { %v3277_v29 = vpack.c.bf16 %v3261_v63, %v3261_v63  ;;  %8308 = vrcp.f32 %v3228_v5 }
 0x6e2   : > { %v3276_v14 = vpack.c.bf16 %v3260_v4, %v3260_v4 }
 0x6e3   : > { %v3366_v34 = vunpack.c.l.b16 %v3277_v29 }
 0x6e4   : > { %v3365_v46 = vunpack.c.l.b16 %v3276_v14 }
 0x6e6   : > { %7662 = vmatmul.msk.bf16.gmra.mxu3 %vm2135_vm8, %v3370_v32  ;;  %v3371_v36 = vpack.c.b16 %v3366_v34, %v3365_v46  ;;  %v8307_v13 = vpop.eup %8306 }
 0x6e7   : > { %7907 = vrot.lane.b32.xlu0 %v7906_v54, %s8694_s29  ;;  %v3689_v55 = vpop.xlane.xlu1 %3688  ;;  %v8309_v48 = vpop.eup %8308  ;;  %v3263_v62 = vmul.f32 %v8307_v13, %v10581_v41 }
 0x6e8   : > { %v10744_v49 = vpop.f32.mrf.mxu3  ;;  %v3350_v3 = vpop.f32.mrf.mxu0  ;;  %v3262_v25 = vmul.f32 %v8309_v48, %v10557_v37  ;;  %8310 = vrcp.f32 %v3689_v55 }
 0x6e9   : > { %v3279_v30 = vpack.c.bf16 %v3263_v62, %v3263_v62  ;;  %v7951_v53 = vpack.i.bf16 %v3350_v3, %v3348_v23  ;;  %8312 = vrcp.f32 %v10728_v26 }
 0x6ea   : > { %v3278_v2 = vpack.c.bf16 %v3262_v25, %v3262_v25 }
 0x6eb   : > { %v3368_v9 = vunpack.c.l.b16 %v3279_v30 }
 0x6ec   : > { %v3367_v61 = vunpack.c.l.b16 %v3278_v2 }
 0x6ee   : > { %v3372_v37 = vpack.c.b16 %v3368_v9, %v3367_v61  ;;  %v8311_v41 = vpop.eup %8310 }
 0x6ef   : > { %7922 = vrot.lane.b32.xlu0 %v7921_v18, %s8694_s29  ;;  %v8313_v57 = vpop.eup %8312  ;;  %v3733_v56 = vmul.f32 %v8311_v41, %v10604_v42 }
 0x6f0   : > { %v10749_v47 = vpop.f32.mrf.mxu3  ;;  %v3732_v26 = vmul.f32 %v8313_v57, %v10577_v20 }
 0x6f1   : > { %v3749_v21 = vpack.c.bf16 %v3733_v56, %v3733_v56 }
 0x6f2   : > { %v3748_v54 = vpack.c.bf16 %v3732_v26, %v3732_v26 }
 0x6f3   : > { %v3838_v63 = vunpack.c.l.b16 %v3749_v21 }
 0x6f4   : > { %v3837_v50 = vunpack.c.l.b16 %v3748_v54 }
 0x6f6   : > { %7663 = vmatmul.msk.bf16.gmra.mxu3 %vm2135_vm8, %v3371_v36  ;;  %v3845_v23 = vpack.c.b16 %v3838_v63, %v3837_v50 }
 0x6f7   : > { %7937 = vrot.lane.b32.xlu0 %v7936_v43, %s8694_s29 }
 0x6f8   : > { %v2930_v27 = vpop.f32.mrf.mxu3 }
 0x6fd   : > { %v3852_v40 = vpop.permute.xlu1 %3851 }
 0x6fe   : > { %v3809_v17 = vpop.f32.mrf.mxu0  ;;  %3879 = vmatpush.bf16.msra.mxu3 %v3852_v40 }
 0x6ff   : > { %7952 = vrot.lane.b32.xlu0 %v7951_v53, %s8694_s29 }
 0x700   : > { %v2932_v52 = vpop.f32.mrf.mxu3 }
 0x701   : > { %v7961_v60 = vpack.i.bf16 %v2932_v52, %v2930_v27 }
 0x702   : > { %3880 = vmatpush.bf16.msra.mxu3 %v3850_v38 }
 0x703   : > { %7962 = vrot.lane.b32.xlu2 %v7961_v60, %s8693_s10 }
 0x706   : > { %7664 = vmatmul.msk.bf16.gmra.mxu3 %vm2135_vm8, %v3372_v37  ;;  %v3811_v1 = vpop.f32.mrf.mxu0 }
 0x707   : > { %v7911_v19 = vpack.i.bf16 %v3811_v1, %v3809_v17  ;;  %v7846_v1 = vld [vmem:[%s12878_s1 + $0x8] sm:$0xff] }
 0x708   : > { %v2935_v32 = vpop.f32.mrf.mxu3  ;;  %4199 = vmatpush.bf16.msrb.mxu1 %v7846_v1 }
 0x709   : > { %7912 = vrot.lane.b32.xlu1 %v7911_v19, %s8695_s14 }
 0x70e   : > { %v3814_v39 = vpop.f32.mrf.mxu0 }
 0x710   : > { %v2937_v4 = vpop.f32.mrf.mxu3 }
 0x711   : > { %v7976_v29 = vpack.i.bf16 %v2937_v4, %v2935_v32 }
 0x713   : > { %7977 = vrot.lane.b32.xlu2 %v7976_v29, %s8693_s10 }
 0x716   : > { %v3816_v18 = vpop.f32.mrf.mxu0  ;;  %7677 = vmatmul.msk.bf16.vlgmr.msra.gmra.mxu3 %vm2135_vm8, %v3845_v23 }
 0x717   : > { %v7926_v42 = vpack.i.bf16 %v3816_v18, %v3814_v39  ;;  %v3692_v13 = vpop.xlane.xlu2 %3691  ;;  %v7845_v39 = vld [vmem:[%s12878_s1] sm:$0xff]  ;;  %s12929_s1 = sld [smem:[#allocation57_spill]] }
 0x718   : > { %v2940_v14 = vpop.f32.mrf.mxu3  ;;  %8314 = vrcp.f32 %v3692_v13  ;;  %4200 = vmatpush.bf16.msrb.mxu1 %v7845_v39 }
 0x719   : > { %7927 = vrot.lane.b32.xlu1 %v7926_v42, %s8695_s14 }
 0x71d   : > { %s12930_s4 = scalar_lea.vmem %s12929_s1, %s8857_s9 }
 0x71e   : > { %v3819_v5 = vpop.f32.mrf.mxu0  ;;  %v8315_v55 = vpop.eup %8314 }
 0x71f   : > { %v3734_v3 = vmul.f32 %v8315_v55, %v10658_v16  ;;  %v3701_v25 = vpop.xlane.xlu2 %3700 }
 0x720   : > { %v2942_v34 = vpop.f32.mrf.mxu3 }
 0x721   : > { %v7991_v20 = vpack.i.bf16 %v2942_v34, %v2940_v14  ;;  %v3750_v27 = vpack.c.bf16 %v3734_v3, %v3734_v3 }
 0x723   : > { %7992 = vrot.lane.b32.xlu2 %v7991_v20, %s8693_s10  ;;  %v3839_v2 = vunpack.c.l.b16 %v3750_v27 }
 0x726   : > { %v3821_v46 = vpop.f32.mrf.mxu0 }
 0x727   : > { %v7941_v36 = vpack.i.bf16 %v3821_v46, %v3819_v5 }
 0x728   : > { %v3698_v48 = vpop.xlane.xlu1 %3697 }
 0x729   : > { %7942 = vrot.lane.b32.xlu1 %v7941_v36, %s8695_s14 }
 0x730   : > { %v3707_v19 = vpop.xlane.xlu1 %3706 }
 0x73e   : > { %v3695_v43 = vpop.xlane.xlu0 %3694 }
 0x73f   : > { %8316 = vrcp.f32 %v3695_v43 }
 0x740   : > { %8318 = vrcp.f32 %v3698_v48 }
 0x741   : > { %8320 = vrcp.f32 %v3701_v25 }
 0x745   : > { %v8317_v62 = vpop.eup %8316 }
 0x746   : > { %v3735_v30 = vmul.f32 %v8317_v62, %v10705_v0  ;;  %v8319_v52 = vpop.eup %8318  ;;  %v3704_v0 = vpop.xlane.xlu0 %3703 }
 0x747   : > { %v8321_v38 = vpop.eup %8320  ;;  %v3736_v16 = vmul.f32 %v8319_v52, %v10678_v22  ;;  %8322 = vrcp.f32 %v3704_v0 }
 0x748   : > { %v3751_v53 = vpack.c.bf16 %v3735_v30, %v3735_v30  ;;  %v3737_v61 = vmul.f32 %v8321_v38, %v10669_v44  ;;  %8324 = vrcp.f32 %v3707_v19 }
 0x749   : > { %v2945_v40 = vpop.f32.mrf.mxu3  ;;  %v3752_v41 = vpack.c.bf16 %v3736_v16, %v3736_v16 }
 0x74a   : > { %v3840_v17 = vunpack.c.l.b16 %v3751_v53  ;;  %v3753_v57 = vpack.c.bf16 %v3737_v61, %v3737_v61 }
 0x74b   : > { %v3841_v56 = vunpack.c.l.b16 %v3752_v41 }
 0x74c   : > { %v3846_v9 = vpack.c.b16 %v3840_v17, %v3839_v2  ;;  %v3842_v26 = vunpack.c.l.b16 %v3753_v57 }
 0x74d   : > { %v8323_v54 = vpop.eup %8322 }
 0x74e   : > { %7678 = vmatmul.msk.bf16.gmra.mxu3 %vm2135_vm8, %v3846_v9  ;;  %v3847_v22 = vpack.c.b16 %v3842_v26, %v3841_v56  ;;  %v8325_v44 = vpop.eup %8324  ;;  %v3738_v63 = vmul.f32 %v8323_v54, %v10714_v24 }
 0x74f   : > { %v3739_v29 = vmul.f32 %v8325_v44, %v10685_v11  ;;  %v7903_v11 = vpop.permute.xlu2 %7902 }
 0x750   : > { %v3754_v18 = vpack.c.bf16 %v3738_v63, %v3738_v63  ;;  %v7905_v43 = vunpack.i.h.bf16 %v7903_v11  ;;  %v7904_v55 = vunpack.i.l.bf16 %v7903_v11 }
 0x751   : > { %v2947_v60 = vpop.f32.mrf.mxu3  ;;  %v3755_v14 = vpack.c.bf16 %v3739_v29, %v3739_v29 }
 0x752   : > { %v8006_v37 = vpack.i.bf16 %v2947_v60, %v2945_v40  ;;  %v3843_v5 = vunpack.c.l.b16 %v3754_v18  ;;  %v4095_v25 = vsel %vm1980_vm7, %v10602_v7, %v7905_v43  ;;  %v4094_v30 = vsel %vm1980_vm7, %v10586_v45, %v7904_v55 }
 0x753   : > { %v3844_v20 = vunpack.c.l.b16 %v3755_v14 }
 0x754   : > { %8007 = vrot.lane.b32.xlu2 %v8006_v37, %s8693_s10 }
 0x755   : > { %v3848_v46 = vpack.c.b16 %v3844_v20, %v3843_v5 }
 0x757   : > { %v7918_v7 = vpop.permute.xlu2 %7917 }
 0x758   : > { %v7920_v45 = vunpack.i.h.bf16 %v7918_v7  ;;  %v7919_v37 = vunpack.i.l.bf16 %v7918_v7 }
 0x759   : > { %v3406_v32 = vpop.f32.mrf.mxu3  ;;  %v7908_v13 = vpop.permute.xlu0 %7907 }
 0x75a   : > { %v7910_v3 = vunpack.i.h.bf16 %v7908_v13  ;;  %v7909_v48 = vunpack.i.l.bf16 %v7908_v13  ;;  %v4097_v19 = vsel %vm1980_vm7, %v10626_v10, %v7920_v45  ;;  %v4096_v56 = vsel %vm1980_vm7, %v10616_v8, %v7919_v37 }
 0x75b   : > { %v3824_v21 = vpop.f32.mrf.mxu0 }
 0x75c   : > { %v4112_v2 = vsel %vm4110_vm9, %v4095_v25, %v7910_v3  ;;  %v4111_v17 = vsel %vm4110_vm9, %v4094_v30, %v7909_v48 }
 0x75e   : > { %7679 = vmatmul.msk.bf16.gmra.mxu3 %vm2135_vm8, %v3847_v22 }
 0x75f   : > { %v7933_v10 = vpop.permute.xlu2 %7932 }
 0x760   : > { %v7935_v8 = vunpack.i.h.bf16 %v7933_v10 }
 0x761   : > { %v3408_v4 = vpop.f32.mrf.mxu3  ;;  %v7923_v61 = vpop.permute.xlu0 %7922 }
 0x762   : > { %v7966_v50 = vpack.i.bf16 %v3408_v4, %v3406_v32  ;;  %v7925_v41 = vunpack.i.h.bf16 %v7923_v61  ;;  %v7924_v0 = vunpack.i.l.bf16 %v7923_v61  ;;  %v4099_v5 = vsel %vm1980_vm7, %v10649_v28, %v7935_v8 }
 0x763   : > { %v3826_v23 = vpop.f32.mrf.mxu0 }
 0x764   : > { %v7956_v42 = vpack.i.bf16 %v3826_v23, %v3824_v21  ;;  %7967 = vrot.lane.b32.xlu0 %v7966_v50, %s8694_s29  ;;  %v4114_v21 = vsel %vm4110_vm9, %v4097_v19, %v7925_v41  ;;  %v4113_v22 = vsel %vm4110_vm9, %v4096_v56, %v7924_v0  ;;  %v7934_v50 = vunpack.i.l.bf16 %v7933_v10 }
 0x766   : > { %7957 = vrot.lane.b32.xlu1 %v7956_v42, %s8695_s14 }
 0x767   : > { %v7948_v48 = vpop.permute.xlu2 %7947 }
 0x769   : > { %v3411_v34 = vpop.f32.mrf.mxu3  ;;  %v7938_v29 = vpop.permute.xlu0 %7937 }
 0x76a   : > { %v7940_v23 = vunpack.i.h.bf16 %v7938_v29  ;;  %v7939_v18 = vunpack.i.l.bf16 %v7938_v29 }
 0x76e   : > { %7680 = vmatmul.msk.bf16.gmra.mxu3 %vm2135_vm8, %v3848_v46 }
 0x76f   : > { %v7963_v10 = vpop.permute.xlu2 %7962 }
 0x770   : > { %v7965_v8 = vunpack.i.h.bf16 %v7963_v10 }
 0x771   : > { %v3413_v24 = vpop.f32.mrf.mxu3 }
 0x772   : > { %v7981_v36 = vpack.i.bf16 %v3413_v24, %v3411_v34  ;;  %v4098_v34 = vsel %vm1980_vm7, %v10639_v15, %v7934_v50  ;;  %v4116_v24 = vsel %vm4110_vm9, %v4099_v5, %v7940_v23  ;;  %v7953_v15 = vpop.permute.xlu0 %7952  ;;  %v7964_v50 = vunpack.i.l.bf16 %v7963_v10 }
 0x773   : > { %v7955_v25 = vunpack.i.h.bf16 %v7953_v15  ;;  %v7954_v30 = vunpack.i.l.bf16 %v7953_v15 }
 0x774   : > { %7982 = vrot.lane.b32.xlu0 %v7981_v36, %s8694_s29  ;;  %v4115_v36 = vsel %vm4110_vm9, %v4098_v34, %v7939_v18  ;;  %v4102_v34 = vsel %vm1980_vm7, %v10676_v35, %v7964_v50 }
 0x779   : > { %v3416_v62 = vpop.f32.mrf.mxu3 }
 0x77b   : > { %v7913_v27 = vpop.permute.xlu1 %7912 }
 0x77c   : > { %v7915_v53 = vunpack.i.h.bf16 %v7913_v27  ;;  %v7914_v40 = vunpack.i.l.bf16 %v7913_v27  ;;  %v7949_v27 = vunpack.i.l.bf16 %v7948_v48 }
 0x77e   : > { %v4128_v9 = vsel %vm4127_vm10, %v4111_v17, %v7914_v40  ;;  %v4129_v52 = vsel %vm4127_vm10, %v4112_v2, %v7915_v53  ;;  %v4100_v40 = vsel %vm1980_vm7, %v10656_v51, %v7949_v27 }
 0x77f   : > { %v4149_v38 = vpack.c.bf16 %v4129_v52, %v4128_v9 }
 0x781   : > { %v3418_v16 = vpop.f32.mrf.mxu3  ;;  %7689 = vmatmul.msk.bf16.vlgmr.msrb.gmra.mxu1 %vm1369_vm2, %v4149_v38 }
 0x782   : > { %v7996_v60 = vpack.i.bf16 %v3418_v16, %v3416_v62  ;;  %v7950_v62 = vunpack.i.h.bf16 %v7948_v48  ;;  %v4117_v16 = vsel %vm4110_vm9, %v4100_v40, %v7954_v30 }
 0x784   : > { %7997 = vrot.lane.b32.xlu0 %v7996_v60, %s8694_s29  ;;  %v4101_v2 = vsel %vm1980_vm7, %v10667_v58, %v7950_v62  ;;  %v8589_v62 = vld [vmem:[#allocation2 + $0x10] sm:$0xff] }
 0x785   : > { %v4118_v38 = vsel %vm4110_vm9, %v4101_v2, %v7955_v25  ;;  %v8590_v25 = vld [vmem:[#allocation2 + $0x20] sm:$0xff] }
 0x789   : > { %v3421_v1 = vpop.f32.mrf.mxu3 }
 0x78b   : > { %v7928_v57 = vpop.permute.xlu1 %7927 }
 0x78c   : > { %v7930_v32 = vunpack.i.h.bf16 %v7928_v57  ;;  %v7929_v26 = vunpack.i.l.bf16 %v7928_v57  ;;  %v10828_v57 = vld [vmem:[%s12880_s12] ss:$0 sm:$0xff]  ;;  %s12932_s12 = scalar_lea.vmem %s12704_s23, %s8857_s9 }
 0x78e   : > { %v4130_v54 = vsel %vm4127_vm10, %v4113_v22, %v7929_v26  ;;  %v4131_v44 = vsel %vm4127_vm10, %v4114_v21, %v7930_v32  ;;  %v8586_v32 = vld [vmem:[#allocation2] sm:$0xff] }
 0x78f   : > { %v4150_v39 = vpack.c.bf16 %v4131_v44, %v4130_v54  ;;  %v8587_v44 = vld [vmem:[#allocation2 + $0x8] sm:$0xff] }
 0x791   : > { %v3423_v63 = vpop.f32.mrf.mxu3  ;;  %7690 = vmatmul.msk.bf16.gmra.mxu1 %vm1369_vm2, %v4150_v39 }
 0x792   : > { %v8011_v4 = vpack.i.bf16 %v3423_v63, %v3421_v1 }
 0x794   : > { %8012 = vrot.lane.b32.xlu0 %v8011_v4, %s8694_s29  ;;  %s12889_s29 = sld [smem:[#allocation53_spill]] }
 0x799   : > { %v3882_v42 = vpop.f32.mrf.mxu3 }
 0x79b   : > { %v7943_v14 = vpop.permute.xlu1 %7942 }
 0x79c   : > { %v7945_v20 = vunpack.i.h.bf16 %v7943_v14  ;;  %v7944_v46 = vunpack.i.l.bf16 %v7943_v14 }
 0x79e   : > { %v4132_v11 = vsel %vm4127_vm10, %v4115_v36, %v7944_v46  ;;  %v4133_v13 = vsel %vm4127_vm10, %v4116_v24, %v7945_v20 }
 0x79f   : > { %v4151_v43 = vpack.c.bf16 %v4133_v13, %v4132_v11 }
 0x7a1   : > { %v3884_v55 = vpop.f32.mrf.mxu3  ;;  %7691 = vmatmul.msk.bf16.gmra.mxu1 %vm1369_vm2, %v4151_v43 }
 0x7a2   : > { %v7971_v3 = vpack.i.bf16 %v3884_v55, %v3882_v42  ;;  %v4103_v42 = vsel %vm1980_vm7, %v10687_v12, %v7965_v8  ;;  %v8588_v55 = vld [vmem:[#allocation2 + $0x18] sm:$0xff]  ;;  %v8592_v8 = vld [vmem:[#allocation2 + $0x30] sm:$0xff] }
 0x7a4   : > { %7972 = vrot.lane.b32.xlu1 %v7971_v3, %s8695_s14 }
 0x7d1   : > { %v3887_v28 = vpop.f32.mrf.mxu3 }
 0x7d6   : > { %v7968_v29 = vpop.permute.xlu0 %7967 }
 0x7d7   : > { %v7970_v23 = vunpack.i.h.bf16 %v7968_v29  ;;  %v7969_v18 = vunpack.i.l.bf16 %v7968_v29 }
 0x7d8   : > { %v7958_v53 = vpop.permute.xlu1 %7957 }
 0x7d9   : > { %v7960_v17 = vunpack.i.h.bf16 %v7958_v53  ;;  %v7959_v9 = vunpack.i.l.bf16 %v7958_v53  ;;  %v3889_v52 = vpop.f32.mrf.mxu3  ;;  %v4120_v36 = vsel %vm4110_vm9, %v4103_v42, %v7970_v23  ;;  %v4119_v11 = vsel %vm4110_vm9, %v4102_v34, %v7969_v18 }
 0x7da   : > { %v7986_v60 = vpack.i.bf16 %v3889_v52, %v3887_v28 }
 0x7db   : > { %v4134_v7 = vsel %vm4127_vm10, %v4117_v16, %v7959_v9  ;;  %v4135_v61 = vsel %vm4127_vm10, %v4118_v38, %v7960_v17  ;;  %v8591_v9 = vld [vmem:[#allocation2 + $0x28] sm:$0xff]  ;;  %v7978_v16 = vpop.permute.xlu2 %7977 }
 0x7dc   : > { %v4152_v45 = vpack.c.bf16 %v4135_v61, %v4134_v7  ;;  %7987 = vrot.lane.b32.xlu1 %v7986_v60, %s8695_s14  ;;  %v7980_v7 = vunpack.i.h.bf16 %v7978_v16  ;;  %v7979_v61 = vunpack.i.l.bf16 %v7978_v16 }
 0x7de   : > { %7692 = vmatmul.msk.bf16.gmra.mxu1 %vm1369_vm2, %v4152_v45 }
 0x7e1   : > { %v3892_v51 = vpop.f32.mrf.mxu3 }
 0x7e6   : > { %v7983_v60 = vpop.permute.xlu0 %7982 }
 0x7e7   : > { %v7985_v45 = vunpack.i.h.bf16 %v7983_v60 }
 0x7e9   : > { %v3894_v58 = vpop.f32.mrf.mxu3 }
 0x7ea   : > { %v8001_v37 = vpack.i.bf16 %v3894_v58, %v3892_v51  ;;  %v7984_v51 = vunpack.i.l.bf16 %v7983_v60 }
 0x7ec   : > { %8002 = vrot.lane.b32.xlu1 %v8001_v37, %s8695_s14  ;;  %v4105_v37 = vsel %vm1980_vm7, %v10716_v59, %v7980_v7 }
 0x7f1   : > { %v3897_v41 = vpop.f32.mrf.mxu3 }
 0x7f9   : > { %v3899_v0 = vpop.f32.mrf.mxu3 }
 0x7fa   : > { %v8016_v1 = vpack.i.bf16 %v3899_v0, %v3897_v41  ;;  %v4104_v41 = vsel %vm1980_vm7, %v10699_v33, %v7979_v61 }
 0x7fc   : > { %8017 = vrot.lane.b32.xlu1 %v8016_v1, %s8695_s14  ;;  %s12890_s14 = scalar_lea.vmem %s12889_s29, %s8857_s9  ;;  %s12920_s29 = scalar_lea.vmem %s12700_s19, %s8857_s9 }
 0x7fe   : > { %v4202_v19 = vpop.f32.mrf.mxu1 }
 0x7ff   : > { %v4245_v56 = vadd.f32 %v10828_v57, %v4202_v19  ;;  %v4122_v19 = vsel %vm4110_vm9, %v4105_v37, %v7985_v45 }
 0x801   : > { %v10832_v26 = vadd.f32 %v8586_v32, %v4245_v56  ;;  %v4121_v56 = vsel %vm4110_vm9, %v4104_v41, %v7984_v51 }
 0x803   : > { %v4279_v21 = vsel %vm1369_vm2, %v10832_v26, 0.0 }
 0x804   : > { %4280 = vadd.xlane.f32.xlu2 %v4279_v21 }
 0x806   : > { %v4204_v22 = vpop.f32.mrf.mxu1 }
 0x807   : > { %v4246_v54 = vadd.f32 %v10828_v57, %v4204_v22 }
 0x809   : > { %v10837_v39 = vadd.f32 %v8587_v44, %v4246_v54  ;;  %v7993_v54 = vpop.permute.xlu2 %7992  ;;  %v7998_v44 = vpop.permute.xlu0 %7997 }
 0x80a   : > { %v7994_v59 = vunpack.i.l.bf16 %v7993_v54  ;;  %v8000_v10 = vunpack.i.h.bf16 %v7998_v44  ;;  %v7999_v33 = vunpack.i.l.bf16 %v7998_v44 }
 0x80b   : > { %v4282_v63 = vsel %vm1369_vm2, %v10837_v39, 0.0 }
 0x80c   : > { %4283 = vadd.xlane.f32.xlu0 %v4282_v63  ;;  %v7995_v63 = vunpack.i.h.bf16 %v7993_v54  ;;  %v4106_v42 = vsel %vm1980_vm7, %v10726_v6, %v7994_v59 }
 0x80e   : > { %v4207_v4 = vpop.f32.mrf.mxu1  ;;  %v4107_v18 = vsel %vm1980_vm7, %v10737_v31, %v7995_v63 }
 0x80f   : > { %v4247_v35 = vadd.f32 %v10828_v57, %v4207_v4  ;;  %v4124_v34 = vsel %vm4110_vm9, %v4107_v18, %v8000_v10 }
 0x811   : > { %v10857_v27 = vadd.f32 %v8589_v62, %v4247_v35  ;;  %v8008_v31 = vpop.permute.xlu2 %8007 }
 0x812   : > { %v8010_v6 = vunpack.i.h.bf16 %v8008_v31 }
 0x813   : > { %v4285_v40 = vsel %vm1369_vm2, %v10857_v27, 0.0 }
 0x814   : > { %v4109_v35 = vsel %vm1980_vm7, %v10749_v47, %v8010_v6 }
 0x816   : > { %v7973_v14 = vpop.permute.xlu1 %7972  ;;  %v4209_v5 = vpop.f32.mrf.mxu1 }
 0x817   : > { %v7975_v20 = vunpack.i.h.bf16 %v7973_v14  ;;  %v7974_v46 = vunpack.i.l.bf16 %v7973_v14  ;;  %v4248_v24 = vadd.f32 %v10828_v57, %v4209_v5 }
 0x819   : > { %v4136_v13 = vsel %vm4127_vm10, %v4119_v11, %v7974_v46  ;;  %v4137_v43 = vsel %vm4127_vm10, %v4120_v36, %v7975_v20  ;;  %v10850_v3 = vadd.f32 %v8588_v55, %v4248_v24  ;;  %v4123_v20 = vsel %vm4110_vm9, %v4106_v42, %v7999_v33 }
 0x81a   : > { %v4153_v12 = vpack.c.bf16 %v4137_v43, %v4136_v13  ;;  %v8013_v13 = vpop.permute.xlu0 %8012  ;;  %v8009_v43 = vunpack.i.l.bf16 %v8008_v31 }
 0x81b   : > { %v4288_v28 = vsel %vm1369_vm2, %v10850_v3, 0.0  ;;  %v8015_v55 = vunpack.i.h.bf16 %v8013_v13 }
 0x81c   : > { %7693 = vmatmul.msk.bf16.gmra.mxu1 %vm1369_vm2, %v4153_v12  ;;  %4289 = vadd.xlane.f32.xlu2 %v4288_v28  ;;  %v8014_v12 = vunpack.i.l.bf16 %v8013_v13  ;;  %v8595_v13 = vld [vmem:[#allocation2 + $0x48] sm:$0xff] }
 0x81e   : > { %v4212_v48 = vpop.f32.mrf.mxu1 }
 0x81f   : > { %v4249_v15 = vadd.f32 %v10828_v57, %v4212_v48  ;;  %v4108_v48 = vsel %vm1980_vm7, %v10744_v49, %v8009_v43 }
 0x821   : > { %v10859_v30 = vadd.f32 %v8590_v25, %v4249_v15  ;;  %v4126_v25 = vsel %vm4110_vm9, %v4109_v35, %v8015_v55 }
 0x823   : > { %v4291_v53 = vsel %vm1369_vm2, %v10859_v30, 0.0 }
 0x824   : > { %4292 = vadd.xlane.f32.xlu0 %v4291_v53  ;;  %v4125_v53 = vsel %vm4110_vm9, %v4108_v48, %v8014_v12  ;;  %v8596_v48 = vld [vmem:[#allocation2 + $0x50] sm:$0xff] }
 0x826   : > { %4286 = vadd.xlane.f32.xlu1 %v4285_v40  ;;  %v4214_v2 = vpop.f32.mrf.mxu1 }
 0x827   : > { %v4250_v17 = vadd.f32 %v10828_v57, %v4214_v2 }
 0x829   : > { %v10866_v52 = vadd.f32 %v8591_v9, %v4250_v17 }
 0x82b   : > { %v4294_v38 = vsel %vm1369_vm2, %v10866_v52, 0.0 }
 0x82e   : > { %4295 = vadd.xlane.f32.xlu1 %v4294_v38  ;;  %v12881_v38 = vld [vmem:[#allocation11_spill] sm:$0xff] }
 0x84e   : > { %v7988_v58 = vpop.permute.xlu1 %7987 }
 0x84f   : > { %v7990_v0 = vunpack.i.h.bf16 %v7988_v58  ;;  %v7989_v1 = vunpack.i.l.bf16 %v7988_v58  ;;  %v8593_v58 = vld [vmem:[#allocation2 + $0x38] sm:$0xff] }
 0x851   : > { %v4138_v32 = vsel %vm4127_vm10, %v4121_v56, %v7989_v1  ;;  %v4139_v21 = vsel %vm4127_vm10, %v4122_v19, %v7990_v0 }
 0x852   : > { %v4154_v22 = vpack.c.bf16 %v4139_v21, %v4138_v32 }
 0x854   : > { %7694 = vmatmul.msk.bf16.gmra.mxu1 %vm1369_vm2, %v4154_v22 }
 0x85b   : > { %v4217_v4 = vpop.f32.mrf.mxu1 }
 0x85c   : > { %v4251_v29 = vadd.f32 %v10828_v57, %v4217_v4 }
 0x85e   : > { %v10880_v50 = vadd.f32 %v8592_v8, %v4251_v29  ;;  %v8003_v23 = vpop.permute.xlu1 %8002 }
 0x85f   : > { %v8005_v14 = vunpack.i.h.bf16 %v8003_v23  ;;  %v8004_v5 = vunpack.i.l.bf16 %v8003_v23  ;;  %v8594_v23 = vld [vmem:[#allocation2 + $0x40] sm:$0xff] }
 0x860   : > { %v4297_v46 = vsel %vm1369_vm2, %v10880_v50, 0.0 }
 0x861   : > { %v4140_v24 = vsel %vm4127_vm10, %v4123_v20, %v8004_v5  ;;  %v4141_v36 = vsel %vm4127_vm10, %v4124_v34, %v8005_v14  ;;  %4298 = vadd.xlane.f32.xlu1 %v4297_v46 }
 0x862   : > { %v4155_v11 = vpack.c.bf16 %v4141_v36, %v4140_v24 }
 0x863   : > { %v4219_v49 = vpop.f32.mrf.mxu1 }
 0x864   : > { %7695 = vmatmul.msk.bf16.gmra.mxu1 %vm1369_vm2, %v4155_v11  ;;  %v4252_v7 = vadd.f32 %v10828_v57, %v4219_v49  ;;  %v8597_v49 = vld [vmem:[#allocation2 + $0x58] sm:$0xff] }
 0x866   : > { %v10911_v37 = vadd.f32 %v8593_v58, %v4252_v7 }
 0x868   : > { %v4300_v19 = vsel %vm1369_vm2, %v10911_v37, 0.0 }
 0x86e   : > { %v8018_v28 = vpop.permute.xlu1 %8017 }
 0x86f   : > { %v8020_v15 = vunpack.i.h.bf16 %v8018_v28  ;;  %v8019_v62 = vunpack.i.l.bf16 %v8018_v28 }
 0x871   : > { %v4142_v40 = vsel %vm4127_vm10, %v4125_v53, %v8019_v62  ;;  %v4143_v2 = vsel %vm4127_vm10, %v4126_v25, %v8020_v15 }
 0x872   : > { %v4156_v17 = vpack.c.bf16 %v4143_v2, %v4142_v40 }
 0x874   : > { %7696 = vmatmul.msk.bf16.gmra.mxu1 %vm1369_vm2, %v4156_v17 }
 0x877   : > { %v4281_v9 = vpop.xlane.xlu2 %4280 }
 0x878   : > { %v4327_v16 = vmul.f32 %v4281_v9, %v12881_v38 }
 0x87a   : > { %v10904_v47 = vsub.f32 %v10832_v26, %v4327_v16 }
 0x87c   : > { %v4359_v60 = vmul.f32 %v10904_v47, %v10904_v47 }
 0x87e   : > { %v4375_v61 = vsel %vm1369_vm2, %v4359_v60, 0.0 }
 0x87f   : > { %v4284_v45 = vpop.xlane.xlu0 %4283  ;;  %4376 = vadd.xlane.f32.xlu2 %v4375_v61 }
 0x880   : > { %v4328_v51 = vmul.f32 %v4284_v45, %v12881_v38 }
 0x882   : > { %v10914_v41 = vsub.f32 %v10837_v39, %v4328_v51  ;;  %v8598_v51 = vld [vmem:[#allocation2 + $0x60] sm:$0xff] }
 0x884   : > { %v4360_v0 = vmul.f32 %v10914_v41, %v10914_v41 }
 0x886   : > { %v4378_v1 = vsel %vm1369_vm2, %v4360_v0, 0.0 }
 0x887   : > { %4379 = vadd.xlane.f32.xlu0 %v4378_v1  ;;  %4301 = vadd.xlane.f32.xlu2 %v4300_v19 }
 0x88f   : > { %v4290_v56 = vpop.xlane.xlu2 %4289 }
 0x890   : > { %v4330_v32 = vmul.f32 %v4290_v56, %v12881_v38  ;;  %v8599_v56 = vld [vmem:[#allocation2 + $0x68] sm:$0xff] }
 0x892   : > { %v10923_v21 = vsub.f32 %v10850_v3, %v4330_v32 }
 0x894   : > { %v4362_v22 = vmul.f32 %v10923_v21, %v10923_v21 }
 0x896   : > { %v4384_v54 = vsel %vm1369_vm2, %v4362_v22, 0.0 }
 0x897   : > { %v4293_v44 = vpop.xlane.xlu0 %4292  ;;  %4385 = vadd.xlane.f32.xlu1 %v4384_v54 }
 0x898   : > { %v4331_v63 = vmul.f32 %v4293_v44, %v12881_v38 }
 0x899   : > { %v4287_v59 = vpop.xlane.xlu1 %4286  ;;  %v4222_v4 = vpop.f32.mrf.mxu1 }
 0x89a   : > { %v10930_v10 = vsub.f32 %v10859_v30, %v4331_v63  ;;  %v4329_v33 = vmul.f32 %v4287_v59, %v12881_v38  ;;  %v4253_v29 = vadd.f32 %v10828_v57, %v4222_v4  ;;  %v7848_v4 = vld [vmem:[%s8897_s5 + $0x8] sm:$0xff] }
 0x89b   : > { %4724 = vmatpush.bf16.msrb.mxu2 %v7848_v4 }
 0x89c   : > { %v10935_v8 = vsub.f32 %v10857_v27, %v4329_v33  ;;  %v10937_v18 = vadd.f32 %v8594_v23, %v4253_v29  ;;  %v4363_v42 = vmul.f32 %v10930_v10, %v10930_v10  ;;  %v8600_v33 = vld [vmem:[#allocation2 + $0x70] sm:$0xff] }
 0x89e   : > { %v4387_v14 = vsel %vm1369_vm2, %v4363_v42, 0.0  ;;  %v4303_v5 = vsel %vm1369_vm2, %v10937_v18, 0.0  ;;  %v4361_v34 = vmul.f32 %v10935_v8, %v10935_v8 }
 0x89f   : > { %4388 = vadd.xlane.f32.xlu1 %v4387_v14  ;;  %4304 = vadd.xlane.f32.xlu2 %v4303_v5  ;;  %v7847_v14 = vld [vmem:[%s8897_s5] sm:$0xff]  ;;  %s12896_s5 = scalar_lea.vmem %s12697_s16, %s8857_s9 }
 0x8a0   : > { %v4381_v20 = vsel %vm1369_vm2, %v4361_v34, 0.0  ;;  %4725 = vmatpush.bf16.msrb.mxu2 %v7847_v14 }
 0x8a1   : > { %4382 = vadd.xlane.f32.xlu0 %v4381_v20  ;;  %v4296_v46 = vpop.xlane.xlu1 %4295  ;;  %v4224_v24 = vpop.f32.mrf.mxu1 }
 0x8a2   : > { %v4332_v36 = vmul.f32 %v4296_v46, %v12881_v38  ;;  %v4254_v11 = vadd.f32 %v10828_v57, %v4224_v24 }
 0x8a4   : > { %v10950_v31 = vsub.f32 %v10866_v52, %v4332_v36  ;;  %v10952_v6 = vadd.f32 %v8595_v13, %v4254_v11 }
 0x8a6   : > { %v4364_v43 = vmul.f32 %v10950_v31, %v10950_v31  ;;  %v4306_v12 = vsel %vm1369_vm2, %v10952_v6, 0.0 }
 0x8a8   : > { %v4390_v55 = vsel %vm1369_vm2, %v4364_v43, 0.0 }
 0x8a9   : > { %4391 = vadd.xlane.f32.xlu2 %v4390_v55  ;;  %4307 = vadd.xlane.f32.xlu0 %v4306_v12 }
 0x8d1   : > { %v4227_v28 = vpop.f32.mrf.mxu1 }
 0x8d2   : > { %v4255_v35 = vadd.f32 %v10828_v57, %v4227_v28 }
 0x8d4   : > { %v10960_v15 = vadd.f32 %v8596_v48, %v4255_v35  ;;  %v4299_v62 = vpop.xlane.xlu1 %4298 }
 0x8d5   : > { %v4333_v25 = vmul.f32 %v4299_v62, %v12881_v38 }
 0x8d6   : > { %12882 = vst [vmem:[#allocation25_spill] sm:$0xff] %v10960_v15  ;;  %v4309_v53 = vsel %vm1369_vm2, %v10960_v15, 0.0 }
 0x8d7   : > { %v10966_v40 = vsub.f32 %v10880_v50, %v4333_v25  ;;  %4310 = vadd.xlane.f32.xlu0 %v4309_v53 }
 0x8d9   : > { %v4229_v2 = vpop.f32.mrf.mxu1  ;;  %v4365_v17 = vmul.f32 %v10966_v40, %v10966_v40 }
 0x8da   : > { %v4256_v9 = vadd.f32 %v10828_v57, %v4229_v2 }
 0x8db   : > { %v4393_v16 = vsel %vm1369_vm2, %v4365_v17, 0.0 }
 0x8dc   : > { %v10972_v60 = vadd.f32 %v8597_v49, %v4256_v9  ;;  %4394 = vadd.xlane.f32.xlu2 %v4393_v16  ;;  %v11008_v49 = vld [vmem:[%s12888_s7] ss:$0 sm:$0xff]  ;;  %s12897_s7 = scalar_lea.vmem %s12698_s17, %s8857_s9 }
 0x8de   : > { %12883 = vst [vmem:[#allocation18_spill] sm:$0xff] %v10972_v60  ;;  %v4312_v7 = vsel %vm1369_vm2, %v10972_v60, 0.0 }
 0x8df   : > { %4313 = vadd.xlane.f32.xlu1 %v4312_v7 }
 0x8e1   : > { %v4232_v61 = vpop.f32.mrf.mxu1 }
 0x8e2   : > { %v4257_v45 = vadd.f32 %v10828_v57, %v4232_v61 }
 0x8e4   : > { %v10977_v58 = vadd.f32 %v8598_v51, %v4257_v45 }
 0x8e6   : > { %12884 = vst [vmem:[#allocation17_spill] sm:$0xff] %v10977_v58  ;;  %v4315_v0 = vsel %vm1369_vm2, %v10977_v58, 0.0 }
 0x8e7   : > { %4316 = vadd.xlane.f32.xlu1 %v4315_v0  ;;  %v11016_v0 = vld [vmem:[%s12890_s14] ss:$0 sm:$0xff] }
 0x8e9   : > { %v4234_v1 = vpop.f32.mrf.mxu1 }
 0x8ea   : > { %v4258_v19 = vadd.f32 %v10828_v57, %v4234_v1 }
 0x8ec   : > { %v10982_v32 = vadd.f32 %v8599_v56, %v4258_v19 }
 0x8ee   : > { %12885 = vst [vmem:[#allocation33_spill] sm:$0xff] %v10982_v32  ;;  %v4318_v22 = vsel %vm1369_vm2, %v10982_v32, 0.0 }
 0x8ef   : > { %4319 = vadd.xlane.f32.xlu2 %v4318_v22 }
 0x8f1   : > { %v4237_v54 = vpop.f32.mrf.mxu1 }
 0x8f2   : > { %v4259_v44 = vadd.f32 %v10828_v57, %v4237_v54  ;;  %v4377_v63 = vpop.xlane.xlu2 %4376 }
 0x8f3   : > { %v4423_v59 = vmul.f32 %v4377_v63, %v12881_v38 }
 0x8f4   : > { %v10989_v29 = vadd.f32 %v8600_v33, %v4259_v44 }
 0x8f5   : > { %v4439_v23 = vadd.f32 1e-05, %v4423_v59 }
 0x8f6   : > { %12886 = vst [vmem:[#allocation26_spill] sm:$0xff] %v10989_v29  ;;  %v4321_v42 = vsel %vm1369_vm2, %v10989_v29, 0.0 }
 0x8f7   : > { %8326 = vrsqrt.f32 %v4439_v23  ;;  %4322 = vadd.xlane.f32.xlu2 %v4321_v42  ;;  %vm4461_vm12 = vweird.f32 %v4439_v23 }
 0x8fa   : > { %v4380_v5 = vpop.xlane.xlu0 %4379  ;;  %v4302_v34 = vpop.xlane.xlu2 %4301 }
 0x8fb   : > { %v4424_v20 = vmul.f32 %v4380_v5, %v12881_v38  ;;  %v4334_v46 = vmul.f32 %v4302_v34, %v12881_v38  ;;  %v4239_v34 = vpop.f32.mrf.mxu1 }
 0x8fd   : > { %v8327_v24 = vpop.eup %8326  ;;  %v4440_v36 = vadd.f32 1e-05, %v4424_v20  ;;  %v10997_v11 = vsub.f32 %v10911_v37, %v4334_v46 }
 0x8fe   : > { %v4456_v13 = vmul.f32 %v8327_v24, %v4439_v23  ;;  %vm4462_vm11 = vweird.f32 %v8327_v24 }
 0x8ff   : > { %8328 = vrsqrt.f32 %v4440_v36  ;;  %v4366_v43 = vmul.f32 %v10997_v11, %v10997_v11  ;;  %vm4463_vm13 = vmor %vm4461_vm12, %vm4462_vm11  ;;  %vm4471_vm15 = vweird.f32 %v4440_v36 }
 0x900   : > { %v4457_v55 = vmul.f32 %v8327_v24, %v4456_v13  ;;  %v4260_v13 = vadd.f32 %v10828_v57, %v4239_v34 }
 0x901   : > { %v4396_v12 = vsel %vm1369_vm2, %v4366_v43, 0.0 }
 0x902   : > { %v4458_v28 = vmul.f32 0.5, %v4457_v55  ;;  %4397 = vadd.xlane.f32.xlu0 %v4396_v12 }
 0x904   : > { %v4459_v35 = vsub.f32 1.5, %v4458_v28 }
 0x905   : > { %v8329_v48 = vpop.eup %8328 }
 0x906   : > { %v4460_v62 = vmul.f32 %v8327_v24, %v4459_v35  ;;  %v4466_v25 = vmul.f32 %v8329_v48, %v4440_v36  ;;  %vm4472_vm14 = vweird.f32 %v8329_v48 }
 0x907   : > { %vm4473_vm0 = vmor %vm4471_vm15, %vm4472_vm14 }
 0x908   : > { %v4467_v53 = vmul.f32 %v8329_v48, %v4466_v25  ;;  %v4464_v2 = vsel %vm4463_vm13, %v8327_v24, %v4460_v62 }
 0x909   : > { %v4615_v7 = vmul.f32 %v4464_v2, %v10904_v47 }
 0x90a   : > { %v4468_v17 = vmul.f32 0.5, %v4467_v53  ;;  %v4386_v9 = vpop.xlane.xlu1 %4385  ;;  %v8601_v53 = vld [vmem:[#allocation2 + $0x78] sm:$0xff] }
 0x90b   : > { %v4426_v16 = vmul.f32 %v4386_v9, %v12881_v38  ;;  %v4634_v1 = vmul.f32 %v11008_v49, %v4615_v7  ;;  %v11039_v2 = vadd.f32 %v8601_v53, %v4260_v13 }
 0x90c   : > { %v4469_v61 = vsub.f32 1.5, %v4468_v17 }
 0x90d   : > { %v4442_v45 = vadd.f32 1e-05, %v4426_v16  ;;  %v4653_v59 = vadd.f32 %v11016_v0, %v4634_v1  ;;  %12891 = vst [vmem:[#allocation19_spill] sm:$0xff] %v11039_v2 }
 0x90e   : > { %v4470_v51 = vmul.f32 %v8329_v48, %v4469_v61 }
 0x90f   : > { %8330 = vrsqrt.f32 %v4442_v45  ;;  %vm4491_vm3 = vweird.f32 %v4442_v45 }
 0x910   : > { %v4474_v19 = vsel %vm4473_vm0, %v8329_v48, %v4470_v51 }
 0x911   : > { %v4616_v56 = vmul.f32 %v4474_v19, %v10914_v41  ;;  %v4324_v19 = vsel %vm1369_vm2, %v11039_v2, 0.0 }
 0x912   : > { %v4389_v22 = vpop.xlane.xlu1 %4388  ;;  %v4305_v47 = vpop.xlane.xlu2 %4304 }
 0x913   : > { %v4635_v54 = vmul.f32 %v11008_v49, %v4616_v56  ;;  %v4427_v44 = vmul.f32 %v4389_v22, %v12881_v38  ;;  %v4335_v63 = vmul.f32 %v4305_v47, %v12881_v38 }
 0x914   : > { %v4383_v4 = vpop.xlane.xlu0 %4382 }
 0x915   : > { %v8331_v33 = vpop.eup %8330  ;;  %v4654_v23 = vadd.f32 %v11016_v0, %v4635_v54  ;;  %v11025_v42 = vadd.f32 1e-05, %v4427_v44  ;;  %v11028_v14 = vsub.f32 %v10937_v18, %v4335_v63  ;;  %v4425_v41 = vmul.f32 %v4383_v4, %v12881_v38 }
 0x916   : > { %v4486_v5 = vmul.f32 %v8331_v33, %v4442_v45  ;;  %vm4492_vm1 = vweird.f32 %v8331_v33 }
 0x917   : > { %v4674_v20 = vpack.c.bf16 %v4654_v23, %v4653_v59  ;;  %8332 = vrsqrt.f32 %v11025_v42  ;;  %v4441_v46 = vadd.f32 1e-05, %v4425_v41  ;;  %v4367_v36 = vmul.f32 %v11028_v14, %v11028_v14  ;;  %vm4493_vm4 = vmor %vm4491_vm3, %vm4492_vm1 }
 0x918   : > { %v4487_v24 = vmul.f32 %v8331_v33, %v4486_v5  ;;  %vm4501_vm13 = vweird.f32 %v11025_v42 }
 0x919   : > { %8334 = vrsqrt.f32 %v4441_v46  ;;  %7705 = vmatmul.msk.bf16.vlgmr.msrb.gmra.mxu2 %vm1369_vm2, %v4674_v20  ;;  %v4399_v55 = vsel %vm1369_vm2, %v4367_v36, 0.0  ;;  %vm4481_vm6 = vweird.f32 %v4441_v46 }
 0x91a   : > { %v4488_v43 = vmul.f32 0.5, %v4487_v24  ;;  %4400 = vadd.xlane.f32.xlu0 %v4399_v55 }
 0x91c   : > { %v4489_v12 = vsub.f32 1.5, %v4488_v43  ;;  %v4392_v28 = vpop.xlane.xlu2 %4391  ;;  %v4308_v35 = vpop.xlane.xlu0 %4307 }
 0x91d   : > { %v8333_v48 = vpop.eup %8332  ;;  %v4428_v62 = vmul.f32 %v4392_v28, %v12881_v38  ;;  %v4336_v25 = vmul.f32 %v4308_v35, %v12881_v38 }
 0x91e   : > { %v4490_v57 = vmul.f32 %v8331_v33, %v4489_v12  ;;  %v4496_v7 = vmul.f32 %v8333_v48, %v11025_v42  ;;  %vm4502_vm10 = vweird.f32 %v8333_v48 }
 0x91f   : > { %v8335_v17 = vpop.eup %8334  ;;  %v4444_v9 = vadd.f32 1e-05, %v4428_v62  ;;  %v11042_v16 = vsub.f32 %v10952_v6, %v4336_v25  ;;  %vm4503_vm14 = vmor %vm4501_vm13, %vm4502_vm10 }
 0x920   : > { %v4476_v61 = vmul.f32 %v8335_v17, %v4441_v46  ;;  %v4494_v22 = vsel %vm4493_vm4, %v8331_v33, %v4490_v57  ;;  %v4497_v47 = vmul.f32 %v8333_v48, %v4496_v7  ;;  %vm4482_vm5 = vweird.f32 %v8335_v17 }
 0x921   : > { %8336 = vrsqrt.f32 %v4444_v9  ;;  %v4368_v51 = vmul.f32 %v11042_v16, %v11042_v16  ;;  %v4618_v59 = vmul.f32 %v4494_v22, %v10923_v21  ;;  %vm4483_vm7 = vmor %vm4481_vm6, %vm4482_vm5  ;;  %vm4511_vm11 = vweird.f32 %v4444_v9 }
 0x922   : > { %v4477_v1 = vmul.f32 %v8335_v17, %v4476_v61  ;;  %4325 = vadd.xlane.f32.xlu0 %v4324_v19  ;;  %v4498_v4 = vmul.f32 0.5, %v4497_v47 }
 0x923   : > { %v4402_v56 = vsel %vm1369_vm2, %v4368_v51, 0.0  ;;  %v4637_v20 = vmul.f32 %v11008_v49, %v4618_v59 }
 0x924   : > { %v4478_v54 = vmul.f32 0.5, %v4477_v1  ;;  %4403 = vadd.xlane.f32.xlu1 %v4402_v56  ;;  %v4499_v33 = vsub.f32 1.5, %v4498_v4 }
 0x925   : > { %v4656_v21 = vadd.f32 %v11016_v0, %v4637_v20 }
 0x926   : > { %v4479_v44 = vsub.f32 1.5, %v4478_v54  ;;  %v4500_v55 = vmul.f32 %v8333_v48, %v4499_v33 }
 0x927   : > { %v8337_v63 = vpop.eup %8336 }
 0x928   : > { %v4480_v23 = vmul.f32 %v8335_v17, %v4479_v44  ;;  %v4506_v45 = vmul.f32 %v8337_v63, %v4444_v9  ;;  %vm4512_vm9 = vweird.f32 %v8337_v63  ;;  %v4504_v28 = vsel %vm4503_vm14, %v8333_v48, %v4500_v55 }
 0x929   : > { %vm4513_vm12 = vmor %vm4511_vm11, %vm4512_vm9  ;;  %v4619_v62 = vmul.f32 %v4504_v28, %v10930_v10 }
 0x92a   : > { %v4484_v41 = vsel %vm4483_vm7, %v8335_v17, %v4480_v23  ;;  %v4507_v5 = vmul.f32 %v8337_v63, %v4506_v45 }
 0x92b   : > { %v4617_v34 = vmul.f32 %v4484_v41, %v10935_v8  ;;  %v4638_v53 = vmul.f32 %v11008_v49, %v4619_v62 }
 0x92c   : > { %v4508_v24 = vmul.f32 0.5, %v4507_v5 }
 0x92d   : > { %v4636_v36 = vmul.f32 %v11008_v49, %v4617_v34  ;;  %v4657_v9 = vadd.f32 %v11016_v0, %v4638_v53 }
 0x92e   : > { %v4509_v13 = vsub.f32 1.5, %v4508_v24 }
 0x92f   : > { %v4655_v43 = vadd.f32 %v11016_v0, %v4636_v36 }
 0x930   : > { %v4510_v46 = vmul.f32 %v8337_v63, %v4509_v13 }
 0x931   : > { %v4675_v12 = vpack.c.bf16 %v4656_v21, %v4655_v43 }
 0x932   : > { %v4514_v8 = vsel %vm4513_vm12, %v8337_v63, %v4510_v46 }
 0x933   : > { %7706 = vmatmul.msk.bf16.gmra.mxu2 %vm1369_vm2, %v4675_v12  ;;  %v4620_v35 = vmul.f32 %v4514_v8, %v10950_v31 }
 0x935   : > { %v4639_v25 = vmul.f32 %v11008_v49, %v4620_v35 }
 0x937   : > { %v4658_v17 = vadd.f32 %v11016_v0, %v4639_v25 }
 0x939   : > { %v4676_v57 = vpack.c.bf16 %v4658_v17, %v4657_v9 }
 0x943   : > { %7707 = vmatmul.msk.bf16.gmra.mxu2 %vm1369_vm2, %v4676_v57 }
 0x94a   : > { %v4311_v42 = vpop.xlane.xlu0 %4310 }
 0x94b   : > { %v4337_v7 = vmul.f32 %v4311_v42, %v12881_v38 }
 0x94d   : > { %v11067_v48 = vsub.f32 %v10960_v15, %v4337_v7 }
 0x94f   : > { %v4369_v10 = vmul.f32 %v11067_v48, %v11067_v48  ;;  %v4395_v22 = vpop.xlane.xlu2 %4394 }
 0x950   : > { %v4429_v59 = vmul.f32 %v4395_v22, %v12881_v38 }
 0x951   : > { %v4405_v31 = vsel %vm1369_vm2, %v4369_v10, 0.0 }
 0x952   : > { %v4314_v61 = vpop.xlane.xlu1 %4313  ;;  %4406 = vadd.xlane.f32.xlu1 %v4405_v31  ;;  %v4445_v41 = vadd.f32 1e-05, %v4429_v59 }
 0x953   : > { %v4338_v51 = vmul.f32 %v4314_v61, %v12881_v38 }
 0x954   : > { %8338 = vrsqrt.f32 %v4445_v41  ;;  %vm4521_vm0 = vweird.f32 %v4445_v41 }
 0x955   : > { %v11074_v1 = vsub.f32 %v10972_v60, %v4338_v51 }
 0x957   : > { %v4370_v19 = vmul.f32 %v11074_v1, %v11074_v1 }
 0x959   : > { %v4408_v56 = vsel %vm1369_vm2, %v4370_v19, 0.0 }
 0x95a   : > { %v4317_v47 = vpop.xlane.xlu1 %4316  ;;  %4409 = vadd.xlane.f32.xlu2 %v4408_v56  ;;  %v8339_v13 = vpop.eup %8338 }
 0x95b   : > { %v4339_v54 = vmul.f32 %v4317_v47, %v12881_v38  ;;  %v4516_v21 = vmul.f32 %v8339_v13, %v4445_v41  ;;  %vm4522_vm15 = vweird.f32 %v8339_v13 }
 0x95c   : > { %vm4523_vm1 = vmor %vm4521_vm0, %vm4522_vm15 }
 0x95d   : > { %v11081_v44 = vsub.f32 %v10977_v58, %v4339_v54  ;;  %v4517_v46 = vmul.f32 %v8339_v13, %v4516_v21 }
 0x95f   : > { %v4371_v63 = vmul.f32 %v11081_v44, %v11081_v44  ;;  %v4518_v35 = vmul.f32 0.5, %v4517_v46 }
 0x961   : > { %v4411_v4 = vsel %vm1369_vm2, %v4371_v63, 0.0  ;;  %v4519_v62 = vsub.f32 1.5, %v4518_v35 }
 0x962   : > { %v4320_v23 = vpop.xlane.xlu2 %4319  ;;  %4412 = vadd.xlane.f32.xlu0 %v4411_v4 }
 0x963   : > { %v4340_v45 = vmul.f32 %v4320_v23, %v12881_v38  ;;  %v4520_v53 = vmul.f32 %v8339_v13, %v4519_v62 }
 0x965   : > { %v11089_v5 = vsub.f32 %v10982_v32, %v4340_v45  ;;  %v4524_v57 = vsel %vm4523_vm1, %v8339_v13, %v4520_v53 }
 0x966   : > { %v4621_v10 = vmul.f32 %v4524_v57, %v10966_v40 }
 0x967   : > { %v4372_v34 = vmul.f32 %v11089_v5, %v11089_v5 }
 0x968   : > { %v4640_v19 = vmul.f32 %v11008_v49, %v4621_v10 }
 0x969   : > { %v4414_v20 = vsel %vm1369_vm2, %v4372_v34, 0.0 }
 0x96a   : > { %4415 = vadd.xlane.f32.xlu1 %v4414_v20  ;;  %v4323_v33 = vpop.xlane.xlu2 %4322  ;;  %v4659_v54 = vadd.f32 %v11016_v0, %v4640_v19  ;;  %v11120_v20 = vld [vmem:[%s12892_s28] ss:$0 sm:$0xff] }
 0x96b   : > { %v4341_v24 = vmul.f32 %v4323_v33, %v12881_v38 }
 0x96d   : > { %v11096_v36 = vsub.f32 %v10989_v29, %v4341_v24 }
 0x96f   : > { %v4373_v43 = vmul.f32 %v11096_v36, %v11096_v36 }
 0x971   : > { %v4417_v55 = vsel %vm1369_vm2, %v4373_v43, 0.0 }
 0x972   : > { %4418 = vadd.xlane.f32.xlu2 %v4417_v55 }
 0x975   : > { %v4398_v12 = vpop.xlane.xlu0 %4397 }
 0x976   : > { %v4430_v8 = vmul.f32 %v4398_v12, %v12881_v38 }
 0x978   : > { %v4446_v28 = vadd.f32 1e-05, %v4430_v8 }
 0x97a   : > { %8340 = vrsqrt.f32 %v4446_v28  ;;  %vm4531_vm4 = vweird.f32 %v4446_v28 }
 0x980   : > { %v8341_v25 = vpop.eup %8340 }
 0x981   : > { %v4526_v17 = vmul.f32 %v8341_v25, %v4446_v28  ;;  %vm4532_vm3 = vweird.f32 %v8341_v25 }
 0x982   : > { %vm4533_vm5 = vmor %vm4531_vm4, %vm4532_vm3 }
 0x983   : > { %v4527_v9 = vmul.f32 %v8341_v25, %v4526_v17 }
 0x985   : > { %v4528_v42 = vmul.f32 0.5, %v4527_v9 }
 0x987   : > { %v4529_v7 = vsub.f32 1.5, %v4528_v42 }
 0x989   : > { %v4530_v31 = vmul.f32 %v8341_v25, %v4529_v7 }
 0x98b   : > { %v4534_v61 = vsel %vm4533_vm5, %v8341_v25, %v4530_v31 }
 0x98c   : > { %v4622_v51 = vmul.f32 %v4534_v61, %v10997_v11 }
 0x98d   : > { %v4401_v56 = vpop.xlane.xlu0 %4400 }
 0x98e   : > { %v4641_v22 = vmul.f32 %v11008_v49, %v4622_v51  ;;  %v4431_v47 = vmul.f32 %v4401_v56, %v12881_v38 }
 0x990   : > { %v4660_v63 = vadd.f32 %v11016_v0, %v4641_v22  ;;  %v4447_v59 = vadd.f32 1e-05, %v4431_v47 }
 0x992   : > { %v4677_v40 = vpack.c.bf16 %v4660_v63, %v4659_v54  ;;  %8342 = vrsqrt.f32 %v4447_v59  ;;  %vm4541_vm7 = vweird.f32 %v4447_v59 }
 0x994   : > { %7708 = vmatmul.msk.bf16.gmra.mxu2 %vm1369_vm2, %v4677_v40 }
 0x995   : > { %v4326_v4 = vpop.xlane.xlu0 %4325 }
 0x996   : > { %v4342_v11 = vmul.f32 %v4326_v4, %v12881_v38 }
 0x997   : > { %v4404_v23 = vpop.xlane.xlu1 %4403 }
 0x998   : > { %v4432_v45 = vmul.f32 %v4404_v23, %v12881_v38  ;;  %v8343_v41 = vpop.eup %8342  ;;  %v11113_v34 = vsub.f32 %v11039_v2, %v4342_v11 }
 0x999   : > { %v4536_v33 = vmul.f32 %v8343_v41, %v4447_v59  ;;  %vm4542_vm6 = vweird.f32 %v8343_v41 }
 0x99a   : > { %v4448_v24 = vadd.f32 1e-05, %v4432_v45  ;;  %v4374_v13 = vmul.f32 %v11113_v34, %v11113_v34  ;;  %vm4543_vm9 = vmor %vm4541_vm7, %vm4542_vm6 }
 0x99b   : > { %v4537_v43 = vmul.f32 %v8343_v41, %v4536_v33 }
 0x99c   : > { %8344 = vrsqrt.f32 %v4448_v24  ;;  %v4727_v21 = vpop.f32.mrf.mxu2  ;;  %v4420_v46 = vsel %vm1369_vm2, %v4374_v13, 0.0  ;;  %vm4551_vm11 = vweird.f32 %v4448_v24 }
 0x99d   : > { %v11125_v55 = vadd.f32 %v11120_v20, %v4727_v21  ;;  %v4538_v12 = vmul.f32 0.5, %v4537_v43  ;;  %4421 = vadd.xlane.f32.xlu0 %v4420_v46 }
 0x99f   : > { %v7713_v8 = vmul.f32 -1.442695, %v11125_v55  ;;  %v4539_v28 = vsub.f32 1.5, %v4538_v12 }
 0x9a1   : > { %8346 = vpow2.f32 %v7713_v8  ;;  %v4540_v62 = vmul.f32 %v8343_v41, %v4539_v28 }
 0x9a2   : > { %v8345_v35 = vpop.eup %8344 }
 0x9a3   : > { %v4546_v25 = vmul.f32 %v8345_v35, %v4448_v24  ;;  %v4544_v42 = vsel %vm4543_vm9, %v8343_v41, %v4540_v62  ;;  %vm4552_vm10 = vweird.f32 %v8345_v35 }
 0x9a4   : > { %v4729_v53 = vpop.f32.mrf.mxu2  ;;  %v4623_v51 = vmul.f32 %v4544_v42, %v11028_v14  ;;  %vm4553_vm12 = vmor %vm4551_vm11, %vm4552_vm10 }
 0x9a5   : > { %v4547_v17 = vmul.f32 %v8345_v35, %v4546_v25  ;;  %v11130_v9 = vadd.f32 %v11120_v20, %v4729_v53 }
 0x9a6   : > { %v4642_v47 = vmul.f32 %v11008_v49, %v4623_v51 }
 0x9a7   : > { %v8347_v57 = vpop.eup %8346  ;;  %v4548_v7 = vmul.f32 0.5, %v4547_v17  ;;  %v7714_v10 = vmul.f32 -1.442695, %v11130_v9 }
 0x9a8   : > { %v4834_v31 = vadd.f32 1.0, %v8347_v57  ;;  %v4661_v11 = vadd.f32 %v11016_v0, %v4642_v47 }
 0x9a9   : > { %v4549_v61 = vsub.f32 1.5, %v4548_v7  ;;  %8348 = vpow2.f32 %v7714_v10 }
 0x9aa   : > { %8350 = vrcp.f32 %v4834_v31  ;;  %v4861_v41 = vand.u32 2147483648, %v4834_v31  ;;  %v4859_v24 = vand.u32 2147483647, %v4834_v31  ;;  %vm4855_vm14 = vweird.f32 %v4834_v31 }
 0x9ab   : > { %v4550_v19 = vmul.f32 %v8345_v35, %v4549_v61 }
 0x9ac   : > { %v4862_v46 = vor.u32 1.1754944e-38, %v4861_v41  ;;  %vm4860_vm0 = vcmp.eq.f32.partialorder %v4859_v24, 8.507059e+37 }
 0x9ad   : > { %v4554_v56 = vsel %vm4553_vm12, %v8345_v35, %v4550_v19 }
 0x9ae   : > { %v4624_v22 = vmul.f32 %v4554_v56, %v11042_v16 }
 0x9af   : > { %v8349_v54 = vpop.eup %8348 }
 0x9b0   : > { %v8351_v63 = vpop.eup %8350  ;;  %v4835_v59 = vadd.f32 1.0, %v8349_v54  ;;  %v4643_v40 = vmul.f32 %v11008_v49, %v4624_v22 }
 0x9b1   : > { %v4851_v4 = vmul.f32 %v8351_v63, %v4834_v31  ;;  %vm4856_vm13 = vweird.f32 %v8351_v63 }
 0x9b2   : > { %8352 = vrcp.f32 %v4835_v59  ;;  %v4662_v14 = vadd.f32 %v11016_v0, %v4643_v40  ;;  %vm4857_vm15 = vmor %vm4855_vm14, %vm4856_vm13  ;;  %v4876_v25 = vand.u32 2147483648, %v4835_v59  ;;  %v4874_v17 = vand.u32 2147483647, %v4835_v59 }
 0x9b3   : > { %v4852_v23 = vsub.f32 1.0, %v4851_v4  ;;  %vm4870_vm3 = vweird.f32 %v4835_v59 }
 0x9b4   : > { %v4678_v45 = vpack.c.bf16 %v4662_v14, %v4661_v11  ;;  %v4877_v10 = vor.u32 1.1754944e-38, %v4876_v25  ;;  %vm4875_vm5 = vcmp.eq.f32.partialorder %v4874_v17, 8.507059e+37 }
 0x9b5   : > { %v4853_v33 = vmul.f32 %v8351_v63, %v4852_v23 }
 0x9b6   : > { %v4732_v16 = vpop.f32.mrf.mxu2  ;;  %7709 = vmatmul.msk.bf16.gmra.mxu2 %vm1369_vm2, %v4678_v45 }
 0x9b7   : > { %v11141_v13 = vadd.f32 %v11120_v20, %v4732_v16  ;;  %v4854_v43 = vadd.f32 %v8351_v63, %v4853_v33 }
 0x9b8   : > { %v8353_v21 = vpop.eup %8352 }
 0x9b9   : > { %v7715_v12 = vmul.f32 -1.442695, %v11141_v13  ;;  %v4858_v8 = vsel %vm4857_vm15, %v8351_v63, %v4854_v43  ;;  %v4866_v28 = vmul.f32 %v8353_v21, %v4835_v59  ;;  %vm4871_vm1 = vweird.f32 %v8353_v21 }
 0x9ba   : > { %v4863_v35 = vsel %vm4860_vm0, %v4862_v46, %v4858_v8  ;;  %vm4872_vm4 = vmor %vm4870_vm3, %vm4871_vm1 }
 0x9bb   : > { %8354 = vpow2.f32 %v7715_v12  ;;  %5106 = vrot.lane.b32.xlu1 %v4863_v35, %s8683_s11  ;;  %v4867_v62 = vsub.f32 1.0, %v4866_v28 }
 0x9bd   : > { %v4868_v53 = vmul.f32 %v8353_v21, %v4867_v62 }
 0x9be   : > { %v4734_v57 = vpop.f32.mrf.mxu2 }
 0x9bf   : > { %v11146_v42 = vadd.f32 %v11120_v20, %v4734_v57  ;;  %v4869_v7 = vadd.f32 %v8353_v21, %v4868_v53 }
 0x9c1   : > { %v8355_v31 = vpop.eup %8354  ;;  %v7716_v61 = vmul.f32 -1.442695, %v11146_v42  ;;  %v4873_v51 = vsel %vm4872_vm4, %v8353_v21, %v4869_v7 }
 0x9c2   : > { %v4836_v19 = vadd.f32 1.0, %v8355_v31  ;;  %v4878_v56 = vsel %vm4875_vm5, %v4877_v10, %v4873_v51 }
 0x9c3   : > { %8356 = vpow2.f32 %v7716_v61  ;;  %5108 = vrot.lane.b32.xlu2 %v4878_v56, %s8683_s11 }
 0x9c4   : > { %8358 = vrcp.f32 %v4836_v19  ;;  %v4889_v16 = vand.u32 2147483647, %v4836_v19  ;;  %v4891_v43 = vand.u32 2147483648, %v4836_v19  ;;  %vm4885_vm7 = vweird.f32 %v4836_v19 }
 0x9c5   : > { %v4407_v22 = vpop.xlane.xlu1 %4406 }
 0x9c6   : > { %v4433_v47 = vmul.f32 %v4407_v22, %v12881_v38  ;;  %v4737_v54 = vpop.f32.mrf.mxu2  ;;  %vm4890_vm10 = vcmp.eq.f32.partialorder %v4889_v16, 8.507059e+37  ;;  %v4892_v57 = vor.u32 1.1754944e-38, %v4891_v43 }
 0x9c7   : > { %v11152_v63 = vadd.f32 %v11120_v20, %v4737_v54 }
 0x9c8   : > { %v11154_v59 = vadd.f32 1e-05, %v4433_v47 }
 0x9c9   : > { %v8357_v40 = vpop.eup %8356  ;;  %v7717_v4 = vmul.f32 -1.442695, %v11152_v63 }
 0x9ca   : > { %v8359_v11 = vpop.eup %8358  ;;  %v4837_v14 = vadd.f32 1.0, %v8357_v40  ;;  %8360 = vrsqrt.f32 %v11154_v59  ;;  %vm4561_vm14 = vweird.f32 %v11154_v59 }
 0x9cb   : > { %8362 = vpow2.f32 %v7717_v4  ;;  %v4881_v23 = vmul.f32 %v8359_v11, %v4836_v19  ;;  %vm4886_vm6 = vweird.f32 %v8359_v11 }
 0x9cc   : > { %8364 = vrcp.f32 %v4837_v14  ;;  %vm4887_vm9 = vmor %vm4885_vm7, %vm4886_vm6  ;;  %v4906_v47 = vand.u32 2147483648, %v4837_v14  ;;  %v4904_v4 = vand.u32 2147483647, %v4837_v14  ;;  %vm4900_vm12 = vweird.f32 %v4837_v14 }
 0x9cd   : > { %v4410_v45 = vpop.xlane.xlu2 %4409  ;;  %v4882_v41 = vsub.f32 1.0, %v4881_v23 }
 0x9ce   : > { %v4434_v33 = vmul.f32 %v4410_v45, %v12881_v38  ;;  %v4739_v24 = vpop.f32.mrf.mxu2  ;;  %vm4905_vm0 = vcmp.eq.f32.partialorder %v4904_v4, 8.507059e+37 }
 0x9cf   : > { %v11160_v21 = vadd.f32 %v11120_v20, %v4739_v24  ;;  %v4883_v46 = vmul.f32 %v8359_v11, %v4882_v41 }
 0x9d0   : > { %v11162_v12 = vpop.eup %8360  ;;  %v11164_v8 = vadd.f32 1e-05, %v4434_v33 }
 0x9d1   : > { %v8363_v28 = vpop.eup %8362  ;;  %v4556_v35 = vmul.f32 %v11162_v12, %v11154_v59  ;;  %v7718_v62 = vmul.f32 -1.442695, %v11160_v21  ;;  %v4884_v25 = vadd.f32 %v8359_v11, %v4883_v46  ;;  %vm4562_vm13 = vweird.f32 %v11162_v12 }
 0x9d2   : > { %v8365_v53 = vpop.eup %8364  ;;  %v11169_v17 = vadd.f32 1.0, %v8363_v28  ;;  %8366 = vrsqrt.f32 %v11164_v8  ;;  %v4907_v46 = vor.u32 1.1754944e-38, %v4906_v47  ;;  %vm11186_vm1 = vmor %vm4561_vm14, %vm4562_vm13  ;;  %vm4571_vm5 = vweird.f32 %v11164_v8 }
 0x9d3   : > { %v4557_v7 = vmul.f32 %v11162_v12, %v4556_v35  ;;  %8368 = vpow2.f32 %v7718_v62  ;;  %v4888_v10 = vsel %vm4887_vm9, %v8359_v11, %v4884_v25  ;;  %v4896_v31 = vmul.f32 %v8365_v53, %v4837_v14 }
 0x9d4   : > { %8370 = vrcp.f32 %v11169_v17  ;;  %v4893_v61 = vsel %vm4890_vm10, %v4892_v57, %v4888_v10  ;;  %vm4901_vm11 = vweird.f32 %v8365_v53  ;;  %vm4915_vm7 = vweird.f32 %v11169_v17 }
 0x9d5   : > { %v4558_v51 = vmul.f32 0.5, %v4557_v7  ;;  %5110 = vrot.lane.b32.xlu0 %v4893_v61, %s8683_s11  ;;  %v4413_v19 = vpop.xlane.xlu0 %4412  ;;  %v4897_v56 = vsub.f32 1.0, %v4896_v31  ;;  %vm4902_vm15 = vmor %vm4900_vm12, %vm4901_vm11  ;;  %v4919_v31 = vand.u32 2147483647, %v11169_v17  ;;  %v4921_v61 = vand.u32 2147483648, %v11169_v17 }
 0x9d6   : > { %v4435_v22 = vmul.f32 %v4413_v19, %v12881_v38 }
 0x9d7   : > { %v4559_v54 = vsub.f32 1.5, %v4558_v51  ;;  %v4898_v40 = vmul.f32 %v8365_v53, %v4897_v56  ;;  %vm4920_vm10 = vcmp.eq.f32.partialorder %v4919_v31, 8.507059e+37 }
 0x9d8   : > { %v8367_v23 = vpop.eup %8366  ;;  %v11176_v45 = vadd.f32 1e-05, %v4435_v22 }
 0x9d9   : > { %v8369_v11 = vpop.eup %8368  ;;  %v4560_v41 = vmul.f32 %v11162_v12, %v4559_v54  ;;  %v4566_v33 = vmul.f32 %v8367_v23, %v11164_v8  ;;  %v4899_v24 = vadd.f32 %v8365_v53, %v4898_v40  ;;  %vm4572_vm3 = vweird.f32 %v8367_v23 }
 0x9da   : > { %v8371_v16 = vpop.eup %8370  ;;  %v11182_v43 = vadd.f32 1.0, %v8369_v11  ;;  %8372 = vrsqrt.f32 %v11176_v45  ;;  %vm4573_vm6 = vmor %vm4571_vm5, %vm4572_vm3  ;;  %v4922_v11 = vor.u32 1.1754944e-38, %v4921_v61 }
 0x9db   : > { %v4567_v28 = vmul.f32 %v8367_v23, %v4566_v33  ;;  %v4903_v35 = vsel %vm4902_vm15, %v8365_v53, %v4899_v24  ;;  %v4911_v14 = vmul.f32 %v8371_v16, %v11169_v17  ;;  %v4564_v59 = vsel %vm11186_vm1, %v11162_v12, %v4560_v41 }
 0x9dc   : > { %8374 = vrcp.f32 %v11182_v43  ;;  %v4908_v25 = vsel %vm4905_vm0, %v4907_v46, %v4903_v35  ;;  %vm4916_vm4 = vweird.f32 %v8371_v16  ;;  %v4625_v22 = vmul.f32 %v4564_v59, %v11067_v48 }
 0x9dd   : > { %v4568_v57 = vmul.f32 0.5, %v4567_v28  ;;  %v4416_v7 = vpop.xlane.xlu1 %4415  ;;  %5112 = vrot.lane.b32.xlu0 %v4908_v25, %s8683_s11  ;;  %v4912_v10 = vsub.f32 1.0, %v4911_v14  ;;  %vm4917_vm9 = vmor %vm4915_vm7, %vm4916_vm4  ;;  %v4936_v62 = vand.u32 2147483648, %v11182_v43  ;;  %vm4930_vm12 = vweird.f32 %v11182_v43 }
 0x9de   : > { %v4436_v53 = vmul.f32 %v4416_v7, %v12881_v38  ;;  %v4644_v28 = vmul.f32 %v11008_v49, %v4625_v22  ;;  %vm4581_vm15 = vweird.f32 %v11176_v45 }
 0x9df   : > { %v4569_v51 = vsub.f32 1.5, %v4568_v57  ;;  %v4913_v19 = vmul.f32 %v8371_v16, %v4912_v10  ;;  %v4937_v61 = vor.u32 1.1754944e-38, %v4936_v62 }
 0x9e0   : > { %v8373_v56 = vpop.eup %8372  ;;  %v4452_v12 = vadd.f32 1e-05, %v4436_v53  ;;  %v4663_v57 = vadd.f32 %v11016_v0, %v4644_v28 }
 0x9e1   : > { %v4570_v47 = vmul.f32 %v8367_v23, %v4569_v51  ;;  %v4576_v54 = vmul.f32 %v8373_v56, %v11176_v45  ;;  %v4914_v40 = vadd.f32 %v8371_v16, %v4913_v19  ;;  %vm4582_vm13 = vweird.f32 %v8373_v56 }
 0x9e2   : > { %v8375_v4 = vpop.eup %8374  ;;  %8376 = vrsqrt.f32 %v4452_v12  ;;  %vm4583_vm1 = vmor %vm4581_vm15, %vm4582_vm13  ;;  %vm4591_vm4 = vweird.f32 %v4452_v12 }
 0x9e3   : > { %v4574_v41 = vsel %vm4573_vm6, %v8367_v23, %v4570_v47  ;;  %v4577_v33 = vmul.f32 %v8373_v56, %v4576_v54  ;;  %v4918_v24 = vsel %vm4917_vm9, %v8371_v16, %v4914_v40  ;;  %v4926_v48 = vmul.f32 %v8375_v4, %v11182_v43 }
 0x9e4   : > { %v4626_v8 = vmul.f32 %v4574_v41, %v11074_v1  ;;  %v4923_v46 = vsel %vm4920_vm10, %v4922_v11, %v4918_v24  ;;  %vm4931_vm11 = vweird.f32 %v8375_v4  ;;  %v4934_v23 = vand.u32 2147483647, %v11182_v43 }
 0x9e5   : > { %v4578_v35 = vmul.f32 0.5, %v4577_v33  ;;  %5114 = vrot.lane.b32.xlu1 %v4923_v46, %s8683_s11  ;;  %v4927_v14 = vsub.f32 1.0, %v4926_v48  ;;  %vm4932_vm14 = vmor %vm4930_vm12, %vm4931_vm11  ;;  %v4419_v48 = vpop.xlane.xlu2 %4418 }
 0x9e6   : > { %v4645_v17 = vmul.f32 %v11008_v49, %v4626_v8  ;;  %vm4935_vm0 = vcmp.eq.f32.partialorder %v4934_v23, 8.507059e+37  ;;  %v4437_v46 = vmul.f32 %v4419_v48, %v12881_v38 }
 0x9e7   : > { %v4579_v25 = vsub.f32 1.5, %v4578_v35  ;;  %v4928_v59 = vmul.f32 %v8375_v4, %v4927_v14 }
 0x9e8   : > { %v8377_v16 = vpop.eup %8376  ;;  %v4664_v1 = vadd.f32 %v11016_v0, %v4645_v17 }
 0x9e9   : > { %v4580_v7 = vmul.f32 %v8373_v56, %v4579_v25  ;;  %v4586_v10 = vmul.f32 %v8377_v16, %v4452_v12  ;;  %v4929_v53 = vadd.f32 %v8375_v4, %v4928_v59  ;;  %vm4592_vm3 = vweird.f32 %v8377_v16 }
 0x9ea   : > { %v4679_v31 = vpack.c.bf16 %v4664_v1, %v4663_v57  ;;  %vm4593_vm5 = vmor %vm4591_vm4, %vm4592_vm3 }
 0x9eb   : > { %v4587_v51 = vmul.f32 %v8377_v16, %v4586_v10  ;;  %v4933_v19 = vsel %vm4932_vm14, %v8375_v4, %v4929_v53  ;;  %v4584_v47 = vsel %vm4583_vm1, %v8373_v56, %v4580_v7 }
 0x9ec   : > { %7710 = vmatmul.msk.bf16.gmra.mxu2 %vm1369_vm2, %v4679_v31  ;;  %v4938_v22 = vsel %vm4935_vm0, %v4937_v61, %v4933_v19  ;;  %v4627_v40 = vmul.f32 %v4584_v47, %v11081_v44  ;;  %v4453_v44 = vadd.f32 1e-05, %v4437_v46 }
 0x9ed   : > { %v4588_v54 = vmul.f32 0.5, %v4587_v51  ;;  %5116 = vrot.lane.b32.xlu2 %v4938_v22, %s8683_s11 }
 0x9ee   : > { %v4646_v4 = vmul.f32 %v11008_v49, %v4627_v40  ;;  %8378 = vrsqrt.f32 %v4453_v44  ;;  %vm4601_vm7 = vweird.f32 %v4453_v44 }
 0x9ef   : > { %v4589_v43 = vsub.f32 1.5, %v4588_v54 }
 0x9f0   : > { %v4665_v24 = vadd.f32 %v11016_v0, %v4646_v4 }
 0x9f1   : > { %v4590_v11 = vmul.f32 %v8377_v16, %v4589_v43 }
 0x9f3   : > { %v4594_v41 = vsel %vm4593_vm5, %v8377_v16, %v4590_v11 }
 0x9f4   : > { %v4628_v45 = vmul.f32 %v4594_v41, %v11089_v5  ;;  %v8379_v12 = vpop.eup %8378 }
 0x9f5   : > { %v4596_v28 = vmul.f32 %v8379_v12, %v4453_v44  ;;  %vm4602_vm6 = vweird.f32 %v8379_v12 }
 0x9f6   : > { %v4647_v33 = vmul.f32 %v11008_v49, %v4628_v45  ;;  %vm4603_vm9 = vmor %vm4601_vm7, %vm4602_vm6 }
 0x9f7   : > { %v4597_v35 = vmul.f32 %v8379_v12, %v4596_v28 }
 0x9f8   : > { %v4666_v56 = vadd.f32 %v11016_v0, %v4647_v33 }
 0x9f9   : > { %v4598_v62 = vmul.f32 0.5, %v4597_v35 }
 0x9fa   : > { %v4680_v8 = vpack.c.bf16 %v4666_v56, %v4665_v24 }
 0x9fb   : > { %v4599_v23 = vsub.f32 1.5, %v4598_v62 }
 0x9fc   : > { %7711 = vmatmul.msk.bf16.gmra.mxu2 %vm1369_vm2, %v4680_v8 }
 0x9fd   : > { %v4600_v1 = vmul.f32 %v8379_v12, %v4599_v23 }
 0x9ff   : > { %v4604_v19 = vsel %vm4603_vm9, %v8379_v12, %v4600_v1 }
 0xa00   : > { %v4629_v11 = vmul.f32 %v4604_v19, %v11096_v36 }
 0xa02   : > { %v4648_v4 = vmul.f32 %v11008_v49, %v4629_v11 }
 0xa04   : > { %v4667_v8 = vadd.f32 %v11016_v0, %v4648_v4 }
 0xa10   : > { %v4422_v5 = vpop.xlane.xlu0 %4421 }
 0xa11   : > { %v4438_v14 = vmul.f32 %v4422_v5, %v12881_v38 }
 0xa13   : > { %v4454_v17 = vadd.f32 1e-05, %v4438_v14 }
 0xa15   : > { %8380 = vrsqrt.f32 %v4454_v17  ;;  %vm4611_vm11 = vweird.f32 %v4454_v17 }
 0xa17   : > { %v4742_v25 = vpop.f32.mrf.mxu2 }
 0xa18   : > { %v11225_v59 = vadd.f32 %v11120_v20, %v4742_v25 }
 0xa1a   : > { %v7719_v16 = vmul.f32 -1.442695, %v11225_v59 }
 0xa1b   : > { %v8381_v57 = vpop.eup %8380 }
 0xa1c   : > { %8382 = vpow2.f32 %v7719_v16  ;;  %v4606_v7 = vmul.f32 %v8381_v57, %v4454_v17  ;;  %vm4612_vm10 = vweird.f32 %v8381_v57 }
 0xa1d   : > { %v5109_v10 = vpop.permute.xlu2 %5108  ;;  %vm4613_vm12 = vmor %vm4611_vm11, %vm4612_vm10 }
 0xa1e   : > { %v5155_v53 = vmul.f32 %v5109_v10, %v11130_v9  ;;  %v4607_v31 = vmul.f32 %v8381_v57, %v4606_v7 }
 0xa1f   : > { %v4744_v61 = vpop.f32.mrf.mxu2 }
 0xa20   : > { %5171 = vst.msk [vmem:[#allocation3 + $0x10] sm:$0xff] %vm1369_vm2, %v5155_v53  ;;  %v11231_v51 = vadd.f32 %v11120_v20, %v4744_v61  ;;  %v4608_v22 = vmul.f32 0.5, %v4607_v31 }
 0xa22   : > { %v8383_v47 = vpop.eup %8382  ;;  %v7720_v54 = vmul.f32 -1.442695, %v11231_v51  ;;  %v4609_v43 = vsub.f32 1.5, %v4608_v22 }
 0xa23   : > { %v4840_v40 = vadd.f32 1.0, %v8383_v47 }
 0xa24   : > { %8384 = vpow2.f32 %v7720_v54  ;;  %v4610_v9 = vmul.f32 %v8381_v57, %v4609_v43 }
 0xa25   : > { %8386 = vrcp.f32 %v4840_v40  ;;  %v4951_v5 = vand.u32 2147483648, %v4840_v40  ;;  %vm4945_vm14 = vweird.f32 %v4840_v40 }
 0xa26   : > { %v4614_v41 = vsel %vm4613_vm12, %v8381_v57, %v4610_v9 }
 0xa27   : > { %v4630_v45 = vmul.f32 %v4614_v41, %v11113_v34 }
 0xa29   : > { %v4649_v24 = vmul.f32 %v11008_v49, %v4630_v45  ;;  %v4949_v49 = vand.u32 2147483647, %v4840_v40 }
 0xa2a   : > { %v8385_v33 = vpop.eup %8384 }
 0xa2b   : > { %v8387_v56 = vpop.eup %8386  ;;  %v4841_v48 = vadd.f32 1.0, %v8385_v33  ;;  %v4668_v46 = vadd.f32 %v11016_v0, %v4649_v24  ;;  %v4952_v0 = vor.u32 1.1754944e-38, %v4951_v5  ;;  %vm4950_vm0 = vcmp.eq.f32.partialorder %v4949_v49, 8.507059e+37 }
 0xa2c   : > { %v4941_v36 = vmul.f32 %v8387_v56, %v4840_v40  ;;  %vm4946_vm13 = vweird.f32 %v8387_v56 }
 0xa2d   : > { %8388 = vrcp.f32 %v4841_v48  ;;  %v5107_v44 = vpop.permute.xlu1 %5106  ;;  %v4681_v28 = vpack.c.bf16 %v4668_v46, %v4667_v8  ;;  %vm4947_vm15 = vmor %vm4945_vm14, %vm4946_vm13  ;;  %v4966_v57 = vand.u32 2147483648, %v4841_v48  ;;  %v4964_v7 = vand.u32 2147483647, %v4841_v48 }
 0xa2e   : > { %v5154_v12 = vmul.f32 %v5107_v44, %v11125_v55  ;;  %v4942_v35 = vsub.f32 1.0, %v4941_v36  ;;  %vm4960_vm3 = vweird.f32 %v4841_v48 }
 0xa2f   : > { %7712 = vmatmul.msk.bf16.gmra.mxu2 %vm1369_vm2, %v4681_v28  ;;  %v4967_v61 = vor.u32 1.1754944e-38, %v4966_v57  ;;  %vm4965_vm5 = vcmp.eq.f32.partialorder %v4964_v7, 8.507059e+37 }
 0xa30   : > { %5170 = vst.msk [vmem:[#allocation3 + $0x8] sm:$0xff] %vm1369_vm2, %v5154_v12  ;;  %v4943_v34 = vmul.f32 %v8387_v56, %v4942_v35 }
 0xa32   : > { %v4944_v14 = vadd.f32 %v8387_v56, %v4943_v34 }
 0xa33   : > { %v8389_v17 = vpop.eup %8388 }
 0xa34   : > { %v4948_v62 = vsel %vm4947_vm15, %v8387_v56, %v4944_v14  ;;  %v4956_v25 = vmul.f32 %v8389_v17, %v4841_v48  ;;  %vm4961_vm1 = vweird.f32 %v8389_v17 }
 0xa35   : > { %v4953_v23 = vsel %vm4950_vm0, %v4952_v0, %v4948_v62  ;;  %vm4962_vm4 = vmor %vm4960_vm3, %vm4961_vm1 }
 0xa36   : > { %5118 = vrot.lane.b32.xlu0 %v4953_v23, %s8683_s11  ;;  %v4957_v55 = vsub.f32 1.0, %v4956_v25 }
 0xa38   : > { %v4958_v16 = vmul.f32 %v8389_v17, %v4957_v55 }
 0xa39   : > { %v4747_v1 = vpop.f32.mrf.mxu2 }
 0xa3a   : > { %v11245_v10 = vadd.f32 %v11120_v20, %v4747_v1  ;;  %v4959_v53 = vadd.f32 %v8389_v17, %v4958_v16 }
 0xa3c   : > { %v7721_v31 = vmul.f32 -1.442695, %v11245_v10  ;;  %v4963_v19 = vsel %vm4962_vm4, %v8389_v17, %v4959_v53 }
 0xa3d   : > { %v4968_v22 = vsel %vm4965_vm5, %v4967_v61, %v4963_v19 }
 0xa3e   : > { %8390 = vpow2.f32 %v7721_v31  ;;  %5120 = vrot.lane.b32.xlu1 %v4968_v22, %s8683_s11 }
 0xa41   : > { %v4749_v47 = vpop.f32.mrf.mxu2 }
 0xa42   : > { %v11250_v54 = vadd.f32 %v11120_v20, %v4749_v47 }
 0xa44   : > { %v8391_v43 = vpop.eup %8390  ;;  %v7722_v40 = vmul.f32 -1.442695, %v11250_v54 }
 0xa45   : > { %v4842_v11 = vadd.f32 1.0, %v8391_v43 }
 0xa46   : > { %8392 = vpow2.f32 %v7722_v40 }
 0xa47   : > { %8394 = vrcp.f32 %v4842_v11  ;;  %v5117_v9 = vpop.permute.xlu2 %5116  ;;  %v5111_v41 = vpop.permute.xlu0 %5110  ;;  %v4981_v44 = vand.u32 2147483648, %v4842_v11  ;;  %vm4975_vm7 = vweird.f32 %v4842_v11 }
 0xa48   : > { %v5159_v45 = vmul.f32 %v5117_v9, %v11160_v21  ;;  %v5156_v4 = vmul.f32 %v5111_v41, %v11141_v13  ;;  %v4979_v21 = vand.u32 2147483647, %v4842_v11 }
 0xa49   : > { %v4982_v35 = vor.u32 1.1754944e-38, %v4981_v44 }
 0xa4a   : > { %5175 = vst.msk [vmem:[#allocation3 + $0x30] sm:$0xff] %vm1369_vm2, %v5159_v45  ;;  %vm4980_vm10 = vcmp.eq.f32.partialorder %v4979_v21, 8.507059e+37 }
 0xa4b   : > { %5172 = vst.msk [vmem:[#allocation3 + $0x18] sm:$0xff] %vm1369_vm2, %v5156_v4 }
 0xa4c   : > { %v8393_v33 = vpop.eup %8392 }
 0xa4d   : > { %v8395_v24 = vpop.eup %8394  ;;  %v4843_v56 = vadd.f32 1.0, %v8393_v33 }
 0xa4e   : > { %v4971_v48 = vmul.f32 %v8395_v24, %v4842_v11  ;;  %vm4976_vm6 = vweird.f32 %v8395_v24 }
 0xa4f   : > { %8396 = vrcp.f32 %v4843_v56  ;;  %v5113_v8 = vpop.permute.xlu0 %5112  ;;  %vm4977_vm9 = vmor %vm4975_vm7, %vm4976_vm6  ;;  %v4996_v0 = vand.u32 2147483648, %v4843_v56  ;;  %v4994_v25 = vand.u32 2147483647, %v4843_v56  ;;  %vm4990_vm12 = vweird.f32 %v4843_v56 }
 0xa50   : > { %v5157_v46 = vmul.f32 %v5113_v8, %v11146_v42  ;;  %v4972_v36 = vsub.f32 1.0, %v4971_v48 }
 0xa51   : > { %v4997_v55 = vor.u32 1.1754944e-38, %v4996_v0  ;;  %vm4995_vm14 = vcmp.eq.f32.partialorder %v4994_v25, 8.507059e+37 }
 0xa52   : > { %5173 = vst.msk [vmem:[#allocation3 + $0x20] sm:$0xff] %vm1369_vm2, %v5157_v46  ;;  %v4973_v12 = vmul.f32 %v8395_v24, %v4972_v36 }
 0xa54   : > { %v4974_v13 = vadd.f32 %v8395_v24, %v4973_v12 }
 0xa55   : > { %v8397_v28 = vpop.eup %8396 }
 0xa56   : > { %v4978_v5 = vsel %vm4977_vm9, %v8395_v24, %v4974_v13  ;;  %v4986_v34 = vmul.f32 %v8397_v28, %v4843_v56  ;;  %vm4991_vm11 = vweird.f32 %v8397_v28 }
 0xa57   : > { %v5115_v49 = vpop.permute.xlu1 %5114  ;;  %v4983_v14 = vsel %vm4980_vm10, %v4982_v35, %v4978_v5  ;;  %vm4992_vm13 = vmor %vm4990_vm12, %vm4991_vm11 }
 0xa58   : > { %v5158_v17 = vmul.f32 %v5115_v49, %v11152_v63  ;;  %5122 = vrot.lane.b32.xlu2 %v4983_v14, %s8683_s11  ;;  %v4987_v42 = vsub.f32 1.0, %v4986_v34 }
 0xa5a   : > { %5174 = vst.msk [vmem:[#allocation3 + $0x28] sm:$0xff] %vm1369_vm2, %v5158_v17  ;;  %v4988_v62 = vmul.f32 %v8397_v28, %v4987_v42 }
 0xa5c   : > { %v4989_v23 = vadd.f32 %v8397_v28, %v4988_v62 }
 0xa5e   : > { %v4993_v16 = vsel %vm4992_vm13, %v8397_v28, %v4989_v23 }
 0xa5f   : > { %v4998_v57 = vsel %vm4995_vm14, %v4997_v55, %v4993_v16 }
 0xa60   : > { %5124 = vrot.lane.b32.xlu0 %v4998_v57, %s8683_s11 }
 0xa6f   : > { %v4752_v1 = vpop.f32.mrf.mxu2 }
 0xa70   : > { %v11264_v63 = vadd.f32 %v11120_v20, %v4752_v1 }
 0xa72   : > { %v7723_v7 = vmul.f32 -1.442695, %v11264_v63 }
 0xa74   : > { %8398 = vpow2.f32 %v7723_v7 }
 0xa77   : > { %v4754_v53 = vpop.f32.mrf.mxu2 }
 0xa78   : > { %v11268_v31 = vadd.f32 %v11120_v20, %v4754_v53 }
 0xa7a   : > { %v8399_v61 = vpop.eup %8398  ;;  %v7724_v19 = vmul.f32 -1.442695, %v11268_v31 }
 0xa7b   : > { %v4844_v22 = vadd.f32 1.0, %v8399_v61 }
 0xa7c   : > { %8400 = vpow2.f32 %v7724_v19 }
 0xa7d   : > { %8402 = vrcp.f32 %v4844_v22  ;;  %v5011_v24 = vand.u32 2147483648, %v4844_v22  ;;  %v5009_v8 = vand.u32 2147483647, %v4844_v22  ;;  %vm5005_vm0 = vweird.f32 %v4844_v22 }
 0xa7f   : > { %v4757_v47 = vpop.f32.mrf.mxu2  ;;  %v5012_v13 = vor.u32 1.1754944e-38, %v5011_v24  ;;  %vm5010_vm3 = vcmp.eq.f32.partialorder %v5009_v8, 8.507059e+37 }
 0xa80   : > { %v11272_v43 = vadd.f32 %v11120_v20, %v4757_v47 }
 0xa82   : > { %v8401_v40 = vpop.eup %8400  ;;  %v7725_v11 = vmul.f32 -1.442695, %v11272_v43 }
 0xa83   : > { %v8403_v9 = vpop.eup %8402  ;;  %v4845_v41 = vadd.f32 1.0, %v8401_v40 }
 0xa84   : > { %8404 = vpow2.f32 %v7725_v11  ;;  %v5001_v45 = vmul.f32 %v8403_v9, %v4844_v22  ;;  %vm5006_vm15 = vweird.f32 %v8403_v9 }
 0xa85   : > { %8406 = vrcp.f32 %v4845_v41  ;;  %vm5007_vm1 = vmor %vm5005_vm0, %vm5006_vm15  ;;  %v5026_v49 = vand.u32 2147483648, %v4845_v41  ;;  %v5024_v17 = vand.u32 2147483647, %v4845_v41  ;;  %vm5020_vm5 = vweird.f32 %v4845_v41 }
 0xa86   : > { %v5002_v4 = vsub.f32 1.0, %v5001_v45 }
 0xa87   : > { %v4759_v33 = vpop.f32.mrf.mxu2  ;;  %v5027_v23 = vor.u32 1.1754944e-38, %v5026_v49  ;;  %vm5025_vm7 = vcmp.eq.f32.partialorder %v5024_v17, 8.507059e+37 }
 0xa88   : > { %v11276_v56 = vadd.f32 %v11120_v20, %v4759_v33  ;;  %v5003_v48 = vmul.f32 %v8403_v9, %v5002_v4 }
 0xa8a   : > { %v8405_v46 = vpop.eup %8404  ;;  %v7726_v36 = vmul.f32 -1.442695, %v11276_v56  ;;  %v5004_v44 = vadd.f32 %v8403_v9, %v5003_v48 }
 0xa8b   : > { %v8407_v12 = vpop.eup %8406  ;;  %v4846_v21 = vadd.f32 1.0, %v8405_v46 }
 0xa8c   : > { %8408 = vpow2.f32 %v7726_v36  ;;  %v5008_v28 = vsel %vm5007_vm1, %v8403_v9, %v5004_v44  ;;  %v5016_v35 = vmul.f32 %v8407_v12, %v4845_v41  ;;  %vm5021_vm4 = vweird.f32 %v8407_v12 }
 0xa8d   : > { %8410 = vrcp.f32 %v4846_v21  ;;  %v5013_v5 = vsel %vm5010_vm3, %v5012_v13, %v5008_v28  ;;  %vm5022_vm6 = vmor %vm5020_vm5, %vm5021_vm4  ;;  %v5041_v7 = vand.u32 2147483648, %v4846_v21  ;;  %v5039_v61 = vand.u32 2147483647, %v4846_v21 }
 0xa8e   : > { %5126 = vrot.lane.b32.xlu1 %v5013_v5, %s8683_s11  ;;  %v5017_v34 = vsub.f32 1.0, %v5016_v35  ;;  %vm5035_vm10 = vweird.f32 %v4846_v21 }
 0xa8f   : > { %v5042_v47 = vor.u32 1.1754944e-38, %v5041_v7  ;;  %vm5040_vm12 = vcmp.eq.f32.partialorder %v5039_v61, 8.507059e+37 }
 0xa90   : > { %v5018_v14 = vmul.f32 %v8407_v12, %v5017_v34 }
 0xa92   : > { %v8409_v42 = vpop.eup %8408  ;;  %v5019_v0 = vadd.f32 %v8407_v12, %v5018_v14 }
 0xa93   : > { %v8411_v62 = vpop.eup %8410  ;;  %v4847_v25 = vadd.f32 1.0, %v8409_v42 }
 0xa94   : > { %v5023_v55 = vsel %vm5022_vm6, %v8407_v12, %v5019_v0  ;;  %v5031_v16 = vmul.f32 %v8411_v62, %v4846_v21  ;;  %vm5036_vm9 = vweird.f32 %v8411_v62 }
 0xa95   : > { %8412 = vrcp.f32 %v4847_v25  ;;  %v5028_v57 = vsel %vm5025_vm7, %v5027_v23, %v5023_v55  ;;  %vm5037_vm11 = vmor %vm5035_vm10, %vm5036_vm9  ;;  %v5056_v45 = vand.u32 2147483648, %v4847_v25  ;;  %v5054_v33 = vand.u32 2147483647, %v4847_v25 }
 0xa96   : > { %5128 = vrot.lane.b32.xlu2 %v5028_v57, %s8683_s11  ;;  %v5032_v1 = vsub.f32 1.0, %v5031_v16  ;;  %vm5050_vm14 = vweird.f32 %v4847_v25 }
 0xa97   : > { %v5057_v48 = vor.u32 1.1754944e-38, %v5056_v45  ;;  %vm5055_vm0 = vcmp.eq.f32.partialorder %v5054_v33, 8.507059e+37 }
 0xa98   : > { %v5033_v53 = vmul.f32 %v8411_v62, %v5032_v1 }
 0xa9a   : > { %v5034_v19 = vadd.f32 %v8411_v62, %v5033_v53 }
 0xa9b   : > { %v8413_v22 = vpop.eup %8412 }
 0xa9c   : > { %v5038_v40 = vsel %vm5037_vm11, %v8411_v62, %v5034_v19  ;;  %v5046_v11 = vmul.f32 %v8413_v22, %v4847_v25  ;;  %vm5051_vm13 = vweird.f32 %v8413_v22 }
 0xa9d   : > { %v5043_v9 = vsel %vm5040_vm12, %v5042_v47, %v5038_v40  ;;  %vm5052_vm15 = vmor %vm5050_vm14, %vm5051_vm13 }
 0xa9e   : > { %5130 = vrot.lane.b32.xlu0 %v5043_v9, %s8683_s11  ;;  %v5047_v41 = vsub.f32 1.0, %v5046_v11 }
 0xaa0   : > { %v5048_v4 = vmul.f32 %v8413_v22, %v5047_v41 }
 0xaa2   : > { %v5049_v24 = vadd.f32 %v8413_v22, %v5048_v4 }
 0xaa4   : > { %v5053_v8 = vsel %vm5052_vm15, %v8413_v22, %v5049_v24 }
 0xaa5   : > { %v5058_v46 = vsel %vm5055_vm0, %v5057_v48, %v5053_v8 }
 0xaa6   : > { %5132 = vrot.lane.b32.xlu1 %v5058_v46, %s8683_s11  ;;  %v11306_v46 = vld [vmem:[%s8907_s24] sm:$0x7f] }
 0xaa8   : > { %v5119_v36 = vpop.permute.xlu0 %5118 }
 0xaa9   : > { %v5160_v44 = vmul.f32 %v5119_v36, %v11225_v59  ;;  %v11309_v36 = vperm.slane %v11306_v46, 0 }
 0xaab   : > { %5176 = vst.msk [vmem:[#allocation3 + $0x38] sm:$0xff] %vm1369_vm2, %v5160_v44  ;;  %v11312_v44 = vperm.slane %v11306_v46, 1 }
 0xab0   : > { %v5121_v12 = vpop.permute.xlu1 %5120 }
 0xab1   : > { %v5161_v21 = vmul.f32 %v5121_v12, %v11231_v51 }
 0xab2   : > { %v5123_v13 = vpop.permute.xlu2 %5122  ;;  %v4762_v35 = vpop.f32.mrf.mxu2 }
 0xab3   : > { %v5162_v28 = vmul.f32 %v5123_v13, %v11245_v10  ;;  %5177 = vst.msk [vmem:[#allocation3 + $0x40] sm:$0xff] %vm1369_vm2, %v5161_v21  ;;  %v11289_v5 = vadd.f32 %v11120_v20, %v4762_v35  ;;  %v5187_v21 = vld [vmem:[#allocation3 + $0x5] sm:$0xff]  ;;  %v5237_v35 = vld [vmem:[#allocation3 + $0xe] sm:$0xff] }
 0xab4   : > { %v5236_v13 = vld [vmem:[#allocation3 + $0x6] sm:$0xff] }
 0xab5   : > { %5178 = vst.msk [vmem:[#allocation3 + $0x58] sm:$0xff] %vm1369_vm2, %v5162_v28  ;;  %v7727_v34 = vmul.f32 -1.442695, %v11289_v5  ;;  %v5188_v28 = vld [vmem:[#allocation3 + $0xd] sm:$0xff] }
 0xab7   : > { %8414 = vpow2.f32 %v7727_v34  ;;  %v5253_v34 = vmul.f32 %v11312_v44, %v5236_v13  ;;  %v5288_v13 = vld [vmem:[#allocation3 + $0x1f] sm:$0xff] }
 0xaba   : > { %v4764_v59 = vpop.f32.mrf.mxu2 }
 0xabb   : > { %v11294_v49 = vadd.f32 %v11120_v20, %v4764_v59  ;;  %v5189_v59 = vld [vmem:[#allocation3 + $0x15] sm:$0xff] }
 0xabd   : > { %v8415_v14 = vpop.eup %8414  ;;  %v7728_v17 = vmul.f32 -1.442695, %v11294_v49 }
 0xabe   : > { %v4848_v51 = vadd.f32 1.0, %v8415_v14  ;;  %v5238_v14 = vld [vmem:[#allocation3 + $0x16] sm:$0xff] }
 0xac0   : > { %8416 = vrcp.f32 %v4848_v51  ;;  %v5071_v23 = vand.u32 2147483648, %v4848_v51  ;;  %v5069_v16 = vand.u32 2147483647, %v4848_v51  ;;  %vm5065_vm3 = vweird.f32 %v4848_v51 }
 0xac1   : > { %8418 = vpow2.f32 %v7728_v17  ;;  %v5205_v17 = vmul.f32 %v11309_v36, %v5188_v28 }
 0xac2   : > { %v5072_v20 = vor.u32 1.1754944e-38, %v5071_v23  ;;  %vm5070_vm5 = vcmp.eq.f32.partialorder %v5069_v16, 8.507059e+37  ;;  %v5286_v23 = vld [vmem:[#allocation3 + $0xf] sm:$0xff] }
 0xac6   : > { %v8417_v10 = vpop.eup %8416 }
 0xac7   : > { %v8419_v42 = vpop.eup %8418  ;;  %v5061_v0 = vmul.f32 %v8417_v10, %v4848_v51  ;;  %vm5066_vm1 = vweird.f32 %v8417_v10  ;;  %v11319_v51 = vperm.slane %v11306_v46, 2 }
 0xac8   : > { %v4849_v62 = vadd.f32 1.0, %v8419_v42  ;;  %vm5067_vm4 = vmor %vm5065_vm3, %vm5066_vm1  ;;  %v5285_v42 = vld [vmem:[#allocation3 + $0x7] sm:$0xff] }
 0xac9   : > { %v5062_v25 = vsub.f32 1.0, %v5061_v0  ;;  %v5255_v0 = vmul.f32 %v11312_v44, %v5238_v14  ;;  %v11345_v14 = vperm.slane %v11306_v46, 5 }
 0xaca   : > { %8420 = vrcp.f32 %v4849_v62  ;;  %v5086_v40 = vand.u32 2147483648, %v4849_v62  ;;  %v5084_v9 = vand.u32 2147483647, %v4849_v62  ;;  %vm5080_vm7 = vweird.f32 %v4849_v62 }
 0xacb   : > { %v5063_v55 = vmul.f32 %v8417_v10, %v5062_v25 }
 0xacc   : > { %v5087_v45 = vor.u32 1.1754944e-38, %v5086_v40  ;;  %vm5085_vm10 = vcmp.eq.f32.partialorder %v5084_v9, 8.507059e+37  ;;  %v5335_v40 = vld [vmem:[#allocation3 + $0x10] sm:$0xff] }
 0xacd   : > { %v5064_v57 = vadd.f32 %v8417_v10, %v5063_v55 }
 0xacf   : > { %v5068_v1 = vsel %vm5067_vm4, %v8417_v10, %v5064_v57  ;;  %v5254_v10 = vmul.f32 %v11312_v44, %v5237_v35  ;;  %v5302_v57 = vmul.f32 %v11319_v51, %v5285_v42  ;;  %v5433_v42 = vld [vmem:[#allocation3 + $0x12] sm:$0xff] }
 0xad0   : > { %v8421_v7 = vpop.eup %8420  ;;  %v5073_v53 = vsel %vm5070_vm5, %v5072_v20, %v5068_v1  ;;  %v5287_v20 = vld [vmem:[#allocation3 + $0x17] sm:$0xff] }
 0xad1   : > { %5134 = vrot.lane.b32.xlu2 %v5073_v53, %s8683_s11  ;;  %v5076_v22 = vmul.f32 %v8421_v7, %v4849_v62  ;;  %vm5081_vm6 = vweird.f32 %v8421_v7  ;;  %v5270_v16 = vadd.f32 %v5254_v10, %v5205_v17  ;;  %v5190_v1 = vld [vmem:[#allocation3 + $0x1d] sm:$0xff]  ;;  %v5334_v53 = vld [vmem:[#allocation3 + $0x8] sm:$0xff] }
 0xad2   : > { %v5125_v61 = vpop.permute.xlu0 %5124  ;;  %vm5082_vm9 = vmor %vm5080_vm7, %vm5081_vm6  ;;  %v5207_v9 = vmul.f32 %v11309_v36, %v5190_v1 }
 0xad3   : > { %v5163_v19 = vmul.f32 %v5125_v61, %v11250_v54  ;;  %v5077_v47 = vsub.f32 1.0, %v5076_v22  ;;  %v5303_v22 = vmul.f32 %v11319_v51, %v5286_v23  ;;  %v5240_v23 = vld [vmem:[#allocation3 + $0x26] sm:$0xff] }
 0xad5   : > { %5179 = vst.msk [vmem:[#allocation3 + $0x60] sm:$0xff] %vm1369_vm2, %v5163_v19  ;;  %v5078_v11 = vmul.f32 %v8421_v7, %v5077_v47  ;;  %v11329_v19 = vperm.slane %v11306_v46, 3 }
 0xad7   : > { %v5079_v41 = vadd.f32 %v8421_v7, %v5078_v11  ;;  %v5304_v11 = vmul.f32 %v11319_v51, %v5287_v20 }
 0xad9   : > { %v5083_v4 = vsel %vm5082_vm9, %v8421_v7, %v5079_v41  ;;  %v5239_v7 = vld [vmem:[#allocation3 + $0x1e] sm:$0xff] }
 0xada   : > { %v5088_v33 = vsel %vm5085_vm10, %v5087_v45, %v5083_v4  ;;  %v5256_v41 = vmul.f32 %v11312_v44, %v5239_v7  ;;  %v11336_v45 = vperm.slane %v11306_v46, 4  ;;  %v5319_v4 = vadd.f32 %v5303_v22, %v5270_v16 }
 0xadb   : > { %5136 = vrot.lane.b32.xlu0 %v5088_v33, %s8683_s11  ;;  %v5351_v33 = vmul.f32 %v11329_v19, %v5334_v53  ;;  %v11349_v7 = vperm.slane %v11306_v46, 6  ;;  %v5450_v22 = vmul.f32 %v11345_v14, %v5433_v42  ;;  %s12931_s11 = scalar_lea.vmem %s12702_s21, %s8857_s9 }
 0xadc   : > { %v5272_v35 = vadd.f32 %v5256_v41, %v5207_v9  ;;  %v5481_v9 = vld [vmem:[#allocation3 + $0xb] sm:$0xff]  ;;  %v5482_v41 = vld [vmem:[#allocation3 + $0x13] sm:$0xff] }
 0xaf0   : > { %v5129_v24 = vpop.permute.xlu2 %5128 }
 0xaf1   : > { %v5165_v54 = vmul.f32 %v5129_v24, %v11268_v31  ;;  %v5336_v24 = vld [vmem:[#allocation3 + $0x18] sm:$0xff] }
 0xaf2   : > { %v5353_v28 = vmul.f32 %v11329_v19, %v5336_v24 }
 0xaf3   : > { %5181 = vst.msk [vmem:[#allocation3 + $0x70] sm:$0xff] %vm1369_vm2, %v5165_v54  ;;  %v5385_v54 = vld [vmem:[#allocation3 + $0x19] sm:$0xff] }
 0xb00   : > { %v5127_v48 = vpop.permute.xlu1 %5126 }
 0xb01   : > { %v5164_v8 = vmul.f32 %v5127_v48, %v11264_v63  ;;  %v5204_v63 = vmul.f32 %v11309_v36, %v5187_v21  ;;  %v5383_v48 = vld [vmem:[#allocation3 + $0x9] sm:$0xff] }
 0xb03   : > { %5180 = vst.msk [vmem:[#allocation3 + $0x68] sm:$0xff] %vm1369_vm2, %v5164_v8  ;;  %v5269_v62 = vadd.f32 %v5253_v34, %v5204_v63  ;;  %v5402_v63 = vmul.f32 %v11336_v45, %v5385_v54  ;;  %v5400_v34 = vmul.f32 %v11336_v45, %v5383_v48  ;;  %v5192_v48 = vld [vmem:[#allocation3 + $0x2d] sm:$0xff] }
 0xb05   : > { %v5318_v47 = vadd.f32 %v5302_v57, %v5269_v62  ;;  %v5434_v62 = vld [vmem:[#allocation3 + $0x1a] sm:$0xff] }
 0xb10   : > { %v5131_v12 = vpop.permute.xlu0 %5130 }
 0xb11   : > { %v5166_v31 = vmul.f32 %v5131_v12, %v11272_v43  ;;  %v5206_v43 = vmul.f32 %v11309_v36, %v5189_v59  ;;  %v5352_v12 = vmul.f32 %v11329_v19, %v5335_v40  ;;  %v5432_v59 = vld [vmem:[#allocation3 + $0xa] sm:$0xff] }
 0xb13   : > { %5182 = vst.msk [vmem:[#allocation3 + $0x78] sm:$0xff] %vm1369_vm2, %v5166_v31  ;;  %v5271_v61 = vadd.f32 %v5255_v0, %v5206_v43  ;;  %v5367_v31 = vadd.f32 %v5351_v33, %v5318_v47  ;;  %v5368_v17 = vadd.f32 %v5352_v12, %v5319_v4  ;;  %v5305_v43 = vmul.f32 %v11319_v51, %v5288_v13  ;;  %v5337_v0 = vld [vmem:[#allocation3 + $0x20] sm:$0xff] }
 0xb14   : > { %v5354_v53 = vmul.f32 %v11329_v19, %v5337_v0  ;;  %v5451_v47 = vmul.f32 %v11345_v14, %v5434_v62  ;;  %v5483_v4 = vld [vmem:[#allocation3 + $0x1b] sm:$0xff]  ;;  %v5499_v13 = vmul.f32 %v11349_v7, %v5482_v41  ;;  %v5209_v0 = vmul.f32 %v11309_v36, %v5192_v48 }
 0xb15   : > { %v5320_v8 = vadd.f32 %v5304_v11, %v5271_v61  ;;  %v5416_v16 = vadd.f32 %v5400_v34, %v5367_v31  ;;  %v5321_v20 = vadd.f32 %v5305_v43, %v5272_v35  ;;  %v5449_v61 = vmul.f32 %v11345_v14, %v5432_v59  ;;  %v5435_v12 = vld [vmem:[#allocation3 + $0x22] sm:$0xff]  ;;  %v5193_v34 = vld [vmem:[#allocation3 + $0x35] sm:$0xff] }
 0xb16   : > { %v5257_v11 = vmul.f32 %v11312_v44, %v5240_v23  ;;  %v5500_v31 = vmul.f32 %v11349_v7, %v5483_v4  ;;  %v5242_v59 = vld [vmem:[#allocation3 + $0x36] sm:$0xff] }
 0xb17   : > { %v5369_v10 = vadd.f32 %v5353_v28, %v5320_v8  ;;  %v5465_v46 = vadd.f32 %v5449_v61, %v5416_v16  ;;  %v5370_v24 = vadd.f32 %v5354_v53, %v5321_v20  ;;  %v5289_v8 = vld [vmem:[#allocation3 + $0x27] sm:$0xff]  ;;  %v5210_v20 = vmul.f32 %v11309_v36, %v5193_v34  ;;  %v5291_v4 = vld [vmem:[#allocation3 + $0x37] sm:$0xff]  ;;  %v5292_v34 = vld [vmem:[#allocation3 + $0x3f] sm:$0xff] }
 0xb18   : > { %v5133_v25 = vpop.permute.xlu1 %5132  ;;  %v5241_v28 = vld [vmem:[#allocation3 + $0x2e] sm:$0xff]  ;;  %v5306_v62 = vmul.f32 %v11319_v51, %v5289_v8 }
 0xb19   : > { %v5167_v55 = vmul.f32 %v5133_v25, %v11276_v56  ;;  %v5384_v56 = vld [vmem:[#allocation3 + $0x11] sm:$0xff]  ;;  %v5191_v25 = vld [vmem:[#allocation3 + $0x25] sm:$0xff]  ;;  %v5418_v1 = vadd.f32 %v5402_v63, %v5369_v10 }
 0xb1a   : > { %v5401_v21 = vmul.f32 %v11336_v45, %v5384_v56  ;;  %v5208_v40 = vmul.f32 %v11309_v36, %v5191_v25  ;;  %v5452_v25 = vmul.f32 %v11345_v14, %v5435_v12  ;;  %v5338_v16 = vld [vmem:[#allocation3 + $0x28] sm:$0xff]  ;;  %v5297_v32 = vld [vmem:[#allocation3 + $0x77] sm:$0xff] }
 0xb1b   : > { %5183 = vst.msk [vmem:[#allocation3 + $0x80] sm:$0xff] %vm1369_vm2, %v5167_v55  ;;  %v5386_v55 = vld [vmem:[#allocation3 + $0x21] sm:$0xff]  ;;  %v5467_v54 = vadd.f32 %v5451_v47, %v5418_v1  ;;  %v5259_v1 = vmul.f32 %v11312_v44, %v5242_v59 }
 0xb1c   : > { %v5417_v57 = vadd.f32 %v5401_v21, %v5368_v17  ;;  %v5403_v56 = vmul.f32 %v11336_v45, %v5386_v55  ;;  %v5498_v21 = vmul.f32 %v11349_v7, %v5481_v9  ;;  %v5273_v35 = vadd.f32 %v5257_v11, %v5208_v40  ;;  %v11366_v17 = vld [vmem:[%s12895_s3] ss:$0 sm:$0xff] }
 0xb1d   : > { %v5516_v43 = vadd.f32 %v5500_v31, %v5467_v54  ;;  %v5258_v55 = vmul.f32 %v11312_v44, %v5241_v28  ;;  %v5194_v47 = vld [vmem:[#allocation3 + $0x3d] sm:$0xff]  ;;  %v5355_v9 = vmul.f32 %v11329_v19, %v5338_v16  ;;  %v5387_v54 = vld [vmem:[#allocation3 + $0x29] sm:$0xff]  ;;  %v5275_v48 = vadd.f32 %v5259_v1, %v5210_v20 }
 0xb1e   : > { %v5466_v33 = vadd.f32 %v5450_v22, %v5417_v57  ;;  %v5419_v63 = vadd.f32 %v5403_v56, %v5370_v24  ;;  %v5514_v10 = vadd.f32 %v5498_v21, %v5465_v46  ;;  %v5484_v57 = vld [vmem:[#allocation3 + $0x23] sm:$0xff]  ;;  %v5322_v61 = vadd.f32 %v5306_v62, %v5273_v35  ;;  %v5290_v56 = vld [vmem:[#allocation3 + $0x2f] sm:$0xff]  ;;  %v5340_v35 = vld [vmem:[#allocation3 + $0x38] sm:$0xff] }
 0xb1f   : > { %v5243_v40 = vld [vmem:[#allocation3 + $0x3e] sm:$0xff]  ;;  %v5501_v41 = vmul.f32 %v11349_v7, %v5484_v57  ;;  %v5274_v24 = vadd.f32 %v5258_v55, %v5209_v0  ;;  %v5211_v8 = vmul.f32 %v11309_v36, %v5194_v47  ;;  %v5307_v31 = vmul.f32 %v11319_v51, %v5290_v56  ;;  %v5244_v0 = vld [vmem:[#allocation3 + $0x56] sm:$0xff]  ;;  %v5436_v55 = vld [vmem:[#allocation3 + $0x2a] sm:$0xff] }
 0xb20   : > { %v5515_v42 = vadd.f32 %v5499_v13, %v5466_v33  ;;  %v5468_v22 = vadd.f32 %v5452_v25, %v5419_v63  ;;  %v11377_v11 = vadd.f32 %v11366_v17, %v5514_v10  ;;  %v5339_v33 = vld [vmem:[#allocation3 + $0x30] sm:$0xff]  ;;  %v5260_v12 = vmul.f32 %v11312_v44, %v5243_v40 }
 0xb21   : > { %v5371_v21 = vadd.f32 %v5355_v9, %v5322_v61  ;;  %v5308_v28 = vmul.f32 %v11319_v51, %v5291_v4  ;;  %v5388_v63 = vld [vmem:[#allocation3 + $0x31] sm:$0xff]  ;;  %v5356_v59 = vmul.f32 %v11329_v19, %v5339_v33  ;;  %v5404_v10 = vmul.f32 %v11336_v45, %v5387_v54  ;;  %v5341_v33 = vld [vmem:[#allocation3 + $0x40] sm:$0xff] }
 0xb22   : > { %v11382_v46 = vadd.f32 %v11366_v17, %v5515_v42  ;;  %v5517_v13 = vadd.f32 %v5501_v41, %v5468_v22  ;;  %v5389_v42 = vld [vmem:[#allocation3 + $0x39] sm:$0xff]  ;;  %v5550_v62 = vsel %vm1369_vm2, %v11377_v11, 0.0  ;;  %v5276_v57 = vadd.f32 %v5260_v12, %v5211_v8  ;;  %v5485_v47 = vld [vmem:[#allocation3 + $0x2b] sm:$0xff] }
 0xb23   : > { %v5324_v16 = vadd.f32 %v5308_v28, %v5275_v48  ;;  %v5420_v1 = vadd.f32 %v5404_v10, %v5371_v21  ;;  %v5405_v61 = vmul.f32 %v11336_v45, %v5388_v63  ;;  %v5309_v40 = vmul.f32 %v11319_v51, %v5292_v34  ;;  %v5245_v21 = vld [vmem:[#allocation3 + $0x5e] sm:$0xff]  ;;  %v5437_v63 = vld [vmem:[#allocation3 + $0x32] sm:$0xff] }
 0xb24   : > { %v5551_v25 = vsel %vm1369_vm2, %v11382_v46, 0.0  ;;  %v11402_v22 = vadd.f32 %v11366_v17, %v5517_v13  ;;  %v5406_v56 = vmul.f32 %v11336_v45, %v5389_v42  ;;  %v5261_v41 = vmul.f32 %v11312_v44, %v5244_v0  ;;  %v5197_v13 = vld [vmem:[#allocation3 + $0x65] sm:$0xff]  ;;  %v5444_v15 = vld [vmem:[#allocation3 + $0x7a] sm:$0xff] }
 0xb25   : > { %v5453_v4 = vmul.f32 %v11345_v14, %v5436_v55  ;;  %v5552_v54 = vadd.f32 %v5551_v25, %v5550_v62  ;;  %v5325_v12 = vadd.f32 %v5309_v40, %v5276_v57  ;;  %v5438_v55 = vld [vmem:[#allocation3 + $0x3a] sm:$0xff] }
 0xb26   : > { %v5555_v10 = vsel %vm1369_vm2, %v11402_v22, 0.0  ;;  %v5486_v25 = vld [vmem:[#allocation3 + $0x33] sm:$0xff] }
 0xb27   : > { %v5469_v28 = vadd.f32 %v5453_v4, %v5420_v1  ;;  %v5262_v1 = vmul.f32 %v11312_v44, %v5245_v21  ;;  %v5342_v40 = vld [vmem:[#allocation3 + $0x58] sm:$0xff] }
 0xb2b   : > { %v5135_v23 = vpop.permute.xlu2 %5134 }
 0xb2c   : > { %v5168_v53 = vmul.f32 %v5135_v23, %v11289_v5  ;;  %v11385_v5 = vadd.f32 %v11366_v17, %v5516_v43  ;;  %v5195_v43 = vld [vmem:[#allocation3 + $0x55] sm:$0xff]  ;;  %v5323_v23 = vadd.f32 %v5307_v31, %v5274_v24  ;;  %v5196_v24 = vld [vmem:[#allocation3 + $0x5d] sm:$0xff]  ;;  %v5246_v31 = vld [vmem:[#allocation3 + $0x66] sm:$0xff] }
 0xb2d   : > { %v5212_v9 = vmul.f32 %v11309_v36, %v5195_v43  ;;  %v5358_v43 = vmul.f32 %v11329_v19, %v5341_v33  ;;  %v5213_v57 = vmul.f32 %v11309_v36, %v5196_v24  ;;  %v5198_v33 = vld [vmem:[#allocation3 + $0x6d] sm:$0xff] }
 0xb2e   : > { %5184 = vst.msk [vmem:[#allocation3 + $0x88] sm:$0xff] %vm1369_vm2, %v5168_v53  ;;  %v5553_v20 = vsel %vm1369_vm2, %v11385_v5, 0.0  ;;  %v5357_v53 = vmul.f32 %v11329_v19, %v5340_v35  ;;  %v5372_v48 = vadd.f32 %v5356_v59, %v5323_v23  ;;  %v5502_v35 = vmul.f32 %v11349_v7, %v5485_v47  ;;  %v5293_v59 = vld [vmem:[#allocation3 + $0x57] sm:$0xff]  ;;  %v5390_v23 = vld [vmem:[#allocation3 + $0x41] sm:$0xff] }
 0xb2f   : > { %v5554_v34 = vadd.f32 %v5553_v20, %v5552_v54  ;;  %v5277_v62 = vadd.f32 %v5261_v41, %v5212_v9  ;;  %v5263_v20 = vmul.f32 %v11312_v44, %v5246_v31  ;;  %v5454_v47 = vmul.f32 %v11345_v14, %v5437_v63  ;;  %v5294_v41 = vld [vmem:[#allocation3 + $0x5f] sm:$0xff]  ;;  %v5247_v54 = vld [vmem:[#allocation3 + $0x6e] sm:$0xff]  ;;  %v5248_v63 = vld [vmem:[#allocation3 + $0x76] sm:$0xff] }
 0xb30   : > { %v5373_v8 = vadd.f32 %v5357_v53, %v5324_v16  ;;  %v5421_v42 = vadd.f32 %v5405_v61, %v5372_v48  ;;  %v5487_v16 = vld [vmem:[#allocation3 + $0x3b] sm:$0xff]  ;;  %v5214_v53 = vmul.f32 %v11309_v36, %v5197_v13  ;;  %v5374_v61 = vadd.f32 %v5358_v43, %v5325_v12  ;;  %v5295_v31 = vld [vmem:[#allocation3 + $0x67] sm:$0xff] }
 0xb31   : > { %v5518_v4 = vadd.f32 %v5502_v35, %v5469_v28  ;;  %v5310_v9 = vmul.f32 %v11319_v51, %v5293_v59  ;;  %v11420_v48 = vadd.f32 %v5555_v10, %v5554_v34  ;;  %v5407_v21 = vmul.f32 %v11336_v45, %v5390_v23  ;;  %v5199_v12 = vld [vmem:[#allocation3 + $0x75] sm:$0xff]  ;;  %v5439_v28 = vld [vmem:[#allocation3 + $0x42] sm:$0xff] }
 0xb32   : > { %v5422_v0 = vadd.f32 %v5406_v56, %v5373_v8  ;;  %v5455_v56 = vmul.f32 %v11345_v14, %v5438_v55  ;;  %v5470_v24 = vadd.f32 %v5454_v47, %v5421_v42  ;;  %v5503_v8 = vmul.f32 %v11349_v7, %v5486_v25  ;;  %v5391_v59 = vld [vmem:[#allocation3 + $0x59] sm:$0xff] }
 0xb33   : > { %v5504_v13 = vmul.f32 %v11349_v7, %v5487_v16  ;;  %v5326_v43 = vadd.f32 %v5310_v9, %v5277_v62  ;;  %v5278_v55 = vadd.f32 %v5262_v1, %v5213_v57  ;;  %v5279_v2 = vadd.f32 %v5263_v20, %v5214_v53  ;;  %v5249_v62 = vld [vmem:[#allocation3 + $0x7e] sm:$0xff] }
 0xb34   : > { %v5471_v35 = vadd.f32 %v5455_v56, %v5422_v0  ;;  %v5423_v29 = vadd.f32 %v5407_v21, %v5374_v61  ;;  %v5359_v34 = vmul.f32 %v11329_v19, %v5342_v40  ;;  %v5215_v10 = vmul.f32 %v11309_v36, %v5198_v33  ;;  %v5200_v0 = vld [vmem:[#allocation3 + $0x7d] sm:$0xff]  ;;  %v5344_v40 = vld [vmem:[#allocation3 + $0x68] sm:$0xff] }
 0xb35   : > { %v5264_v42 = vmul.f32 %v11312_v44, %v5247_v54  ;;  %v5311_v25 = vmul.f32 %v11319_v51, %v5294_v41  ;;  %v5312_v23 = vmul.f32 %v11319_v51, %v5295_v31  ;;  %v5216_v16 = vmul.f32 %v11309_v36, %v5199_v12  ;;  %v5343_v20 = vld [vmem:[#allocation3 + $0x60] sm:$0xff]  ;;  %v5296_v54 = vld [vmem:[#allocation3 + $0x6f] sm:$0xff] }
 0xb36   : > { %v5265_v47 = vmul.f32 %v11312_v44, %v5248_v63  ;;  %v11433_v57 = vadd.f32 %v11366_v17, %v5518_v4  ;;  %v5519_v1 = vadd.f32 %v5503_v8, %v5470_v24  ;;  %v5456_v53 = vmul.f32 %v11345_v14, %v5439_v28  ;;  %v5392_v56 = vld [vmem:[#allocation3 + $0x61] sm:$0xff] }
 0xb37   : > { %v5408_v61 = vmul.f32 %v11336_v45, %v5391_v59  ;;  %v5520_v9 = vadd.f32 %v5504_v13, %v5471_v35  ;;  %v5375_v41 = vadd.f32 %v5359_v34, %v5326_v43  ;;  %v5327_v33 = vadd.f32 %v5311_v25, %v5278_v55  ;;  %v5488_v12 = vld [vmem:[#allocation3 + $0x43] sm:$0xff]  ;;  %v5440_v28 = vld [vmem:[#allocation3 + $0x5a] sm:$0xff] }
 0xb38   : > { %v5328_v21 = vadd.f32 %v5312_v23, %v5279_v2  ;;  %v5472_v31 = vadd.f32 %v5456_v53, %v5423_v29  ;;  %v5280_v63 = vadd.f32 %v5264_v42, %v5215_v10  ;;  %v5217_v4 = vmul.f32 %v11309_v36, %v5200_v0  ;;  %v5345_v29 = vld [vmem:[#allocation3 + $0x70] sm:$0xff]  ;;  %v5441_v23 = vld [vmem:[#allocation3 + $0x62] sm:$0xff] }
 0xb39   : > { %v5266_v24 = vmul.f32 %v11312_v44, %v5249_v62  ;;  %v5360_v8 = vmul.f32 %v11329_v19, %v5343_v20  ;;  %v5361_v59 = vmul.f32 %v11329_v19, %v5344_v40  ;;  %v5409_v58 = vmul.f32 %v11336_v45, %v5392_v56  ;;  %v5393_v55 = vld [vmem:[#allocation3 + $0x69] sm:$0xff]  ;;  %v5346_v20 = vld [vmem:[#allocation3 + $0x78] sm:$0xff] }
 0xb3a   : > { %v5281_v13 = vadd.f32 %v5265_v47, %v5216_v16  ;;  %v11443_v35 = vadd.f32 %v11366_v17, %v5519_v1  ;;  %v5424_v2 = vadd.f32 %v5408_v61, %v5375_v41  ;;  %v5313_v43 = vmul.f32 %v11319_v51, %v5296_v54  ;;  %v5394_v16 = vld [vmem:[#allocation3 + $0x71] sm:$0xff]  ;;  %v5298_v47 = vld [vmem:[#allocation3 + $0x7f] sm:$0xff]  ;;  %v7850_v56 = vld [vmem:[%s8924_s0 + $0x8] sm:$0xff] }
 0xb3b   : > { %v5557_v34 = vsel %vm1369_vm2, %v11433_v57, 0.0  ;;  %v5505_v10 = vmul.f32 %v11349_v7, %v5488_v12  ;;  %v5376_v42 = vadd.f32 %v5360_v8, %v5327_v33  ;;  %v5377_v25 = vadd.f32 %v5361_v59, %v5328_v21  ;;  %v5395_v40 = vld [vmem:[#allocation3 + $0x79] sm:$0xff]  ;;  %v5442_v12 = vld [vmem:[#allocation3 + $0x6a] sm:$0xff]  ;;  %6107 = vmatpush.bf16.msra.mxu0 %v7850_v56 }
 0xb3c   : > { %v5314_v0 = vmul.f32 %v11319_v51, %v5297_v32  ;;  %v11451_v62 = vadd.f32 %v11366_v17, %v5520_v9  ;;  %v5457_v1 = vmul.f32 %v11345_v14, %v5440_v28  ;;  %v5329_v53 = vadd.f32 %v5313_v43, %v5280_v63  ;;  %v5489_v54 = vld [vmem:[#allocation3 + $0x5b] sm:$0xff]  ;;  %v5201_v63 = vld [vmem:[#allocation3 + $0x85] sm:$0xff]  ;;  %v5443_v56 = vld [vmem:[#allocation3 + $0x72] sm:$0xff] }
 0xb3d   : > { %v5282_v61 = vadd.f32 %v5266_v24, %v5217_v4  ;;  %v5521_v41 = vadd.f32 %v5505_v10, %v5472_v31  ;;  %v5410_v33 = vmul.f32 %v11336_v45, %v5393_v55  ;;  %v5425_v21 = vadd.f32 %v5409_v58, %v5376_v42  ;;  %v5250_v43 = vld [vmem:[#allocation3 + $0x86] sm:$0xff] }
 0xb3e   : > { %v5330_v32 = vadd.f32 %v5314_v0, %v5281_v13  ;;  %v5473_v8 = vadd.f32 %v5457_v1, %v5424_v2  ;;  %v5362_v59 = vmul.f32 %v11329_v19, %v5345_v29  ;;  %v5411_v9 = vmul.f32 %v11336_v45, %v5394_v16  ;;  %v7849_v4 = vld [vmem:[%s8924_s0] sm:$0xff] }
 0xb3f   : > { %v5315_v28 = vmul.f32 %v11319_v51, %v5298_v47  ;;  %v5426_v24 = vadd.f32 %v5410_v33, %v5377_v25  ;;  %v5458_v31 = vmul.f32 %v11345_v14, %v5441_v23  ;;  %v5363_v10 = vmul.f32 %v11329_v19, %v5346_v20  ;;  %v5347_v55 = vld [vmem:[#allocation3 + $0x80] sm:$0xff]  ;;  %v5491_v20 = vld [vmem:[#allocation3 + $0x6b] sm:$0xff]  ;;  %6108 = vmatpush.bf16.msra.mxu0 %v7849_v4  ;;  %v5492_v4 = vld [vmem:[#allocation3 + $0x73] sm:$0xff] }
 0xb40   : > { %v5412_v58 = vmul.f32 %v11336_v45, %v5395_v40  ;;  %v5396_v13 = vld [vmem:[#allocation3 + $0x81] sm:$0xff]  ;;  %v5506_v2 = vmul.f32 %v11349_v7, %v5489_v54  ;;  %v5459_v29 = vmul.f32 %v11345_v14, %v5442_v12  ;;  %v5378_v0 = vadd.f32 %v5362_v59, %v5329_v53 }
 0xb41   : > { %v5490_v42 = vld [vmem:[#allocation3 + $0x63] sm:$0xff]  ;;  %v5331_v16 = vadd.f32 %v5315_v28, %v5282_v61  ;;  %v5474_v47 = vadd.f32 %v5458_v31, %v5425_v21  ;;  %v5379_v1 = vadd.f32 %v5363_v10, %v5330_v32  ;;  %v5218_v25 = vmul.f32 %v11309_v36, %v5201_v63 }
 0xb42   : > { %v5267_v23 = vmul.f32 %v11312_v44, %v5250_v43  ;;  %v5427_v60 = vadd.f32 %v5411_v9, %v5378_v0  ;;  %v5364_v40 = vmul.f32 %v11329_v19, %v5347_v55  ;;  %v5413_v54 = vmul.f32 %v11336_v45, %v5396_v13  ;;  %v5299_v63 = vld [vmem:[#allocation3 + $0x87] sm:$0xff] }
 0xb43   : > { %v5522_v53 = vadd.f32 %v5506_v2, %v5473_v8  ;;  %v5475_v61 = vadd.f32 %v5459_v29, %v5426_v24  ;;  %v5507_v21 = vmul.f32 %v11349_v7, %v5490_v42  ;;  %v5428_v32 = vadd.f32 %v5412_v58, %v5379_v1  ;;  %v5445_v10 = vld [vmem:[#allocation3 + $0x82] sm:$0xff] }
 0xb44   : > { %v5460_v59 = vmul.f32 %v11345_v14, %v5443_v56  ;;  %v5380_v28 = vadd.f32 %v5364_v40, %v5331_v16  ;;  %v5558_v9 = vadd.f32 %v5557_v34, %v11420_v48  ;;  %v5559_v43 = vsel %vm1369_vm2, %v11443_v35, 0.0  ;;  %v5493_v2 = vld [vmem:[#allocation3 + $0x7b] sm:$0xff]  ;;  %v5348_v16 = vld [vmem:[#allocation3 + $0x88] sm:$0xff] }
 0xb45   : > { %v5508_v31 = vmul.f32 %v11349_v7, %v5491_v20  ;;  %v5461_v8 = vmul.f32 %v11345_v14, %v5444_v15  ;;  %v5283_v24 = vadd.f32 %v5267_v23, %v5218_v25  ;;  %v11479_v55 = vadd.f32 %v11366_v17, %v5521_v41  ;;  %v5494_v25 = vld [vmem:[#allocation3 + $0x83] sm:$0xff] }
 0xb46   : > { %v5561_v58 = vsel %vm1369_vm2, %v11451_v62, 0.0  ;;  %v5476_v13 = vadd.f32 %v5460_v59, %v5427_v60  ;;  %v5429_v48 = vadd.f32 %v5413_v54, %v5380_v28  ;;  %v11484_v34 = vadd.f32 %v11366_v17, %v5522_v53 }
 0xb47   : > { %v5524_v29 = vadd.f32 %v5508_v31, %v5475_v61  ;;  %v5477_v42 = vadd.f32 %v5461_v8, %v5428_v32  ;;  %v5316_v0 = vmul.f32 %v11319_v51, %v5299_v63  ;;  %v5509_v15 = vmul.f32 %v11349_v7, %v5492_v4 }
 0xb48   : > { %v5560_v41 = vadd.f32 %v5559_v43, %v5558_v9  ;;  %v5510_v60 = vmul.f32 %v11349_v7, %v5493_v2  ;;  %v5563_v23 = vsel %vm1369_vm2, %v11479_v55, 0.0  ;;  %v5565_v54 = vsel %vm1369_vm2, %v11484_v34, 0.0 }
 0xb49   : > { %v5332_v56 = vadd.f32 %v5316_v0, %v5283_v24  ;;  %v5365_v61 = vmul.f32 %v11329_v19, %v5348_v16  ;;  %v5511_v28 = vmul.f32 %v11349_v7, %v5494_v25 }
 0xb4a   : > { %v5562_v40 = vadd.f32 %v5561_v58, %v5560_v41  ;;  %v5526_v53 = vadd.f32 %v5510_v60, %v5477_v42 }
 0xb4d   : > { %v5137_v33 = vpop.permute.xlu0 %5136 }
 0xb4e   : > { %v5169_v12 = vmul.f32 %v5137_v33, %v11294_v49  ;;  %v5523_v49 = vadd.f32 %v5507_v21, %v5474_v47  ;;  %v5462_v47 = vmul.f32 %v11345_v14, %v5445_v10  ;;  %v5525_v33 = vadd.f32 %v5509_v15, %v5476_v13 }
 0xb4f   : > { %v5564_v10 = vadd.f32 %v5563_v23, %v5562_v40  ;;  %v8696_v15 = vmov 128.0  }
 0xb50   : > { %5185 = vst.msk [vmem:[#allocation3 + $0x90] sm:$0xff] %vm1369_vm2, %v5169_v12  ;;  %v11490_v1 = vadd.f32 %v11366_v17, %v5523_v49  ;;  %v5478_v20 = vadd.f32 %v5462_v47, %v5429_v48  ;;  %v11498_v12 = vadd.f32 %v11366_v17, %v5524_v29  ;;  %v5381_v49 = vadd.f32 %v5365_v61, %v5332_v56 }
 0xb51   : > { %v11508_v58 = vadd.f32 %v11366_v17, %v5525_v33  ;;  %v5566_v0 = vadd.f32 %v5565_v54, %v5564_v10  ;;  %8422 = vrcp.f32 %v8696_v15  ;;  %v11515_v47 = vadd.f32 %v11366_v17, %v5526_v53 }
 0xb52   : > { %v5567_v31 = vsel %vm1369_vm2, %v11490_v1, 0.0  ;;  %v5527_v13 = vadd.f32 %v5511_v28, %v5478_v20  ;;  %v5569_v16 = vsel %vm1369_vm2, %v11498_v12, 0.0 }
 0xb53   : > { %v5568_v23 = vadd.f32 %v5567_v31, %v5566_v0  ;;  %v5571_v33 = vsel %vm1369_vm2, %v11508_v58, 0.0 }
 0xb54   : > { %v11522_v20 = vadd.f32 %v11366_v17, %v5527_v13 }
 0xb57   : > { %v5202_v21 = vld [vmem:[#allocation3 + $0x8d] sm:$0xff]  ;;  %v8423_v28 = vpop.eup %8422 }
 0xb58   : > { %v5251_v32 = vld [vmem:[#allocation3 + $0x8e] sm:$0xff]  ;;  %v5219_v63 = vmul.f32 %v11309_v36, %v5202_v21  ;;  %v5570_v21 = vadd.f32 %v5569_v16, %v5568_v23  ;;  %vm5592_vm11 = vweird.f32 %v8423_v28 }
 0xb59   : > { %v5300_v59 = vld [vmem:[#allocation3 + $0x8f] sm:$0xff]  ;;  %v5268_v9 = vmul.f32 %v11312_v44, %v5251_v32 }
 0xb5a   : > { %v5397_v43 = vld [vmem:[#allocation3 + $0x89] sm:$0xff]  ;;  %v5317_v48 = vmul.f32 %v11319_v51, %v5300_v59  ;;  %v5398_v29 = vld [vmem:[#allocation3 + $0x91] sm:$0xff] }
 0xb5b   : > { %v5349_v4 = vld [vmem:[#allocation3 + $0x90] sm:$0xff]  ;;  %v5414_v8 = vmul.f32 %v11336_v45, %v5397_v43  ;;  %v5284_v2 = vadd.f32 %v5268_v9, %v5219_v63  ;;  %v5415_v54 = vmul.f32 %v11336_v45, %v5398_v29  ;;  %v5572_v9 = vadd.f32 %v5571_v33, %v5570_v21 }
 0xb5c   : > { %v5446_v24 = vld [vmem:[#allocation3 + $0x8a] sm:$0xff]  ;;  %v5366_v60 = vmul.f32 %v11329_v19, %v5349_v4  ;;  %v5447_v56 = vld [vmem:[#allocation3 + $0x92] sm:$0xff]  ;;  %v5573_v19 = vsel %vm1369_vm2, %v11515_v47, 0.0  ;;  %v5575_v43 = vsel %vm1369_vm2, %v11522_v20, 0.0 }
 0xb5d   : > { %v5495_v36 = vld [vmem:[#allocation3 + $0x8b] sm:$0xff]  ;;  %v5430_v44 = vadd.f32 %v5414_v8, %v5381_v49  ;;  %v5463_v42 = vmul.f32 %v11345_v14, %v5446_v24  ;;  %v5333_v41 = vadd.f32 %v5317_v48, %v5284_v2  ;;  %v5496_v61 = vld [vmem:[#allocation3 + $0x93] sm:$0xff]  ;;  %v5464_v59 = vmul.f32 %v11345_v14, %v5447_v56 }
 0xb5e   : > { %v5512_v51 = vmul.f32 %v11349_v7, %v5495_v36  ;;  %v5513_v45 = vmul.f32 %v11349_v7, %v5496_v61  ;;  %v5574_v49 = vadd.f32 %v5573_v19, %v5572_v9  ;;  %v5588_v24 = vmul.f32 128.0, %v8423_v28 }
 0xb5f   : > { %v5479_v25 = vadd.f32 %v5463_v42, %v5430_v44  ;;  %v5382_v40 = vadd.f32 %v5366_v60, %v5333_v41 }
 0xb60   : > { %v5576_v10 = vadd.f32 %v5575_v43, %v5574_v49  ;;  %v5589_v48 = vsub.f32 1.0, %v5588_v24 }
 0xb61   : > { %v5528_v53 = vadd.f32 %v5512_v51, %v5479_v25  ;;  %v5431_v32 = vadd.f32 %v5415_v54, %v5382_v40 }
 0xb62   : > { %v5590_v44 = vmul.f32 %v8423_v28, %v5589_v48 }
 0xb63   : > { %v11529_v63 = vadd.f32 %v11366_v17, %v5528_v53  ;;  %v5480_v31 = vadd.f32 %v5464_v59, %v5431_v32 }
 0xb64   : > { %v5591_v0 = vadd.f32 %v8423_v28, %v5590_v44 }
 0xb65   : > { %v5529_v4 = vadd.f32 %v5513_v45, %v5480_v31  ;;  %v5577_v8 = vsel %vm1369_vm2, %v11529_v63, 0.0 }
 0xb66   : > { %v5578_v13 = vadd.f32 %v5577_v8, %v5576_v10  ;;  %v11541_v41 = vsel %vm5592_vm11, %v8423_v28, %v5591_v0 }
 0xb67   : > { %v11537_v14 = vadd.f32 %v11366_v17, %v5529_v4 }
 0xb69   : > { %v5579_v2 = vsel %vm1369_vm2, %v11537_v14, 0.0 }
 0xb6a   : > { %v5580_v36 = vadd.f32 %v5579_v2, %v5578_v13 }
 0xb6c   : > { %v5581_v29 = vrot.slane %v5580_v36, 4 }
 0xb6e   : > { %v5582_v42 = vadd.f32 %v5581_v29, %v5580_v36 }
 0xb70   : > { %v5583_v7 = vrot.slane %v5582_v42, 2 }
 0xb72   : > { %v5584_v15 = vadd.f32 %v5583_v7, %v5582_v42 }
 0xb74   : > { %v5585_v16 = vrot.slane %v5584_v15, 1 }
 0xb76   : > { %v5586_v60 = vadd.f32 %v5585_v16, %v5584_v15 }
 0xb78   : > { %v5594_v17 = vmul.f32 %v11541_v41, %v5586_v60 }
 0xb7a   : > { %v11545_v56 = vsub.f32 %v11377_v11, %v5594_v17  ;;  %v11548_v25 = vsub.f32 %v11382_v46, %v5594_v17  ;;  %v11551_v51 = vsub.f32 %v11385_v5, %v5594_v17  ;;  %v11554_v23 = vsub.f32 %v11402_v22, %v5594_v17 }
 0xb7b   : > { %v11561_v54 = vsub.f32 %v11433_v57, %v5594_v17  ;;  %v11566_v46 = vsub.f32 %v11443_v35, %v5594_v17  ;;  %v11573_v21 = vsub.f32 %v11451_v62, %v5594_v17  ;;  %v11579_v35 = vsub.f32 %v11479_v55, %v5594_v17 }
 0xb7c   : > { %v5611_v33 = vmul.f32 %v11545_v56, %v11545_v56  ;;  %v5612_v40 = vmul.f32 %v11548_v25, %v11548_v25  ;;  %v5613_v11 = vmul.f32 %v11551_v51, %v11551_v51  ;;  %v5614_v5 = vmul.f32 %v11554_v23, %v11554_v23 }
 0xb7d   : > { %v5615_v57 = vmul.f32 %v11561_v54, %v11561_v54  ;;  %v5616_v59 = vmul.f32 %v11566_v46, %v11566_v46  ;;  %v11585_v43 = vsub.f32 %v11484_v34, %v5594_v17  ;;  %v5617_v62 = vmul.f32 %v11573_v21, %v11573_v21 }
 0xb7e   : > { %v5627_v22 = vsel %vm1369_vm2, %v5611_v33, 0.0  ;;  %v5628_v61 = vsel %vm1369_vm2, %v5612_v40, 0.0  ;;  %v5630_v19 = vsel %vm1369_vm2, %v5613_v11, 0.0  ;;  %v5632_v28 = vsel %vm1369_vm2, %v5614_v5, 0.0 }
 0xb7f   : > { %v5629_v53 = vadd.f32 %v5628_v61, %v5627_v22  ;;  %v5634_v31 = vsel %vm1369_vm2, %v5615_v57, 0.0  ;;  %v11591_v49 = vsub.f32 %v11490_v1, %v5594_v17  ;;  %v5618_v55 = vmul.f32 %v11579_v35, %v11579_v35 }
 0xb80   : > { %v5636_v4 = vsel %vm1369_vm2, %v5616_v59, 0.0  ;;  %v11597_v24 = vsub.f32 %v11498_v12, %v5594_v17  ;;  %v5619_v34 = vmul.f32 %v11585_v43, %v11585_v43  ;;  %v5638_v10 = vsel %vm1369_vm2, %v5617_v62, 0.0 }
 0xb81   : > { %v5631_v32 = vadd.f32 %v5630_v19, %v5629_v53  ;;  %v11603_v2 = vsub.f32 %v11508_v58, %v5594_v17  ;;  %v5620_v1 = vmul.f32 %v11591_v49, %v11591_v49  ;;  %v5640_v48 = vsel %vm1369_vm2, %v5618_v55, 0.0 }
 0xb82   : > { %v11609_v29 = vsub.f32 %v11515_v47, %v5594_v17  ;;  %v5621_v12 = vmul.f32 %v11597_v24, %v11597_v24  ;;  %v5642_v44 = vsel %vm1369_vm2, %v5619_v34, 0.0  ;;  %v11615_v7 = vsub.f32 %v11522_v20, %v5594_v17 }
 0xb83   : > { %v5633_v9 = vadd.f32 %v5632_v28, %v5631_v32  ;;  %v5622_v58 = vmul.f32 %v11603_v2, %v11603_v2  ;;  %v5644_v0 = vsel %vm1369_vm2, %v5620_v1, 0.0  ;;  %v11621_v16 = vsub.f32 %v11529_v63, %v5594_v17 }
 0xb84   : > { %v5623_v47 = vmul.f32 %v11609_v29, %v11609_v29  ;;  %v5646_v60 = vsel %vm1369_vm2, %v5621_v12, 0.0  ;;  %v11627_v40 = vsub.f32 %v11537_v14, %v5594_v17  ;;  %v5624_v20 = vmul.f32 %v11615_v7, %v11615_v7  ;;  %v11646_v12 = vld [vmem:[%s12896_s5] ss:$0 sm:$0xff] }
 0xb85   : > { %v5635_v45 = vadd.f32 %v5634_v31, %v5633_v9  ;;  %v5648_v11 = vsel %vm1369_vm2, %v5622_v58, 0.0  ;;  %v5625_v22 = vmul.f32 %v11621_v16, %v11621_v16  ;;  %v11659_v58 = vld [vmem:[%s12897_s7] ss:$0 sm:$0xff] }
 0xb86   : > { %v5650_v63 = vsel %vm1369_vm2, %v5623_v47, 0.0  ;;  %v5626_v53 = vmul.f32 %v11627_v40, %v11627_v40  ;;  %v5652_v57 = vsel %vm1369_vm2, %v5624_v20, 0.0 }
 0xb87   : > { %v5637_v8 = vadd.f32 %v5636_v4, %v5635_v45  ;;  %v5654_v14 = vsel %vm1369_vm2, %v5625_v22, 0.0 }
 0xb88   : > { %v5656_v32 = vsel %vm1369_vm2, %v5626_v53, 0.0 }
 0xb89   : > { %v5639_v13 = vadd.f32 %v5638_v10, %v5637_v8 }
 0xb8b   : > { %v5641_v36 = vadd.f32 %v5640_v48, %v5639_v13 }
 0xb8d   : > { %v5643_v42 = vadd.f32 %v5642_v44, %v5641_v36 }
 0xb8f   : > { %v5645_v15 = vadd.f32 %v5644_v0, %v5643_v42 }
 0xb91   : > { %v5647_v33 = vadd.f32 %v5646_v60, %v5645_v15 }
 0xb93   : > { %v5649_v5 = vadd.f32 %v5648_v11, %v5647_v33 }
 0xb95   : > { %v5651_v61 = vadd.f32 %v5650_v63, %v5649_v5 }
 0xb97   : > { %v5653_v19 = vadd.f32 %v5652_v57, %v5651_v61 }
 0xb99   : > { %v5655_v17 = vadd.f32 %v5654_v14, %v5653_v19 }
 0xb9b   : > { %v5657_v59 = vadd.f32 %v5656_v32, %v5655_v17 }
 0xb9d   : > { %v5658_v28 = vrot.slane %v5657_v59, 4 }
 0xb9f   : > { %v5659_v9 = vadd.f32 %v5658_v28, %v5657_v59 }
 0xba1   : > { %v5660_v62 = vrot.slane %v5659_v9, 2 }
 0xba3   : > { %v5661_v31 = vadd.f32 %v5660_v62, %v5659_v9 }
 0xba5   : > { %v5662_v45 = vrot.slane %v5661_v31, 1 }
 0xba7   : > { %v5663_v55 = vadd.f32 %v5662_v45, %v5661_v31 }
 0xba9   : > { %v5664_v4 = vmul.f32 %v5663_v55, %v11541_v41 }
 0xbab   : > { %v5665_v8 = vadd.f32 1e-05, %v5664_v4 }
 0xbad   : > { %8424 = vrsqrt.f32 %v5665_v8  ;;  %vm5672_vm13 = vweird.f32 %v5665_v8 }
 0xbb3   : > { %v8425_v34 = vpop.eup %8424 }
 0xbb4   : > { %v5667_v10 = vmul.f32 %v8425_v34, %v5665_v8  ;;  %vm5673_vm12 = vweird.f32 %v8425_v34 }
 0xbb5   : > { %vm5674_vm14 = vmor %vm5672_vm13, %vm5673_vm12 }
 0xbb6   : > { %v5668_v13 = vmul.f32 %v8425_v34, %v5667_v10 }
 0xbb8   : > { %v5669_v1 = vmul.f32 0.5, %v5668_v13 }
 0xbba   : > { %v5670_v48 = vsub.f32 1.5, %v5669_v1 }
 0xbbc   : > { %v5671_v36 = vmul.f32 %v8425_v34, %v5670_v48 }
 0xbbe   : > { %v11648_v44 = vsel %vm5674_vm14, %v8425_v34, %v5671_v36 }
 0xbbf   : > { %v5676_v41 = vmul.f32 %v11648_v44, %v11545_v56  ;;  %v5677_v42 = vmul.f32 %v11648_v44, %v11548_v25  ;;  %v5678_v0 = vmul.f32 %v11648_v44, %v11551_v51  ;;  %v5679_v15 = vmul.f32 %v11648_v44, %v11554_v23 }
 0xbc0   : > { %v5680_v47 = vmul.f32 %v11648_v44, %v11561_v54  ;;  %v5681_v56 = vmul.f32 %v11648_v44, %v11566_v46  ;;  %v5682_v23 = vmul.f32 %v11648_v44, %v11573_v21  ;;  %v5683_v21 = vmul.f32 %v11648_v44, %v11579_v35 }
 0xbc1   : > { %v5696_v25 = vmul.f32 %v11646_v12, %v5676_v41  ;;  %v5697_v60 = vmul.f32 %v11646_v12, %v5677_v42  ;;  %v5698_v33 = vmul.f32 %v11646_v12, %v5678_v0  ;;  %v5699_v20 = vmul.f32 %v11646_v12, %v5679_v15 }
 0xbc2   : > { %v5700_v11 = vmul.f32 %v11646_v12, %v5680_v47  ;;  %v5701_v51 = vmul.f32 %v11646_v12, %v5681_v56  ;;  %v5684_v14 = vmul.f32 %v11648_v44, %v11585_v43  ;;  %v5702_v32 = vmul.f32 %v11646_v12, %v5682_v23 }
 0xbc3   : > { %v11678_v54 = vadd.f32 %v11659_v58, %v5696_v25  ;;  %v11681_v46 = vadd.f32 %v11659_v58, %v5697_v60  ;;  %v11684_v5 = vadd.f32 %v11659_v58, %v5698_v33  ;;  %v11687_v22 = vadd.f32 %v11659_v58, %v5699_v20 }
 0xbc4   : > { %v11690_v63 = vadd.f32 %v11659_v58, %v5700_v11  ;;  %v11693_v61 = vadd.f32 %v11659_v58, %v5701_v51  ;;  %v5685_v59 = vmul.f32 %v11648_v44, %v11591_v49  ;;  %v5704_v9 = vmul.f32 %v11646_v12, %v5684_v14 }
 0xbc5   : > { %v7729_v53 = vmul.f32 -1.442695, %v11678_v54  ;;  %v7730_v57 = vmul.f32 -1.442695, %v11681_v46  ;;  %v7731_v19 = vmul.f32 -1.442695, %v11684_v5  ;;  %v5686_v43 = vmul.f32 %v11648_v44, %v11597_v24 }
 0xbc6   : > { %v7732_v17 = vmul.f32 -1.442695, %v11687_v22  ;;  %v7733_v28 = vmul.f32 -1.442695, %v11690_v63  ;;  %v7734_v35 = vmul.f32 -1.442695, %v11693_v61  ;;  %v5705_v62 = vmul.f32 %v11646_v12, %v5685_v59 }
 0xbc7   : > { %8426 = vpow2.f32 %v7729_v53  ;;  %v5687_v31 = vmul.f32 %v11648_v44, %v11603_v2  ;;  %v5703_v45 = vmul.f32 %v11646_v12, %v5683_v21  ;;  %v11716_v49 = vadd.f32 %v11659_v58, %v5704_v9 }
 0xbc8   : > { %8428 = vpow2.f32 %v7730_v57  ;;  %v11719_v55 = vadd.f32 %v11659_v58, %v5705_v62  ;;  %v5706_v4 = vmul.f32 %v11646_v12, %v5686_v43  ;;  %v11724_v24 = vadd.f32 %v11659_v58, %v5702_v32 }
 0xbc9   : > { %8430 = vpow2.f32 %v7731_v19  ;;  %v5707_v8 = vmul.f32 %v11646_v12, %v5687_v31  ;;  %v5688_v2 = vmul.f32 %v11648_v44, %v11609_v29  ;;  %v5689_v34 = vmul.f32 %v11648_v44, %v11615_v7 }
 0xbca   : > { %8432 = vpow2.f32 %v7732_v17  ;;  %v11731_v10 = vadd.f32 %v11659_v58, %v5706_v4  ;;  %v11739_v0 = vadd.f32 %v11659_v58, %v5703_v45  ;;  %v7735_v7 = vmul.f32 -1.442695, %v11724_v24 }
 0xbcb   : > { %8434 = vpow2.f32 %v7733_v28  ;;  %v11734_v13 = vadd.f32 %v11659_v58, %v5707_v8  ;;  %v5708_v48 = vmul.f32 %v11646_v12, %v5688_v2  ;;  %v5709_v36 = vmul.f32 %v11646_v12, %v5689_v34 }
 0xbcc   : > { %8436 = vpow2.f32 %v7734_v35  ;;  %v7736_v23 = vmul.f32 -1.442695, %v11739_v0  ;;  %v7737_v21 = vmul.f32 -1.442695, %v11716_v49  ;;  %v7738_v43 = vmul.f32 -1.442695, %v11719_v55 }
 0xbcd   : > { %v8427_v1 = vpop.eup %8426  ;;  %v11745_v47 = vadd.f32 %v11659_v58, %v5708_v48  ;;  %v11748_v56 = vadd.f32 %v11659_v58, %v5709_v36 }
 0xbce   : > { %v8429_v41 = vpop.eup %8428  ;;  %v5780_v42 = vadd.f32 1.0, %v8427_v1 }
 0xbcf   : > { %v8431_v29 = vpop.eup %8430  ;;  %v11741_v15 = vadd.f32 1.0, %v8429_v41 }
 0xbd0   : > { %v8433_v25 = vpop.eup %8432  ;;  %8438 = vrcp.f32 %v5780_v42  ;;  %v11751_v20 = vadd.f32 1.0, %v8431_v29  ;;  %v5805_v19 = vand.u32 2147483647, %v5780_v42  ;;  %v5807_v14 = vand.u32 2147483648, %v5780_v42 }
 0xbd1   : > { %v8435_v60 = vpop.eup %8434  ;;  %8440 = vrcp.f32 %v11741_v15  ;;  %v11753_v11 = vadd.f32 1.0, %v8433_v25  ;;  %v5820_v59 = vand.u32 2147483647, %v11741_v15  ;;  %v5822_v35 = vand.u32 2147483648, %v11741_v15 }
 0xbd2   : > { %v8437_v33 = vpop.eup %8436  ;;  %v11755_v51 = vadd.f32 1.0, %v8435_v60  ;;  %8442 = vpow2.f32 %v7735_v7  ;;  %vm5801_vm15 = vweird.f32 %v5780_v42  ;;  %vm11771_vm0 = vcmp.eq.f32.partialorder %v5805_v19, 8.507059e+37 }
 0xbd3   : > { %8444 = vrcp.f32 %v11751_v20  ;;  %v11761_v53 = vadd.f32 1.0, %v8437_v33  ;;  %v5808_v4 = vor.u32 1.1754944e-38, %v5807_v14  ;;  %vm5816_vm1 = vweird.f32 %v11741_v15 }
 0xbd4   : > { %8446 = vrcp.f32 %v11753_v11  ;;  %vm11778_vm4 = vcmp.eq.f32.partialorder %v5820_v59, 8.507059e+37  ;;  %v5823_v29 = vor.u32 1.1754944e-38, %v5822_v35  ;;  %vm5831_vm11 = vweird.f32 %v11751_v20 }
 0xbd5   : > { %8448 = vrcp.f32 %v11755_v51  ;;  %v5852_v1 = vand.u32 2147483648, %v11753_v11  ;;  %vm5846_vm13 = vweird.f32 %v11753_v11 }
 0xbd6   : > { %v8439_v57 = vpop.eup %8438  ;;  %8450 = vpow2.f32 %v7736_v23  ;;  %v5835_v23 = vand.u32 2147483647, %v11751_v20 }
 0xbd7   : > { %v8441_v17 = vpop.eup %8440  ;;  %v5797_v32 = vmul.f32 %v8439_v57, %v5780_v42  ;;  %8452 = vpow2.f32 %v7737_v21  ;;  %vm5802_vm3 = vweird.f32 %v8439_v57 }
 0xbd8   : > { %v5812_v28 = vmul.f32 %v8441_v17, %v11741_v15  ;;  %v8443_v9 = vpop.eup %8442  ;;  %8454 = vrcp.f32 %v11761_v53  ;;  %vm5817_vm5 = vweird.f32 %v8441_v17  ;;  %vm5803_vm6 = vmor %vm5801_vm15, %vm5802_vm3  ;;  %vm11826_vm14 = vcmp.eq.f32.partialorder %v5835_v23, 8.507059e+37 }
 0xbd9   : > { %v5798_v62 = vsub.f32 1.0, %v5797_v32  ;;  %v11769_v31 = vpop.eup %8444  ;;  %v11793_v59 = vadd.f32 1.0, %v8443_v9  ;;  %vm5818_vm9 = vmor %vm5816_vm1, %vm5817_vm5  ;;  %8456 = vpow2.f32 %v7738_v43  ;;  %vm5861_vm1 = vweird.f32 %v11755_v51 }
 0xbda   : > { %v5813_v8 = vsub.f32 1.0, %v5812_v28  ;;  %v11776_v2 = vpop.eup %8446  ;;  %v5827_v48 = vmul.f32 %v11769_v31, %v11751_v20  ;;  %vm5832_vm7 = vweird.f32 %v11769_v31 }
 0xbdb   : > { %v5799_v34 = vmul.f32 %v8439_v57, %v5798_v62  ;;  %v11784_v36 = vpop.eup %8448  ;;  %v5842_v7 = vmul.f32 %v11776_v2, %v11753_v11  ;;  %vm5847_vm10 = vweird.f32 %v11776_v2  ;;  %vm11819_vm12 = vmor %vm5831_vm11, %vm5832_vm7  ;;  %8458 = vrcp.f32 %v11793_v59 }
 0xbdc   : > { %v5814_v41 = vmul.f32 %v8441_v17, %v5813_v8  ;;  %v8451_v25 = vpop.eup %8450  ;;  %v5828_v33 = vsub.f32 1.0, %v5827_v48  ;;  %v5857_v21 = vmul.f32 %v11784_v36, %v11755_v51  ;;  %vm11832_vm15 = vmor %vm5846_vm13, %vm5847_vm10 }
 0xbdd   : > { %v5800_v60 = vadd.f32 %v8439_v57, %v5799_v34  ;;  %v8453_v19 = vpop.eup %8452  ;;  %v5843_v32 = vsub.f32 1.0, %v5842_v7  ;;  %v5837_v7 = vand.u32 2147483648, %v11751_v20  ;;  %v7742_v20 = vmul.f32 -1.442695, %v11748_v56 }
 0xbde   : > { %v5815_v14 = vadd.f32 %v8441_v17, %v5814_v41  ;;  %v11795_v28 = vpop.eup %8454  ;;  %v5829_v62 = vmul.f32 %v11769_v31, %v5828_v33  ;;  %v5858_v8 = vsub.f32 1.0, %v5857_v21  ;;  %v11837_v21 = vadd.f32 1.0, %v8451_v25 }
 0xbdf   : > { %v5804_v35 = vsel %vm5803_vm6, %v8439_v57, %v5800_v60  ;;  %v5844_v48 = vmul.f32 %v11776_v2, %v5843_v32  ;;  %v5872_v9 = vmul.f32 %v11795_v28, %v11761_v53  ;;  %v8457_v60 = vpop.eup %8456  ;;  %v5867_v25 = vand.u32 2147483648, %v11755_v51 }
 0xbe0   : > { %v5809_v42 = vsel %vm11771_vm0, %v5808_v4, %v5804_v35  ;;  %v5819_v34 = vsel %vm5818_vm9, %v8441_v17, %v5815_v14  ;;  %v5830_v15 = vadd.f32 %v11769_v31, %v5829_v62  ;;  %v5859_v17 = vmul.f32 %v11784_v36, %v5858_v8 }
 0xbe1   : > { %v5824_v57 = vsel %vm11778_vm4, %v5823_v29, %v5819_v34  ;;  %v6036_v41 = vmul.f32 %v5809_v42, %v11678_v54  ;;  %v5845_v45 = vadd.f32 %v11776_v2, %v5844_v48  ;;  %v5873_v4 = vsub.f32 1.0, %v5872_v9 }
 0xbe2   : > { %v6037_v43 = vmul.f32 %v5824_v57, %v11681_v46  ;;  %v5850_v46 = vand.u32 2147483647, %v11753_v11  ;;  %vm5862_vm0 = vweird.f32 %v11784_v36  ;;  %v7739_v14 = vmul.f32 -1.442695, %v11731_v10 }
 0xbe3   : > { %v5834_v11 = vsel %vm11819_vm12, %v11769_v31, %v5830_v15  ;;  %v5849_v23 = vsel %vm11832_vm15, %v11776_v2, %v5845_v45  ;;  %v5860_v32 = vadd.f32 %v11784_v36, %v5859_v17  ;;  %v5874_v35 = vmul.f32 %v11795_v28, %v5873_v4  ;;  %vm11858_vm4 = vmor %vm5861_vm1, %vm5862_vm0  ;;  %v11866_v15 = vpop.eup %8458 }
 0xbe4   : > { %v6057_v29 = vpack.c.bf16 %v6037_v43, %v6036_v41  ;;  %v5838_v62 = vor.u32 1.1754944e-38, %v5837_v7  ;;  %v5853_v8 = vor.u32 1.1754944e-38, %v5852_v1  ;;  %vm5851_vm3 = vcmp.eq.f32.partialorder %v5850_v46, 8.507059e+37 }
 0xbe5   : > { %v5865_v42 = vand.u32 2147483647, %v11755_v51  ;;  %v5880_v34 = vand.u32 2147483647, %v11761_v53  ;;  %v5882_v31 = vand.u32 2147483648, %v11761_v53  ;;  %v11862_v57 = vadd.f32 1.0, %v8453_v19 }
 0xbe6   : > { %7753 = vmatmul.msk.bf16.vlgmr.msra.gmra.mxu0 %vm1369_vm2, %v6057_v29  ;;  %v5839_v2 = vsel %vm11826_vm14, %v5838_v62, %v5834_v11  ;;  %v5854_v48 = vsel %vm5851_vm3, %v5853_v8, %v5849_v23  ;;  %v11864_v41 = vadd.f32 1.0, %v8457_v60  ;;  %v5864_v51 = vsel %vm11858_vm4, %v11784_v36, %v5860_v32 }
 0xbe7   : > { %v5875_v43 = vadd.f32 %v11795_v28, %v5874_v35  ;;  %vm5877_vm5 = vweird.f32 %v11795_v28  ;;  %8460 = vrcp.f32 %v11837_v21  ;;  %v5868_v45 = vor.u32 1.1754944e-38, %v5867_v25 }
 0xbe8   : > { %vm5876_vm6 = vweird.f32 %v11761_v53  ;;  %8462 = vrcp.f32 %v11862_v57  ;;  %v7740_v19 = vmul.f32 -1.442695, %v11734_v13  ;;  %v6038_v17 = vmul.f32 %v5839_v2, %v11684_v5 }
 0xbe9   : > { %v6039_v4 = vmul.f32 %v5854_v48, %v11687_v22  ;;  %vm5866_vm7 = vcmp.eq.f32.partialorder %v5865_v42, 8.507059e+37  ;;  %8464 = vrcp.f32 %v11864_v41  ;;  %vm11880_vm9 = vmor %vm5876_vm6, %vm5877_vm5  ;;  %v5887_v1 = vmul.f32 %v11866_v15, %v11793_v59 }
 0xbea   : > { %v5869_v36 = vsel %vm5866_vm7, %v5868_v45, %v5864_v51  ;;  %v5879_v53 = vsel %vm11880_vm9, %v11795_v28, %v5875_v43  ;;  %vm5881_vm10 = vcmp.eq.f32.partialorder %v5880_v34, 8.507059e+37  ;;  %v5883_v29 = vor.u32 1.1754944e-38, %v5882_v31 }
 0xbeb   : > { %v5895_v5 = vand.u32 2147483647, %v11793_v59  ;;  %v5897_v22 = vand.u32 2147483648, %v11793_v59  ;;  %8466 = vpow2.f32 %v7739_v14  ;;  %v7741_v54 = vmul.f32 -1.442695, %v11745_v47 }
 0xbec   : > { %v6058_v60 = vpack.c.bf16 %v6039_v4, %v6038_v17  ;;  %v11895_v33 = vmul.f32 %v5869_v36, %v11690_v63  ;;  %8468 = vpow2.f32 %v7740_v19  ;;  %v5884_v28 = vsel %vm5881_vm10, %v5883_v29, %v5879_v53 }
 0xbed   : > { %v11892_v46 = vpop.eup %8460  ;;  %v5888_v23 = vsub.f32 1.0, %v5887_v1  ;;  %v5690_v32 = vmul.f32 %v11648_v44, %v11621_v16  ;;  %v5691_v14 = vmul.f32 %v11648_v44, %v11627_v40  ;;  %vm5892_vm11 = vweird.f32 %v11866_v15 }
 0xbee   : > { %v8463_v11 = vpop.eup %8462  ;;  %v5912_v62 = vand.u32 2147483648, %v11837_v21  ;;  %v5925_v8 = vand.u32 2147483647, %v11862_v57  ;;  %v5927_v25 = vand.u32 2147483648, %v11862_v57  ;;  %v5940_v34 = vand.u32 2147483647, %v11864_v41 }
 0xbef   : > { %v8465_v35 = vpop.eup %8464  ;;  %v5917_v63 = vmul.f32 %v8463_v11, %v11862_v57  ;;  %8470 = vpow2.f32 %v7741_v54  ;;  %vm5891_vm12 = vweird.f32 %v11793_v59  ;;  %v5902_v16 = vmul.f32 %v11892_v46, %v11837_v21 }
 0xbf0   : > { %v5932_v42 = vmul.f32 %v8465_v35, %v11864_v41  ;;  %8472 = vpow2.f32 %v7742_v20  ;;  %v5710_v44 = vmul.f32 %v11646_v12, %v5690_v32  ;;  %v5889_v2 = vmul.f32 %v11866_v15, %v5888_v23  ;;  %vm11947_vm9 = vmor %vm5891_vm12, %vm5892_vm11 }
 0xbf1   : > { %v5918_v40 = vsub.f32 1.0, %v5917_v63  ;;  %v8467_v31 = vpop.eup %8466  ;;  %v5942_v9 = vand.u32 2147483648, %v11864_v41  ;;  %v5711_v51 = vmul.f32 %v11646_v12, %v5691_v14  ;;  %vm5922_vm13 = vweird.f32 %v8463_v11 }
 0xbf2   : > { %v5933_v48 = vsub.f32 1.0, %v5932_v42  ;;  %v8469_v43 = vpop.eup %8468  ;;  %v11917_v19 = vadd.f32 1.0, %v8467_v31  ;;  %v11920_v17 = vadd.f32 %v11659_v58, %v5710_v44  ;;  %vm5937_vm14 = vweird.f32 %v8465_v35 }
 0xbf3   : > { %v5919_v45 = vmul.f32 %v8463_v11, %v5918_v40  ;;  %v11922_v36 = vadd.f32 1.0, %v8469_v43  ;;  %v11925_v7 = vadd.f32 %v11659_v58, %v5711_v51  ;;  %v5903_v1 = vsub.f32 1.0, %v5902_v16 }
 0xbf4   : > { %v5934_v4 = vmul.f32 %v8465_v35, %v5933_v48  ;;  %vm5921_vm15 = vweird.f32 %v11862_v57  ;;  %8474 = vrcp.f32 %v11917_v19  ;;  %v5928_v29 = vor.u32 1.1754944e-38, %v5927_v25 }
 0xbf5   : > { %v5920_v53 = vadd.f32 %v8463_v11, %v5919_v45  ;;  %v8471_v12 = vpop.eup %8470  ;;  %vm5923_vm0 = vmor %vm5921_vm15, %vm5922_vm13  ;;  %vm5936_vm1 = vweird.f32 %v11864_v41  ;;  %8476 = vrcp.f32 %v11922_v36  ;;  %v5890_v20 = vadd.f32 %v11866_v15, %v5889_v2 }
 0xbf6   : > { %7754 = vmatmul.msk.bf16.gmra.mxu0 %vm1369_vm2, %v6058_v60  ;;  %v5935_v54 = vadd.f32 %v8465_v35, %v5934_v4  ;;  %v8473_v60 = vpop.eup %8472  ;;  %vm5926_vm3 = vcmp.eq.f32.partialorder %v5925_v8, 8.507059e+37  ;;  %vm5938_vm4 = vmor %vm5936_vm1, %vm5937_vm14  ;;  %v5943_v58 = vor.u32 1.1754944e-38, %v5942_v9  ;;  %vm11933_vm5 = vcmp.eq.f32.partialorder %v5895_v5, 8.507059e+37 }
 0xbf7   : > { %v5924_v23 = vsel %vm5923_vm0, %v8463_v11, %v5920_v53  ;;  %vm5941_vm6 = vcmp.eq.f32.partialorder %v5940_v34, 8.507059e+37  ;;  %v5904_v63 = vmul.f32 %v11892_v46, %v5903_v1  ;;  %vm5906_vm7 = vweird.f32 %v11837_v21 }
 0xbf8   : > { %v5929_v32 = vsel %vm5926_vm3, %v5928_v29, %v5924_v23  ;;  %v5939_v14 = vsel %vm5938_vm4, %v8465_v35, %v5935_v54  ;;  %v6041_v11 = vmul.f32 %v5884_v28, %v11693_v61  ;;  %v11954_v8 = vadd.f32 1.0, %v8471_v12 }
 0xbf9   : > { %v5944_v41 = vsel %vm5941_vm6, %v5943_v58, %v5939_v14  ;;  %v11940_v25 = vmul.f32 %v5929_v32, %v11716_v49  ;;  %v11956_v42 = vadd.f32 1.0, %v8473_v60  ;;  %v5894_v61 = vsel %vm11947_vm9, %v11866_v15, %v5890_v20 }
 0xbfa   : > { %v11952_v35 = vmul.f32 %v5944_v41, %v11719_v55  ;;  %v8475_v34 = vpop.eup %8474  ;;  %v5898_v49 = vor.u32 1.1754944e-38, %v5897_v22  ;;  %v5910_v28 = vand.u32 2147483647, %v11837_v21  ;;  %v11964_v16 = vor.u32 1.1754944e-38, %v5912_v62 }
 0xbfb   : > { %v8477_v40 = vpop.eup %8476  ;;  %v5947_v44 = vmul.f32 %v8475_v34, %v11917_v19  ;;  %8478 = vrcp.f32 %v11954_v8  ;;  %v7743_v31 = vmul.f32 -1.442695, %v11920_v17  ;;  %v11972_v2 = vadd.f32 %v11892_v46, %v5904_v63 }
 0xbfc   : > { %v6061_v55 = vpack.c.bf16 %v11952_v35, %v11940_v25  ;;  %vm5907_vm10 = vweird.f32 %v11892_v46  ;;  %v5962_v59 = vmul.f32 %v8477_v40, %v11922_v36  ;;  %v7744_v15 = vmul.f32 -1.442695, %v11925_v7 }
 0xbfd   : > { %v6059_v22 = vpack.c.bf16 %v6041_v11, %v11895_v33  ;;  %v5948_v62 = vsub.f32 1.0, %v5947_v44  ;;  %v5955_v48 = vand.u32 2147483647, %v11917_v19  ;;  %8480 = vrcp.f32 %v11956_v42  ;;  %vm11986_vm11 = vmor %vm5906_vm7, %vm5907_vm10 }
 0xbfe   : > { %v5899_v9 = vsel %vm11933_vm5, %v5898_v49, %v5894_v61  ;;  %v5957_v51 = vand.u32 2147483648, %v11917_v19  ;;  %v5963_v43 = vsub.f32 1.0, %v5962_v59  ;;  %v5970_v45 = vand.u32 2147483647, %v11922_v36 }
 0xbff   : > { %v5949_v33 = vmul.f32 %v8475_v34, %v5948_v62  ;;  %vm5952_vm12 = vweird.f32 %v8475_v34  ;;  %v5972_v1 = vand.u32 2147483648, %v11922_v36  ;;  %8482 = vpow2.f32 %v7743_v31 }
 0xc00   : > { %v5909_v53 = vsel %vm11986_vm11, %v11892_v46, %v11972_v2  ;;  %vm11995_vm13 = vcmp.eq.f32.partialorder %v5910_v28, 8.507059e+37  ;;  %v5964_v29 = vmul.f32 %v8477_v40, %v5963_v43  ;;  %vm5967_vm14 = vweird.f32 %v8477_v40 }
 0xc01   : > { %8484 = vpow2.f32 %v7744_v15  ;;  %v8479_v21 = vpop.eup %8478  ;;  %v5950_v54 = vadd.f32 %v8475_v34, %v5949_v33  ;;  %vm5951_vm15 = vweird.f32 %v11917_v19  ;;  %vm5956_vm0 = vcmp.eq.f32.partialorder %v5955_v48, 8.507059e+37 }
 0xc02   : > { %vm5966_vm1 = vweird.f32 %v11922_v36  ;;  %vm5953_vm3 = vmor %vm5951_vm15, %vm5952_vm12  ;;  %v5958_v60 = vor.u32 1.1754944e-38, %v5957_v51  ;;  %v5965_v20 = vadd.f32 %v8477_v40, %v5964_v29  ;;  %vm5971_vm4 = vcmp.eq.f32.partialorder %v5970_v45, 8.507059e+37 }
 0xc03   : > { %v5977_v46 = vmul.f32 %v8479_v21, %v11954_v8  ;;  %v8481_v23 = vpop.eup %8480  ;;  %v5954_v58 = vsel %vm5953_vm3, %v8475_v34, %v5950_v54  ;;  %vm5968_vm5 = vmor %vm5966_vm1, %vm5967_vm14  ;;  %v5973_v57 = vor.u32 1.1754944e-38, %v5972_v1  ;;  %vm5981_vm6 = vweird.f32 %v11954_v8 }
 0xc04   : > { %v5985_v19 = vand.u32 2147483647, %v11954_v8  ;;  %v5959_v32 = vsel %vm5956_vm0, %v5958_v60, %v5954_v58  ;;  %v5969_v14 = vsel %vm5968_vm5, %v8477_v40, %v5965_v20  ;;  %v5992_v63 = vmul.f32 %v8481_v23, %v11956_v42 }
 0xc05   : > { %v5978_v36 = vsub.f32 1.0, %v5977_v46  ;;  %v8483_v41 = vpop.eup %8482  ;;  %v5974_v11 = vsel %vm5971_vm4, %v5973_v57, %v5969_v14  ;;  %v12008_v5 = vmul.f32 %v5959_v32, %v11731_v10  ;;  %vm5982_vm7 = vweird.f32 %v8479_v21 }
 0xc06   : > { %7755 = vmatmul.msk.bf16.gmra.mxu0 %vm1369_vm2, %v6059_v22  ;;  %v5987_v34 = vand.u32 2147483648, %v11954_v8  ;;  %v12012_v49 = vmul.f32 %v5974_v11, %v11734_v13  ;;  %v5993_v44 = vsub.f32 1.0, %v5992_v63  ;;  %v5794_v31 = vadd.f32 1.0, %v8483_v41  ;;  %vm5983_vm10 = vmor %vm5981_vm6, %vm5982_vm7 }
 0xc07   : > { %v8485_v61 = vpop.eup %8484  ;;  %v5979_v28 = vmul.f32 %v8479_v21, %v5978_v36  ;;  %vm5997_vm9 = vweird.f32 %v8481_v23  ;;  %v6000_v40 = vand.u32 2147483647, %v11956_v42  ;;  %v6002_v2 = vand.u32 2147483648, %v11956_v42 }
 0xc08   : > { %v5795_v59 = vadd.f32 1.0, %v8485_v61  ;;  %v6062_v10 = vpack.c.bf16 %v12012_v49, %v12008_v5  ;;  %v5994_v22 = vmul.f32 %v8481_v23, %v5993_v44  ;;  %8486 = vrcp.f32 %v5794_v31  ;;  %v12045_v61 = vld [vmem:[%s12920_s29] ss:$0 sm:$0xff] }
 0xc09   : > { %v5980_v15 = vadd.f32 %v8479_v21, %v5979_v28  ;;  %v5914_v13 = vsel %vm11995_vm13, %v11964_v16, %v5909_v53  ;;  %v5988_v62 = vor.u32 1.1754944e-38, %v5987_v34  ;;  %vm5986_vm11 = vcmp.eq.f32.partialorder %v5985_v19, 8.507059e+37 }
 0xc0a   : > { %8488 = vrcp.f32 %v5795_v59  ;;  %v5995_v51 = vadd.f32 %v8481_v23, %v5994_v22  ;;  %vm5996_vm12 = vweird.f32 %v11956_v42  ;;  %v6042_v43 = vmul.f32 %v5899_v9, %v11724_v24 }
 0xc0b   : > { %v5984_v48 = vsel %vm5983_vm10, %v8479_v21, %v5980_v15  ;;  %vm5998_vm14 = vmor %vm5996_vm12, %vm5997_vm9  ;;  %v6003_v4 = vor.u32 1.1754944e-38, %v6002_v2  ;;  %v6043_v33 = vmul.f32 %v5914_v13, %v11739_v0  ;;  %vm6001_vm13 = vcmp.eq.f32.partialorder %v6000_v40, 8.507059e+37 }
 0xc0c   : > { %v5989_v45 = vsel %vm5986_vm11, %v5988_v62, %v5984_v48  ;;  %v5999_v16 = vsel %vm5998_vm14, %v8481_v23, %v5995_v51  ;;  %v6017_v9 = vand.u32 2147483648, %v5794_v31  ;;  %v6015_v0 = vand.u32 2147483647, %v5794_v31 }
 0xc0d   : > { %v6048_v8 = vmul.f32 %v5989_v45, %v11745_v47  ;;  %v6004_v1 = vsel %vm6001_vm13, %v6003_v4, %v5999_v16  ;;  %v6060_v54 = vpack.c.bf16 %v6043_v33, %v6042_v43  ;;  %v6032_v23 = vand.u32 2147483648, %v5795_v59 }
 0xc0e   : > { %v8487_v53 = vpop.eup %8486  ;;  %v6049_v12 = vmul.f32 %v6004_v1, %v11748_v56  ;;  %v6030_v47 = vand.u32 2147483647, %v5795_v59  ;;  %vm6011_vm1 = vweird.f32 %v5794_v31  ;;  %v6018_v56 = vor.u32 1.1754944e-38, %v6017_v9 }
 0xc0f   : > { %v6007_v21 = vmul.f32 %v8487_v53, %v5794_v31  ;;  %vm6012_vm15 = vweird.f32 %v8487_v53  ;;  %vm6026_vm4 = vweird.f32 %v5795_v59  ;;  %vm6016_vm5 = vcmp.eq.f32.partialorder %v6015_v0, 8.507059e+37 }
 0xc10   : > { %v8489_v29 = vpop.eup %8488  ;;  %v6063_v42 = vpack.c.bf16 %v6049_v12, %v6048_v8  ;;  %vm6013_vm3 = vmor %vm6011_vm1, %vm6012_vm15  ;;  %v6033_v14 = vor.u32 1.1754944e-38, %v6032_v23  ;;  %vm6031_vm7 = vcmp.eq.f32.partialorder %v6030_v47, 8.507059e+37 }
 0xc11   : > { %v6022_v60 = vmul.f32 %v8489_v29, %v5795_v59  ;;  %v6008_v24 = vsub.f32 1.0, %v6007_v21  ;;  %vm6027_vm0 = vweird.f32 %v8489_v29 }
 0xc12   : > { %vm6028_vm6 = vmor %vm6026_vm4, %vm6027_vm0 }
 0xc13   : > { %v6023_v20 = vsub.f32 1.0, %v6022_v60  ;;  %v6009_v46 = vmul.f32 %v8487_v53, %v6008_v24 }
 0xc15   : > { %v6024_v58 = vmul.f32 %v8489_v29, %v6023_v20  ;;  %v6010_v57 = vadd.f32 %v8487_v53, %v6009_v46 }
 0xc16   : > { %7756 = vmatmul.msk.bf16.gmra.mxu0 %vm1369_vm2, %v6060_v54 }
 0xc17   : > { %v6025_v19 = vadd.f32 %v8489_v29, %v6024_v58  ;;  %v6014_v32 = vsel %vm6013_vm3, %v8487_v53, %v6010_v57 }
 0xc18   : > { %v6019_v36 = vsel %vm6016_vm5, %v6018_v56, %v6014_v32 }
 0xc19   : > { %v6029_v63 = vsel %vm6028_vm6, %v8489_v29, %v6025_v19  ;;  %v6050_v11 = vmul.f32 %v6019_v36, %v11920_v17 }
 0xc1a   : > { %v6034_v41 = vsel %vm6031_vm7, %v6033_v14, %v6029_v63 }
 0xc1b   : > { %v6051_v5 = vmul.f32 %v6034_v41, %v11925_v7 }
 0xc1d   : > { %v6064_v34 = vpack.c.bf16 %v6051_v5, %v6050_v11 }
 0xc26   : > { %7757 = vmatmul.msk.bf16.gmra.mxu0 %vm1369_vm2, %v6061_v55 }
 0xc36   : > { %7758 = vmatmul.msk.bf16.gmra.mxu0 %vm1369_vm2, %v6062_v10 }
 0xc46   : > { %7759 = vmatmul.msk.bf16.gmra.mxu0 %vm1369_vm2, %v6063_v42 }
 0xc56   : > { %7760 = vmatmul.msk.bf16.gmra.mxu0 %vm1369_vm2, %v6064_v34 }
 0xc63   : > { %v6110_v17 = vpop.f32.mrf.mxu0 }
 0xc64   : > { %v6153_v7 = vadd.f32 %v12045_v61, %v6110_v17 }
 0xc66   : > { %v12049_v49 = vadd.f32 %v6153_v7, %v10832_v26 }
 0xc68   : > { %v6187_v25 = vsel %vm1369_vm2, %v12049_v49, 0.0 }
 0xc69   : > { %6188 = vadd.xlane.f32.xlu1 %v6187_v25 }
 0xc6b   : > { %v6112_v35 = vpop.f32.mrf.mxu0 }
 0xc6c   : > { %v6154_v55 = vadd.f32 %v12045_v61, %v6112_v35  ;;  %v12921_v35 = vld [vmem:[#allocation25_spill] sm:$0xff] }
 0xc6e   : > { %v12055_v28 = vadd.f32 %v6154_v55, %v10837_v39 }
 0xc70   : > { %v6190_v44 = vsel %vm1369_vm2, %v12055_v28, 0.0 }
 0xc71   : > { %6191 = vadd.xlane.f32.xlu2 %v6190_v44 }
 0xc73   : > { %v6115_v31 = vpop.f32.mrf.mxu0 }
 0xc74   : > { %v6155_v40 = vadd.f32 %v12045_v61, %v6115_v31 }
 0xc76   : > { %v12061_v26 = vadd.f32 %v6155_v40, %v10857_v27 }
 0xc78   : > { %v6193_v2 = vsel %vm1369_vm2, %v12061_v26, 0.0 }
 0xc79   : > { %6194 = vadd.xlane.f32.xlu0 %v6193_v2 }
 0xc7b   : > { %v6117_v59 = vpop.f32.mrf.mxu0 }
 0xc7c   : > { %v6156_v10 = vadd.f32 %v12045_v61, %v6117_v59 }
 0xc7e   : > { %v12067_v39 = vadd.f32 %v6156_v10, %v10850_v3 }
 0xc80   : > { %v6196_v15 = vsel %vm1369_vm2, %v12067_v39, 0.0 }
 0xc81   : > { %6197 = vadd.xlane.f32.xlu2 %v6196_v15 }
 0xc83   : > { %v6120_v22 = vpop.f32.mrf.mxu0 }
 0xc84   : > { %v6157_v13 = vadd.f32 %v12045_v61, %v6120_v22 }
 0xc86   : > { %v12073_v27 = vadd.f32 %v6157_v13, %v10859_v30  ;;  %v12922_v13 = vld [vmem:[#allocation18_spill] sm:$0xff] }
 0xc88   : > { %v6199_v62 = vsel %vm1369_vm2, %v12073_v27, 0.0 }
 0xc89   : > { %6200 = vadd.xlane.f32.xlu1 %v6199_v62 }
 0xc8b   : > { %v6122_v48 = vpop.f32.mrf.mxu0 }
 0xc8c   : > { %v6158_v51 = vadd.f32 %v12045_v61, %v6122_v48 }
 0xc8e   : > { %v12079_v3 = vadd.f32 %v6158_v51, %v10866_v52 }
 0xc90   : > { %v6202_v43 = vsel %vm1369_vm2, %v12079_v3, 0.0 }
 0xc91   : > { %6203 = vadd.xlane.f32.xlu0 %v6202_v43 }
 0xc93   : > { %v6125_v45 = vpop.f32.mrf.mxu0 }
 0xc94   : > { %v6159_v4 = vadd.f32 %v12045_v61, %v6125_v45 }
 0xc96   : > { %v12085_v30 = vadd.f32 %v6159_v4, %v10880_v50 }
 0xc98   : > { %v6205_v33 = vsel %vm1369_vm2, %v12085_v30, 0.0 }
 0xc99   : > { %6206 = vadd.xlane.f32.xlu0 %v6205_v33 }
 0xc9b   : > { %v6127_v16 = vpop.f32.mrf.mxu0 }
 0xc9c   : > { %v6160_v29 = vadd.f32 %v12045_v61, %v6127_v16 }
 0xc9e   : > { %v12099_v60 = vadd.f32 %v6160_v29, %v10911_v37 }
 0xca0   : > { %v6208_v0 = vsel %vm1369_vm2, %v12099_v60, 0.0 }
 0xca3   : > { %v6130_v8 = vpop.f32.mrf.mxu0 }
 0xca4   : > { %v6161_v20 = vadd.f32 %v12045_v61, %v6130_v8 }
 0xca6   : > { %v12112_v37 = vadd.f32 %v6161_v20, %v10937_v18 }
 0xca8   : > { %v6211_v14 = vsel %vm1369_vm2, %v12112_v37, 0.0 }
 0xcab   : > { %v6132_v42 = vpop.f32.mrf.mxu0 }
 0xcac   : > { %v6162_v19 = vadd.f32 %v12045_v61, %v6132_v42  ;;  %v12924_v42 = vld [vmem:[#allocation33_spill] sm:$0xff] }
 0xcae   : > { %v12125_v63 = vadd.f32 %v6162_v19, %v10952_v6 }
 0xcb0   : > { %v6214_v7 = vsel %vm1369_vm2, %v12125_v63, 0.0 }
 0xcb3   : > { %v6135_v57 = vpop.f32.mrf.mxu0 }
 0xcb4   : > { %v6163_v34 = vadd.f32 %v12045_v61, %v6135_v57 }
 0xcb6   : > { %v12138_v55 = vadd.f32 %v6163_v34, %v12921_v35 }
 0xcb8   : > { %v6217_v59 = vsel %vm1369_vm2, %v12138_v55, 0.0 }
 0xcbb   : > { %v6137_v5 = vpop.f32.mrf.mxu0 }
 0xcbc   : > { %v6164_v40 = vadd.f32 %v12045_v61, %v6137_v5 }
 0xcbe   : > { %v12151_v62 = vadd.f32 %v6164_v40, %v12922_v13 }
 0xcc0   : > { %v6220_v4 = vsel %vm1369_vm2, %v12151_v62, 0.0 }
 0xcc3   : > { %v6140_v10 = vpop.f32.mrf.mxu0 }
 0xcc4   : > { %v6165_v43 = vadd.f32 %v12045_v61, %v6140_v10 }
 0xccb   : > { %v6142_v8 = vpop.f32.mrf.mxu0 }
 0xcd3   : > { %v6145_v20 = vpop.f32.mrf.mxu0 }
 0xcdc   : > { %v6189_v1 = vpop.xlane.xlu1 %6188 }
 0xcdd   : > { %v6235_v52 = vmul.f32 %v6189_v1, %v12881_v38  ;;  %v12923_v1 = vld [vmem:[#allocation17_spill] sm:$0xff] }
 0xcdf   : > { %v12091_v53 = vsub.f32 %v12049_v49, %v6235_v52  ;;  %v12164_v52 = vadd.f32 %v6165_v43, %v12923_v1 }
 0xce1   : > { %v6267_v12 = vmul.f32 %v12091_v53, %v12091_v53 }
 0xce3   : > { %v6283_v50 = vsel %vm1369_vm2, %v6267_v12, 0.0 }
 0xce4   : > { %v6192_v21 = vpop.xlane.xlu2 %6191  ;;  %6284 = vadd.xlane.f32.xlu2 %v6283_v50  ;;  %v6166_v50 = vadd.f32 %v12045_v61, %v6142_v8 }
 0xce5   : > { %v6236_v54 = vmul.f32 %v6192_v21, %v12881_v38 }
 0xce7   : > { %v12102_v24 = vsub.f32 %v12055_v28, %v6236_v54  ;;  %v6223_v54 = vsel %vm1369_vm2, %v12164_v52, 0.0 }
 0xce9   : > { %v6268_v9 = vmul.f32 %v12102_v24, %v12102_v24 }
 0xceb   : > { %v6286_v46 = vsel %vm1369_vm2, %v6268_v9, 0.0  ;;  %v12176_v9 = vadd.f32 %v6166_v50, %v12924_v42 }
 0xcec   : > { %v6195_v23 = vpop.xlane.xlu0 %6194  ;;  %6287 = vadd.xlane.f32.xlu1 %v6286_v46  ;;  %6209 = vadd.xlane.f32.xlu2 %v6208_v0  ;;  %v6167_v46 = vadd.f32 %v12045_v61, %v6145_v20 }
 0xced   : > { %v6237_v58 = vmul.f32 %v6195_v23, %v12881_v38  ;;  %v6226_v0 = vsel %vm1369_vm2, %v12176_v9, 0.0  ;;  %v12925_v23 = vld [vmem:[#allocation26_spill] sm:$0xff] }
 0xcef   : > { %v12115_v47 = vsub.f32 %v12061_v26, %v6237_v58  ;;  %v12182_v58 = vadd.f32 %v6167_v46, %v12925_v23 }
 0xcf1   : > { %v6269_v56 = vmul.f32 %v12115_v47, %v12115_v47  ;;  %v6229_v57 = vsel %vm1369_vm2, %v12182_v58, 0.0 }
 0xcf3   : > { %v6289_v32 = vsel %vm1369_vm2, %v6269_v56, 0.0 }
 0xcf4   : > { %v6198_v36 = vpop.xlane.xlu2 %6197  ;;  %6290 = vadd.xlane.f32.xlu1 %v6289_v32  ;;  %6212 = vadd.xlane.f32.xlu2 %v6211_v14 }
 0xcf5   : > { %v6238_v18 = vmul.f32 %v6198_v36, %v12881_v38 }
 0xcf7   : > { %v12128_v41 = vsub.f32 %v12067_v39, %v6238_v18 }
 0xcf9   : > { %v6270_v11 = vmul.f32 %v12128_v41, %v12128_v41 }
 0xcfb   : > { %v6292_v17 = vsel %vm1369_vm2, %v6270_v11, 0.0 }
 0xcfc   : > { %v6201_v25 = vpop.xlane.xlu1 %6200  ;;  %6293 = vadd.xlane.f32.xlu0 %v6292_v17  ;;  %6215 = vadd.xlane.f32.xlu1 %v6214_v7 }
 0xcfd   : > { %v6239_v6 = vmul.f32 %v6201_v25, %v12881_v38 }
 0xcff   : > { %v12141_v44 = vsub.f32 %v12073_v27, %v6239_v6 }
 0xd01   : > { %v6271_v31 = vmul.f32 %v12141_v44, %v12141_v44 }
 0xd03   : > { %v6295_v2 = vsel %vm1369_vm2, %v6271_v31, 0.0  ;;  %v7852_v31 = vld [vmem:[%s8941_s27 + $0x8] sm:$0xff] }
 0xd04   : > { %v6204_v15 = vpop.xlane.xlu0 %6203  ;;  %6296 = vadd.xlane.f32.xlu0 %v6295_v2  ;;  %6218 = vadd.xlane.f32.xlu1 %v6217_v59 }
 0xd05   : > { %v6240_v22 = vmul.f32 %v6204_v15, %v12881_v38  ;;  %6632 = vmatpush.bf16.msrb.mxu3 %v7852_v31 }
 0xd07   : > { %v12154_v48 = vsub.f32 %v12079_v3, %v6240_v22 }
 0xd09   : > { %v6272_v51 = vmul.f32 %v12154_v48, %v12154_v48 }
 0xd0b   : > { %v6298_v45 = vsel %vm1369_vm2, %v6272_v51, 0.0 }
 0xd0c   : > { %v6207_v33 = vpop.xlane.xlu0 %6206  ;;  %6299 = vadd.xlane.f32.xlu2 %v6298_v45  ;;  %6221 = vadd.xlane.f32.xlu0 %v6220_v4  ;;  %v6147_v45 = vpop.f32.mrf.mxu0 }
 0xd0d   : > { %v6241_v16 = vmul.f32 %v6207_v33, %v12881_v38  ;;  %v6168_v1 = vadd.f32 %v12045_v61, %v6147_v45 }
 0xd0f   : > { %v12167_v12 = vsub.f32 %v12085_v30, %v6241_v16 }
 0xd11   : > { %v6273_v29 = vmul.f32 %v12167_v12, %v12167_v12 }
 0xd13   : > { %v6301_v21 = vsel %vm1369_vm2, %v6273_v29, 0.0 }
 0xd14   : > { %6302 = vadd.xlane.f32.xlu2 %v6301_v21  ;;  %6224 = vadd.xlane.f32.xlu0 %v6223_v54  ;;  %v7851_v21 = vld [vmem:[%s8941_s27] sm:$0xff] }
 0xd15   : > { %6633 = vmatpush.bf16.msrb.mxu3 %v7851_v21 }
 0xd1c   : > { %6227 = vadd.xlane.f32.xlu2 %v6226_v0 }
 0xd24   : > { %6230 = vadd.xlane.f32.xlu2 %v6229_v57 }
 0xd57   : > { %v6285_v56 = vpop.xlane.xlu2 %6284 }
 0xd58   : > { %v6331_v19 = vmul.f32 %v6285_v56, %v12881_v38  ;;  %v12928_v56 = vld [vmem:[#allocation19_spill] sm:$0xff] }
 0xd5a   : > { %v6347_v32 = vadd.f32 1e-05, %v6331_v19  ;;  %v12218_v19 = vadd.f32 %v6168_v1, %v12928_v56 }
 0xd5c   : > { %8490 = vrsqrt.f32 %v6347_v32  ;;  %vm6369_vm10 = vweird.f32 %v6347_v32 }
 0xd5f   : > { %v6288_v14 = vpop.xlane.xlu1 %6287  ;;  %v6210_v36 = vpop.xlane.xlu2 %6209 }
 0xd60   : > { %v6332_v18 = vmul.f32 %v6288_v14, %v12881_v38  ;;  %v6242_v11 = vmul.f32 %v6210_v36, %v12881_v38 }
 0xd62   : > { %v8491_v5 = vpop.eup %8490  ;;  %v6348_v34 = vadd.f32 1e-05, %v6332_v18  ;;  %v12190_v17 = vsub.f32 %v12099_v60, %v6242_v11 }
 0xd63   : > { %v6364_v7 = vmul.f32 %v8491_v5, %v6347_v32  ;;  %vm6370_vm9 = vweird.f32 %v8491_v5  ;;  %v12225_v32 = vld [vmem:[%s12930_s4] ss:$0 sm:$0xff] }
 0xd64   : > { %8492 = vrsqrt.f32 %v6348_v34  ;;  %v6274_v25 = vmul.f32 %v12190_v17, %v12190_v17  ;;  %vm12207_vm11 = vmor %vm6369_vm10, %vm6370_vm9  ;;  %vm6379_vm14 = vweird.f32 %v6348_v34 }
 0xd65   : > { %v6365_v6 = vmul.f32 %v8491_v5, %v6364_v7 }
 0xd66   : > { %v6304_v35 = vsel %vm1369_vm2, %v6274_v25, 0.0 }
 0xd67   : > { %v6366_v40 = vmul.f32 0.5, %v6365_v6  ;;  %v6291_v2 = vpop.xlane.xlu1 %6290  ;;  %v6213_v59 = vpop.xlane.xlu2 %6212  ;;  %6305 = vadd.xlane.f32.xlu1 %v6304_v35 }
 0xd68   : > { %v6333_v10 = vmul.f32 %v6291_v2, %v12881_v38  ;;  %v6243_v15 = vmul.f32 %v6213_v59, %v12881_v38 }
 0xd69   : > { %v6367_v22 = vsub.f32 1.5, %v6366_v40  ;;  %v6232_v40 = vsel %vm1369_vm2, %v12218_v19, 0.0 }
 0xd6a   : > { %v8493_v13 = vpop.eup %8492  ;;  %v12198_v51 = vadd.f32 1e-05, %v6333_v10  ;;  %v12201_v43 = vsub.f32 %v12112_v37, %v6243_v15 }
 0xd6b   : > { %v6368_v4 = vmul.f32 %v8491_v5, %v6367_v22  ;;  %v6374_v33 = vmul.f32 %v8493_v13, %v6348_v34  ;;  %vm6380_vm12 = vweird.f32 %v8493_v13 }
 0xd6c   : > { %8494 = vrsqrt.f32 %v12198_v51  ;;  %v6275_v16 = vmul.f32 %v12201_v43, %v12201_v43  ;;  %vm6381_vm13 = vmor %vm6379_vm14, %vm6380_vm12  ;;  %vm6389_vm0 = vweird.f32 %v12198_v51 }
 0xd6d   : > { %v6375_v8 = vmul.f32 %v8493_v13, %v6374_v33  ;;  %v6372_v54 = vsel %vm12207_vm11, %v8491_v5, %v6368_v4 }
 0xd6e   : > { %v6307_v50 = vsel %vm1369_vm2, %v6275_v16, 0.0  ;;  %v6523_v14 = vmul.f32 %v6372_v54, %v12091_v53  ;;  %v12239_v53 = vld [vmem:[%s12931_s11] ss:$0 sm:$0xff] }
 0xd6f   : > { %v6376_v42 = vmul.f32 0.5, %v6375_v8  ;;  %v6294_v20 = vpop.xlane.xlu0 %6293  ;;  %v6216_v46 = vpop.xlane.xlu1 %6215  ;;  %6308 = vadd.xlane.f32.xlu1 %v6307_v50 }
 0xd70   : > { %v6334_v0 = vmul.f32 %v6294_v20, %v12881_v38  ;;  %v6244_v23 = vmul.f32 %v6216_v46, %v12881_v38  ;;  %v6542_v35 = vmul.f32 %v12225_v32, %v6523_v14 }
 0xd71   : > { %v6377_v61 = vsub.f32 1.5, %v6376_v42 }
 0xd72   : > { %v8495_v57 = vpop.eup %8494  ;;  %v6350_v36 = vadd.f32 1e-05, %v6334_v0  ;;  %v12229_v18 = vsub.f32 %v12125_v63, %v6244_v23 }
 0xd73   : > { %v6378_v11 = vmul.f32 %v8493_v13, %v6377_v61  ;;  %v6384_v5 = vmul.f32 %v8495_v57, %v12198_v51  ;;  %vm6390_vm15 = vweird.f32 %v8495_v57 }
 0xd74   : > { %8496 = vrsqrt.f32 %v6350_v36  ;;  %v6276_v7 = vmul.f32 %v12229_v18, %v12229_v18  ;;  %vm6391_vm1 = vmor %vm6389_vm0, %vm6390_vm15  ;;  %vm6399_vm4 = vweird.f32 %v6350_v36 }
 0xd75   : > { %v6382_v25 = vsel %vm6381_vm13, %v8493_v13, %v6378_v11  ;;  %v6385_v6 = vmul.f32 %v8495_v57, %v6384_v5 }
 0xd76   : > { %v6524_v31 = vmul.f32 %v6382_v25, %v12102_v24  ;;  %v6310_v34 = vsel %vm1369_vm2, %v6276_v7, 0.0  ;;  %v6561_v24 = vadd.f32 %v12239_v53, %v6542_v35 }
 0xd77   : > { %v6386_v2 = vmul.f32 0.5, %v6385_v6  ;;  %v6297_v59 = vpop.xlane.xlu0 %6296  ;;  %v6219_v10 = vpop.xlane.xlu1 %6218  ;;  %6311 = vadd.xlane.f32.xlu0 %v6310_v34  ;;  %6233 = vadd.xlane.f32.xlu1 %v6232_v40 }
 0xd78   : > { %v6543_v15 = vmul.f32 %v12225_v32, %v6524_v31  ;;  %v6335_v22 = vmul.f32 %v6297_v59, %v12881_v38  ;;  %v6245_v13 = vmul.f32 %v6219_v10, %v12881_v38 }
 0xd79   : > { %v6387_v45 = vsub.f32 1.5, %v6386_v2 }
 0xd7a   : > { %v8497_v4 = vpop.eup %8496  ;;  %v6562_v33 = vadd.f32 %v12239_v53, %v6543_v15  ;;  %v6351_v16 = vadd.f32 1e-05, %v6335_v22  ;;  %v12252_v8 = vsub.f32 %v12138_v55, %v6245_v13 }
 0xd7b   : > { %v6388_v1 = vmul.f32 %v8495_v57, %v6387_v45  ;;  %v6394_v29 = vmul.f32 %v8497_v4, %v6350_v36  ;;  %vm6400_vm3 = vweird.f32 %v8497_v4 }
 0xd7c   : > { %v6582_v50 = vpack.c.bf16 %v6562_v33, %v6561_v24  ;;  %8498 = vrsqrt.f32 %v6351_v16  ;;  %v6277_v21 = vmul.f32 %v12252_v8, %v12252_v8  ;;  %vm6401_vm5 = vmor %vm6399_vm4, %vm6400_vm3  ;;  %vm6409_vm7 = vweird.f32 %v6351_v16 }
 0xd7d   : > { %v6395_v54 = vmul.f32 %v8497_v4, %v6394_v29  ;;  %v6392_v20 = vsel %vm6391_vm1, %v8495_v57, %v6388_v1 }
 0xd7e   : > { %7769 = vmatmul.msk.bf16.vlgmr.msrb.gmra.mxu3 %vm1369_vm2, %v6582_v50  ;;  %v6313_v42 = vsel %vm1369_vm2, %v6277_v21, 0.0  ;;  %v6525_v51 = vmul.f32 %v6392_v20, %v12115_v47 }
 0xd7f   : > { %v6396_v46 = vmul.f32 0.5, %v6395_v54  ;;  %v6300_v0 = vpop.xlane.xlu2 %6299  ;;  %v6222_v23 = vpop.xlane.xlu0 %6221  ;;  %6314 = vadd.xlane.f32.xlu0 %v6313_v42 }
 0xd80   : > { %v6336_v61 = vmul.f32 %v6300_v0, %v12881_v38  ;;  %v6246_v56 = vmul.f32 %v6222_v23, %v12881_v38  ;;  %v6544_v47 = vmul.f32 %v12225_v32, %v6525_v51 }
 0xd81   : > { %v6397_v14 = vsub.f32 1.5, %v6396_v46 }
 0xd82   : > { %v8499_v11 = vpop.eup %8498  ;;  %v6352_v5 = vadd.f32 1e-05, %v6336_v61  ;;  %v12263_v7 = vsub.f32 %v12151_v62, %v6246_v56 }
 0xd83   : > { %v6398_v25 = vmul.f32 %v8497_v4, %v6397_v14  ;;  %v6404_v57 = vmul.f32 %v8499_v11, %v6351_v16  ;;  %vm6410_vm6 = vweird.f32 %v8499_v11 }
 0xd84   : > { %8500 = vrsqrt.f32 %v6352_v5  ;;  %v6278_v6 = vmul.f32 %v12263_v7, %v12263_v7  ;;  %vm6411_vm9 = vmor %vm6409_vm7, %vm6410_vm6  ;;  %vm6419_vm11 = vweird.f32 %v6352_v5 }
 0xd85   : > { %v6402_v35 = vsel %vm6401_vm5, %v8497_v4, %v6398_v25  ;;  %v6405_v31 = vmul.f32 %v8499_v11, %v6404_v57  ;;  %v6563_v4 = vadd.f32 %v12239_v53, %v6544_v47 }
 0xd86   : > { %v6526_v34 = vmul.f32 %v6402_v35, %v12128_v41  ;;  %v6316_v40 = vsel %vm1369_vm2, %v6278_v6, 0.0 }
 0xd87   : > { %v6406_v2 = vmul.f32 0.5, %v6405_v31  ;;  %v6303_v59 = vpop.xlane.xlu2 %6302  ;;  %v6225_v10 = vpop.xlane.xlu0 %6224  ;;  %6317 = vadd.xlane.f32.xlu2 %v6316_v40 }
 0xd88   : > { %v6247_v36 = vmul.f32 %v6225_v10, %v12881_v38  ;;  %v6545_v15 = vmul.f32 %v12225_v32, %v6526_v34  ;;  %v6337_v47 = vmul.f32 %v6303_v59, %v12881_v38 }
 0xd89   : > { %v6407_v22 = vsub.f32 1.5, %v6406_v2 }
 0xd8a   : > { %v8501_v13 = vpop.eup %8500  ;;  %v12273_v45 = vsub.f32 %v12164_v52, %v6247_v36  ;;  %v6564_v41 = vadd.f32 %v12239_v53, %v6545_v15  ;;  %v6353_v2 = vadd.f32 1e-05, %v6337_v47 }
 0xd8b   : > { %v6408_v24 = vmul.f32 %v8499_v11, %v6407_v22  ;;  %v6414_v33 = vmul.f32 %v8501_v13, %v6352_v5  ;;  %vm6420_vm10 = vweird.f32 %v8501_v13 }
 0xd8c   : > { %v6583_v1 = vpack.c.bf16 %v6564_v41, %v6563_v4  ;;  %v6279_v29 = vmul.f32 %v12273_v45, %v12273_v45  ;;  %vm6421_vm12 = vmor %vm6419_vm11, %vm6420_vm10  ;;  %8502 = vrsqrt.f32 %v6353_v2  ;;  %vm6429_vm13 = vweird.f32 %v6353_v2 }
 0xd8d   : > { %v6415_v50 = vmul.f32 %v8501_v13, %v6414_v33  ;;  %v6412_v54 = vsel %vm6411_vm9, %v8499_v11, %v6408_v24 }
 0xd8e   : > { %7770 = vmatmul.msk.bf16.gmra.mxu3 %vm1369_vm2, %v6583_v1  ;;  %v6319_v21 = vsel %vm1369_vm2, %v6279_v29, 0.0  ;;  %v6527_v23 = vmul.f32 %v6412_v54, %v12141_v44 }
 0xd8f   : > { %v6416_v42 = vmul.f32 0.5, %v6415_v50  ;;  %v6228_v20 = vpop.xlane.xlu2 %6227  ;;  %6320 = vadd.xlane.f32.xlu1 %v6319_v21 }
 0xd90   : > { %v6248_v46 = vmul.f32 %v6228_v20, %v12881_v38  ;;  %v6546_v25 = vmul.f32 %v12225_v32, %v6527_v23 }
 0xd91   : > { %v6417_v0 = vsub.f32 1.5, %v6416_v42 }
 0xd92   : > { %v12284_v61 = vsub.f32 %v12176_v9, %v6248_v46  ;;  %v6565_v5 = vadd.f32 %v12239_v53, %v6546_v25  ;;  %v8503_v10 = vpop.eup %8502 }
 0xd93   : > { %v6418_v16 = vmul.f32 %v8501_v13, %v6417_v0  ;;  %v6424_v36 = vmul.f32 %v8503_v10, %v6353_v2  ;;  %vm6430_vm14 = vweird.f32 %v8503_v10 }
 0xd94   : > { %v6280_v56 = vmul.f32 %v12284_v61, %v12284_v61  ;;  %vm6431_vm15 = vmor %vm6429_vm13, %vm6430_vm14 }
 0xd95   : > { %v6422_v14 = vsel %vm6421_vm12, %v8501_v13, %v6418_v16  ;;  %v6425_v15 = vmul.f32 %v8503_v10, %v6424_v36 }
 0xd96   : > { %v6528_v11 = vmul.f32 %v6422_v14, %v12154_v48  ;;  %v6322_v51 = vsel %vm1369_vm2, %v6280_v56, 0.0 }
 0xd97   : > { %6323 = vadd.xlane.f32.xlu0 %v6322_v51  ;;  %v6231_v57 = vpop.xlane.xlu2 %6230  ;;  %v6426_v41 = vmul.f32 0.5, %v6425_v15 }
 0xd98   : > { %v6249_v44 = vmul.f32 %v6231_v57, %v12881_v38  ;;  %v6547_v6 = vmul.f32 %v12225_v32, %v6528_v11 }
 0xd99   : > { %v6427_v24 = vsub.f32 1.5, %v6426_v41 }
 0xd9a   : > { %v12294_v35 = vsub.f32 %v12182_v58, %v6249_v44  ;;  %v6566_v31 = vadd.f32 %v12239_v53, %v6547_v6 }
 0xd9b   : > { %v6428_v21 = vmul.f32 %v8503_v10, %v6427_v24 }
 0xd9c   : > { %v6584_v34 = vpack.c.bf16 %v6566_v31, %v6565_v5  ;;  %v6281_v48 = vmul.f32 %v12294_v35, %v12294_v35 }
 0xd9d   : > { %v6432_v42 = vsel %vm6431_vm15, %v8503_v10, %v6428_v21 }
 0xd9e   : > { %7771 = vmatmul.msk.bf16.gmra.mxu3 %vm1369_vm2, %v6584_v34  ;;  %v6325_v40 = vsel %vm1369_vm2, %v6281_v48, 0.0  ;;  %v6529_v11 = vmul.f32 %v6432_v42, %v12167_v12  ;;  %v12334_v42 = vld [vmem:[%s12932_s12] ss:$0 sm:$0xff] }
 0xd9f   : > { %6326 = vadd.xlane.f32.xlu2 %v6325_v40 }
 0xda0   : > { %v6548_v48 = vmul.f32 %v12225_v32, %v6529_v11 }
 0xda2   : > { %v6567_v15 = vadd.f32 %v12239_v53, %v6548_v48 }
 0xdda   : > { %v6306_v22 = vpop.xlane.xlu1 %6305 }
 0xddb   : > { %v6338_v13 = vmul.f32 %v6306_v22, %v12881_v38 }
 0xddd   : > { %v6354_v4 = vadd.f32 1e-05, %v6338_v13 }
 0xddf   : > { %8504 = vrsqrt.f32 %v6354_v4  ;;  %vm6439_vm1 = vweird.f32 %v6354_v4 }
 0xde2   : > { %v6309_v33 = vpop.xlane.xlu1 %6308 }
 0xde3   : > { %v6339_v1 = vmul.f32 %v6309_v33, %v12881_v38 }
 0xde5   : > { %v8505_v29 = vpop.eup %8504  ;;  %v6355_v50 = vadd.f32 1e-05, %v6339_v1 }
 0xde6   : > { %v6434_v59 = vmul.f32 %v8505_v29, %v6354_v4  ;;  %vm6440_vm0 = vweird.f32 %v8505_v29 }
 0xde7   : > { %8506 = vrsqrt.f32 %v6355_v50  ;;  %vm6441_vm3 = vmor %vm6439_vm1, %vm6440_vm0  ;;  %vm6449_vm6 = vweird.f32 %v6355_v50 }
 0xde8   : > { %v6435_v54 = vmul.f32 %v8505_v29, %v6434_v59 }
 0xdea   : > { %v6436_v20 = vmul.f32 0.5, %v6435_v54  ;;  %v6312_v46 = vpop.xlane.xlu0 %6311  ;;  %v6234_v0 = vpop.xlane.xlu1 %6233 }
 0xdeb   : > { %v6340_v23 = vmul.f32 %v6312_v46, %v12881_v38  ;;  %v6250_v16 = vmul.f32 %v6234_v0, %v12881_v38 }
 0xdec   : > { %v6437_v56 = vsub.f32 1.5, %v6436_v20 }
 0xded   : > { %v8507_v14 = vpop.eup %8506  ;;  %v6356_v51 = vadd.f32 1e-05, %v6340_v23  ;;  %v12309_v25 = vsub.f32 %v12218_v19, %v6250_v16 }
 0xdee   : > { %v6438_v57 = vmul.f32 %v8505_v29, %v6437_v56  ;;  %v6444_v44 = vmul.f32 %v8507_v14, %v6355_v50  ;;  %vm6450_vm4 = vweird.f32 %v8507_v14 }
 0xdef   : > { %8508 = vrsqrt.f32 %v6356_v51  ;;  %v6282_v6 = vmul.f32 %v12309_v25, %v12309_v25  ;;  %vm6451_vm7 = vmor %vm6449_vm6, %vm6450_vm4  ;;  %vm6459_vm9 = vweird.f32 %v6356_v51 }
 0xdf0   : > { %v6442_v5 = vsel %vm6441_vm3, %v8505_v29, %v6438_v57  ;;  %v6445_v40 = vmul.f32 %v8507_v14, %v6444_v44 }
 0xdf1   : > { %v6530_v31 = vmul.f32 %v6442_v5, %v12190_v17  ;;  %v6328_v34 = vsel %vm1369_vm2, %v6282_v6, 0.0 }
 0xdf2   : > { %v6315_v12 = vpop.xlane.xlu0 %6314  ;;  %6329 = vadd.xlane.f32.xlu1 %v6328_v34  ;;  %v6446_v13 = vmul.f32 0.5, %v6445_v40 }
 0xdf3   : > { %v6341_v47 = vmul.f32 %v6315_v12, %v12881_v38  ;;  %v6549_v2 = vmul.f32 %v12225_v32, %v6530_v31 }
 0xdf4   : > { %v6447_v1 = vsub.f32 1.5, %v6446_v13 }
 0xdf5   : > { %v8509_v10 = vpop.eup %8508  ;;  %v12318_v36 = vadd.f32 1e-05, %v6341_v47  ;;  %v6568_v22 = vadd.f32 %v12239_v53, %v6549_v2 }
 0xdf6   : > { %v6454_v17 = vmul.f32 %v8509_v10, %v6356_v51  ;;  %v6448_v20 = vmul.f32 %v8507_v14, %v6447_v1  ;;  %vm6460_vm5 = vweird.f32 %v8509_v10 }
 0xdf7   : > { %v6585_v4 = vpack.c.bf16 %v6568_v22, %v6567_v15  ;;  %8510 = vrsqrt.f32 %v12318_v36  ;;  %vm6461_vm10 = vmor %vm6459_vm9, %vm6460_vm5  ;;  %vm6469_vm13 = vweird.f32 %v12318_v36 }
 0xdf8   : > { %v6455_v41 = vmul.f32 %v8509_v10, %v6454_v17  ;;  %v6452_v11 = vsel %vm6451_vm7, %v8507_v14, %v6448_v20 }
 0xdf9   : > { %7772 = vmatmul.msk.bf16.gmra.mxu3 %vm1369_vm2, %v6585_v4  ;;  %v6531_v31 = vmul.f32 %v6452_v11, %v12201_v43  ;;  %v7860_v43 = vld [vmem:[%s8955_s20 + $0x38] sm:$0xff] }
 0xdfa   : > { %v6456_v24 = vmul.f32 0.5, %v6455_v41  ;;  %v6318_v33 = vpop.xlane.xlu2 %6317  ;;  %7087 = vmatpush.bf16.msra.mxu1 %v7860_v43 }
 0xdfb   : > { %v6342_v29 = vmul.f32 %v6318_v33, %v12881_v38 }
 0xdfc   : > { %v6457_v21 = vsub.f32 1.5, %v6456_v24 }
 0xdfd   : > { %v12325_v59 = vadd.f32 1e-05, %v6342_v29  ;;  %v12327_v54 = vpop.eup %8510 }
 0xdfe   : > { %v6458_v46 = vmul.f32 %v8509_v10, %v6457_v21  ;;  %v6464_v0 = vmul.f32 %v12327_v54, %v12318_v36  ;;  %vm6470_vm12 = vweird.f32 %v12327_v54 }
 0xdff   : > { %8512 = vrsqrt.f32 %v12325_v59  ;;  %vm6479_vm14 = vweird.f32 %v12325_v59  ;;  %vm6471_vm0 = vmor %vm6469_vm13, %vm6470_vm12 }
 0xe00   : > { %v6462_v57 = vsel %vm6461_vm10, %v8509_v10, %v6458_v46  ;;  %v6465_v50 = vmul.f32 %v12327_v54, %v6464_v0  ;;  %v6550_v10 = vmul.f32 %v12225_v32, %v6531_v31 }
 0xe01   : > { %v6635_v23 = vpop.f32.mrf.mxu3  ;;  %v6532_v34 = vmul.f32 %v6462_v57, %v12229_v18 }
 0xe02   : > { %v12340_v16 = vadd.f32 %v12334_v42, %v6635_v23  ;;  %v6321_v56 = vpop.xlane.xlu1 %6320  ;;  %v6466_v12 = vmul.f32 0.5, %v6465_v50  ;;  %v6569_v21 = vadd.f32 %v12239_v53, %v6550_v10  ;;  %v7859_v23 = vld [vmem:[%s8955_s20 + $0x30] sm:$0xff] }
 0xe03   : > { %v6343_v44 = vmul.f32 %v6321_v56, %v12881_v38  ;;  %v6551_v15 = vmul.f32 %v12225_v32, %v6532_v34  ;;  %7088 = vmatpush.bf16.msra.mxu1 %v7859_v23 }
 0xe04   : > { %v7777_v6 = vmul.f32 -1.442695, %v12340_v16  ;;  %v6467_v33 = vsub.f32 1.5, %v6466_v12 }
 0xe05   : > { %v8513_v5 = vpop.eup %8512  ;;  %v12345_v51 = vadd.f32 1e-05, %v6343_v44  ;;  %v6570_v41 = vadd.f32 %v12239_v53, %v6551_v15  ;;  %v7858_v44 = vld [vmem:[%s8955_s20 + $0x28] sm:$0xff] }
 0xe06   : > { %v6474_v48 = vmul.f32 %v8513_v5, %v12325_v59  ;;  %8514 = vpow2.f32 %v7777_v6  ;;  %vm6480_vm11 = vweird.f32 %v8513_v5  ;;  %v6468_v56 = vmul.f32 %v12327_v54, %v6467_v33 }
 0xe07   : > { %8516 = vrsqrt.f32 %v12345_v51  ;;  %v6586_v0 = vpack.c.bf16 %v6570_v41, %v6569_v21  ;;  %vm6481_vm15 = vmor %vm6479_vm14, %vm6480_vm11  ;;  %7089 = vmatpush.bf16.msra.mxu1 %v7858_v44  ;;  %vm6489_vm1 = vweird.f32 %v12345_v51 }
 0xe08   : > { %v6475_v14 = vmul.f32 %v8513_v5, %v6474_v48  ;;  %v6472_v59 = vsel %vm6471_vm0, %v12327_v54, %v6468_v56 }
 0xe09   : > { %v6637_v40 = vpop.f32.mrf.mxu3  ;;  %7773 = vmatmul.msk.bf16.gmra.mxu3 %vm1369_vm2, %v6586_v0  ;;  %v7856_v0 = vld [vmem:[%s8955_s20 + $0x18] sm:$0xff] }
 0xe0a   : > { %v6476_v47 = vmul.f32 0.5, %v6475_v14  ;;  %v12352_v2 = vadd.f32 %v12334_v42, %v6637_v40  ;;  %v6324_v22 = vpop.xlane.xlu0 %6323 }
 0xe0b   : > { %v6344_v18 = vmul.f32 %v6324_v22, %v12881_v38 }
 0xe0c   : > { %v8515_v17 = vpop.eup %8514  ;;  %v6477_v13 = vsub.f32 1.5, %v6476_v47  ;;  %v7778_v4 = vmul.f32 -1.442695, %v12352_v2 }
 0xe0d   : > { %v12360_v24 = vpop.eup %8516  ;;  %v12362_v1 = vadd.f32 1.0, %v8515_v17  ;;  %v12364_v29 = vadd.f32 1e-05, %v6344_v18  ;;  %v7857_v17 = vld [vmem:[%s8955_s20 + $0x20] sm:$0xff] }
 0xe0e   : > { %8518 = vpow2.f32 %v7778_v4  ;;  %v6484_v20 = vmul.f32 %v12360_v24, %v12345_v51  ;;  %v6478_v46 = vmul.f32 %v8513_v5, %v6477_v13  ;;  %vm6490_vm3 = vweird.f32 %v12360_v24  ;;  %7090 = vmatpush.bf16.msra.mxu1 %v7857_v17 }
 0xe0f   : > { %8520 = vrcp.f32 %v12362_v1  ;;  %vm6763_vm4 = vweird.f32 %v12362_v1  ;;  %v6767_v21 = vand.u32 2147483647, %v12362_v1  ;;  %vm6499_vm7 = vweird.f32 %v12364_v29  ;;  %vm12435_vm10 = vmor %vm6489_vm1, %vm6490_vm3 }
 0xe10   : > { %8522 = vrsqrt.f32 %v12364_v29  ;;  %v6485_v6 = vmul.f32 %v12360_v24, %v6484_v20  ;;  %v6482_v31 = vsel %vm6481_vm15, %v8513_v5, %v6478_v46  ;;  %v6533_v5 = vmul.f32 %v6472_v59, %v12252_v8 }
 0xe11   : > { %v6640_v11 = vpop.f32.mrf.mxu3  ;;  %v6534_v40 = vmul.f32 %v6482_v31, %v12263_v7  ;;  %v6769_v59 = vand.u32 2147483648, %v12362_v1  ;;  %vm12459_vm14 = vcmp.eq.f32.partialorder %v6767_v21, 8.507059e+37 }
 0xe12   : > { %v12377_v57 = vadd.f32 %v12334_v42, %v6640_v11  ;;  %v6486_v47 = vmul.f32 0.5, %v6485_v6  ;;  %v6552_v41 = vmul.f32 %v12225_v32, %v6533_v5  ;;  %7091 = vmatpush.bf16.msra.mxu1 %v7856_v0  ;;  %v7855_v5 = vld [vmem:[%s8955_s20 + $0x10] sm:$0xff] }
 0xe13   : > { %v6553_v7 = vmul.f32 %v12225_v32, %v6534_v40 }
 0xe14   : > { %v8519_v50 = vpop.eup %8518  ;;  %v7779_v34 = vmul.f32 -1.442695, %v12377_v57  ;;  %v6487_v18 = vsub.f32 1.5, %v6486_v47 }
 0xe15   : > { %v12383_v48 = vpop.eup %8520  ;;  %v12386_v14 = vadd.f32 1.0, %v8519_v50  ;;  %v6572_v11 = vadd.f32 %v12239_v53, %v6553_v7 }
 0xe16   : > { %v12388_v12 = vpop.eup %8522  ;;  %v6759_v36 = vmul.f32 %v12383_v48, %v12362_v1  ;;  %8524 = vpow2.f32 %v7779_v34  ;;  %vm6764_vm6 = vweird.f32 %v12383_v48  ;;  %v6488_v44 = vmul.f32 %v12360_v24, %v6487_v18  ;;  %7092 = vmatpush.bf16.msra.mxu1 %v7855_v5 }
 0xe17   : > { %8526 = vrcp.f32 %v12386_v14  ;;  %v6494_v54 = vmul.f32 %v12388_v12, %v12364_v29  ;;  %vm6500_vm5 = vweird.f32 %v12388_v12  ;;  %v6571_v34 = vadd.f32 %v12239_v53, %v6552_v41  ;;  %vm12446_vm12 = vmor %vm6763_vm4, %vm6764_vm6 }
 0xe18   : > { %v6760_v10 = vsub.f32 1.0, %v6759_v36  ;;  %v6782_v36 = vand.u32 2147483647, %v12386_v14  ;;  %v6784_v40 = vand.u32 2147483648, %v12386_v14  ;;  %vm12426_vm9 = vmor %vm6499_vm7, %vm6500_vm5  ;;  %v6492_v51 = vsel %vm12435_vm10, %v12360_v24, %v6488_v44 }
 0xe19   : > { %v6642_v15 = vpop.f32.mrf.mxu3  ;;  %v6495_v22 = vmul.f32 %v12388_v12, %v6494_v54  ;;  %vm6778_vm13 = vweird.f32 %v12386_v14  ;;  %v6535_v21 = vmul.f32 %v6492_v51, %v12273_v45  ;;  %v7853_v45 = vld [vmem:[%s8955_s20] sm:$0xff] }
 0xe1a   : > { %v12399_v43 = vadd.f32 %v12334_v42, %v6642_v15  ;;  %v6761_v8 = vmul.f32 %v12383_v48, %v6760_v10  ;;  %v6785_v24 = vor.u32 1.1754944e-38, %v6784_v40  ;;  %vm6783_vm0 = vcmp.eq.f32.partialorder %v6782_v36, 8.507059e+37 }
 0xe1b   : > { %v6496_v4 = vmul.f32 0.5, %v6495_v22  ;;  %v6587_v22 = vpack.c.bf16 %v6572_v11, %v6571_v34 }
 0xe1c   : > { %v8525_v13 = vpop.eup %8524  ;;  %v7780_v46 = vmul.f32 -1.442695, %v12399_v43  ;;  %v6762_v6 = vadd.f32 %v12383_v48, %v6761_v8  ;;  %v6770_v8 = vor.u32 1.1754944e-38, %v6769_v59 }
 0xe1d   : > { %v8527_v33 = vpop.eup %8526  ;;  %v12409_v20 = vadd.f32 1.0, %v8525_v13  ;;  %v6497_v56 = vsub.f32 1.5, %v6496_v4  ;;  %7774 = vmatmul.msk.bf16.gmra.mxu3 %vm1369_vm2, %v6587_v22 }
 0xe1e   : > { %v6774_v23 = vmul.f32 %v8527_v33, %v12386_v14  ;;  %vm6779_vm11 = vweird.f32 %v8527_v33 }
 0xe1f   : > { %8528 = vrcp.f32 %v12409_v20  ;;  %v6498_v31 = vmul.f32 %v12388_v12, %v6497_v56  ;;  %vm6780_vm15 = vmor %vm6778_vm13, %vm6779_vm11  ;;  %v6799_v22 = vand.u32 2147483648, %v12409_v20  ;;  %vm6793_vm3 = vweird.f32 %v12409_v20 }
 0xe20   : > { %v6775_v50 = vsub.f32 1.0, %v6774_v23  ;;  %8530 = vpow2.f32 %v7780_v46  ;;  %v6797_v18 = vand.u32 2147483647, %v12409_v20 }
 0xe21   : > { %v6645_v29 = vpop.f32.mrf.mxu3  ;;  %v6502_v15 = vsel %vm12426_vm9, %v12388_v12, %v6498_v31  ;;  %v6766_v12 = vsel %vm12446_vm12, %v12383_v48, %v6762_v6  ;;  %v7854_v48 = vld [vmem:[%s8955_s20 + $0x8] sm:$0xff]  ;;  %v6554_v31 = vmul.f32 %v12225_v32, %v6535_v21 }
 0xe22   : > { %v6776_v54 = vmul.f32 %v8527_v33, %v6775_v50  ;;  %v12454_v7 = vadd.f32 %v12334_v42, %v6645_v29  ;;  %v6536_v4 = vmul.f32 %v6502_v15, %v12284_v61  ;;  %v6771_v23 = vsel %vm12459_vm14, %v6770_v8, %v6766_v12  ;;  %7093 = vmatpush.bf16.msra.mxu1 %v7854_v48 }
 0xe23   : > { %v6573_v5 = vadd.f32 %v12239_v53, %v6554_v31  ;;  %v6800_v48 = vor.u32 1.1754944e-38, %v6799_v22  ;;  %vm6798_vm6 = vcmp.eq.f32.partialorder %v6797_v18, 8.507059e+37 }
 0xe24   : > { %v6777_v1 = vadd.f32 %v8527_v33, %v6776_v54  ;;  %v7781_v41 = vmul.f32 -1.442695, %v12454_v7  ;;  %v6555_v50 = vmul.f32 %v12225_v32, %v6536_v4 }
 0xe25   : > { %v12465_v13 = vpop.eup %8528 }
 0xe26   : > { %v6781_v46 = vsel %vm6780_vm15, %v8527_v33, %v6777_v1  ;;  %v6789_v14 = vmul.f32 %v12465_v13, %v12409_v20  ;;  %v8531_v0 = vpop.eup %8530  ;;  %8532 = vpow2.f32 %v7781_v41  ;;  %v6998_v33 = vmul.f32 %v6771_v23, %v12340_v16  ;;  %7094 = vmatpush.bf16.msra.mxu1 %v7853_v45 }
 0xe27   : > { %v6786_v56 = vsel %vm6783_vm0, %v6785_v24, %v6781_v46  ;;  %v6745_v11 = vadd.f32 1.0, %v8531_v0  ;;  %v6574_v36 = vadd.f32 %v12239_v53, %v6555_v50  ;;  %vm6794_vm1 = vweird.f32 %v12465_v13 }
 0xe28   : > { %v6999_v61 = vmul.f32 %v6786_v56, %v12352_v2  ;;  %v6790_v44 = vsub.f32 1.0, %v6789_v14  ;;  %vm12492_vm4 = vmor %vm6793_vm3, %vm6794_vm1 }
 0xe29   : > { %v6647_v6 = vpop.f32.mrf.mxu3  ;;  %8534 = vrcp.f32 %v6745_v11  ;;  %v6588_v10 = vpack.c.bf16 %v6574_v36, %v6573_v5  ;;  %v6814_v17 = vand.u32 2147483648, %v6745_v11  ;;  %v6812_v4 = vand.u32 2147483647, %v6745_v11 }
 0xe2a   : > { %v12481_v34 = vadd.f32 %v12334_v42, %v6647_v6  ;;  %v7031_v59 = vpack.c.bf16 %v6999_v61, %v6998_v33  ;;  %v6791_v2 = vmul.f32 %v12465_v13, %v6790_v44  ;;  %vm6808_vm7 = vweird.f32 %v6745_v11 }
 0xe2b   : > { %v6815_v0 = vor.u32 1.1754944e-38, %v6814_v17  ;;  %vm6813_vm10 = vcmp.eq.f32.partialorder %v6812_v4, 8.507059e+37 }
 0xe2c   : > { %v8533_v40 = vpop.eup %8532  ;;  %v7782_v47 = vmul.f32 -1.442695, %v12481_v34  ;;  %7095 = vmatmul.bf16.vlgmr.msra.gmra.mxu1 %v7031_v59  ;;  %v6792_v54 = vadd.f32 %v12465_v13, %v6791_v2 }
 0xe2d   : > { %v6746_v29 = vadd.f32 1.0, %v8533_v40  ;;  %7775 = vmatmul.msk.bf16.gmra.mxu3 %vm1369_vm2, %v6588_v10 }
 0xe2e   : > { %8536 = vpow2.f32 %v7782_v47  ;;  %v6796_v8 = vsel %vm12492_vm4, %v12465_v13, %v6792_v54 }
 0xe2f   : > { %v8535_v16 = vpop.eup %8534  ;;  %8538 = vrcp.f32 %v6746_v29  ;;  %v6801_v14 = vsel %vm6798_vm6, %v6800_v48, %v6796_v8  ;;  %vm6823_vm12 = vweird.f32 %v6746_v29  ;;  %v6827_v36 = vand.u32 2147483647, %v6746_v29 }
 0xe30   : > { %v6804_v15 = vmul.f32 %v8535_v16, %v6745_v11  ;;  %vm6809_vm5 = vweird.f32 %v8535_v16  ;;  %v7000_v13 = vmul.f32 %v6801_v14, %v12377_v57  ;;  %v6829_v11 = vand.u32 2147483648, %v6746_v29 }
 0xe31   : > { %vm6810_vm9 = vmor %vm6808_vm7, %vm6809_vm5  ;;  %vm6828_vm0 = vcmp.eq.f32.partialorder %v6827_v36, 8.507059e+37 }
 0xe32   : > { %v6805_v51 = vsub.f32 1.0, %v6804_v15  ;;  %v6830_v57 = vor.u32 1.1754944e-38, %v6829_v11 }
 0xe34   : > { %v8537_v1 = vpop.eup %8536  ;;  %v6806_v24 = vmul.f32 %v8535_v16, %v6805_v51  ;;  %v6327_v51 = vpop.xlane.xlu2 %6326 }
 0xe35   : > { %v8539_v41 = vpop.eup %8538  ;;  %v6747_v21 = vadd.f32 1.0, %v8537_v1  ;;  %v6345_v12 = vmul.f32 %v6327_v51, %v12881_v38 }
 0xe36   : > { %v6807_v20 = vadd.f32 %v8535_v16, %v6806_v24  ;;  %v6819_v46 = vmul.f32 %v8539_v41, %v6746_v29  ;;  %vm6824_vm11 = vweird.f32 %v8539_v41 }
 0xe37   : > { %8540 = vrcp.f32 %v6747_v21  ;;  %v6844_v40 = vand.u32 2147483648, %v6747_v21  ;;  %vm6825_vm14 = vmor %vm6823_vm12, %vm6824_vm11  ;;  %v6842_v47 = vand.u32 2147483647, %v6747_v21  ;;  %vm6838_vm15 = vweird.f32 %v6747_v21 }
 0xe38   : > { %v6811_v23 = vsel %vm6810_vm9, %v8535_v16, %v6807_v20  ;;  %v6820_v56 = vsub.f32 1.0, %v6819_v46  ;;  %v6361_v17 = vadd.f32 1e-05, %v6345_v12 }
 0xe39   : > { %v6816_v61 = vsel %vm6813_vm10, %v6815_v0, %v6811_v23  ;;  %vm6843_vm3 = vcmp.eq.f32.partialorder %v6842_v47, 8.507059e+37 }
 0xe3a   : > { %v7001_v44 = vmul.f32 %v6816_v61, %v12399_v43  ;;  %v6821_v6 = vmul.f32 %v8539_v41, %v6820_v56  ;;  %v6845_v43 = vor.u32 1.1754944e-38, %v6844_v40  ;;  %8542 = vrsqrt.f32 %v6361_v17 }
 0xe3b   : > { %vm6509_vm5 = vweird.f32 %v6361_v17 }
 0xe3c   : > { %v7032_v50 = vpack.c.bf16 %v7001_v44, %v7000_v13  ;;  %v6822_v31 = vadd.f32 %v8539_v41, %v6821_v6 }
 0xe3d   : > { %v8541_v45 = vpop.eup %8540 }
 0xe3e   : > { %v6834_v33 = vmul.f32 %v8541_v45, %v6747_v21  ;;  %7100 = vmatmul.bf16.gmra.mxu1 %v7032_v50  ;;  %vm6839_vm13 = vweird.f32 %v8541_v45  ;;  %v6826_v5 = vsel %vm6825_vm14, %v8539_v41, %v6822_v31 }
 0xe3f   : > { %vm6840_vm1 = vmor %vm6838_vm15, %vm6839_vm13  ;;  %v6831_v10 = vsel %vm6828_vm0, %v6830_v57, %v6826_v5 }
 0xe40   : > { %v6835_v59 = vsub.f32 1.0, %v6834_v33  ;;  %v7002_v29 = vmul.f32 %v6831_v10, %v12454_v7  ;;  %v8543_v1 = vpop.eup %8542 }
 0xe41   : > { %v6504_v24 = vmul.f32 %v8543_v1, %v6361_v17  ;;  %vm6510_vm4 = vweird.f32 %v8543_v1 }
 0xe42   : > { %v6836_v2 = vmul.f32 %v8541_v45, %v6835_v59  ;;  %vm6511_vm7 = vmor %vm6509_vm5, %vm6510_vm4 }
 0xe43   : > { %v6505_v48 = vmul.f32 %v8543_v1, %v6504_v24 }
 0xe44   : > { %v6837_v16 = vadd.f32 %v8541_v45, %v6836_v2 }
 0xe45   : > { %v6506_v21 = vmul.f32 0.5, %v6505_v48 }
 0xe46   : > { %v6841_v54 = vsel %vm6840_vm1, %v8541_v45, %v6837_v16 }
 0xe47   : > { %v6846_v15 = vsel %vm6843_vm3, %v6845_v43, %v6841_v54  ;;  %v6507_v46 = vsub.f32 1.5, %v6506_v21 }
 0xe48   : > { %v7003_v22 = vmul.f32 %v6846_v15, %v12481_v34 }
 0xe49   : > { %v6508_v0 = vmul.f32 %v8543_v1, %v6507_v46 }
 0xe4a   : > { %v7033_v18 = vpack.c.bf16 %v7003_v22, %v7002_v29 }
 0xe4b   : > { %v6512_v61 = vsel %vm6511_vm7, %v8543_v1, %v6508_v0 }
 0xe4c   : > { %v6537_v44 = vmul.f32 %v6512_v61, %v12294_v35 }
 0xe4e   : > { %7105 = vmatmul.bf16.gmra.mxu1 %v7033_v18  ;;  %v6556_v33 = vmul.f32 %v12225_v32, %v6537_v44 }
 0xe50   : > { %v6575_v36 = vadd.f32 %v12239_v53, %v6556_v33 }
 0xe65   : > { %v6330_v8 = vpop.xlane.xlu1 %6329 }
 0xe66   : > { %v6346_v4 = vmul.f32 %v6330_v8, %v12881_v38 }
 0xe68   : > { %v6362_v41 = vadd.f32 1e-05, %v6346_v4 }
 0xe6a   : > { %8544 = vrsqrt.f32 %v6362_v41  ;;  %vm6519_vm9 = vweird.f32 %v6362_v41 }
 0xe70   : > { %v8545_v20 = vpop.eup %8544 }
 0xe71   : > { %v6514_v34 = vmul.f32 %v8545_v20, %v6362_v41  ;;  %vm6520_vm6 = vweird.f32 %v8545_v20 }
 0xe72   : > { %vm6521_vm10 = vmor %vm6519_vm9, %vm6520_vm6 }
 0xe73   : > { %v6515_v7 = vmul.f32 %v8545_v20, %v6514_v34 }
 0xe75   : > { %v6516_v14 = vmul.f32 0.5, %v6515_v7 }
 0xe77   : > { %v6517_v23 = vsub.f32 1.5, %v6516_v14 }
 0xe79   : > { %v6518_v56 = vmul.f32 %v8545_v20, %v6517_v23 }
 0xe7b   : > { %v6522_v38 = vsel %vm6521_vm10, %v8545_v20, %v6518_v56 }
 0xe7c   : > { %v6650_v13 = vpop.f32.mrf.mxu3  ;;  %v6538_v50 = vmul.f32 %v6522_v38, %v12309_v25 }
 0xe7d   : > { %v12508_v6 = vadd.f32 %v12334_v42, %v6650_v13 }
 0xe7e   : > { %v6557_v31 = vmul.f32 %v12225_v32, %v6538_v50 }
 0xe7f   : > { %v7783_v45 = vmul.f32 -1.442695, %v12508_v6 }
 0xe80   : > { %v6576_v40 = vadd.f32 %v12239_v53, %v6557_v31 }
 0xe81   : > { %8546 = vpow2.f32 %v7783_v45 }
 0xe82   : > { %v6589_v47 = vpack.c.bf16 %v6576_v40, %v6575_v36 }
 0xe84   : > { %v6652_v11 = vpop.f32.mrf.mxu3  ;;  %7776 = vmatmul.msk.bf16.gmra.mxu3 %vm1369_vm2, %v6589_v47  ;;  %v12540_v47 = vld [vmem:[%s1158_s18] ss:$0 sm:$0xff]  ;;  %s12946_s18 = sld [smem:[#allocation8_spill]] }
 0xe85   : > { %v6685_v59 = vadd.f32 %v12334_v42, %v6652_v11 }
 0xe87   : > { %v8547_v35 = vpop.eup %8546  ;;  %v7784_v2 = vmul.f32 -1.442695, %v6685_v59 }
 0xe88   : > { %v6748_v5 = vadd.f32 1.0, %v8547_v35 }
 0xe89   : > { %8548 = vpow2.f32 %v7784_v2 }
 0xe8a   : > { %8550 = vrcp.f32 %v6748_v5  ;;  %v6859_v20 = vand.u32 2147483648, %v6748_v5  ;;  %vm6853_vm15 = vweird.f32 %v6748_v5  ;;  %v6857_v34 = vand.u32 2147483647, %v6748_v5  ;;  %p7825_p5 = scmp.ne.s32.totalorder %s12946_s18, 1 }
 0xe8b   : > { %s12947_s7 = sld [smem:[#allocation61_spill]] (!%p7825_p5) }
 0xe8c   : > { %v6655_v32 = vpop.f32.mrf.mxu3  ;;  %v6860_v0 = vor.u32 1.1754944e-38, %v6859_v20  ;;  %vm6858_vm3 = vcmp.eq.f32.partialorder %v6857_v34, 8.507059e+37  ;;  %s12948_s14 = sld [smem:[#allocation60_spill]] (!%p7825_p5) }
 0xe8d   : > { %v12519_v10 = vadd.f32 %v12334_v42, %v6655_v32 }
 0xe8f   : > { %v8549_v25 = vpop.eup %8548  ;;  %v7785_v53 = vmul.f32 -1.442695, %v12519_v10 }
 0xe90   : > { %v6749_v57 = vadd.f32 1.0, %v8549_v25  ;;  %v8551_v16 = vpop.eup %8550 }
 0xe91   : > { %v6849_v43 = vmul.f32 %v8551_v16, %v6748_v5  ;;  %vm6854_vm12 = vweird.f32 %v8551_v16 }
 0xe92   : > { %8552 = vrcp.f32 %v6749_v57  ;;  %v6874_v4 = vand.u32 2147483648, %v6749_v57  ;;  %vm6868_vm14 = vweird.f32 %v6749_v57  ;;  %v6872_v21 = vand.u32 2147483647, %v6749_v57  ;;  %vm6855_vm0 = vmor %vm6853_vm15, %vm6854_vm12 }
 0xe93   : > { %v6850_v22 = vsub.f32 1.0, %v6849_v43  ;;  %8554 = vpow2.f32 %v7785_v53 }
 0xe94   : > { %v6657_v51 = vpop.f32.mrf.mxu3  ;;  %v6875_v7 = vor.u32 1.1754944e-38, %v6874_v4  ;;  %vm6873_vm1 = vcmp.eq.f32.partialorder %v6872_v21, 8.507059e+37 }
 0xe95   : > { %v6851_v12 = vmul.f32 %v8551_v16, %v6850_v22  ;;  %v12523_v17 = vadd.f32 %v12334_v42, %v6657_v51 }
 0xe97   : > { %v7786_v24 = vmul.f32 -1.442695, %v12523_v17  ;;  %v6852_v48 = vadd.f32 %v8551_v16, %v6851_v12 }
 0xe98   : > { %v8553_v54 = vpop.eup %8552 }
 0xe99   : > { %v6864_v15 = vmul.f32 %v8553_v54, %v6749_v57  ;;  %v8555_v1 = vpop.eup %8554  ;;  %vm6869_vm11 = vweird.f32 %v8553_v54  ;;  %8556 = vpow2.f32 %v7786_v24  ;;  %v6856_v14 = vsel %vm6855_vm0, %v8551_v16, %v6852_v48 }
 0xe9a   : > { %v12526_v41 = vadd.f32 1.0, %v8555_v1  ;;  %vm6870_vm13 = vmor %vm6868_vm14, %vm6869_vm11  ;;  %v6861_v44 = vsel %vm6858_vm3, %v6860_v0, %v6856_v14 }
 0xe9b   : > { %v6865_v29 = vsub.f32 1.0, %v6864_v15  ;;  %v7004_v11 = vmul.f32 %v6861_v44, %v12508_v6 }
 0xe9c   : > { %8558 = vrcp.f32 %v12526_v41  ;;  %vm6883_vm5 = vweird.f32 %v12526_v41  ;;  %v6887_v22 = vand.u32 2147483647, %v12526_v41 }
 0xe9d   : > { %v6866_v18 = vmul.f32 %v8553_v54, %v6865_v29 }
 0xe9e   : > { %vm6888_vm9 = vcmp.eq.f32.partialorder %v6887_v22, 8.507059e+37 }
 0xe9f   : > { %v6867_v8 = vadd.f32 %v8553_v54, %v6866_v18  ;;  %v8557_v61 = vpop.eup %8556 }
 0xea0   : > { %v6660_v56 = vpop.f32.mrf.mxu3  ;;  %v6751_v50 = vadd.f32 1.0, %v8557_v61 }
 0xea1   : > { %v6871_v46 = vsel %vm6870_vm13, %v8553_v54, %v6867_v8  ;;  %v12530_v38 = vadd.f32 %v12334_v42, %v6660_v56  ;;  %v6889_v54 = vand.u32 2147483648, %v12526_v41 }
 0xea2   : > { %v6876_v23 = vsel %vm6873_vm1, %v6875_v7, %v6871_v46  ;;  %v8559_v13 = vpop.eup %8558  ;;  %8560 = vrcp.f32 %v6751_v50  ;;  %v6904_v51 = vand.u32 2147483648, %v6751_v50  ;;  %v6902_v1 = vand.u32 2147483647, %v6751_v50 }
 0xea3   : > { %v7005_v45 = vmul.f32 %v6876_v23, %v6685_v59  ;;  %v6879_v33 = vmul.f32 %v8559_v13, %v12526_v41  ;;  %v7787_v31 = vmul.f32 -1.442695, %v12530_v38  ;;  %vm6884_vm4 = vweird.f32 %v8559_v13 }
 0xea4   : > { %vm12555_vm6 = vmor %vm6883_vm5, %vm6884_vm4  ;;  %v6890_v24 = vor.u32 1.1754944e-38, %v6889_v54  ;;  %vm6898_vm10 = vweird.f32 %v6751_v50  ;;  %v6905_v34 = vor.u32 1.1754944e-38, %v6904_v51  ;;  %vm6903_vm12 = vcmp.eq.f32.partialorder %v6902_v1, 8.507059e+37 }
 0xea5   : > { %v6880_v36 = vsub.f32 1.0, %v6879_v33  ;;  %8562 = vpow2.f32 %v7787_v31  ;;  %v7034_v35 = vpack.c.bf16 %v7005_v45, %v7004_v11 }
 0xea7   : > { %v6881_v40 = vmul.f32 %v8559_v13, %v6880_v36  ;;  %7110 = vmatmul.bf16.gmra.mxu1 %v7034_v35 }
 0xea8   : > { %v6662_v5 = vpop.f32.mrf.mxu3  ;;  %v8561_v57 = vpop.eup %8560 }
 0xea9   : > { %v7096_v2 = vpop.f32.mrf.mxu1  ;;  %v12543_v59 = vadd.f32 %v12334_v42, %v6662_v5  ;;  %v6882_v16 = vadd.f32 %v8559_v13, %v6881_v40  ;;  %v6894_v32 = vmul.f32 %v8561_v57, %v6751_v50  ;;  %vm6899_vm7 = vweird.f32 %v8561_v57 }
 0xeaa   : > { %v7139_v25 = vadd.f32 %v12540_v47, %v7096_v2  ;;  %vm6900_vm11 = vmor %vm6898_vm10, %vm6899_vm7 }
 0xeab   : > { %v8563_v6 = vpop.eup %8562  ;;  %v7788_v43 = vmul.f32 -1.442695, %v12543_v59  ;;  %v6895_v29 = vsub.f32 1.0, %v6894_v32 }
 0xeac   : > { %v12548_v53 = vadd.f32 1.0, %v8563_v6  ;;  %v12551_v15 = vadd.f32 %v7139_v25, %v12049_v49  ;;  %v6886_v49 = vsel %vm12555_vm6, %v8559_v13, %v6882_v16 }
 0xead   : > { %8564 = vpow2.f32 %v7788_v43  ;;  %v6896_v12 = vmul.f32 %v8561_v57, %v6895_v29  ;;  %v6891_v20 = vsel %vm6888_vm9, %v6890_v24, %v6886_v49 }
 0xeae   : > { %8566 = vrcp.f32 %v12548_v53  ;;  %7171 = vst.msk [vmem:[#allocation2] sm:$0xff] %vm1369_vm2, %v12551_v15  ;;  %v7006_v13 = vmul.f32 %v6891_v20, %v12519_v10  ;;  %v6919_v6 = vand.u32 2147483648, %v12548_v53  ;;  %vm6913_vm13 = vweird.f32 %v12548_v53 }
 0xeaf   : > { %v6897_v48 = vadd.f32 %v8561_v57, %v6896_v12 }
 0xeb0   : > { %v6665_v4 = vpop.f32.mrf.mxu3  ;;  %v6920_v51 = vor.u32 1.1754944e-38, %v6919_v6 }
 0xeb1   : > { %v7098_v8 = vpop.f32.mrf.mxu1  ;;  %v12566_v21 = vadd.f32 %v12334_v42, %v6665_v4  ;;  %v6901_v14 = vsel %vm6900_vm11, %v8561_v57, %v6897_v48 }
 0xeb2   : > { %v7140_v41 = vadd.f32 %v12540_v47, %v7098_v8  ;;  %v6906_v56 = vsel %vm6903_vm12, %v6905_v34, %v6901_v14 }
 0xeb3   : > { %v8565_v7 = vpop.eup %8564  ;;  %v7789_v0 = vmul.f32 -1.442695, %v12566_v21  ;;  %v7007_v44 = vmul.f32 %v6906_v56, %v12523_v17 }
 0xeb4   : > { %v12569_v46 = vadd.f32 %v7140_v41, %v12055_v28  ;;  %v8567_v23 = vpop.eup %8566  ;;  %v6753_v61 = vadd.f32 1.0, %v8565_v7 }
 0xeb5   : > { %v6909_v50 = vmul.f32 %v8567_v23, %v12548_v53  ;;  %8568 = vpow2.f32 %v7789_v0  ;;  %v7035_v45 = vpack.c.bf16 %v7007_v44, %v7006_v13  ;;  %vm6914_vm14 = vweird.f32 %v8567_v23 }
 0xeb6   : > { %7172 = vst.msk [vmem:[#allocation2 + $0x8] sm:$0xff] %vm1369_vm2, %v12569_v46  ;;  %8570 = vrcp.f32 %v6753_v61  ;;  %vm6915_vm15 = vmor %vm6913_vm13, %vm6914_vm14  ;;  %v6934_v43 = vand.u32 2147483648, %v6753_v61  ;;  %v6932_v18 = vand.u32 2147483647, %v6753_v61  ;;  %vm6928_vm3 = vweird.f32 %v6753_v61 }
 0xeb7   : > { %v6910_v28 = vsub.f32 1.0, %v6909_v50  ;;  %7115 = vmatmul.bf16.gmra.mxu1 %v7035_v45 }
 0xeb8   : > { %v6667_v31 = vpop.f32.mrf.mxu3  ;;  %v6935_v24 = vor.u32 1.1754944e-38, %v6934_v43  ;;  %vm6933_vm5 = vcmp.eq.f32.partialorder %v6932_v18, 8.507059e+37 }
 0xeb9   : > { %v6911_v36 = vmul.f32 %v8567_v23, %v6910_v28  ;;  %v12579_v40 = vadd.f32 %v12334_v42, %v6667_v31 }
 0xebb   : > { %v7101_v33 = vpop.f32.mrf.mxu1  ;;  %v8569_v10 = vpop.eup %8568  ;;  %v7790_v17 = vmul.f32 -1.442695, %v12579_v40  ;;  %v6912_v25 = vadd.f32 %v8567_v23, %v6911_v36 }
 0xebc   : > { %v7141_v11 = vadd.f32 %v12540_v47, %v7101_v33  ;;  %v8571_v2 = vpop.eup %8570  ;;  %v12585_v5 = vadd.f32 1.0, %v8569_v10 }
 0xebd   : > { %v6924_v57 = vmul.f32 %v8571_v2, %v6753_v61  ;;  %8572 = vpow2.f32 %v7790_v17  ;;  %v6916_v22 = vsel %vm6915_vm15, %v8567_v23, %v6912_v25  ;;  %vm6929_vm0 = vweird.f32 %v8571_v2 }
 0xebe   : > { %v12582_v35 = vadd.f32 %v7141_v11, %v12061_v26  ;;  %8574 = vrcp.f32 %v12585_v5  ;;  %v6917_v26 = vand.u32 2147483647, %v12548_v53  ;;  %vm6930_vm4 = vmor %vm6928_vm3, %vm6929_vm0  ;;  %vm6943_vm7 = vweird.f32 %v12585_v5 }
 0xebf   : > { %v6925_v16 = vsub.f32 1.0, %v6924_v57 }
 0xec0   : > { %7173 = vst.msk [vmem:[#allocation2 + $0x10] sm:$0xff] %vm1369_vm2, %v12582_v35  ;;  %vm6918_vm1 = vcmp.eq.f32.partialorder %v6917_v26, 8.507059e+37 }
 0xec1   : > { %v6926_v29 = vmul.f32 %v8571_v2, %v6925_v16  ;;  %v6921_v53 = vsel %vm6918_vm1, %v6920_v51, %v6916_v22 }
 0xec3   : > { %v7103_v32 = vpop.f32.mrf.mxu1  ;;  %v8573_v12 = vpop.eup %8572  ;;  %v6927_v1 = vadd.f32 %v8571_v2, %v6926_v29 }
 0xec4   : > { %v7142_v54 = vadd.f32 %v12540_v47, %v7103_v32  ;;  %v8575_v8 = vpop.eup %8574  ;;  %v6755_v4 = vadd.f32 1.0, %v8573_v12 }
 0xec5   : > { %v6931_v41 = vsel %vm6930_vm4, %v8571_v2, %v6927_v1  ;;  %v6939_v48 = vmul.f32 %v8575_v8, %v12585_v5  ;;  %vm6944_vm6 = vweird.f32 %v8575_v8 }
 0xec6   : > { %v12595_v49 = vadd.f32 %v7142_v54, %v12067_v39  ;;  %v6936_v20 = vsel %vm6933_vm5, %v6935_v24, %v6931_v41  ;;  %8576 = vrcp.f32 %v6755_v4  ;;  %v7008_v39 = vmul.f32 %v6921_v53, %v12530_v38  ;;  %vm6945_vm9 = vmor %vm6943_vm7, %vm6944_vm6 }
 0xec7   : > { %v7009_v34 = vmul.f32 %v6936_v20, %v12543_v59  ;;  %v6940_v7 = vsub.f32 1.0, %v6939_v48  ;;  %v6949_v38 = vand.u32 2147483648, %v12585_v5  ;;  %v6947_v59 = vand.u32 2147483647, %v12585_v5 }
 0xec8   : > { %7174 = vst.msk [vmem:[#allocation2 + $0x18] sm:$0xff] %vm1369_vm2, %v12595_v49  ;;  %v6964_v33 = vand.u32 2147483648, %v6755_v4  ;;  %v6962_v36 = vand.u32 2147483647, %v6755_v4  ;;  %vm6958_vm12 = vweird.f32 %v6755_v4 }
 0xec9   : > { %v6941_v23 = vmul.f32 %v8575_v8, %v6940_v7  ;;  %v7036_v56 = vpack.c.bf16 %v7009_v34, %v7008_v39  ;;  %v6950_v10 = vor.u32 1.1754944e-38, %v6949_v38  ;;  %vm6948_vm11 = vcmp.eq.f32.partialorder %v6947_v59, 8.507059e+37 }
 0xeca   : > { %v6965_v5 = vor.u32 1.1754944e-38, %v6964_v33  ;;  %vm6963_vm13 = vcmp.eq.f32.partialorder %v6962_v36, 8.507059e+37 }
 0xecb   : > { %v7106_v14 = vpop.f32.mrf.mxu1  ;;  %7120 = vmatmul.bf16.gmra.mxu1 %v7036_v56  ;;  %v6942_v44 = vadd.f32 %v8575_v8, %v6941_v23 }
 0xecc   : > { %v7143_v0 = vadd.f32 %v12540_v47, %v7106_v14  ;;  %v8577_v13 = vpop.eup %8576 }
 0xecd   : > { %v6954_v50 = vmul.f32 %v8577_v13, %v6755_v4  ;;  %v6946_v31 = vsel %vm6945_vm9, %v8575_v8, %v6942_v44  ;;  %vm6959_vm10 = vweird.f32 %v8577_v13 }
 0xece   : > { %v12604_v61 = vadd.f32 %v7143_v0, %v12073_v27  ;;  %v6951_v25 = vsel %vm6948_vm11, %v6950_v10, %v6946_v31  ;;  %vm6960_vm14 = vmor %vm6958_vm12, %vm6959_vm10 }
 0xecf   : > { %v6955_v28 = vsub.f32 1.0, %v6954_v50  ;;  %v7010_v26 = vmul.f32 %v6951_v25, %v12566_v21 }
 0xed0   : > { %7175 = vst.msk [vmem:[#allocation2 + $0x20] sm:$0xff] %vm1369_vm2, %v12604_v61 }
 0xed1   : > { %v6956_v11 = vmul.f32 %v8577_v13, %v6955_v28 }
 0xed3   : > { %v7108_v45 = vpop.f32.mrf.mxu1  ;;  %v6957_v2 = vadd.f32 %v8577_v13, %v6956_v11 }
 0xed4   : > { %v7144_v27 = vadd.f32 %v12540_v47, %v7108_v45 }
 0xed5   : > { %v6961_v57 = vsel %vm6960_vm14, %v8577_v13, %v6957_v2 }
 0xed6   : > { %v12613_v17 = vadd.f32 %v7144_v27, %v12079_v3  ;;  %v6966_v6 = vsel %vm6963_vm13, %v6965_v5, %v6961_v57 }
 0xed7   : > { %v7011_v16 = vmul.f32 %v6966_v6, %v12579_v40 }
 0xed8   : > { %7176 = vst.msk [vmem:[#allocation2 + $0x28] sm:$0xff] %vm1369_vm2, %v12613_v17 }
 0xed9   : > { %v7037_v32 = vpack.c.bf16 %v7011_v16, %v7010_v26 }
 0xedb   : > { %7125 = vmatmul.bf16.gmra.mxu1 %v7037_v32 }
 0xf07   : > { %v6670_v3 = vpop.f32.mrf.mxu3 }
 0xf08   : > { %v6692_v43 = vadd.f32 %v12334_v42, %v6670_v3 }
 0xf0a   : > { %v7791_v54 = vmul.f32 -1.442695, %v6692_v43 }
 0xf0c   : > { %8578 = vpow2.f32 %v7791_v54 }
 0xf0f   : > { %v6672_v22 = vpop.f32.mrf.mxu3 }
 0xf10   : > { %v6693_v29 = vadd.f32 %v12334_v42, %v6672_v22 }
 0xf12   : > { %v8579_v18 = vpop.eup %8578  ;;  %v7792_v51 = vmul.f32 -1.442695, %v6693_v29 }
 0xf13   : > { %v6756_v12 = vadd.f32 1.0, %v8579_v18 }
 0xf14   : > { %8580 = vpow2.f32 %v7792_v51 }
 0xf15   : > { %8582 = vrcp.f32 %v6756_v12  ;;  %v6979_v20 = vand.u32 2147483648, %v6756_v12  ;;  %vm6973_vm0 = vweird.f32 %v6756_v12  ;;  %v6977_v39 = vand.u32 2147483647, %v6756_v12 }
 0xf17   : > { %v6980_v56 = vor.u32 1.1754944e-38, %v6979_v20  ;;  %vm6978_vm4 = vcmp.eq.f32.partialorder %v6977_v39, 8.507059e+37 }
 0xf1a   : > { %v8581_v1 = vpop.eup %8580 }
 0xf1b   : > { %v8583_v8 = vpop.eup %8582  ;;  %v6757_v21 = vadd.f32 1.0, %v8581_v1 }
 0xf1c   : > { %v6969_v53 = vmul.f32 %v8583_v8, %v6756_v12  ;;  %vm6974_vm15 = vweird.f32 %v8583_v8 }
 0xf1d   : > { %8584 = vrcp.f32 %v6757_v21  ;;  %vm6975_vm1 = vmor %vm6973_vm0, %vm6974_vm15  ;;  %v6994_v34 = vand.u32 2147483648, %v6757_v21  ;;  %v6992_v0 = vand.u32 2147483647, %v6757_v21  ;;  %vm6988_vm5 = vweird.f32 %v6757_v21 }
 0xf1e   : > { %v6970_v40 = vsub.f32 1.0, %v6969_v53 }
 0xf1f   : > { %v6995_v38 = vor.u32 1.1754944e-38, %v6994_v34  ;;  %vm6993_vm7 = vcmp.eq.f32.partialorder %v6992_v0, 8.507059e+37 }
 0xf20   : > { %v6971_v24 = vmul.f32 %v8583_v8, %v6970_v40 }
 0xf22   : > { %v6972_v41 = vadd.f32 %v8583_v8, %v6971_v24 }
 0xf23   : > { %v8585_v4 = vpop.eup %8584 }
 0xf24   : > { %v6984_v48 = vmul.f32 %v8585_v4, %v6757_v21  ;;  %v6976_v7 = vsel %vm6975_vm1, %v8583_v8, %v6972_v41  ;;  %vm6989_vm3 = vweird.f32 %v8585_v4  ;;  %v7111_v23 = vpop.f32.mrf.mxu1 }
 0xf25   : > { %v7145_v13 = vadd.f32 %v12540_v47, %v7111_v23  ;;  %v6981_v50 = vsel %vm6978_vm4, %v6980_v56, %v6976_v7  ;;  %vm6990_vm6 = vmor %vm6988_vm5, %vm6989_vm3 }
 0xf26   : > { %v6985_v42 = vsub.f32 1.0, %v6984_v48  ;;  %v7012_v33 = vmul.f32 %v6981_v50, %v6692_v43 }
 0xf27   : > { %v7161_v59 = vadd.f32 %v7145_v13, %v12085_v30 }
 0xf28   : > { %v6986_v14 = vmul.f32 %v8585_v4, %v6985_v42 }
 0xf29   : > { %7177 = vst.msk [vmem:[#allocation2 + $0x30] sm:$0xff] %vm1369_vm2, %v7161_v59 }
 0xf2a   : > { %v6987_v44 = vadd.f32 %v8585_v4, %v6986_v14 }
 0xf2c   : > { %v6991_v28 = vsel %vm6990_vm6, %v8585_v4, %v6987_v44  ;;  %v7113_v31 = vpop.f32.mrf.mxu1 }
 0xf2d   : > { %v6996_v45 = vsel %vm6993_vm7, %v6995_v38, %v6991_v28  ;;  %v7146_v36 = vadd.f32 %v12540_v47, %v7113_v31 }
 0xf2e   : > { %v7013_v27 = vmul.f32 %v6996_v45, %v6693_v29 }
 0xf2f   : > { %v7162_v10 = vadd.f32 %v7146_v36, %v12099_v60 }
 0xf30   : > { %v7038_v11 = vpack.c.bf16 %v7013_v27, %v7012_v33 }
 0xf31   : > { %7178 = vst.msk [vmem:[#allocation2 + $0x38] sm:$0xff] %vm1369_vm2, %v7162_v10 }
 0xf32   : > { %7130 = vmatmul.bf16.gmra.mxu1 %v7038_v11 }
 0xf34   : > { %v7116_v2 = vpop.f32.mrf.mxu1 }
 0xf35   : > { %v7147_v25 = vadd.f32 %v12540_v47, %v7116_v2 }
 0xf37   : > { %v7163_v30 = vadd.f32 %v7147_v25, %v12112_v37 }
 0xf39   : > { %7179 = vst.msk [vmem:[#allocation2 + $0x40] sm:$0xff] %vm1369_vm2, %v7163_v30 }
 0xf3c   : > { %v7118_v5 = vpop.f32.mrf.mxu1 }
 0xf3d   : > { %v7148_v57 = vadd.f32 %v12540_v47, %v7118_v5 }
 0xf3f   : > { %v7164_v6 = vadd.f32 %v7148_v57, %v12125_v63 }
 0xf41   : > { %7180 = vst.msk [vmem:[#allocation2 + $0x48] sm:$0xff] %vm1369_vm2, %v7164_v6 }
 0xf48   : > { %v7121_v26 = vpop.f32.mrf.mxu1 }
 0xf49   : > { %v7149_v16 = vadd.f32 %v12540_v47, %v7121_v26 }
 0xf4b   : > { %v7165_v60 = vadd.f32 %v7149_v16, %v12138_v55 }
 0xf4d   : > { %7181 = vst.msk [vmem:[#allocation2 + $0x50] sm:$0xff] %vm1369_vm2, %v7165_v60 }
 0xf50   : > { %v7123_v32 = vpop.f32.mrf.mxu1 }
 0xf51   : > { %v7150_v3 = vadd.f32 %v12540_v47, %v7123_v32 }
 0xf53   : > { %v7166_v37 = vadd.f32 %v7150_v3, %v12151_v62 }
 0xf55   : > { %7182 = vst.msk [vmem:[#allocation2 + $0x58] sm:$0xff] %vm1369_vm2, %v7166_v37 }
 0xf58   : > { %v7126_v43 = vpop.f32.mrf.mxu1 }
 0xf59   : > { %v7151_v54 = vadd.f32 %v12540_v47, %v7126_v43 }
 0xf5b   : > { %v7167_v63 = vadd.f32 %v7151_v54, %v12164_v52 }
 0xf5d   : > { %7183 = vst.msk [vmem:[#allocation2 + $0x60] sm:$0xff] %vm1369_vm2, %v7167_v63 }
 0xf60   : > { %v7128_v22 = vpop.f32.mrf.mxu1 }
 0xf61   : > { %v7152_v29 = vadd.f32 %v12540_v47, %v7128_v22 }
 0xf63   : > { %v7168_v55 = vadd.f32 %v7152_v29, %v12176_v9 }
 0xf65   : > { %7184 = vst.msk [vmem:[#allocation2 + $0x68] sm:$0xff] %vm1369_vm2, %v7168_v55 }
 0xfaf   : > { %v7131_v18 = vpop.f32.mrf.mxu1 }
 0xfb0   : > { %v7153_v51 = vadd.f32 %v12540_v47, %v7131_v18 }
 0xfb2   : > { %v7169_v62 = vadd.f32 %v7153_v51, %v12182_v58 }
 0xfb4   : > { %7185 = vst.msk [vmem:[#allocation2 + $0x70] sm:$0xff] %vm1369_vm2, %v7169_v62 }
 0xfb7   : > { %v7133_v12 = vpop.f32.mrf.mxu1 }
 0xfb8   : > { %v7154_v1 = vadd.f32 %v12540_v47, %v7133_v12  ;;  %7190 = sbr.rel (%p7825_p5) target bundleno = 4369 (0x1111), region = 140 }
 0xfba   : > { %v7170_v52 = vadd.f32 %v7154_v1, %v12218_v19 }
 0xfbc   : > { %7186 = vst.msk [vmem:[#allocation2 + $0x78] sm:$0xff] %vm1369_vm2, %v7170_v52 }
 0xfbd   : > { %v8602_v9 = vpack.i.bf16 %v7163_v30, %v12551_v15  ;;  %v8604_v8 = vpack.i.bf16 %v7164_v6, %v12569_v46  ;;  %v8606_v58 = vpack.i.bf16 %v7165_v60, %v12582_v35  ;;  %v8608_v21 = vpack.i.bf16 %v7166_v37, %v12595_v49  ;;  %v7193_v46 = vld [vmem:[%s12947_s7] sm:$0xff] }
 0xfbe   : > { %v8610_v47 = vpack.i.bf16 %v7167_v63, %v12604_v61  ;;  %v8612_v19 = vpack.i.bf16 %v7168_v55, %v12613_v17  ;;  %v8614_v53 = vpack.i.bf16 %v7169_v62, %v7161_v59  ;;  %v8616_v40 = vpack.i.bf16 %v7170_v52, %v7162_v10  ;;  %v7194_v61 = vld [vmem:[%s12947_s7 + $0x8] sm:$0xff]  ;;  %v7861_v13 = vld [vmem:[%s12948_s14] sm:$0xff] }
 0xfbf   : > { %8603 = vxpose.xlu0.b32.start [1/8] (short) (narrow) %v8602_v9, 32  ;;  %v8697_v35 = vmov 0  }
 0xfc0   : > { %8638 = vset.pattern.permute.xlu1 %v8697_v35 }
 0xfc1   : > { %7231 = vperm.xlu1 %8638, %v7193_v46  }
 0xfc7   : > { %8605 = vxpose.xlu0.b32.cont [2/8] (short) (narrow) %v8604_v8, 32 }
 0xfc9   : > { %7236 = vperm.xlu1 %8638, %v7194_v61  }
 0xfcf   : > { %8607 = vxpose.xlu0.b32.cont [3/8] (short) (narrow) %v8606_v58, 32 }
 0xfd7   : > { %8609 = vxpose.xlu0.b32.cont [4/8] (short) (narrow) %v8608_v21, 32 }
 0xfdf   : > { %8611 = vxpose.xlu0.b32.cont [5/8] (short) (narrow) %v8610_v47, 32 }
 0xfe7   : > { %8613 = vxpose.xlu0.b32.cont [6/8] (short) (narrow) %v8612_v19, 32 }
 0xfef   : > { %8615 = vxpose.xlu0.b32.cont [7/8] (short) (narrow) %v8614_v53, 32 }
 0xff7   : > { %8617 = vxpose.xlu0.b32.end [8/8] (short) (narrow) %v8616_v40, 32 }
0x1033   : > { %v7232_v44 = vpop.permute.xlu1 %7231 }
0x103b   : > { %v7237_v45 = vpop.permute.xlu1 %7236 }
0x105e   : > { %8639 = vset.pattern.permute.xlu0 %v8697_v35 }
0x1063   : > { %v8618_v15 = vpop.trf.xlu0 }
0x1064   : > { %v8619_v14 = vunpack.i.l.bf16 %v8618_v15  ;;  %v8622_v0 = vunpack.i.h.bf16 %v8618_v15 }
0x106b   : > { %v8623_v49 = vpop.trf.xlu0 }
0x106c   : > { %v8624_v34 = vunpack.i.l.bf16 %v8623_v49  ;;  %v8627_v7 = vunpack.i.h.bf16 %v8623_v49 }
0x106e   : > { %v7227_v23 = vpack.c.bf16 %v8624_v34, %v8619_v14  ;;  %v7295_v56 = vpack.c.bf16 %v8627_v7, %v8622_v0 }
0x1073   : > { %v8628_v17 = vpop.trf.xlu0 }
0x1074   : > { %v8629_v4 = vunpack.i.l.bf16 %v8628_v17  ;;  %v8632_v41 = vunpack.i.h.bf16 %v8628_v17 }
0x107b   : > { %v8633_v24 = vpop.trf.xlu0 }
0x107c   : > { %v8634_v48 = vunpack.i.l.bf16 %v8633_v24  ;;  %v8637_v20 = vunpack.i.h.bf16 %v8633_v24 }
0x107e   : > { %v7228_v39 = vpack.c.bf16 %v8634_v48, %v8629_v4  ;;  %v7296_v42 = vpack.c.bf16 %v8637_v20, %v8632_v41 }
0x1080   : > { %7253 = vmatpush.bf16.msra.mxu0 %v7228_v39  ;;  %7303 = vmatpush.bf16.msra.mxu1 %v7296_v42 }
0x1084   : > { %7254 = vmatpush.bf16.msra.mxu0 %v7227_v23  ;;  %7304 = vmatpush.bf16.msra.mxu1 %v7295_v56 }
0x1087   : > { %7830 = vmatmul.msk.bf16.vlgmr.msra.gmra.mxu0 %vm1369_vm2, %v7861_v13  ;;  %7831 = vmatmul.msk.bf16.vlgmr.msra.gmra.mxu1 %vm1369_vm2, %v7861_v13 }
0x1104   : > { %v7256_v50 = vpop.f32.mrf.mxu0  ;;  %v7306_v38 = vpop.f32.mrf.mxu1 }
0x1105   : > { %v7257_v59 = vadd.f32 %v7256_v50, %v7232_v44  ;;  %v7307_v28 = vadd.f32 %v7306_v38, %v7232_v44 }
0x1107   : > { %7261 = vst.msk [vmem:[#allocation4] sm:$0xff] %vm2135_vm8, %v7257_v59 }
0x1108   : > { %7312 = vst.msk [vmem:[#allocation4 + $0x10] sm:$0xff] %vm2135_vm8, %v7307_v28 }
0x110c   : > { %v7258_v33 = vpop.f32.mrf.mxu0  ;;  %v7308_v27 = vpop.f32.mrf.mxu1 }
0x110d   : > { %v7259_v31 = vadd.f32 %v7258_v33, %v7237_v45  ;;  %v7309_v11 = vadd.f32 %v7308_v27, %v7237_v45 }
0x110f   : > { %7262 = vst.msk [vmem:[#allocation4 + $0x8] sm:$0xff] %vm2135_vm8, %v7259_v31 }
0x1110   : > { %7313 = vst.msk [vmem:[#allocation4 + $0x18] sm:$0xff] %vm2135_vm8, %v7309_v11 }
0x1111 PF: > { %s12949_s1 = sld [smem:[#allocation8_spill]]  ;;  %s8698_s4 = smov [#allocation4]  }
0x1112   : > { %s7319_s28 = sshll.u32 %s8698_s4, 4  ;;  %s12950_s3 = sld [smem:[#allocation62_spill]]  ;;  %s7320_s28 = int_to_ptr.vmem [resolvable:$true] %s7319_s28 }
0x1113   : > { %s8699_s12 = smov 128  }
0x1117   : > { %p7869_p6 = scmp.eq.s32.totalorder %s12949_s1, 1 }
0x1118   : > { %s7321_s0 = sshll.u32 %s12950_s3, 4  ;;  %s7322_s0 = int_to_ptr.hbm [resolvable:$true] %s7321_s0 }
0x1119   : > { %7866 = dma.vmem_to_hbm [thread:$0]  (%p7869_p6), %s7320_s28, 512, %s7322_s0, [#allocation5], %s8699_s12, %s8699_s12, %s8693_s10  }
0x111a   : > { %8673 = dma.done.wait (%p7869_p6), [#allocation5], 512  }
0x111b   : > { %8675 = vsyncadd (%p7869_p6), [#allocation5], 4294966784 }
0x111c PF: > { %s12951_s20 = sld [smem:[#allocation7_spill]] }
0x1122   : > { %s39_s8 = sadd.s32 1, %s12951_s20  }
0x1123   : > { %p36_p7 = scmp.ge.s32.totalorder %s39_s8, 4  }
0x1125   :  { %38 = sbr.rel (!%p36_p7) target bundleno = 23 (0x17), region = 231 }
0x112a   :  { %7338 = vsyncpa [#allocation5], 1 }
0x112b   :  { %7340 = vsyncpa [#allocation5 + $0x1], 1 }

</bundles_post_ra>
